<compile_context>
chip_gen: v7x
topology: tpu7x:2x2x1
jax: 0.10.0
libtpu: 0.0.40
codegen_flags: <defaults>
</compile_context>

<pallas_src>
import functools

import jax
import jax.numpy as jnp
from jax.experimental import pallas as pl
from jax.experimental.pallas import tpu as pltpu

LANES = 512                     # last dim of the slab; multiple of 128 -> unmasked vst
SMALL_BYTES = 8 * 1024 * 1024   # below this, a fused XLA clip beats a pallas_call
_MIB = 1 << 20


def _clip_kernel(x_ref, o_ref, *, min_val, max_val):
    x = x_ref[...]
    lo = jnp.asarray(min_val, dtype=x.dtype)
    hi = jnp.asarray(max_val, dtype=x.dtype)
    o_ref[...] = jnp.minimum(jnp.maximum(x, lo), hi)


def _vmem_capacity_bytes():
    try:
        return int(pltpu.get_tpu_info().vmem_capacity_bytes)
    except Exception:
        return 64 * _MIB  # conservative default (v7x per-TC physical VMEM)


def clip(img, min_val=0.0, max_val=1.0):
    """Elementwise clip of `img` to [min_val, max_val] (Pallas TPU kernel)."""
    orig_shape = img.shape
    dtype = img.dtype
    n = img.size
    itemsize = jnp.dtype(dtype).itemsize
    total_bytes = n * itemsize

    # Fast paths: tiny tensors, ragged (non multiple-of-LANES) sizes, or traced
    # bounds -> fused XLA clip. A fused elementwise clip is already at HBM
    # roofline, so Pallas has nothing to win there (and the old pad/slice path
    # tripled HBM traffic).
    if (total_bytes < SMALL_BYTES
            or n % LANES != 0
            or not isinstance(min_val, (int, float))
            or not isinstance(max_val, (int, float))):
        lo = jnp.asarray(min_val, dtype=dtype)
        hi = jnp.asarray(max_val, dtype=dtype)
        return jnp.clip(img, lo, hi)

    rows = n // LANES
    x2d = img.reshape(rows, LANES)          # free row-major reshape, lane-dense slab

    # --- Block sizing: constant bytes across dtypes, capped so the grid keeps
    #     >=4 steps (megacore sharding on v7x + DMA/compute overlap).
    row_bytes = LANES * itemsize
    sublane = max(8, 32 // itemsize)        # f32: 8, bf16: 16, int8/fp8: 32
    vmem_cap = _vmem_capacity_bytes()
    target_bytes = max(2 * _MIB, min(8 * _MIB, vmem_cap // 8))
    cap_bytes = max(sublane * row_bytes, total_bytes // 4)
    block_bytes = min(target_bytes, cap_bytes)
    block_rows = max(sublane, (block_bytes // row_bytes) // sublane * sublane)
    block_rows = min(block_rows, rows)
    block_bytes = block_rows * row_bytes

    grid = (pl.cdiv(rows, block_rows),)
    # 2 arrays x 2 pipeline buffers x block, plus headroom for internal scratch;
    # never above 3/4 of physical VMEM (v7x has only 64 MiB per TC).
    vmem_limit = int(min(vmem_cap * 3 // 4, 4 * block_bytes + 16 * _MIB))

    kernel = functools.partial(_clip_kernel, min_val=min_val, max_val=max_val)

    out2d = pl.pallas_call(
        kernel,
        out_shape=jax.ShapeDtypeStruct((rows, LANES), dtype),
        grid=grid,
        in_specs=[pl.BlockSpec((block_rows, LANES), lambda i: (i, 0))],
        out_specs=pl.BlockSpec((block_rows, LANES), lambda i: (i, 0)),
        input_output_aliases={0: 0},        # clip may overwrite its input
        compiler_params=pltpu.CompilerParams(
            dimension_semantics=("parallel",),
            vmem_limit_bytes=vmem_limit,
        ),
    )(x2d)

    return out2d.reshape(orig_shape)


if __name__ == "__main__":
    key = jax.random.PRNGKey(0)
    k1, k2, k3, k4 = jax.random.split(key, 4)

    # 1) Small NCHW input consistent with the module's typical usage
    #    (batch=2, channels=4, 16x16) -> fused-clip fast path.
    x_small = jax.random.uniform(k1, (2, 4, 16, 16), dtype=jnp.float32,
                                 minval=-1.0, maxval=2.0)
    y_small = jax.block_until_ready(clip(x_small, 0.0, 1.0))
    assert y_small.shape == x_small.shape and y_small.dtype == x_small.dtype
    assert bool(jnp.all(y_small == jnp.clip(x_small, 0.0, 1.0)))

    # 2) Large f32 input (16 MiB) -> Pallas kernel path (>=4 grid steps).
    x_big = jax.random.uniform(k2, (4, 4, 512, 512), dtype=jnp.float32,
                               minval=-1.0, maxval=2.0)
    y_big = jax.block_until_ready(clip(x_big, 0.0, 1.0))
    assert y_big.shape == x_big.shape and y_big.dtype == x_big.dtype
    assert bool(jnp.all(y_big == jnp.clip(x_big, 0.0, 1.0)))

    # 3) Large bf16 input (16 MiB) -> kernel path with dtype-scaled block rows.
    x_bf16 = jax.random.uniform(k3, (8, 4, 512, 512), dtype=jnp.float32,
                                minval=-1.0, maxval=2.0).astype(jnp.bfloat16)
    y_bf16 = jax.block_until_ready(clip(x_bf16, 0.25, 0.75))
    assert y_bf16.shape == x_bf16.shape and y_bf16.dtype == x_bf16.dtype
    assert bool(jnp.all(
        y_bf16 == jnp.clip(x_bf16, jnp.bfloat16(0.25), jnp.bfloat16(0.75))))

    # 4) Odd-sized input (numel not a multiple of 512) -> fused-clip fast path
    #    (no more pad + slice round trips).
    x_odd = jax.random.uniform(k4, (1, 1, 257, 300), dtype=jnp.float32,
                               minval=-1.0, maxval=2.0)
    y_odd = jax.block_until_ready(clip(x_odd, 0.25, 0.75))
    assert y_odd.shape == x_odd.shape and y_odd.dtype == x_odd.dtype
    assert bool(jnp.all(y_odd == jnp.clip(x_odd, 0.25, 0.75)))

    print("KERNEL_OK")
</pallas_src>

<mosaic_0001>
module attributes {stable_mosaic.version = 11 : i64} {
  func.func @_clip_kernel(%arg0: i32, %arg1: memref<2048x512xf32, #tpu.memory_space<vmem>>, %arg2: memref<2048x512xf32, #tpu.memory_space<vmem>>) attributes {dimension_semantics = [#tpu.dimension_semantics<parallel>], iteration_bounds = array<i64: 4>, scalar_prefetch = 0 : i64, scratch_operands = 0 : i64, tpu.core_type = #tpu.core_type<tc>, window_params = [{transform_indices = @transform_0, window_bounds = array<i64: 2048, 512>}, {transform_indices = @transform_1, window_bounds = array<i64: 2048, 512>}]} {
    %c0 = arith.constant 0 : index
    %c0_0 = arith.constant 0 : index
    %0 = vector.load %arg1[%c0, %c0_0] : memref<2048x512xf32, #tpu.memory_space<vmem>>, vector<2048x512xf32>
    %cst = arith.constant 0.000000e+00 : f32
    %1 = vector.broadcast %cst : f32 to vector<2048x512xf32>
    %2 = arith.maximumf %0, %1 : vector<2048x512xf32>
    %cst_1 = arith.constant 1.000000e+00 : f32
    %3 = vector.broadcast %cst_1 : f32 to vector<2048x512xf32>
    %4 = arith.minimumf %2, %3 : vector<2048x512xf32>
    %c0_2 = arith.constant 0 : index
    %c0_3 = arith.constant 0 : index
    %5 = vector.load %arg2[%c0_2, %c0_3] : memref<2048x512xf32, #tpu.memory_space<vmem>>, vector<2048x512xf32>
    tpu.vector_store %arg2[%c0_2, %c0_3], %4 {strides = array<i32>} : memref<2048x512xf32, #tpu.memory_space<vmem>>, vector<2048x512xf32>,
    return
  }
  func.func @transform_0(%arg0: i32) -> (i32, i32) {
    %c0_i32 = arith.constant 0 : i32
    %c0_i32_0 = arith.constant 0 : i32
    return %arg0, %c0_i32 : i32, i32
  }
  func.func @transform_1(%arg0: i32) -> (i32, i32) {
    %c0_i32 = arith.constant 0 : i32
    %c0_i32_0 = arith.constant 0 : i32
    return %arg0, %c0_i32 : i32, i32
  }
}

</mosaic_0001>

<bundles_post_ra>
// kernel: tpu_custom_call.1
= control target key start
LH: loop header
LB: loop body
LE: loop exit
PB: predicated region body
PF: predicated region fallthrough
CT: control target
= control target key end

     0   :  { %6 = vsyncpa [#allocation3], 0  ;;  %s6723_s0 = inlined_call_operand.hbm [shape: f32[8192,512], index: 0, kind: input, shape index: {}, may-alias: {0,1}]   ;;  %s6724_s1 = inlined_call_operand.hbm [shape: f32[8192,512], index: 1, kind: output, shape index: {}, may-alias: {0,1}]  }
   0x1   :  { %8 = vsyncpa [#allocation3 + $0x1], 0 }
   0x2   :  { %9 = vsyncpa [#allocation4], 0 }
   0x3   :  { %11 = vsyncpa [#allocation4 + $0x1], 0  ;;  %s4506_s6 = smov 0   ;;  %s4508_s7 = smov 0  }
   0x4   :  { %s4510_s8 = smov 0   ;;  %s4512_s9 = smov 0  }
   0x5 LB: > { %s4527_s10 = sadd.s32 4294967295, %s4488_s9   ;;  %s4322_s11 = sadd.s32 4294967294, %s4488_s9   ;;  %s4488_s9 = sphi %s4512_s9, %s6736_s9   ;;  %s4484_s8 = sphi %s4510_s8, %s6735_s8   ;;  %s4480_s7 = sphi %s4508_s7, %s6734_s7   ;;  %s4476_s6 = sphi %s4506_s6, %s6733_s6  }
   0x6   : > { %s4531_s12 = sadd.s32 1, %s4488_s9   ;;  %s24_s13 = sadd.s32 1, %s4484_s8 }
   0x7   : > { %s21_s14 = ssub.s32 %s4488_s9, %s4531_s12  ;;  %p31_p0 = scmp.ne.s32.totalorder %s4484_s8, %s4480_s7 }
   0x8   : > { %p22_p1 = scmp.eq.s32.totalorder %s21_s14, 0  ;;  %p32_p2 = scmp.eq.s32.totalorder %s4488_s9, 0 }
   0x9   : > { %p37_p3 = scmp.ne.s32.totalorder %s4480_s7, %s4476_s6  ;;  %p38_p4 = scmp.eq.s32.totalorder %s4527_s10, 0 }
   0xa   : > { %s4543_s15 = scalar_select %p22_p1, %s4484_s8, %s24_s13  }
   0xb   : > { %p4545_p5 = por %p32_p2, %p31_p0  ;;  %p4549_p6 = por %p38_p4, %p37_p3 }
   0xc   : > { %p61_p7 = scmp.eq.s32.totalorder %s4527_s10, 3  ;;  %p67_p8 = scmp.eq.s32.totalorder %s4322_s11, 3 }
   0xd   : > { %p4354_p9 = scmp.lt.s32.totalorder %s4488_s9, 4  ;;  %s87_s20 = sand.u32 1, %s4484_s8  }
   0xe   : > { %p4555_p10 = por %p61_p7, %p31_p0  ;;  %p4559_p11 = por %p67_p8, %p37_p3 }
   0xf   : > { %s4339_s21 = sshll.u32 %s4488_s9, 17  ;;  %s4325_s22 = sshll.u32 %s87_s20, 13 }
  0x10   : > { %s6728_s18 = scalar_select %p4555_p10, 1, 0 }
  0x11   : > { %s6729_s19 = scalar_select %p4559_p11, 1, 0 }
  0x12   : > { %s4568_s25 = scalar_lea.hbm %s6723_s0, %s4339_s21  ;;  %s91_s26 = scalar_lea.vmem [#allocation2], %s4325_s22 }
  0x13   : > { %s99_s27 = sshll.u32 %s91_s26, 4  ;;  %p4572_p12 = pnand %p4354_p9, %p4545_p5  ;;  %s4576_s27 = int_to_ptr.vmem [resolvable:$true] %s99_s27 }
  0x14   : > { %s4578_s29 = scalar_lea.sflag [#allocation3], %s87_s20  ;;  %s4392_s30 = scalar_lea.hbm %s4568_s25, 131072 }
  0x15   : > { %p4393_p13 = scmp.ne.s32.totalorder %s4568_s25, %s4392_s30  ;;  %p4394_p0 = pneg %p4572_p12 }
  0x16   : > { %s4397_s4 = scalar_lea.hbm %s6723_s0, 524288  ;;  %p4398_p3 = scmp.lt.u32.totalorder %s4568_s25, %s6723_s0 }
  0x17   : > { %p4395_p1 = pnand %p4394_p0, %p4393_p13  ;;  %p4399_p4 = scmp.lt.u32.totalorder %s4397_s4, %s4392_s30 }
  0x18   : > { %p4401_p7 = scmp.lt.u32.totalorder %s4392_s30, %s4568_s25 }
  0x19   : > { %p4396_p2 = pneg %p4395_p1  ;;  %p4400_p5 = por %p4399_p4, %p4398_p3 }
  0x1b   : > { %p4402_p8 = por %p4401_p7, %p4400_p5 }
  0x1d   : > { %p4403_p9 = pnand %p4402_p8, %p4396_p2 }
  0x1f   : > { %4406 = shalt.err (!%p4403_p9)
}
  0x20   : > { %s4407_s13 = scalar_lea.vmem %s4576_s27, 131072  ;;  %s4490_s14 = smov [#allocation2]  }
  0x21   : > { %p4408_p13 = scmp.ne.s32.totalorder %s4576_s27, %s4407_s13  ;;  %s4412_s16 = sshll.u32 %s4490_s14, 4  ;;  %s4413_s16 = int_to_ptr.vmem [resolvable:$false] %s4412_s16 }
  0x22   : > { %s4414_s20 = scalar_lea.vmem %s4413_s16, 262144  ;;  %p4415_p10 = scmp.lt.s32.totalorder %s4576_s27, %s4413_s16 }
  0x23   : > { %p4410_p1 = pnand %p4408_p13, %p4394_p0  ;;  %p4416_p3 = scmp.lt.s32.totalorder %s4414_s20, %s4407_s13 }
  0x25   : > { %p4411_p11 = pneg %p4410_p1  ;;  %p4417_p4 = por %p4416_p3, %p4415_p10 }
  0x27   : > { %p4418_p5 = pnand %p4417_p4, %p4411_p11 }
  0x29   : > { %4421 = shalt.err (!%p4418_p5)
}
  0x2a   : > { %s4491_s21 = smov 512   ;;  %s4492_s22 = smov 32  }
  0x2b   : > { %4349 = dma.hbm_to_vmem [thread:$0]  (!%p4572_p12), %s4568_s25, 131072, %s4576_s27, %s4578_s29, %s4491_s21, %s4491_s21, %s4492_s22  }
  0x2c   : > { %p4329_p0 = scmp.ge.s32.totalorder %s4488_s9, 1  ;;  %p107_p2 = scmp.lt.s32.totalorder %s4488_s9, 5 }
  0x2e   : > { %p108_p7 = pnand %p4329_p0, %p107_p2 }
  0x2f   : > { %s4609_s23 = sand.u32 (!%p108_p7), 1, %s4480_s7  }
  0x30   : > { %111 = sbr.rel (%p108_p7) target bundleno = 762 (0x2fa), region = 24  ;;  %s4330_s24 = sshll.u32 (!%p108_p7), %s4609_s23, 13 }
  0x31   : > { %s114_s26 = scalar_lea.sflag (!%p108_p7), [#allocation3], %s4609_s23  ;;  %s4615_s30 = scalar_lea.vmem (!%p108_p7), [#allocation2], %s4330_s24 }
  0x37   : > { %4467 = dma.done.wait (%p4549_p6), %s114_s26, 131072  }
  0x38   : > { %4469 = vsyncadd (%p4549_p6), %s114_s26, 4294836224  ;;  %v138_v0 = vld [vmem:[%s4615_s30] sm:$0xff]  ;;  %v139_v1 = vld [vmem:[%s4615_s30 + $0x8] sm:$0xff]  ;;  %s4636_s17 = scalar_lea.vmem [#allocation5], %s4330_s24  ;;  %s4341_s25 = sshll.u32 %s4527_s10, 17 }
  0x39   : > { %v140_v2 = vld [vmem:[%s4615_s30 + $0x10] sm:$0xff]  ;;  %v1162_v3 = vmax.f32 %v138_v0, 0.0  ;;  %v1163_v4 = vmax.f32 %v139_v1, 0.0  ;;  %v141_v6 = vld [vmem:[%s4615_s30 + $0x18] sm:$0xff]  ;;  %v142_v7 = vld [vmem:[%s4615_s30 + $0x20] sm:$0xff]  ;;  %s4249_s27 = sshll.u32 %s4636_s17, 4  ;;  %s6673_s2 = scalar_lea.hbm %s6724_s1, %s4341_s25  ;;  %s6675_s27 = int_to_ptr.vmem [resolvable:$true] %s4249_s27 }
  0x3a   : > { %v1164_v5 = vmax.f32 %v140_v2, 0.0  ;;  %v143_v8 = vld [vmem:[%s4615_s30 + $0x28] sm:$0xff]  ;;  %v1165_v9 = vmax.f32 %v141_v6, 0.0  ;;  %v1166_v10 = vmax.f32 %v142_v7, 0.0  ;;  %v144_v12 = vld [vmem:[%s4615_s30 + $0x30] sm:$0xff]  ;;  %v145_v13 = vld [vmem:[%s4615_s30 + $0x38] sm:$0xff] }
  0x3b   : > { %v1167_v11 = vmax.f32 %v143_v8, 0.0  ;;  %v146_v14 = vld [vmem:[%s4615_s30 + $0x40] sm:$0xff]  ;;  %v2186_v15 = vmin.f32 %v1162_v3, 1.0  ;;  %v2187_v16 = vmin.f32 %v1163_v4, 1.0  ;;  %v1168_v18 = vmax.f32 %v144_v12, 0.0  ;;  %v147_v19 = vld [vmem:[%s4615_s30 + $0x48] sm:$0xff] }
  0x3c   : > { %v2188_v17 = vmin.f32 %v1164_v5, 1.0  ;;  %v148_v20 = vld [vmem:[%s4615_s30 + $0x50] sm:$0xff]  ;;  %v2189_v21 = vmin.f32 %v1165_v9, 1.0  ;;  %v2190_v22 = vmin.f32 %v1166_v10, 1.0  ;;  %v1169_v24 = vmax.f32 %v145_v13, 0.0  ;;  %v149_v25 = vld [vmem:[%s4615_s30 + $0x58] sm:$0xff] }
  0x3d   : > { %v2191_v23 = vmin.f32 %v1167_v11, 1.0  ;;  %v150_v26 = vld [vmem:[%s4615_s30 + $0x60] sm:$0xff]  ;;  %3210 = vst [vmem:[%s4636_s17] sm:$0xff] %v2186_v15  ;;  %3211 = vst [vmem:[%s4636_s17 + $0x8] sm:$0xff] %v2187_v16  ;;  %v2192_v27 = vmin.f32 %v1168_v18, 1.0  ;;  %v1170_v28 = vmax.f32 %v146_v14, 0.0  ;;  %v1171_v29 = vmax.f32 %v147_v19, 0.0 }
  0x3e   : > { %3212 = vst [vmem:[%s4636_s17 + $0x10] sm:$0xff] %v2188_v17  ;;  %v1172_v30 = vmax.f32 %v148_v20, 0.0  ;;  %v151_v31 = vld [vmem:[%s4615_s30 + $0x68] sm:$0xff]  ;;  %v152_v32 = vld [vmem:[%s4615_s30 + $0x70] sm:$0xff]  ;;  %3213 = vst [vmem:[%s4636_s17 + $0x18] sm:$0xff] %v2189_v21  ;;  %v2193_v33 = vmin.f32 %v1169_v24, 1.0 }
  0x3f   : > { %3214 = vst [vmem:[%s4636_s17 + $0x20] sm:$0xff] %v2190_v22  ;;  %3215 = vst [vmem:[%s4636_s17 + $0x28] sm:$0xff] %v2191_v23  ;;  %v1173_v34 = vmax.f32 %v149_v25, 0.0  ;;  %v1174_v35 = vmax.f32 %v150_v26, 0.0  ;;  %v1175_v36 = vmax.f32 %v151_v31, 0.0  ;;  %v153_v37 = vld [vmem:[%s4615_s30 + $0x78] sm:$0xff] }
  0x40   : > { %v154_v38 = vld [vmem:[%s4615_s30 + $0x80] sm:$0xff]  ;;  %3216 = vst [vmem:[%s4636_s17 + $0x30] sm:$0xff] %v2192_v27  ;;  %v2194_v39 = vmin.f32 %v1170_v28, 1.0  ;;  %v2195_v40 = vmin.f32 %v1171_v29, 1.0  ;;  %v2196_v41 = vmin.f32 %v1172_v30, 1.0  ;;  %v1176_v42 = vmax.f32 %v152_v32, 0.0 }
  0x41   : > { %v155_v43 = vld [vmem:[%s4615_s30 + $0x88] sm:$0xff]  ;;  %v156_v44 = vld [vmem:[%s4615_s30 + $0x90] sm:$0xff]  ;;  %3217 = vst [vmem:[%s4636_s17 + $0x38] sm:$0xff] %v2193_v33  ;;  %v2197_v45 = vmin.f32 %v1173_v34, 1.0  ;;  %v2198_v46 = vmin.f32 %v1174_v35, 1.0  ;;  %v2199_v47 = vmin.f32 %v1175_v36, 1.0 }
  0x42   : > { %v1177_v48 = vmax.f32 %v153_v37, 0.0  ;;  %v157_v49 = vld [vmem:[%s4615_s30 + $0x98] sm:$0xff]  ;;  %v158_v50 = vld [vmem:[%s4615_s30 + $0xa0] sm:$0xff]  ;;  %3218 = vst [vmem:[%s4636_s17 + $0x40] sm:$0xff] %v2194_v39  ;;  %3219 = vst [vmem:[%s4636_s17 + $0x48] sm:$0xff] %v2195_v40  ;;  %v2200_v51 = vmin.f32 %v1176_v42, 1.0 }
  0x43   : > { %3220 = vst [vmem:[%s4636_s17 + $0x50] sm:$0xff] %v2196_v41  ;;  %v1178_v52 = vmax.f32 %v154_v38, 0.0  ;;  %v1179_v53 = vmax.f32 %v155_v43, 0.0  ;;  %v1180_v54 = vmax.f32 %v156_v44, 0.0  ;;  %v159_v55 = vld [vmem:[%s4615_s30 + $0xa8] sm:$0xff]  ;;  %v160_v56 = vld [vmem:[%s4615_s30 + $0xb0] sm:$0xff] }
  0x44   : > { %3221 = vst [vmem:[%s4636_s17 + $0x58] sm:$0xff] %v2197_v45  ;;  %3222 = vst [vmem:[%s4636_s17 + $0x60] sm:$0xff] %v2198_v46  ;;  %v2201_v57 = vmin.f32 %v1177_v48, 1.0  ;;  %v1181_v58 = vmax.f32 %v157_v49, 0.0  ;;  %v1182_v59 = vmax.f32 %v158_v50, 0.0  ;;  %v1183_v60 = vmax.f32 %v159_v55, 0.0 }
  0x45   : > { %3223 = vst [vmem:[%s4636_s17 + $0x68] sm:$0xff] %v2199_v47  ;;  %v161_v61 = vld [vmem:[%s4615_s30 + $0xb8] sm:$0xff]  ;;  %v162_v62 = vld [vmem:[%s4615_s30 + $0xc0] sm:$0xff]  ;;  %3224 = vst [vmem:[%s4636_s17 + $0x70] sm:$0xff] %v2200_v51  ;;  %v2202_v63 = vmin.f32 %v1178_v52, 1.0  ;;  %v2203_v0 = vmin.f32 %v1179_v53, 1.0 }
  0x46   : > { %v2204_v1 = vmin.f32 %v1180_v54, 1.0  ;;  %v1184_v2 = vmax.f32 %v160_v56, 0.0  ;;  %v163_v3 = vld [vmem:[%s4615_s30 + $0xc8] sm:$0xff]  ;;  %v164_v4 = vld [vmem:[%s4615_s30 + $0xd0] sm:$0xff]  ;;  %3225 = vst [vmem:[%s4636_s17 + $0x78] sm:$0xff] %v2201_v57  ;;  %v2205_v5 = vmin.f32 %v1181_v58, 1.0 }
  0x47   : > { %v2206_v6 = vmin.f32 %v1182_v59, 1.0  ;;  %v2207_v7 = vmin.f32 %v1183_v60, 1.0  ;;  %v1185_v8 = vmax.f32 %v161_v61, 0.0  ;;  %v165_v9 = vld [vmem:[%s4615_s30 + $0xd8] sm:$0xff]  ;;  %v166_v10 = vld [vmem:[%s4615_s30 + $0xe0] sm:$0xff]  ;;  %3226 = vst [vmem:[%s4636_s17 + $0x80] sm:$0xff] %v2202_v63 }
  0x48   : > { %3227 = vst [vmem:[%s4636_s17 + $0x88] sm:$0xff] %v2203_v0  ;;  %3228 = vst [vmem:[%s4636_s17 + $0x90] sm:$0xff] %v2204_v1  ;;  %v2208_v11 = vmin.f32 %v1184_v2, 1.0  ;;  %v1186_v12 = vmax.f32 %v162_v62, 0.0  ;;  %v1187_v13 = vmax.f32 %v163_v3, 0.0  ;;  %v1188_v14 = vmax.f32 %v164_v4, 0.0 }
  0x49   : > { %v167_v15 = vld [vmem:[%s4615_s30 + $0xe8] sm:$0xff]  ;;  %v168_v16 = vld [vmem:[%s4615_s30 + $0xf0] sm:$0xff]  ;;  %3229 = vst [vmem:[%s4636_s17 + $0x98] sm:$0xff] %v2205_v5  ;;  %3230 = vst [vmem:[%s4636_s17 + $0xa0] sm:$0xff] %v2206_v6  ;;  %v2209_v17 = vmin.f32 %v1185_v8, 1.0  ;;  %v1189_v18 = vmax.f32 %v165_v9, 0.0 }
  0x4a   : > { %3231 = vst [vmem:[%s4636_s17 + $0xa8] sm:$0xff] %v2207_v7  ;;  %v1190_v19 = vmax.f32 %v166_v10, 0.0  ;;  %v1191_v20 = vmax.f32 %v167_v15, 0.0  ;;  %v169_v21 = vld [vmem:[%s4615_s30 + $0xf8] sm:$0xff]  ;;  %v170_v22 = vld [vmem:[%s4615_s30 + $0x100] sm:$0xff]  ;;  %3232 = vst [vmem:[%s4636_s17 + $0xb0] sm:$0xff] %v2208_v11 }
  0x4b   : > { %v2210_v23 = vmin.f32 %v1186_v12, 1.0  ;;  %v2211_v24 = vmin.f32 %v1187_v13, 1.0  ;;  %v2212_v25 = vmin.f32 %v1188_v14, 1.0  ;;  %v1192_v26 = vmax.f32 %v168_v16, 0.0  ;;  %v171_v27 = vld [vmem:[%s4615_s30 + $0x108] sm:$0xff]  ;;  %v172_v28 = vld [vmem:[%s4615_s30 + $0x110] sm:$0xff] }
  0x4c   : > { %3233 = vst [vmem:[%s4636_s17 + $0xb8] sm:$0xff] %v2209_v17  ;;  %v2213_v29 = vmin.f32 %v1189_v18, 1.0  ;;  %v2214_v30 = vmin.f32 %v1190_v19, 1.0  ;;  %v2215_v31 = vmin.f32 %v1191_v20, 1.0  ;;  %v1193_v32 = vmax.f32 %v169_v21, 0.0  ;;  %v173_v33 = vld [vmem:[%s4615_s30 + $0x118] sm:$0xff] }
  0x4d   : > { %v174_v34 = vld [vmem:[%s4615_s30 + $0x120] sm:$0xff]  ;;  %3234 = vst [vmem:[%s4636_s17 + $0xc0] sm:$0xff] %v2210_v23  ;;  %3235 = vst [vmem:[%s4636_s17 + $0xc8] sm:$0xff] %v2211_v24  ;;  %v2216_v35 = vmin.f32 %v1192_v26, 1.0  ;;  %v1194_v36 = vmax.f32 %v170_v22, 0.0  ;;  %v1195_v37 = vmax.f32 %v171_v27, 0.0 }
  0x4e   : > { %3236 = vst [vmem:[%s4636_s17 + $0xd0] sm:$0xff] %v2212_v25  ;;  %v1196_v38 = vmax.f32 %v172_v28, 0.0  ;;  %v175_v39 = vld [vmem:[%s4615_s30 + $0x128] sm:$0xff]  ;;  %v176_v40 = vld [vmem:[%s4615_s30 + $0x130] sm:$0xff]  ;;  %3237 = vst [vmem:[%s4636_s17 + $0xd8] sm:$0xff] %v2213_v29  ;;  %v2217_v41 = vmin.f32 %v1193_v32, 1.0 }
  0x4f   : > { %3238 = vst [vmem:[%s4636_s17 + $0xe0] sm:$0xff] %v2214_v30  ;;  %3239 = vst [vmem:[%s4636_s17 + $0xe8] sm:$0xff] %v2215_v31  ;;  %v1197_v42 = vmax.f32 %v173_v33, 0.0  ;;  %v1198_v43 = vmax.f32 %v174_v34, 0.0  ;;  %v1199_v44 = vmax.f32 %v175_v39, 0.0  ;;  %v177_v45 = vld [vmem:[%s4615_s30 + $0x138] sm:$0xff] }
  0x50   : > { %v178_v46 = vld [vmem:[%s4615_s30 + $0x140] sm:$0xff]  ;;  %3240 = vst [vmem:[%s4636_s17 + $0xf0] sm:$0xff] %v2216_v35  ;;  %v2218_v47 = vmin.f32 %v1194_v36, 1.0  ;;  %v2219_v48 = vmin.f32 %v1195_v37, 1.0  ;;  %v2220_v49 = vmin.f32 %v1196_v38, 1.0  ;;  %v1200_v50 = vmax.f32 %v176_v40, 0.0 }
  0x51   : > { %v179_v51 = vld [vmem:[%s4615_s30 + $0x148] sm:$0xff]  ;;  %v180_v52 = vld [vmem:[%s4615_s30 + $0x150] sm:$0xff]  ;;  %3241 = vst [vmem:[%s4636_s17 + $0xf8] sm:$0xff] %v2217_v41  ;;  %v2221_v53 = vmin.f32 %v1197_v42, 1.0  ;;  %v2222_v54 = vmin.f32 %v1198_v43, 1.0  ;;  %v2223_v55 = vmin.f32 %v1199_v44, 1.0 }
  0x52   : > { %v1201_v56 = vmax.f32 %v177_v45, 0.0  ;;  %v181_v57 = vld [vmem:[%s4615_s30 + $0x158] sm:$0xff]  ;;  %v182_v58 = vld [vmem:[%s4615_s30 + $0x160] sm:$0xff]  ;;  %3242 = vst [vmem:[%s4636_s17 + $0x100] sm:$0xff] %v2218_v47  ;;  %3243 = vst [vmem:[%s4636_s17 + $0x108] sm:$0xff] %v2219_v48  ;;  %v2224_v59 = vmin.f32 %v1200_v50, 1.0 }
  0x53   : > { %3244 = vst [vmem:[%s4636_s17 + $0x110] sm:$0xff] %v2220_v49  ;;  %v1202_v60 = vmax.f32 %v178_v46, 0.0  ;;  %v1203_v61 = vmax.f32 %v179_v51, 0.0  ;;  %v1204_v62 = vmax.f32 %v180_v52, 0.0  ;;  %v183_v63 = vld [vmem:[%s4615_s30 + $0x168] sm:$0xff]  ;;  %v184_v0 = vld [vmem:[%s4615_s30 + $0x170] sm:$0xff] }
  0x54   : > { %3245 = vst [vmem:[%s4636_s17 + $0x118] sm:$0xff] %v2221_v53  ;;  %3246 = vst [vmem:[%s4636_s17 + $0x120] sm:$0xff] %v2222_v54  ;;  %v2225_v1 = vmin.f32 %v1201_v56, 1.0  ;;  %v1205_v2 = vmax.f32 %v181_v57, 0.0  ;;  %v1206_v3 = vmax.f32 %v182_v58, 0.0  ;;  %v1207_v4 = vmax.f32 %v183_v63, 0.0 }
  0x55   : > { %3247 = vst [vmem:[%s4636_s17 + $0x128] sm:$0xff] %v2223_v55  ;;  %v185_v5 = vld [vmem:[%s4615_s30 + $0x178] sm:$0xff]  ;;  %v186_v6 = vld [vmem:[%s4615_s30 + $0x180] sm:$0xff]  ;;  %3248 = vst [vmem:[%s4636_s17 + $0x130] sm:$0xff] %v2224_v59  ;;  %v2226_v7 = vmin.f32 %v1202_v60, 1.0  ;;  %v2227_v8 = vmin.f32 %v1203_v61, 1.0 }
  0x56   : > { %v2228_v9 = vmin.f32 %v1204_v62, 1.0  ;;  %v1208_v10 = vmax.f32 %v184_v0, 0.0  ;;  %v187_v11 = vld [vmem:[%s4615_s30 + $0x188] sm:$0xff]  ;;  %v188_v12 = vld [vmem:[%s4615_s30 + $0x190] sm:$0xff]  ;;  %3249 = vst [vmem:[%s4636_s17 + $0x138] sm:$0xff] %v2225_v1  ;;  %v2229_v13 = vmin.f32 %v1205_v2, 1.0 }
  0x57   : > { %v2230_v14 = vmin.f32 %v1206_v3, 1.0  ;;  %v2231_v15 = vmin.f32 %v1207_v4, 1.0  ;;  %v1209_v16 = vmax.f32 %v185_v5, 0.0  ;;  %v189_v17 = vld [vmem:[%s4615_s30 + $0x198] sm:$0xff]  ;;  %v190_v18 = vld [vmem:[%s4615_s30 + $0x1a0] sm:$0xff]  ;;  %3250 = vst [vmem:[%s4636_s17 + $0x140] sm:$0xff] %v2226_v7 }
  0x58   : > { %3251 = vst [vmem:[%s4636_s17 + $0x148] sm:$0xff] %v2227_v8  ;;  %3252 = vst [vmem:[%s4636_s17 + $0x150] sm:$0xff] %v2228_v9  ;;  %v2232_v19 = vmin.f32 %v1208_v10, 1.0  ;;  %v1210_v20 = vmax.f32 %v186_v6, 0.0  ;;  %v1211_v21 = vmax.f32 %v187_v11, 0.0  ;;  %v1212_v22 = vmax.f32 %v188_v12, 0.0 }
  0x59   : > { %v191_v23 = vld [vmem:[%s4615_s30 + $0x1a8] sm:$0xff]  ;;  %v192_v24 = vld [vmem:[%s4615_s30 + $0x1b0] sm:$0xff]  ;;  %3253 = vst [vmem:[%s4636_s17 + $0x158] sm:$0xff] %v2229_v13  ;;  %3254 = vst [vmem:[%s4636_s17 + $0x160] sm:$0xff] %v2230_v14  ;;  %v2233_v25 = vmin.f32 %v1209_v16, 1.0  ;;  %v1213_v26 = vmax.f32 %v189_v17, 0.0 }
  0x5a   : > { %3255 = vst [vmem:[%s4636_s17 + $0x168] sm:$0xff] %v2231_v15  ;;  %v1214_v27 = vmax.f32 %v190_v18, 0.0  ;;  %v1215_v28 = vmax.f32 %v191_v23, 0.0  ;;  %v193_v29 = vld [vmem:[%s4615_s30 + $0x1b8] sm:$0xff]  ;;  %v194_v30 = vld [vmem:[%s4615_s30 + $0x1c0] sm:$0xff]  ;;  %3256 = vst [vmem:[%s4636_s17 + $0x170] sm:$0xff] %v2232_v19 }
  0x5b   : > { %v2234_v31 = vmin.f32 %v1210_v20, 1.0  ;;  %v2235_v32 = vmin.f32 %v1211_v21, 1.0  ;;  %v2236_v33 = vmin.f32 %v1212_v22, 1.0  ;;  %v1216_v34 = vmax.f32 %v192_v24, 0.0  ;;  %v195_v35 = vld [vmem:[%s4615_s30 + $0x1c8] sm:$0xff]  ;;  %v196_v36 = vld [vmem:[%s4615_s30 + $0x1d0] sm:$0xff] }
  0x5c   : > { %3257 = vst [vmem:[%s4636_s17 + $0x178] sm:$0xff] %v2233_v25  ;;  %v2237_v37 = vmin.f32 %v1213_v26, 1.0  ;;  %v2238_v38 = vmin.f32 %v1214_v27, 1.0  ;;  %v2239_v39 = vmin.f32 %v1215_v28, 1.0  ;;  %v1217_v40 = vmax.f32 %v193_v29, 0.0  ;;  %v197_v41 = vld [vmem:[%s4615_s30 + $0x1d8] sm:$0xff] }
  0x5d   : > { %v198_v42 = vld [vmem:[%s4615_s30 + $0x1e0] sm:$0xff]  ;;  %3258 = vst [vmem:[%s4636_s17 + $0x180] sm:$0xff] %v2234_v31  ;;  %3259 = vst [vmem:[%s4636_s17 + $0x188] sm:$0xff] %v2235_v32  ;;  %v2240_v43 = vmin.f32 %v1216_v34, 1.0  ;;  %v1218_v44 = vmax.f32 %v194_v30, 0.0  ;;  %v1219_v45 = vmax.f32 %v195_v35, 0.0 }
  0x5e   : > { %3260 = vst [vmem:[%s4636_s17 + $0x190] sm:$0xff] %v2236_v33  ;;  %v1220_v46 = vmax.f32 %v196_v36, 0.0  ;;  %v199_v47 = vld [vmem:[%s4615_s30 + $0x1e8] sm:$0xff]  ;;  %v200_v48 = vld [vmem:[%s4615_s30 + $0x1f0] sm:$0xff]  ;;  %3261 = vst [vmem:[%s4636_s17 + $0x198] sm:$0xff] %v2237_v37  ;;  %v2241_v49 = vmin.f32 %v1217_v40, 1.0 }
  0x5f   : > { %3262 = vst [vmem:[%s4636_s17 + $0x1a0] sm:$0xff] %v2238_v38  ;;  %3263 = vst [vmem:[%s4636_s17 + $0x1a8] sm:$0xff] %v2239_v39  ;;  %v1221_v50 = vmax.f32 %v197_v41, 0.0  ;;  %v1222_v51 = vmax.f32 %v198_v42, 0.0  ;;  %v1223_v52 = vmax.f32 %v199_v47, 0.0  ;;  %v201_v53 = vld [vmem:[%s4615_s30 + $0x1f8] sm:$0xff] }
  0x60   : > { %v202_v54 = vld [vmem:[%s4615_s30 + $0x200] sm:$0xff]  ;;  %3264 = vst [vmem:[%s4636_s17 + $0x1b0] sm:$0xff] %v2240_v43  ;;  %v2242_v55 = vmin.f32 %v1218_v44, 1.0  ;;  %v2243_v56 = vmin.f32 %v1219_v45, 1.0  ;;  %v2244_v57 = vmin.f32 %v1220_v46, 1.0  ;;  %v1224_v58 = vmax.f32 %v200_v48, 0.0 }
  0x61   : > { %v203_v59 = vld [vmem:[%s4615_s30 + $0x208] sm:$0xff]  ;;  %v204_v60 = vld [vmem:[%s4615_s30 + $0x210] sm:$0xff]  ;;  %3265 = vst [vmem:[%s4636_s17 + $0x1b8] sm:$0xff] %v2241_v49  ;;  %v2245_v61 = vmin.f32 %v1221_v50, 1.0  ;;  %v2246_v62 = vmin.f32 %v1222_v51, 1.0  ;;  %v2247_v63 = vmin.f32 %v1223_v52, 1.0 }
  0x62   : > { %v1225_v0 = vmax.f32 %v201_v53, 0.0  ;;  %v205_v1 = vld [vmem:[%s4615_s30 + $0x218] sm:$0xff]  ;;  %v206_v2 = vld [vmem:[%s4615_s30 + $0x220] sm:$0xff]  ;;  %3266 = vst [vmem:[%s4636_s17 + $0x1c0] sm:$0xff] %v2242_v55  ;;  %3267 = vst [vmem:[%s4636_s17 + $0x1c8] sm:$0xff] %v2243_v56  ;;  %v2248_v3 = vmin.f32 %v1224_v58, 1.0 }
  0x63   : > { %3268 = vst [vmem:[%s4636_s17 + $0x1d0] sm:$0xff] %v2244_v57  ;;  %v1226_v4 = vmax.f32 %v202_v54, 0.0  ;;  %v1227_v5 = vmax.f32 %v203_v59, 0.0  ;;  %v1228_v6 = vmax.f32 %v204_v60, 0.0  ;;  %v207_v7 = vld [vmem:[%s4615_s30 + $0x228] sm:$0xff]  ;;  %v208_v8 = vld [vmem:[%s4615_s30 + $0x230] sm:$0xff] }
  0x64   : > { %3269 = vst [vmem:[%s4636_s17 + $0x1d8] sm:$0xff] %v2245_v61  ;;  %3270 = vst [vmem:[%s4636_s17 + $0x1e0] sm:$0xff] %v2246_v62  ;;  %v2249_v9 = vmin.f32 %v1225_v0, 1.0  ;;  %v1229_v10 = vmax.f32 %v205_v1, 0.0  ;;  %v1230_v11 = vmax.f32 %v206_v2, 0.0  ;;  %v1231_v12 = vmax.f32 %v207_v7, 0.0 }
  0x65   : > { %3271 = vst [vmem:[%s4636_s17 + $0x1e8] sm:$0xff] %v2247_v63  ;;  %v209_v13 = vld [vmem:[%s4615_s30 + $0x238] sm:$0xff]  ;;  %v210_v14 = vld [vmem:[%s4615_s30 + $0x240] sm:$0xff]  ;;  %3272 = vst [vmem:[%s4636_s17 + $0x1f0] sm:$0xff] %v2248_v3  ;;  %v2250_v15 = vmin.f32 %v1226_v4, 1.0  ;;  %v2251_v16 = vmin.f32 %v1227_v5, 1.0 }
  0x66   : > { %v2252_v17 = vmin.f32 %v1228_v6, 1.0  ;;  %v1232_v18 = vmax.f32 %v208_v8, 0.0  ;;  %v211_v19 = vld [vmem:[%s4615_s30 + $0x248] sm:$0xff]  ;;  %v212_v20 = vld [vmem:[%s4615_s30 + $0x250] sm:$0xff]  ;;  %3273 = vst [vmem:[%s4636_s17 + $0x1f8] sm:$0xff] %v2249_v9  ;;  %v2253_v21 = vmin.f32 %v1229_v10, 1.0 }
  0x67   : > { %v2254_v22 = vmin.f32 %v1230_v11, 1.0  ;;  %v2255_v23 = vmin.f32 %v1231_v12, 1.0  ;;  %v1233_v24 = vmax.f32 %v209_v13, 0.0  ;;  %v213_v25 = vld [vmem:[%s4615_s30 + $0x258] sm:$0xff]  ;;  %v214_v26 = vld [vmem:[%s4615_s30 + $0x260] sm:$0xff]  ;;  %3274 = vst [vmem:[%s4636_s17 + $0x200] sm:$0xff] %v2250_v15 }
  0x68   : > { %3275 = vst [vmem:[%s4636_s17 + $0x208] sm:$0xff] %v2251_v16  ;;  %3276 = vst [vmem:[%s4636_s17 + $0x210] sm:$0xff] %v2252_v17  ;;  %v2256_v27 = vmin.f32 %v1232_v18, 1.0  ;;  %v1234_v28 = vmax.f32 %v210_v14, 0.0  ;;  %v1235_v29 = vmax.f32 %v211_v19, 0.0  ;;  %v1236_v30 = vmax.f32 %v212_v20, 0.0 }
  0x69   : > { %v215_v31 = vld [vmem:[%s4615_s30 + $0x268] sm:$0xff]  ;;  %v216_v32 = vld [vmem:[%s4615_s30 + $0x270] sm:$0xff]  ;;  %3277 = vst [vmem:[%s4636_s17 + $0x218] sm:$0xff] %v2253_v21  ;;  %3278 = vst [vmem:[%s4636_s17 + $0x220] sm:$0xff] %v2254_v22  ;;  %v2257_v33 = vmin.f32 %v1233_v24, 1.0  ;;  %v1237_v34 = vmax.f32 %v213_v25, 0.0 }
  0x6a   : > { %3279 = vst [vmem:[%s4636_s17 + $0x228] sm:$0xff] %v2255_v23  ;;  %v1238_v35 = vmax.f32 %v214_v26, 0.0  ;;  %v1239_v36 = vmax.f32 %v215_v31, 0.0  ;;  %v217_v37 = vld [vmem:[%s4615_s30 + $0x278] sm:$0xff]  ;;  %v218_v38 = vld [vmem:[%s4615_s30 + $0x280] sm:$0xff]  ;;  %3280 = vst [vmem:[%s4636_s17 + $0x230] sm:$0xff] %v2256_v27 }
  0x6b   : > { %v2258_v39 = vmin.f32 %v1234_v28, 1.0  ;;  %v2259_v40 = vmin.f32 %v1235_v29, 1.0  ;;  %v2260_v41 = vmin.f32 %v1236_v30, 1.0  ;;  %v1240_v42 = vmax.f32 %v216_v32, 0.0  ;;  %v219_v43 = vld [vmem:[%s4615_s30 + $0x288] sm:$0xff]  ;;  %v220_v44 = vld [vmem:[%s4615_s30 + $0x290] sm:$0xff] }
  0x6c   : > { %3281 = vst [vmem:[%s4636_s17 + $0x238] sm:$0xff] %v2257_v33  ;;  %v2261_v45 = vmin.f32 %v1237_v34, 1.0  ;;  %v2262_v46 = vmin.f32 %v1238_v35, 1.0  ;;  %v2263_v47 = vmin.f32 %v1239_v36, 1.0  ;;  %v1241_v48 = vmax.f32 %v217_v37, 0.0  ;;  %v221_v49 = vld [vmem:[%s4615_s30 + $0x298] sm:$0xff] }
  0x6d   : > { %v222_v50 = vld [vmem:[%s4615_s30 + $0x2a0] sm:$0xff]  ;;  %3282 = vst [vmem:[%s4636_s17 + $0x240] sm:$0xff] %v2258_v39  ;;  %3283 = vst [vmem:[%s4636_s17 + $0x248] sm:$0xff] %v2259_v40  ;;  %v2264_v51 = vmin.f32 %v1240_v42, 1.0  ;;  %v1242_v52 = vmax.f32 %v218_v38, 0.0  ;;  %v1243_v53 = vmax.f32 %v219_v43, 0.0 }
  0x6e   : > { %3284 = vst [vmem:[%s4636_s17 + $0x250] sm:$0xff] %v2260_v41  ;;  %v1244_v54 = vmax.f32 %v220_v44, 0.0  ;;  %v223_v55 = vld [vmem:[%s4615_s30 + $0x2a8] sm:$0xff]  ;;  %v224_v56 = vld [vmem:[%s4615_s30 + $0x2b0] sm:$0xff]  ;;  %3285 = vst [vmem:[%s4636_s17 + $0x258] sm:$0xff] %v2261_v45  ;;  %v2265_v57 = vmin.f32 %v1241_v48, 1.0 }
  0x6f   : > { %3286 = vst [vmem:[%s4636_s17 + $0x260] sm:$0xff] %v2262_v46  ;;  %3287 = vst [vmem:[%s4636_s17 + $0x268] sm:$0xff] %v2263_v47  ;;  %v1245_v58 = vmax.f32 %v221_v49, 0.0  ;;  %v1246_v59 = vmax.f32 %v222_v50, 0.0  ;;  %v1247_v60 = vmax.f32 %v223_v55, 0.0  ;;  %v225_v61 = vld [vmem:[%s4615_s30 + $0x2b8] sm:$0xff] }
  0x70   : > { %v226_v62 = vld [vmem:[%s4615_s30 + $0x2c0] sm:$0xff]  ;;  %3288 = vst [vmem:[%s4636_s17 + $0x270] sm:$0xff] %v2264_v51  ;;  %v2266_v63 = vmin.f32 %v1242_v52, 1.0  ;;  %v2267_v0 = vmin.f32 %v1243_v53, 1.0  ;;  %v2268_v1 = vmin.f32 %v1244_v54, 1.0  ;;  %v1248_v2 = vmax.f32 %v224_v56, 0.0 }
  0x71   : > { %v227_v3 = vld [vmem:[%s4615_s30 + $0x2c8] sm:$0xff]  ;;  %v228_v4 = vld [vmem:[%s4615_s30 + $0x2d0] sm:$0xff]  ;;  %3289 = vst [vmem:[%s4636_s17 + $0x278] sm:$0xff] %v2265_v57  ;;  %v2269_v5 = vmin.f32 %v1245_v58, 1.0  ;;  %v2270_v6 = vmin.f32 %v1246_v59, 1.0  ;;  %v2271_v7 = vmin.f32 %v1247_v60, 1.0 }
  0x72   : > { %v1249_v8 = vmax.f32 %v225_v61, 0.0  ;;  %v229_v9 = vld [vmem:[%s4615_s30 + $0x2d8] sm:$0xff]  ;;  %v230_v10 = vld [vmem:[%s4615_s30 + $0x2e0] sm:$0xff]  ;;  %3290 = vst [vmem:[%s4636_s17 + $0x280] sm:$0xff] %v2266_v63  ;;  %3291 = vst [vmem:[%s4636_s17 + $0x288] sm:$0xff] %v2267_v0  ;;  %v2272_v11 = vmin.f32 %v1248_v2, 1.0 }
  0x73   : > { %3292 = vst [vmem:[%s4636_s17 + $0x290] sm:$0xff] %v2268_v1  ;;  %v1250_v12 = vmax.f32 %v226_v62, 0.0  ;;  %v1251_v13 = vmax.f32 %v227_v3, 0.0  ;;  %v1252_v14 = vmax.f32 %v228_v4, 0.0  ;;  %v231_v15 = vld [vmem:[%s4615_s30 + $0x2e8] sm:$0xff]  ;;  %v232_v16 = vld [vmem:[%s4615_s30 + $0x2f0] sm:$0xff] }
  0x74   : > { %3293 = vst [vmem:[%s4636_s17 + $0x298] sm:$0xff] %v2269_v5  ;;  %3294 = vst [vmem:[%s4636_s17 + $0x2a0] sm:$0xff] %v2270_v6  ;;  %v2273_v17 = vmin.f32 %v1249_v8, 1.0  ;;  %v1253_v18 = vmax.f32 %v229_v9, 0.0  ;;  %v1254_v19 = vmax.f32 %v230_v10, 0.0  ;;  %v1255_v20 = vmax.f32 %v231_v15, 0.0 }
  0x75   : > { %3295 = vst [vmem:[%s4636_s17 + $0x2a8] sm:$0xff] %v2271_v7  ;;  %v233_v21 = vld [vmem:[%s4615_s30 + $0x2f8] sm:$0xff]  ;;  %v234_v22 = vld [vmem:[%s4615_s30 + $0x300] sm:$0xff]  ;;  %3296 = vst [vmem:[%s4636_s17 + $0x2b0] sm:$0xff] %v2272_v11  ;;  %v2274_v23 = vmin.f32 %v1250_v12, 1.0  ;;  %v2275_v24 = vmin.f32 %v1251_v13, 1.0 }
  0x76   : > { %v2276_v25 = vmin.f32 %v1252_v14, 1.0  ;;  %v1256_v26 = vmax.f32 %v232_v16, 0.0  ;;  %v235_v27 = vld [vmem:[%s4615_s30 + $0x308] sm:$0xff]  ;;  %v236_v28 = vld [vmem:[%s4615_s30 + $0x310] sm:$0xff]  ;;  %3297 = vst [vmem:[%s4636_s17 + $0x2b8] sm:$0xff] %v2273_v17  ;;  %v2277_v29 = vmin.f32 %v1253_v18, 1.0 }
  0x77   : > { %v2278_v30 = vmin.f32 %v1254_v19, 1.0  ;;  %v2279_v31 = vmin.f32 %v1255_v20, 1.0  ;;  %v1257_v32 = vmax.f32 %v233_v21, 0.0  ;;  %v237_v33 = vld [vmem:[%s4615_s30 + $0x318] sm:$0xff]  ;;  %v238_v34 = vld [vmem:[%s4615_s30 + $0x320] sm:$0xff]  ;;  %3298 = vst [vmem:[%s4636_s17 + $0x2c0] sm:$0xff] %v2274_v23 }
  0x78   : > { %3299 = vst [vmem:[%s4636_s17 + $0x2c8] sm:$0xff] %v2275_v24  ;;  %3300 = vst [vmem:[%s4636_s17 + $0x2d0] sm:$0xff] %v2276_v25  ;;  %v2280_v35 = vmin.f32 %v1256_v26, 1.0  ;;  %v1258_v36 = vmax.f32 %v234_v22, 0.0  ;;  %v1259_v37 = vmax.f32 %v235_v27, 0.0  ;;  %v1260_v38 = vmax.f32 %v236_v28, 0.0 }
  0x79   : > { %v239_v39 = vld [vmem:[%s4615_s30 + $0x328] sm:$0xff]  ;;  %v240_v40 = vld [vmem:[%s4615_s30 + $0x330] sm:$0xff]  ;;  %3301 = vst [vmem:[%s4636_s17 + $0x2d8] sm:$0xff] %v2277_v29  ;;  %3302 = vst [vmem:[%s4636_s17 + $0x2e0] sm:$0xff] %v2278_v30  ;;  %v2281_v41 = vmin.f32 %v1257_v32, 1.0  ;;  %v1261_v42 = vmax.f32 %v237_v33, 0.0 }
  0x7a   : > { %3303 = vst [vmem:[%s4636_s17 + $0x2e8] sm:$0xff] %v2279_v31  ;;  %v1262_v43 = vmax.f32 %v238_v34, 0.0  ;;  %v1263_v44 = vmax.f32 %v239_v39, 0.0  ;;  %v241_v45 = vld [vmem:[%s4615_s30 + $0x338] sm:$0xff]  ;;  %v242_v46 = vld [vmem:[%s4615_s30 + $0x340] sm:$0xff]  ;;  %3304 = vst [vmem:[%s4636_s17 + $0x2f0] sm:$0xff] %v2280_v35 }
  0x7b   : > { %v2282_v47 = vmin.f32 %v1258_v36, 1.0  ;;  %v2283_v48 = vmin.f32 %v1259_v37, 1.0  ;;  %v2284_v49 = vmin.f32 %v1260_v38, 1.0  ;;  %v1264_v50 = vmax.f32 %v240_v40, 0.0  ;;  %v243_v51 = vld [vmem:[%s4615_s30 + $0x348] sm:$0xff]  ;;  %v244_v52 = vld [vmem:[%s4615_s30 + $0x350] sm:$0xff] }
  0x7c   : > { %3305 = vst [vmem:[%s4636_s17 + $0x2f8] sm:$0xff] %v2281_v41  ;;  %v2285_v53 = vmin.f32 %v1261_v42, 1.0  ;;  %v2286_v54 = vmin.f32 %v1262_v43, 1.0  ;;  %v2287_v55 = vmin.f32 %v1263_v44, 1.0  ;;  %v1265_v56 = vmax.f32 %v241_v45, 0.0  ;;  %v245_v57 = vld [vmem:[%s4615_s30 + $0x358] sm:$0xff] }
  0x7d   : > { %v246_v58 = vld [vmem:[%s4615_s30 + $0x360] sm:$0xff]  ;;  %3306 = vst [vmem:[%s4636_s17 + $0x300] sm:$0xff] %v2282_v47  ;;  %3307 = vst [vmem:[%s4636_s17 + $0x308] sm:$0xff] %v2283_v48  ;;  %v2288_v59 = vmin.f32 %v1264_v50, 1.0  ;;  %v1266_v60 = vmax.f32 %v242_v46, 0.0  ;;  %v1267_v61 = vmax.f32 %v243_v51, 0.0 }
  0x7e   : > { %3308 = vst [vmem:[%s4636_s17 + $0x310] sm:$0xff] %v2284_v49  ;;  %v1268_v62 = vmax.f32 %v244_v52, 0.0  ;;  %v247_v63 = vld [vmem:[%s4615_s30 + $0x368] sm:$0xff]  ;;  %v248_v0 = vld [vmem:[%s4615_s30 + $0x370] sm:$0xff]  ;;  %3309 = vst [vmem:[%s4636_s17 + $0x318] sm:$0xff] %v2285_v53  ;;  %v2289_v1 = vmin.f32 %v1265_v56, 1.0 }
  0x7f   : > { %3310 = vst [vmem:[%s4636_s17 + $0x320] sm:$0xff] %v2286_v54  ;;  %3311 = vst [vmem:[%s4636_s17 + $0x328] sm:$0xff] %v2287_v55  ;;  %v1269_v2 = vmax.f32 %v245_v57, 0.0  ;;  %v1270_v3 = vmax.f32 %v246_v58, 0.0  ;;  %v1271_v4 = vmax.f32 %v247_v63, 0.0  ;;  %v249_v5 = vld [vmem:[%s4615_s30 + $0x378] sm:$0xff] }
  0x80   : > { %v250_v6 = vld [vmem:[%s4615_s30 + $0x380] sm:$0xff]  ;;  %3312 = vst [vmem:[%s4636_s17 + $0x330] sm:$0xff] %v2288_v59  ;;  %v2290_v7 = vmin.f32 %v1266_v60, 1.0  ;;  %v2291_v8 = vmin.f32 %v1267_v61, 1.0  ;;  %v2292_v9 = vmin.f32 %v1268_v62, 1.0  ;;  %v1272_v10 = vmax.f32 %v248_v0, 0.0 }
  0x81   : > { %v251_v11 = vld [vmem:[%s4615_s30 + $0x388] sm:$0xff]  ;;  %v252_v12 = vld [vmem:[%s4615_s30 + $0x390] sm:$0xff]  ;;  %3313 = vst [vmem:[%s4636_s17 + $0x338] sm:$0xff] %v2289_v1  ;;  %v2293_v13 = vmin.f32 %v1269_v2, 1.0  ;;  %v2294_v14 = vmin.f32 %v1270_v3, 1.0  ;;  %v2295_v15 = vmin.f32 %v1271_v4, 1.0 }
  0x82   : > { %v1273_v16 = vmax.f32 %v249_v5, 0.0  ;;  %v253_v17 = vld [vmem:[%s4615_s30 + $0x398] sm:$0xff]  ;;  %v254_v18 = vld [vmem:[%s4615_s30 + $0x3a0] sm:$0xff]  ;;  %3314 = vst [vmem:[%s4636_s17 + $0x340] sm:$0xff] %v2290_v7  ;;  %3315 = vst [vmem:[%s4636_s17 + $0x348] sm:$0xff] %v2291_v8  ;;  %v2296_v19 = vmin.f32 %v1272_v10, 1.0 }
  0x83   : > { %3316 = vst [vmem:[%s4636_s17 + $0x350] sm:$0xff] %v2292_v9  ;;  %v1274_v20 = vmax.f32 %v250_v6, 0.0  ;;  %v1275_v21 = vmax.f32 %v251_v11, 0.0  ;;  %v1276_v22 = vmax.f32 %v252_v12, 0.0  ;;  %v255_v23 = vld [vmem:[%s4615_s30 + $0x3a8] sm:$0xff]  ;;  %v256_v24 = vld [vmem:[%s4615_s30 + $0x3b0] sm:$0xff] }
  0x84   : > { %3317 = vst [vmem:[%s4636_s17 + $0x358] sm:$0xff] %v2293_v13  ;;  %3318 = vst [vmem:[%s4636_s17 + $0x360] sm:$0xff] %v2294_v14  ;;  %v2297_v25 = vmin.f32 %v1273_v16, 1.0  ;;  %v1277_v26 = vmax.f32 %v253_v17, 0.0  ;;  %v1278_v27 = vmax.f32 %v254_v18, 0.0  ;;  %v1279_v28 = vmax.f32 %v255_v23, 0.0 }
  0x85   : > { %3319 = vst [vmem:[%s4636_s17 + $0x368] sm:$0xff] %v2295_v15  ;;  %v257_v29 = vld [vmem:[%s4615_s30 + $0x3b8] sm:$0xff]  ;;  %v258_v30 = vld [vmem:[%s4615_s30 + $0x3c0] sm:$0xff]  ;;  %3320 = vst [vmem:[%s4636_s17 + $0x370] sm:$0xff] %v2296_v19  ;;  %v2298_v31 = vmin.f32 %v1274_v20, 1.0  ;;  %v2299_v32 = vmin.f32 %v1275_v21, 1.0 }
  0x86   : > { %v2300_v33 = vmin.f32 %v1276_v22, 1.0  ;;  %v1280_v34 = vmax.f32 %v256_v24, 0.0  ;;  %v259_v35 = vld [vmem:[%s4615_s30 + $0x3c8] sm:$0xff]  ;;  %v260_v36 = vld [vmem:[%s4615_s30 + $0x3d0] sm:$0xff]  ;;  %3321 = vst [vmem:[%s4636_s17 + $0x378] sm:$0xff] %v2297_v25  ;;  %v2301_v37 = vmin.f32 %v1277_v26, 1.0 }
  0x87   : > { %v2302_v38 = vmin.f32 %v1278_v27, 1.0  ;;  %v2303_v39 = vmin.f32 %v1279_v28, 1.0  ;;  %v1281_v40 = vmax.f32 %v257_v29, 0.0  ;;  %v261_v41 = vld [vmem:[%s4615_s30 + $0x3d8] sm:$0xff]  ;;  %v262_v42 = vld [vmem:[%s4615_s30 + $0x3e0] sm:$0xff]  ;;  %3322 = vst [vmem:[%s4636_s17 + $0x380] sm:$0xff] %v2298_v31 }
  0x88   : > { %3323 = vst [vmem:[%s4636_s17 + $0x388] sm:$0xff] %v2299_v32  ;;  %3324 = vst [vmem:[%s4636_s17 + $0x390] sm:$0xff] %v2300_v33  ;;  %v2304_v43 = vmin.f32 %v1280_v34, 1.0  ;;  %v1282_v44 = vmax.f32 %v258_v30, 0.0  ;;  %v1283_v45 = vmax.f32 %v259_v35, 0.0  ;;  %v1284_v46 = vmax.f32 %v260_v36, 0.0 }
  0x89   : > { %v263_v47 = vld [vmem:[%s4615_s30 + $0x3e8] sm:$0xff]  ;;  %v264_v48 = vld [vmem:[%s4615_s30 + $0x3f0] sm:$0xff]  ;;  %3325 = vst [vmem:[%s4636_s17 + $0x398] sm:$0xff] %v2301_v37  ;;  %3326 = vst [vmem:[%s4636_s17 + $0x3a0] sm:$0xff] %v2302_v38  ;;  %v2305_v49 = vmin.f32 %v1281_v40, 1.0  ;;  %v1285_v50 = vmax.f32 %v261_v41, 0.0 }
  0x8a   : > { %3327 = vst [vmem:[%s4636_s17 + $0x3a8] sm:$0xff] %v2303_v39  ;;  %v1286_v51 = vmax.f32 %v262_v42, 0.0  ;;  %v1287_v52 = vmax.f32 %v263_v47, 0.0  ;;  %v265_v53 = vld [vmem:[%s4615_s30 + $0x3f8] sm:$0xff]  ;;  %v266_v54 = vld [vmem:[%s4615_s30 + $0x400] sm:$0xff]  ;;  %3328 = vst [vmem:[%s4636_s17 + $0x3b0] sm:$0xff] %v2304_v43 }
  0x8b   : > { %v2306_v55 = vmin.f32 %v1282_v44, 1.0  ;;  %v2307_v56 = vmin.f32 %v1283_v45, 1.0  ;;  %v2308_v57 = vmin.f32 %v1284_v46, 1.0  ;;  %v1288_v58 = vmax.f32 %v264_v48, 0.0  ;;  %v267_v59 = vld [vmem:[%s4615_s30 + $0x408] sm:$0xff]  ;;  %v268_v60 = vld [vmem:[%s4615_s30 + $0x410] sm:$0xff] }
  0x8c   : > { %3329 = vst [vmem:[%s4636_s17 + $0x3b8] sm:$0xff] %v2305_v49  ;;  %v2309_v61 = vmin.f32 %v1285_v50, 1.0  ;;  %v2310_v62 = vmin.f32 %v1286_v51, 1.0  ;;  %v2311_v63 = vmin.f32 %v1287_v52, 1.0  ;;  %v1289_v0 = vmax.f32 %v265_v53, 0.0  ;;  %v269_v1 = vld [vmem:[%s4615_s30 + $0x418] sm:$0xff] }
  0x8d   : > { %v270_v2 = vld [vmem:[%s4615_s30 + $0x420] sm:$0xff]  ;;  %3330 = vst [vmem:[%s4636_s17 + $0x3c0] sm:$0xff] %v2306_v55  ;;  %3331 = vst [vmem:[%s4636_s17 + $0x3c8] sm:$0xff] %v2307_v56  ;;  %v2312_v3 = vmin.f32 %v1288_v58, 1.0  ;;  %v1290_v4 = vmax.f32 %v266_v54, 0.0  ;;  %v1291_v5 = vmax.f32 %v267_v59, 0.0 }
  0x8e   : > { %3332 = vst [vmem:[%s4636_s17 + $0x3d0] sm:$0xff] %v2308_v57  ;;  %v1292_v6 = vmax.f32 %v268_v60, 0.0  ;;  %v271_v7 = vld [vmem:[%s4615_s30 + $0x428] sm:$0xff]  ;;  %v272_v8 = vld [vmem:[%s4615_s30 + $0x430] sm:$0xff]  ;;  %3333 = vst [vmem:[%s4636_s17 + $0x3d8] sm:$0xff] %v2309_v61  ;;  %v2313_v9 = vmin.f32 %v1289_v0, 1.0 }
  0x8f   : > { %3334 = vst [vmem:[%s4636_s17 + $0x3e0] sm:$0xff] %v2310_v62  ;;  %3335 = vst [vmem:[%s4636_s17 + $0x3e8] sm:$0xff] %v2311_v63  ;;  %v1293_v10 = vmax.f32 %v269_v1, 0.0  ;;  %v1294_v11 = vmax.f32 %v270_v2, 0.0  ;;  %v1295_v12 = vmax.f32 %v271_v7, 0.0  ;;  %v273_v13 = vld [vmem:[%s4615_s30 + $0x438] sm:$0xff] }
  0x90   : > { %v274_v14 = vld [vmem:[%s4615_s30 + $0x440] sm:$0xff]  ;;  %3336 = vst [vmem:[%s4636_s17 + $0x3f0] sm:$0xff] %v2312_v3  ;;  %v2314_v15 = vmin.f32 %v1290_v4, 1.0  ;;  %v2315_v16 = vmin.f32 %v1291_v5, 1.0  ;;  %v2316_v17 = vmin.f32 %v1292_v6, 1.0  ;;  %v1296_v18 = vmax.f32 %v272_v8, 0.0 }
  0x91   : > { %v275_v19 = vld [vmem:[%s4615_s30 + $0x448] sm:$0xff]  ;;  %v276_v20 = vld [vmem:[%s4615_s30 + $0x450] sm:$0xff]  ;;  %3337 = vst [vmem:[%s4636_s17 + $0x3f8] sm:$0xff] %v2313_v9  ;;  %v2317_v21 = vmin.f32 %v1293_v10, 1.0  ;;  %v2318_v22 = vmin.f32 %v1294_v11, 1.0  ;;  %v2319_v23 = vmin.f32 %v1295_v12, 1.0 }
  0x92   : > { %v1297_v24 = vmax.f32 %v273_v13, 0.0  ;;  %v277_v25 = vld [vmem:[%s4615_s30 + $0x458] sm:$0xff]  ;;  %v278_v26 = vld [vmem:[%s4615_s30 + $0x460] sm:$0xff]  ;;  %3338 = vst [vmem:[%s4636_s17 + $0x400] sm:$0xff] %v2314_v15  ;;  %3339 = vst [vmem:[%s4636_s17 + $0x408] sm:$0xff] %v2315_v16  ;;  %v2320_v27 = vmin.f32 %v1296_v18, 1.0 }
  0x93   : > { %3340 = vst [vmem:[%s4636_s17 + $0x410] sm:$0xff] %v2316_v17  ;;  %v1298_v28 = vmax.f32 %v274_v14, 0.0  ;;  %v1299_v29 = vmax.f32 %v275_v19, 0.0  ;;  %v1300_v30 = vmax.f32 %v276_v20, 0.0  ;;  %v279_v31 = vld [vmem:[%s4615_s30 + $0x468] sm:$0xff]  ;;  %v280_v32 = vld [vmem:[%s4615_s30 + $0x470] sm:$0xff] }
  0x94   : > { %3341 = vst [vmem:[%s4636_s17 + $0x418] sm:$0xff] %v2317_v21  ;;  %3342 = vst [vmem:[%s4636_s17 + $0x420] sm:$0xff] %v2318_v22  ;;  %v2321_v33 = vmin.f32 %v1297_v24, 1.0  ;;  %v1301_v34 = vmax.f32 %v277_v25, 0.0  ;;  %v1302_v35 = vmax.f32 %v278_v26, 0.0  ;;  %v1303_v36 = vmax.f32 %v279_v31, 0.0 }
  0x95   : > { %3343 = vst [vmem:[%s4636_s17 + $0x428] sm:$0xff] %v2319_v23  ;;  %v281_v37 = vld [vmem:[%s4615_s30 + $0x478] sm:$0xff]  ;;  %v282_v38 = vld [vmem:[%s4615_s30 + $0x480] sm:$0xff]  ;;  %3344 = vst [vmem:[%s4636_s17 + $0x430] sm:$0xff] %v2320_v27  ;;  %v2322_v39 = vmin.f32 %v1298_v28, 1.0  ;;  %v2323_v40 = vmin.f32 %v1299_v29, 1.0 }
  0x96   : > { %v2324_v41 = vmin.f32 %v1300_v30, 1.0  ;;  %v1304_v42 = vmax.f32 %v280_v32, 0.0  ;;  %v283_v43 = vld [vmem:[%s4615_s30 + $0x488] sm:$0xff]  ;;  %v284_v44 = vld [vmem:[%s4615_s30 + $0x490] sm:$0xff]  ;;  %3345 = vst [vmem:[%s4636_s17 + $0x438] sm:$0xff] %v2321_v33  ;;  %v2325_v45 = vmin.f32 %v1301_v34, 1.0 }
  0x97   : > { %v2326_v46 = vmin.f32 %v1302_v35, 1.0  ;;  %v2327_v47 = vmin.f32 %v1303_v36, 1.0  ;;  %v1305_v48 = vmax.f32 %v281_v37, 0.0  ;;  %v285_v49 = vld [vmem:[%s4615_s30 + $0x498] sm:$0xff]  ;;  %v286_v50 = vld [vmem:[%s4615_s30 + $0x4a0] sm:$0xff]  ;;  %3346 = vst [vmem:[%s4636_s17 + $0x440] sm:$0xff] %v2322_v39 }
  0x98   : > { %3347 = vst [vmem:[%s4636_s17 + $0x448] sm:$0xff] %v2323_v40  ;;  %3348 = vst [vmem:[%s4636_s17 + $0x450] sm:$0xff] %v2324_v41  ;;  %v2328_v51 = vmin.f32 %v1304_v42, 1.0  ;;  %v1306_v52 = vmax.f32 %v282_v38, 0.0  ;;  %v1307_v53 = vmax.f32 %v283_v43, 0.0  ;;  %v1308_v54 = vmax.f32 %v284_v44, 0.0 }
  0x99   : > { %v287_v55 = vld [vmem:[%s4615_s30 + $0x4a8] sm:$0xff]  ;;  %v288_v56 = vld [vmem:[%s4615_s30 + $0x4b0] sm:$0xff]  ;;  %3349 = vst [vmem:[%s4636_s17 + $0x458] sm:$0xff] %v2325_v45  ;;  %3350 = vst [vmem:[%s4636_s17 + $0x460] sm:$0xff] %v2326_v46  ;;  %v2329_v57 = vmin.f32 %v1305_v48, 1.0  ;;  %v1309_v58 = vmax.f32 %v285_v49, 0.0 }
  0x9a   : > { %3351 = vst [vmem:[%s4636_s17 + $0x468] sm:$0xff] %v2327_v47  ;;  %v1310_v59 = vmax.f32 %v286_v50, 0.0  ;;  %v1311_v60 = vmax.f32 %v287_v55, 0.0  ;;  %v289_v61 = vld [vmem:[%s4615_s30 + $0x4b8] sm:$0xff]  ;;  %v290_v62 = vld [vmem:[%s4615_s30 + $0x4c0] sm:$0xff]  ;;  %3352 = vst [vmem:[%s4636_s17 + $0x470] sm:$0xff] %v2328_v51 }
  0x9b   : > { %v2330_v63 = vmin.f32 %v1306_v52, 1.0  ;;  %v2331_v0 = vmin.f32 %v1307_v53, 1.0  ;;  %v2332_v1 = vmin.f32 %v1308_v54, 1.0  ;;  %v1312_v2 = vmax.f32 %v288_v56, 0.0  ;;  %v291_v3 = vld [vmem:[%s4615_s30 + $0x4c8] sm:$0xff]  ;;  %v292_v4 = vld [vmem:[%s4615_s30 + $0x4d0] sm:$0xff] }
  0x9c   : > { %3353 = vst [vmem:[%s4636_s17 + $0x478] sm:$0xff] %v2329_v57  ;;  %v2333_v5 = vmin.f32 %v1309_v58, 1.0  ;;  %v2334_v6 = vmin.f32 %v1310_v59, 1.0  ;;  %v2335_v7 = vmin.f32 %v1311_v60, 1.0  ;;  %v1313_v8 = vmax.f32 %v289_v61, 0.0  ;;  %v293_v9 = vld [vmem:[%s4615_s30 + $0x4d8] sm:$0xff] }
  0x9d   : > { %v294_v10 = vld [vmem:[%s4615_s30 + $0x4e0] sm:$0xff]  ;;  %3354 = vst [vmem:[%s4636_s17 + $0x480] sm:$0xff] %v2330_v63  ;;  %3355 = vst [vmem:[%s4636_s17 + $0x488] sm:$0xff] %v2331_v0  ;;  %v2336_v11 = vmin.f32 %v1312_v2, 1.0  ;;  %v1314_v12 = vmax.f32 %v290_v62, 0.0  ;;  %v1315_v13 = vmax.f32 %v291_v3, 0.0 }
  0x9e   : > { %3356 = vst [vmem:[%s4636_s17 + $0x490] sm:$0xff] %v2332_v1  ;;  %v1316_v14 = vmax.f32 %v292_v4, 0.0  ;;  %v295_v15 = vld [vmem:[%s4615_s30 + $0x4e8] sm:$0xff]  ;;  %v296_v16 = vld [vmem:[%s4615_s30 + $0x4f0] sm:$0xff]  ;;  %3357 = vst [vmem:[%s4636_s17 + $0x498] sm:$0xff] %v2333_v5  ;;  %v2337_v17 = vmin.f32 %v1313_v8, 1.0 }
  0x9f   : > { %3358 = vst [vmem:[%s4636_s17 + $0x4a0] sm:$0xff] %v2334_v6  ;;  %3359 = vst [vmem:[%s4636_s17 + $0x4a8] sm:$0xff] %v2335_v7  ;;  %v1317_v18 = vmax.f32 %v293_v9, 0.0  ;;  %v1318_v19 = vmax.f32 %v294_v10, 0.0  ;;  %v1319_v20 = vmax.f32 %v295_v15, 0.0  ;;  %v297_v21 = vld [vmem:[%s4615_s30 + $0x4f8] sm:$0xff] }
  0xa0   : > { %v298_v22 = vld [vmem:[%s4615_s30 + $0x500] sm:$0xff]  ;;  %3360 = vst [vmem:[%s4636_s17 + $0x4b0] sm:$0xff] %v2336_v11  ;;  %v2338_v23 = vmin.f32 %v1314_v12, 1.0  ;;  %v2339_v24 = vmin.f32 %v1315_v13, 1.0  ;;  %v2340_v25 = vmin.f32 %v1316_v14, 1.0  ;;  %v1320_v26 = vmax.f32 %v296_v16, 0.0 }
  0xa1   : > { %v299_v27 = vld [vmem:[%s4615_s30 + $0x508] sm:$0xff]  ;;  %v300_v28 = vld [vmem:[%s4615_s30 + $0x510] sm:$0xff]  ;;  %3361 = vst [vmem:[%s4636_s17 + $0x4b8] sm:$0xff] %v2337_v17  ;;  %v2341_v29 = vmin.f32 %v1317_v18, 1.0  ;;  %v2342_v30 = vmin.f32 %v1318_v19, 1.0  ;;  %v2343_v31 = vmin.f32 %v1319_v20, 1.0 }
  0xa2   : > { %v1321_v32 = vmax.f32 %v297_v21, 0.0  ;;  %v301_v33 = vld [vmem:[%s4615_s30 + $0x518] sm:$0xff]  ;;  %v302_v34 = vld [vmem:[%s4615_s30 + $0x520] sm:$0xff]  ;;  %3362 = vst [vmem:[%s4636_s17 + $0x4c0] sm:$0xff] %v2338_v23  ;;  %3363 = vst [vmem:[%s4636_s17 + $0x4c8] sm:$0xff] %v2339_v24  ;;  %v2344_v35 = vmin.f32 %v1320_v26, 1.0 }
  0xa3   : > { %3364 = vst [vmem:[%s4636_s17 + $0x4d0] sm:$0xff] %v2340_v25  ;;  %v1322_v36 = vmax.f32 %v298_v22, 0.0  ;;  %v1323_v37 = vmax.f32 %v299_v27, 0.0  ;;  %v1324_v38 = vmax.f32 %v300_v28, 0.0  ;;  %v303_v39 = vld [vmem:[%s4615_s30 + $0x528] sm:$0xff]  ;;  %v304_v40 = vld [vmem:[%s4615_s30 + $0x530] sm:$0xff] }
  0xa4   : > { %3365 = vst [vmem:[%s4636_s17 + $0x4d8] sm:$0xff] %v2341_v29  ;;  %3366 = vst [vmem:[%s4636_s17 + $0x4e0] sm:$0xff] %v2342_v30  ;;  %v2345_v41 = vmin.f32 %v1321_v32, 1.0  ;;  %v1325_v42 = vmax.f32 %v301_v33, 0.0  ;;  %v1326_v43 = vmax.f32 %v302_v34, 0.0  ;;  %v1327_v44 = vmax.f32 %v303_v39, 0.0 }
  0xa5   : > { %3367 = vst [vmem:[%s4636_s17 + $0x4e8] sm:$0xff] %v2343_v31  ;;  %v305_v45 = vld [vmem:[%s4615_s30 + $0x538] sm:$0xff]  ;;  %v306_v46 = vld [vmem:[%s4615_s30 + $0x540] sm:$0xff]  ;;  %3368 = vst [vmem:[%s4636_s17 + $0x4f0] sm:$0xff] %v2344_v35  ;;  %v2346_v47 = vmin.f32 %v1322_v36, 1.0  ;;  %v2347_v48 = vmin.f32 %v1323_v37, 1.0 }
  0xa6   : > { %v2348_v49 = vmin.f32 %v1324_v38, 1.0  ;;  %v1328_v50 = vmax.f32 %v304_v40, 0.0  ;;  %v307_v51 = vld [vmem:[%s4615_s30 + $0x548] sm:$0xff]  ;;  %v308_v52 = vld [vmem:[%s4615_s30 + $0x550] sm:$0xff]  ;;  %3369 = vst [vmem:[%s4636_s17 + $0x4f8] sm:$0xff] %v2345_v41  ;;  %v2349_v53 = vmin.f32 %v1325_v42, 1.0 }
  0xa7   : > { %v2350_v54 = vmin.f32 %v1326_v43, 1.0  ;;  %v2351_v55 = vmin.f32 %v1327_v44, 1.0  ;;  %v1329_v56 = vmax.f32 %v305_v45, 0.0  ;;  %v309_v57 = vld [vmem:[%s4615_s30 + $0x558] sm:$0xff]  ;;  %v310_v58 = vld [vmem:[%s4615_s30 + $0x560] sm:$0xff]  ;;  %3370 = vst [vmem:[%s4636_s17 + $0x500] sm:$0xff] %v2346_v47 }
  0xa8   : > { %3371 = vst [vmem:[%s4636_s17 + $0x508] sm:$0xff] %v2347_v48  ;;  %3372 = vst [vmem:[%s4636_s17 + $0x510] sm:$0xff] %v2348_v49  ;;  %v2352_v59 = vmin.f32 %v1328_v50, 1.0  ;;  %v1330_v60 = vmax.f32 %v306_v46, 0.0  ;;  %v1331_v61 = vmax.f32 %v307_v51, 0.0  ;;  %v1332_v62 = vmax.f32 %v308_v52, 0.0 }
  0xa9   : > { %v311_v63 = vld [vmem:[%s4615_s30 + $0x568] sm:$0xff]  ;;  %v312_v0 = vld [vmem:[%s4615_s30 + $0x570] sm:$0xff]  ;;  %3373 = vst [vmem:[%s4636_s17 + $0x518] sm:$0xff] %v2349_v53  ;;  %3374 = vst [vmem:[%s4636_s17 + $0x520] sm:$0xff] %v2350_v54  ;;  %v2353_v1 = vmin.f32 %v1329_v56, 1.0  ;;  %v1333_v2 = vmax.f32 %v309_v57, 0.0 }
  0xaa   : > { %3375 = vst [vmem:[%s4636_s17 + $0x528] sm:$0xff] %v2351_v55  ;;  %v1334_v3 = vmax.f32 %v310_v58, 0.0  ;;  %v1335_v4 = vmax.f32 %v311_v63, 0.0  ;;  %v313_v5 = vld [vmem:[%s4615_s30 + $0x578] sm:$0xff]  ;;  %v314_v6 = vld [vmem:[%s4615_s30 + $0x580] sm:$0xff]  ;;  %3376 = vst [vmem:[%s4636_s17 + $0x530] sm:$0xff] %v2352_v59 }
  0xab   : > { %v2354_v7 = vmin.f32 %v1330_v60, 1.0  ;;  %v2355_v8 = vmin.f32 %v1331_v61, 1.0  ;;  %v2356_v9 = vmin.f32 %v1332_v62, 1.0  ;;  %v1336_v10 = vmax.f32 %v312_v0, 0.0  ;;  %v315_v11 = vld [vmem:[%s4615_s30 + $0x588] sm:$0xff]  ;;  %v316_v12 = vld [vmem:[%s4615_s30 + $0x590] sm:$0xff] }
  0xac   : > { %3377 = vst [vmem:[%s4636_s17 + $0x538] sm:$0xff] %v2353_v1  ;;  %v2357_v13 = vmin.f32 %v1333_v2, 1.0  ;;  %v2358_v14 = vmin.f32 %v1334_v3, 1.0  ;;  %v2359_v15 = vmin.f32 %v1335_v4, 1.0  ;;  %v1337_v16 = vmax.f32 %v313_v5, 0.0  ;;  %v317_v17 = vld [vmem:[%s4615_s30 + $0x598] sm:$0xff] }
  0xad   : > { %v318_v18 = vld [vmem:[%s4615_s30 + $0x5a0] sm:$0xff]  ;;  %3378 = vst [vmem:[%s4636_s17 + $0x540] sm:$0xff] %v2354_v7  ;;  %3379 = vst [vmem:[%s4636_s17 + $0x548] sm:$0xff] %v2355_v8  ;;  %v2360_v19 = vmin.f32 %v1336_v10, 1.0  ;;  %v1338_v20 = vmax.f32 %v314_v6, 0.0  ;;  %v1339_v21 = vmax.f32 %v315_v11, 0.0 }
  0xae   : > { %3380 = vst [vmem:[%s4636_s17 + $0x550] sm:$0xff] %v2356_v9  ;;  %v1340_v22 = vmax.f32 %v316_v12, 0.0  ;;  %v319_v23 = vld [vmem:[%s4615_s30 + $0x5a8] sm:$0xff]  ;;  %v320_v24 = vld [vmem:[%s4615_s30 + $0x5b0] sm:$0xff]  ;;  %3381 = vst [vmem:[%s4636_s17 + $0x558] sm:$0xff] %v2357_v13  ;;  %v2361_v25 = vmin.f32 %v1337_v16, 1.0 }
  0xaf   : > { %3382 = vst [vmem:[%s4636_s17 + $0x560] sm:$0xff] %v2358_v14  ;;  %3383 = vst [vmem:[%s4636_s17 + $0x568] sm:$0xff] %v2359_v15  ;;  %v1341_v26 = vmax.f32 %v317_v17, 0.0  ;;  %v1342_v27 = vmax.f32 %v318_v18, 0.0  ;;  %v1343_v28 = vmax.f32 %v319_v23, 0.0  ;;  %v321_v29 = vld [vmem:[%s4615_s30 + $0x5b8] sm:$0xff] }
  0xb0   : > { %v322_v30 = vld [vmem:[%s4615_s30 + $0x5c0] sm:$0xff]  ;;  %3384 = vst [vmem:[%s4636_s17 + $0x570] sm:$0xff] %v2360_v19  ;;  %v2362_v31 = vmin.f32 %v1338_v20, 1.0  ;;  %v2363_v32 = vmin.f32 %v1339_v21, 1.0  ;;  %v2364_v33 = vmin.f32 %v1340_v22, 1.0  ;;  %v1344_v34 = vmax.f32 %v320_v24, 0.0 }
  0xb1   : > { %v323_v35 = vld [vmem:[%s4615_s30 + $0x5c8] sm:$0xff]  ;;  %v324_v36 = vld [vmem:[%s4615_s30 + $0x5d0] sm:$0xff]  ;;  %3385 = vst [vmem:[%s4636_s17 + $0x578] sm:$0xff] %v2361_v25  ;;  %v2365_v37 = vmin.f32 %v1341_v26, 1.0  ;;  %v2366_v38 = vmin.f32 %v1342_v27, 1.0  ;;  %v2367_v39 = vmin.f32 %v1343_v28, 1.0 }
  0xb2   : > { %v1345_v40 = vmax.f32 %v321_v29, 0.0  ;;  %v325_v41 = vld [vmem:[%s4615_s30 + $0x5d8] sm:$0xff]  ;;  %v326_v42 = vld [vmem:[%s4615_s30 + $0x5e0] sm:$0xff]  ;;  %3386 = vst [vmem:[%s4636_s17 + $0x580] sm:$0xff] %v2362_v31  ;;  %3387 = vst [vmem:[%s4636_s17 + $0x588] sm:$0xff] %v2363_v32  ;;  %v2368_v43 = vmin.f32 %v1344_v34, 1.0 }
  0xb3   : > { %3388 = vst [vmem:[%s4636_s17 + $0x590] sm:$0xff] %v2364_v33  ;;  %v1346_v44 = vmax.f32 %v322_v30, 0.0  ;;  %v1347_v45 = vmax.f32 %v323_v35, 0.0  ;;  %v1348_v46 = vmax.f32 %v324_v36, 0.0  ;;  %v327_v47 = vld [vmem:[%s4615_s30 + $0x5e8] sm:$0xff]  ;;  %v328_v48 = vld [vmem:[%s4615_s30 + $0x5f0] sm:$0xff] }
  0xb4   : > { %3389 = vst [vmem:[%s4636_s17 + $0x598] sm:$0xff] %v2365_v37  ;;  %3390 = vst [vmem:[%s4636_s17 + $0x5a0] sm:$0xff] %v2366_v38  ;;  %v2369_v49 = vmin.f32 %v1345_v40, 1.0  ;;  %v1349_v50 = vmax.f32 %v325_v41, 0.0  ;;  %v1350_v51 = vmax.f32 %v326_v42, 0.0  ;;  %v1351_v52 = vmax.f32 %v327_v47, 0.0 }
  0xb5   : > { %3391 = vst [vmem:[%s4636_s17 + $0x5a8] sm:$0xff] %v2367_v39  ;;  %v329_v53 = vld [vmem:[%s4615_s30 + $0x5f8] sm:$0xff]  ;;  %v330_v54 = vld [vmem:[%s4615_s30 + $0x600] sm:$0xff]  ;;  %3392 = vst [vmem:[%s4636_s17 + $0x5b0] sm:$0xff] %v2368_v43  ;;  %v2370_v55 = vmin.f32 %v1346_v44, 1.0  ;;  %v2371_v56 = vmin.f32 %v1347_v45, 1.0 }
  0xb6   : > { %v2372_v57 = vmin.f32 %v1348_v46, 1.0  ;;  %v1352_v58 = vmax.f32 %v328_v48, 0.0  ;;  %v331_v59 = vld [vmem:[%s4615_s30 + $0x608] sm:$0xff]  ;;  %v332_v60 = vld [vmem:[%s4615_s30 + $0x610] sm:$0xff]  ;;  %3393 = vst [vmem:[%s4636_s17 + $0x5b8] sm:$0xff] %v2369_v49  ;;  %v2373_v61 = vmin.f32 %v1349_v50, 1.0 }
  0xb7   : > { %v2374_v62 = vmin.f32 %v1350_v51, 1.0  ;;  %v2375_v63 = vmin.f32 %v1351_v52, 1.0  ;;  %v1353_v0 = vmax.f32 %v329_v53, 0.0  ;;  %v333_v1 = vld [vmem:[%s4615_s30 + $0x618] sm:$0xff]  ;;  %v334_v2 = vld [vmem:[%s4615_s30 + $0x620] sm:$0xff]  ;;  %3394 = vst [vmem:[%s4636_s17 + $0x5c0] sm:$0xff] %v2370_v55 }
  0xb8   : > { %3395 = vst [vmem:[%s4636_s17 + $0x5c8] sm:$0xff] %v2371_v56  ;;  %3396 = vst [vmem:[%s4636_s17 + $0x5d0] sm:$0xff] %v2372_v57  ;;  %v2376_v3 = vmin.f32 %v1352_v58, 1.0  ;;  %v1354_v4 = vmax.f32 %v330_v54, 0.0  ;;  %v1355_v5 = vmax.f32 %v331_v59, 0.0  ;;  %v1356_v6 = vmax.f32 %v332_v60, 0.0 }
  0xb9   : > { %v335_v7 = vld [vmem:[%s4615_s30 + $0x628] sm:$0xff]  ;;  %v336_v8 = vld [vmem:[%s4615_s30 + $0x630] sm:$0xff]  ;;  %3397 = vst [vmem:[%s4636_s17 + $0x5d8] sm:$0xff] %v2373_v61  ;;  %3398 = vst [vmem:[%s4636_s17 + $0x5e0] sm:$0xff] %v2374_v62  ;;  %v2377_v9 = vmin.f32 %v1353_v0, 1.0  ;;  %v1357_v10 = vmax.f32 %v333_v1, 0.0 }
  0xba   : > { %3399 = vst [vmem:[%s4636_s17 + $0x5e8] sm:$0xff] %v2375_v63  ;;  %v1358_v11 = vmax.f32 %v334_v2, 0.0  ;;  %v1359_v12 = vmax.f32 %v335_v7, 0.0  ;;  %v337_v13 = vld [vmem:[%s4615_s30 + $0x638] sm:$0xff]  ;;  %v338_v14 = vld [vmem:[%s4615_s30 + $0x640] sm:$0xff]  ;;  %3400 = vst [vmem:[%s4636_s17 + $0x5f0] sm:$0xff] %v2376_v3 }
  0xbb   : > { %v2378_v15 = vmin.f32 %v1354_v4, 1.0  ;;  %v2379_v16 = vmin.f32 %v1355_v5, 1.0  ;;  %v2380_v17 = vmin.f32 %v1356_v6, 1.0  ;;  %v1360_v18 = vmax.f32 %v336_v8, 0.0  ;;  %v339_v19 = vld [vmem:[%s4615_s30 + $0x648] sm:$0xff]  ;;  %v340_v20 = vld [vmem:[%s4615_s30 + $0x650] sm:$0xff] }
  0xbc   : > { %3401 = vst [vmem:[%s4636_s17 + $0x5f8] sm:$0xff] %v2377_v9  ;;  %v2381_v21 = vmin.f32 %v1357_v10, 1.0  ;;  %v2382_v22 = vmin.f32 %v1358_v11, 1.0  ;;  %v2383_v23 = vmin.f32 %v1359_v12, 1.0  ;;  %v1361_v24 = vmax.f32 %v337_v13, 0.0  ;;  %v341_v25 = vld [vmem:[%s4615_s30 + $0x658] sm:$0xff] }
  0xbd   : > { %v342_v26 = vld [vmem:[%s4615_s30 + $0x660] sm:$0xff]  ;;  %3402 = vst [vmem:[%s4636_s17 + $0x600] sm:$0xff] %v2378_v15  ;;  %3403 = vst [vmem:[%s4636_s17 + $0x608] sm:$0xff] %v2379_v16  ;;  %v2384_v27 = vmin.f32 %v1360_v18, 1.0  ;;  %v1362_v28 = vmax.f32 %v338_v14, 0.0  ;;  %v1363_v29 = vmax.f32 %v339_v19, 0.0 }
  0xbe   : > { %3404 = vst [vmem:[%s4636_s17 + $0x610] sm:$0xff] %v2380_v17  ;;  %v1364_v30 = vmax.f32 %v340_v20, 0.0  ;;  %v343_v31 = vld [vmem:[%s4615_s30 + $0x668] sm:$0xff]  ;;  %v344_v32 = vld [vmem:[%s4615_s30 + $0x670] sm:$0xff]  ;;  %3405 = vst [vmem:[%s4636_s17 + $0x618] sm:$0xff] %v2381_v21  ;;  %v2385_v33 = vmin.f32 %v1361_v24, 1.0 }
  0xbf   : > { %3406 = vst [vmem:[%s4636_s17 + $0x620] sm:$0xff] %v2382_v22  ;;  %3407 = vst [vmem:[%s4636_s17 + $0x628] sm:$0xff] %v2383_v23  ;;  %v1365_v34 = vmax.f32 %v341_v25, 0.0  ;;  %v1366_v35 = vmax.f32 %v342_v26, 0.0  ;;  %v1367_v36 = vmax.f32 %v343_v31, 0.0  ;;  %v345_v37 = vld [vmem:[%s4615_s30 + $0x678] sm:$0xff] }
  0xc0   : > { %v346_v38 = vld [vmem:[%s4615_s30 + $0x680] sm:$0xff]  ;;  %3408 = vst [vmem:[%s4636_s17 + $0x630] sm:$0xff] %v2384_v27  ;;  %v2386_v39 = vmin.f32 %v1362_v28, 1.0  ;;  %v2387_v40 = vmin.f32 %v1363_v29, 1.0  ;;  %v2388_v41 = vmin.f32 %v1364_v30, 1.0  ;;  %v1368_v42 = vmax.f32 %v344_v32, 0.0 }
  0xc1   : > { %v347_v43 = vld [vmem:[%s4615_s30 + $0x688] sm:$0xff]  ;;  %v348_v44 = vld [vmem:[%s4615_s30 + $0x690] sm:$0xff]  ;;  %3409 = vst [vmem:[%s4636_s17 + $0x638] sm:$0xff] %v2385_v33  ;;  %v2389_v45 = vmin.f32 %v1365_v34, 1.0  ;;  %v2390_v46 = vmin.f32 %v1366_v35, 1.0  ;;  %v2391_v47 = vmin.f32 %v1367_v36, 1.0 }
  0xc2   : > { %v1369_v48 = vmax.f32 %v345_v37, 0.0  ;;  %v349_v49 = vld [vmem:[%s4615_s30 + $0x698] sm:$0xff]  ;;  %v350_v50 = vld [vmem:[%s4615_s30 + $0x6a0] sm:$0xff]  ;;  %3410 = vst [vmem:[%s4636_s17 + $0x640] sm:$0xff] %v2386_v39  ;;  %3411 = vst [vmem:[%s4636_s17 + $0x648] sm:$0xff] %v2387_v40  ;;  %v2392_v51 = vmin.f32 %v1368_v42, 1.0 }
  0xc3   : > { %3412 = vst [vmem:[%s4636_s17 + $0x650] sm:$0xff] %v2388_v41  ;;  %v1370_v52 = vmax.f32 %v346_v38, 0.0  ;;  %v1371_v53 = vmax.f32 %v347_v43, 0.0  ;;  %v1372_v54 = vmax.f32 %v348_v44, 0.0  ;;  %v351_v55 = vld [vmem:[%s4615_s30 + $0x6a8] sm:$0xff]  ;;  %v352_v56 = vld [vmem:[%s4615_s30 + $0x6b0] sm:$0xff] }
  0xc4   : > { %3413 = vst [vmem:[%s4636_s17 + $0x658] sm:$0xff] %v2389_v45  ;;  %3414 = vst [vmem:[%s4636_s17 + $0x660] sm:$0xff] %v2390_v46  ;;  %v2393_v57 = vmin.f32 %v1369_v48, 1.0  ;;  %v1373_v58 = vmax.f32 %v349_v49, 0.0  ;;  %v1374_v59 = vmax.f32 %v350_v50, 0.0  ;;  %v1375_v60 = vmax.f32 %v351_v55, 0.0 }
  0xc5   : > { %3415 = vst [vmem:[%s4636_s17 + $0x668] sm:$0xff] %v2391_v47  ;;  %v353_v61 = vld [vmem:[%s4615_s30 + $0x6b8] sm:$0xff]  ;;  %v354_v62 = vld [vmem:[%s4615_s30 + $0x6c0] sm:$0xff]  ;;  %3416 = vst [vmem:[%s4636_s17 + $0x670] sm:$0xff] %v2392_v51  ;;  %v2394_v63 = vmin.f32 %v1370_v52, 1.0  ;;  %v2395_v0 = vmin.f32 %v1371_v53, 1.0 }
  0xc6   : > { %v2396_v1 = vmin.f32 %v1372_v54, 1.0  ;;  %v1376_v2 = vmax.f32 %v352_v56, 0.0  ;;  %v355_v3 = vld [vmem:[%s4615_s30 + $0x6c8] sm:$0xff]  ;;  %v356_v4 = vld [vmem:[%s4615_s30 + $0x6d0] sm:$0xff]  ;;  %3417 = vst [vmem:[%s4636_s17 + $0x678] sm:$0xff] %v2393_v57  ;;  %v2397_v5 = vmin.f32 %v1373_v58, 1.0 }
  0xc7   : > { %v2398_v6 = vmin.f32 %v1374_v59, 1.0  ;;  %v2399_v7 = vmin.f32 %v1375_v60, 1.0  ;;  %v1377_v8 = vmax.f32 %v353_v61, 0.0  ;;  %v357_v9 = vld [vmem:[%s4615_s30 + $0x6d8] sm:$0xff]  ;;  %v358_v10 = vld [vmem:[%s4615_s30 + $0x6e0] sm:$0xff]  ;;  %3418 = vst [vmem:[%s4636_s17 + $0x680] sm:$0xff] %v2394_v63 }
  0xc8   : > { %3419 = vst [vmem:[%s4636_s17 + $0x688] sm:$0xff] %v2395_v0  ;;  %3420 = vst [vmem:[%s4636_s17 + $0x690] sm:$0xff] %v2396_v1  ;;  %v2400_v11 = vmin.f32 %v1376_v2, 1.0  ;;  %v1378_v12 = vmax.f32 %v354_v62, 0.0  ;;  %v1379_v13 = vmax.f32 %v355_v3, 0.0  ;;  %v1380_v14 = vmax.f32 %v356_v4, 0.0 }
  0xc9   : > { %v359_v15 = vld [vmem:[%s4615_s30 + $0x6e8] sm:$0xff]  ;;  %v360_v16 = vld [vmem:[%s4615_s30 + $0x6f0] sm:$0xff]  ;;  %3421 = vst [vmem:[%s4636_s17 + $0x698] sm:$0xff] %v2397_v5  ;;  %3422 = vst [vmem:[%s4636_s17 + $0x6a0] sm:$0xff] %v2398_v6  ;;  %v2401_v17 = vmin.f32 %v1377_v8, 1.0  ;;  %v1381_v18 = vmax.f32 %v357_v9, 0.0 }
  0xca   : > { %3423 = vst [vmem:[%s4636_s17 + $0x6a8] sm:$0xff] %v2399_v7  ;;  %v1382_v19 = vmax.f32 %v358_v10, 0.0  ;;  %v1383_v20 = vmax.f32 %v359_v15, 0.0  ;;  %v361_v21 = vld [vmem:[%s4615_s30 + $0x6f8] sm:$0xff]  ;;  %v362_v22 = vld [vmem:[%s4615_s30 + $0x700] sm:$0xff]  ;;  %3424 = vst [vmem:[%s4636_s17 + $0x6b0] sm:$0xff] %v2400_v11 }
  0xcb   : > { %v2402_v23 = vmin.f32 %v1378_v12, 1.0  ;;  %v2403_v24 = vmin.f32 %v1379_v13, 1.0  ;;  %v2404_v25 = vmin.f32 %v1380_v14, 1.0  ;;  %v1384_v26 = vmax.f32 %v360_v16, 0.0  ;;  %v363_v27 = vld [vmem:[%s4615_s30 + $0x708] sm:$0xff]  ;;  %v364_v28 = vld [vmem:[%s4615_s30 + $0x710] sm:$0xff] }
  0xcc   : > { %3425 = vst [vmem:[%s4636_s17 + $0x6b8] sm:$0xff] %v2401_v17  ;;  %v2405_v29 = vmin.f32 %v1381_v18, 1.0  ;;  %v2406_v30 = vmin.f32 %v1382_v19, 1.0  ;;  %v2407_v31 = vmin.f32 %v1383_v20, 1.0  ;;  %v1385_v32 = vmax.f32 %v361_v21, 0.0  ;;  %v365_v33 = vld [vmem:[%s4615_s30 + $0x718] sm:$0xff] }
  0xcd   : > { %v366_v34 = vld [vmem:[%s4615_s30 + $0x720] sm:$0xff]  ;;  %3426 = vst [vmem:[%s4636_s17 + $0x6c0] sm:$0xff] %v2402_v23  ;;  %3427 = vst [vmem:[%s4636_s17 + $0x6c8] sm:$0xff] %v2403_v24  ;;  %v2408_v35 = vmin.f32 %v1384_v26, 1.0  ;;  %v1386_v36 = vmax.f32 %v362_v22, 0.0  ;;  %v1387_v37 = vmax.f32 %v363_v27, 0.0 }
  0xce   : > { %3428 = vst [vmem:[%s4636_s17 + $0x6d0] sm:$0xff] %v2404_v25  ;;  %v1388_v38 = vmax.f32 %v364_v28, 0.0  ;;  %v367_v39 = vld [vmem:[%s4615_s30 + $0x728] sm:$0xff]  ;;  %v368_v40 = vld [vmem:[%s4615_s30 + $0x730] sm:$0xff]  ;;  %3429 = vst [vmem:[%s4636_s17 + $0x6d8] sm:$0xff] %v2405_v29  ;;  %v2409_v41 = vmin.f32 %v1385_v32, 1.0 }
  0xcf   : > { %3430 = vst [vmem:[%s4636_s17 + $0x6e0] sm:$0xff] %v2406_v30  ;;  %3431 = vst [vmem:[%s4636_s17 + $0x6e8] sm:$0xff] %v2407_v31  ;;  %v1389_v42 = vmax.f32 %v365_v33, 0.0  ;;  %v1390_v43 = vmax.f32 %v366_v34, 0.0  ;;  %v1391_v44 = vmax.f32 %v367_v39, 0.0  ;;  %v369_v45 = vld [vmem:[%s4615_s30 + $0x738] sm:$0xff] }
  0xd0   : > { %v370_v46 = vld [vmem:[%s4615_s30 + $0x740] sm:$0xff]  ;;  %3432 = vst [vmem:[%s4636_s17 + $0x6f0] sm:$0xff] %v2408_v35  ;;  %v2410_v47 = vmin.f32 %v1386_v36, 1.0  ;;  %v2411_v48 = vmin.f32 %v1387_v37, 1.0  ;;  %v2412_v49 = vmin.f32 %v1388_v38, 1.0  ;;  %v1392_v50 = vmax.f32 %v368_v40, 0.0 }
  0xd1   : > { %v371_v51 = vld [vmem:[%s4615_s30 + $0x748] sm:$0xff]  ;;  %v372_v52 = vld [vmem:[%s4615_s30 + $0x750] sm:$0xff]  ;;  %3433 = vst [vmem:[%s4636_s17 + $0x6f8] sm:$0xff] %v2409_v41  ;;  %v2413_v53 = vmin.f32 %v1389_v42, 1.0  ;;  %v2414_v54 = vmin.f32 %v1390_v43, 1.0  ;;  %v2415_v55 = vmin.f32 %v1391_v44, 1.0 }
  0xd2   : > { %v1393_v56 = vmax.f32 %v369_v45, 0.0  ;;  %v373_v57 = vld [vmem:[%s4615_s30 + $0x758] sm:$0xff]  ;;  %v374_v58 = vld [vmem:[%s4615_s30 + $0x760] sm:$0xff]  ;;  %3434 = vst [vmem:[%s4636_s17 + $0x700] sm:$0xff] %v2410_v47  ;;  %3435 = vst [vmem:[%s4636_s17 + $0x708] sm:$0xff] %v2411_v48  ;;  %v2416_v59 = vmin.f32 %v1392_v50, 1.0 }
  0xd3   : > { %3436 = vst [vmem:[%s4636_s17 + $0x710] sm:$0xff] %v2412_v49  ;;  %v1394_v60 = vmax.f32 %v370_v46, 0.0  ;;  %v1395_v61 = vmax.f32 %v371_v51, 0.0  ;;  %v1396_v62 = vmax.f32 %v372_v52, 0.0  ;;  %v375_v63 = vld [vmem:[%s4615_s30 + $0x768] sm:$0xff]  ;;  %v376_v0 = vld [vmem:[%s4615_s30 + $0x770] sm:$0xff] }
  0xd4   : > { %3437 = vst [vmem:[%s4636_s17 + $0x718] sm:$0xff] %v2413_v53  ;;  %3438 = vst [vmem:[%s4636_s17 + $0x720] sm:$0xff] %v2414_v54  ;;  %v2417_v1 = vmin.f32 %v1393_v56, 1.0  ;;  %v1397_v2 = vmax.f32 %v373_v57, 0.0  ;;  %v1398_v3 = vmax.f32 %v374_v58, 0.0  ;;  %v1399_v4 = vmax.f32 %v375_v63, 0.0 }
  0xd5   : > { %3439 = vst [vmem:[%s4636_s17 + $0x728] sm:$0xff] %v2415_v55  ;;  %v377_v5 = vld [vmem:[%s4615_s30 + $0x778] sm:$0xff]  ;;  %v378_v6 = vld [vmem:[%s4615_s30 + $0x780] sm:$0xff]  ;;  %3440 = vst [vmem:[%s4636_s17 + $0x730] sm:$0xff] %v2416_v59  ;;  %v2418_v7 = vmin.f32 %v1394_v60, 1.0  ;;  %v2419_v8 = vmin.f32 %v1395_v61, 1.0 }
  0xd6   : > { %v2420_v9 = vmin.f32 %v1396_v62, 1.0  ;;  %v1400_v10 = vmax.f32 %v376_v0, 0.0  ;;  %v379_v11 = vld [vmem:[%s4615_s30 + $0x788] sm:$0xff]  ;;  %v380_v12 = vld [vmem:[%s4615_s30 + $0x790] sm:$0xff]  ;;  %3441 = vst [vmem:[%s4636_s17 + $0x738] sm:$0xff] %v2417_v1  ;;  %v2421_v13 = vmin.f32 %v1397_v2, 1.0 }
  0xd7   : > { %v2422_v14 = vmin.f32 %v1398_v3, 1.0  ;;  %v2423_v15 = vmin.f32 %v1399_v4, 1.0  ;;  %v1401_v16 = vmax.f32 %v377_v5, 0.0  ;;  %v381_v17 = vld [vmem:[%s4615_s30 + $0x798] sm:$0xff]  ;;  %v382_v18 = vld [vmem:[%s4615_s30 + $0x7a0] sm:$0xff]  ;;  %3442 = vst [vmem:[%s4636_s17 + $0x740] sm:$0xff] %v2418_v7 }
  0xd8   : > { %3443 = vst [vmem:[%s4636_s17 + $0x748] sm:$0xff] %v2419_v8  ;;  %3444 = vst [vmem:[%s4636_s17 + $0x750] sm:$0xff] %v2420_v9  ;;  %v2424_v19 = vmin.f32 %v1400_v10, 1.0  ;;  %v1402_v20 = vmax.f32 %v378_v6, 0.0  ;;  %v1403_v21 = vmax.f32 %v379_v11, 0.0  ;;  %v1404_v22 = vmax.f32 %v380_v12, 0.0 }
  0xd9   : > { %v383_v23 = vld [vmem:[%s4615_s30 + $0x7a8] sm:$0xff]  ;;  %v384_v24 = vld [vmem:[%s4615_s30 + $0x7b0] sm:$0xff]  ;;  %3445 = vst [vmem:[%s4636_s17 + $0x758] sm:$0xff] %v2421_v13  ;;  %3446 = vst [vmem:[%s4636_s17 + $0x760] sm:$0xff] %v2422_v14  ;;  %v2425_v25 = vmin.f32 %v1401_v16, 1.0  ;;  %v1405_v26 = vmax.f32 %v381_v17, 0.0 }
  0xda   : > { %3447 = vst [vmem:[%s4636_s17 + $0x768] sm:$0xff] %v2423_v15  ;;  %v1406_v27 = vmax.f32 %v382_v18, 0.0  ;;  %v1407_v28 = vmax.f32 %v383_v23, 0.0  ;;  %v385_v29 = vld [vmem:[%s4615_s30 + $0x7b8] sm:$0xff]  ;;  %v386_v30 = vld [vmem:[%s4615_s30 + $0x7c0] sm:$0xff]  ;;  %3448 = vst [vmem:[%s4636_s17 + $0x770] sm:$0xff] %v2424_v19 }
  0xdb   : > { %v2426_v31 = vmin.f32 %v1402_v20, 1.0  ;;  %v2427_v32 = vmin.f32 %v1403_v21, 1.0  ;;  %v2428_v33 = vmin.f32 %v1404_v22, 1.0  ;;  %v1408_v34 = vmax.f32 %v384_v24, 0.0  ;;  %v387_v35 = vld [vmem:[%s4615_s30 + $0x7c8] sm:$0xff]  ;;  %v388_v36 = vld [vmem:[%s4615_s30 + $0x7d0] sm:$0xff] }
  0xdc   : > { %3449 = vst [vmem:[%s4636_s17 + $0x778] sm:$0xff] %v2425_v25  ;;  %v2429_v37 = vmin.f32 %v1405_v26, 1.0  ;;  %v2430_v38 = vmin.f32 %v1406_v27, 1.0  ;;  %v2431_v39 = vmin.f32 %v1407_v28, 1.0  ;;  %v1409_v40 = vmax.f32 %v385_v29, 0.0  ;;  %v389_v41 = vld [vmem:[%s4615_s30 + $0x7d8] sm:$0xff] }
  0xdd   : > { %v390_v42 = vld [vmem:[%s4615_s30 + $0x7e0] sm:$0xff]  ;;  %3450 = vst [vmem:[%s4636_s17 + $0x780] sm:$0xff] %v2426_v31  ;;  %3451 = vst [vmem:[%s4636_s17 + $0x788] sm:$0xff] %v2427_v32  ;;  %v2432_v43 = vmin.f32 %v1408_v34, 1.0  ;;  %v1410_v44 = vmax.f32 %v386_v30, 0.0  ;;  %v1411_v45 = vmax.f32 %v387_v35, 0.0 }
  0xde   : > { %3452 = vst [vmem:[%s4636_s17 + $0x790] sm:$0xff] %v2428_v33  ;;  %v1412_v46 = vmax.f32 %v388_v36, 0.0  ;;  %v391_v47 = vld [vmem:[%s4615_s30 + $0x7e8] sm:$0xff]  ;;  %v392_v48 = vld [vmem:[%s4615_s30 + $0x7f0] sm:$0xff]  ;;  %3453 = vst [vmem:[%s4636_s17 + $0x798] sm:$0xff] %v2429_v37  ;;  %v2433_v49 = vmin.f32 %v1409_v40, 1.0 }
  0xdf   : > { %3454 = vst [vmem:[%s4636_s17 + $0x7a0] sm:$0xff] %v2430_v38  ;;  %3455 = vst [vmem:[%s4636_s17 + $0x7a8] sm:$0xff] %v2431_v39  ;;  %v1413_v50 = vmax.f32 %v389_v41, 0.0  ;;  %v1414_v51 = vmax.f32 %v390_v42, 0.0  ;;  %v1415_v52 = vmax.f32 %v391_v47, 0.0  ;;  %v393_v53 = vld [vmem:[%s4615_s30 + $0x7f8] sm:$0xff] }
  0xe0   : > { %v394_v54 = vld [vmem:[%s4615_s30 + $0x800] sm:$0xff]  ;;  %3456 = vst [vmem:[%s4636_s17 + $0x7b0] sm:$0xff] %v2432_v43  ;;  %v2434_v55 = vmin.f32 %v1410_v44, 1.0  ;;  %v2435_v56 = vmin.f32 %v1411_v45, 1.0  ;;  %v2436_v57 = vmin.f32 %v1412_v46, 1.0  ;;  %v1416_v58 = vmax.f32 %v392_v48, 0.0 }
  0xe1   : > { %v395_v59 = vld [vmem:[%s4615_s30 + $0x808] sm:$0xff]  ;;  %v396_v60 = vld [vmem:[%s4615_s30 + $0x810] sm:$0xff]  ;;  %3457 = vst [vmem:[%s4636_s17 + $0x7b8] sm:$0xff] %v2433_v49  ;;  %v2437_v61 = vmin.f32 %v1413_v50, 1.0  ;;  %v2438_v62 = vmin.f32 %v1414_v51, 1.0  ;;  %v2439_v63 = vmin.f32 %v1415_v52, 1.0 }
  0xe2   : > { %v1417_v0 = vmax.f32 %v393_v53, 0.0  ;;  %v397_v1 = vld [vmem:[%s4615_s30 + $0x818] sm:$0xff]  ;;  %v398_v2 = vld [vmem:[%s4615_s30 + $0x820] sm:$0xff]  ;;  %3458 = vst [vmem:[%s4636_s17 + $0x7c0] sm:$0xff] %v2434_v55  ;;  %3459 = vst [vmem:[%s4636_s17 + $0x7c8] sm:$0xff] %v2435_v56  ;;  %v2440_v3 = vmin.f32 %v1416_v58, 1.0 }
  0xe3   : > { %3460 = vst [vmem:[%s4636_s17 + $0x7d0] sm:$0xff] %v2436_v57  ;;  %v1418_v4 = vmax.f32 %v394_v54, 0.0  ;;  %v1419_v5 = vmax.f32 %v395_v59, 0.0  ;;  %v1420_v6 = vmax.f32 %v396_v60, 0.0  ;;  %v399_v7 = vld [vmem:[%s4615_s30 + $0x828] sm:$0xff]  ;;  %v400_v8 = vld [vmem:[%s4615_s30 + $0x830] sm:$0xff] }
  0xe4   : > { %3461 = vst [vmem:[%s4636_s17 + $0x7d8] sm:$0xff] %v2437_v61  ;;  %3462 = vst [vmem:[%s4636_s17 + $0x7e0] sm:$0xff] %v2438_v62  ;;  %v2441_v9 = vmin.f32 %v1417_v0, 1.0  ;;  %v1421_v10 = vmax.f32 %v397_v1, 0.0  ;;  %v1422_v11 = vmax.f32 %v398_v2, 0.0  ;;  %v1423_v12 = vmax.f32 %v399_v7, 0.0 }
  0xe5   : > { %3463 = vst [vmem:[%s4636_s17 + $0x7e8] sm:$0xff] %v2439_v63  ;;  %v401_v13 = vld [vmem:[%s4615_s30 + $0x838] sm:$0xff]  ;;  %v402_v14 = vld [vmem:[%s4615_s30 + $0x840] sm:$0xff]  ;;  %3464 = vst [vmem:[%s4636_s17 + $0x7f0] sm:$0xff] %v2440_v3  ;;  %v2442_v15 = vmin.f32 %v1418_v4, 1.0  ;;  %v2443_v16 = vmin.f32 %v1419_v5, 1.0 }
  0xe6   : > { %v2444_v17 = vmin.f32 %v1420_v6, 1.0  ;;  %v1424_v18 = vmax.f32 %v400_v8, 0.0  ;;  %v403_v19 = vld [vmem:[%s4615_s30 + $0x848] sm:$0xff]  ;;  %v404_v20 = vld [vmem:[%s4615_s30 + $0x850] sm:$0xff]  ;;  %3465 = vst [vmem:[%s4636_s17 + $0x7f8] sm:$0xff] %v2441_v9  ;;  %v2445_v21 = vmin.f32 %v1421_v10, 1.0 }
  0xe7   : > { %v2446_v22 = vmin.f32 %v1422_v11, 1.0  ;;  %v2447_v23 = vmin.f32 %v1423_v12, 1.0  ;;  %v1425_v24 = vmax.f32 %v401_v13, 0.0  ;;  %v405_v25 = vld [vmem:[%s4615_s30 + $0x858] sm:$0xff]  ;;  %v406_v26 = vld [vmem:[%s4615_s30 + $0x860] sm:$0xff]  ;;  %3466 = vst [vmem:[%s4636_s17 + $0x800] sm:$0xff] %v2442_v15 }
  0xe8   : > { %3467 = vst [vmem:[%s4636_s17 + $0x808] sm:$0xff] %v2443_v16  ;;  %3468 = vst [vmem:[%s4636_s17 + $0x810] sm:$0xff] %v2444_v17  ;;  %v2448_v27 = vmin.f32 %v1424_v18, 1.0  ;;  %v1426_v28 = vmax.f32 %v402_v14, 0.0  ;;  %v1427_v29 = vmax.f32 %v403_v19, 0.0  ;;  %v1428_v30 = vmax.f32 %v404_v20, 0.0 }
  0xe9   : > { %v407_v31 = vld [vmem:[%s4615_s30 + $0x868] sm:$0xff]  ;;  %v408_v32 = vld [vmem:[%s4615_s30 + $0x870] sm:$0xff]  ;;  %3469 = vst [vmem:[%s4636_s17 + $0x818] sm:$0xff] %v2445_v21  ;;  %3470 = vst [vmem:[%s4636_s17 + $0x820] sm:$0xff] %v2446_v22  ;;  %v2449_v33 = vmin.f32 %v1425_v24, 1.0  ;;  %v1429_v34 = vmax.f32 %v405_v25, 0.0 }
  0xea   : > { %3471 = vst [vmem:[%s4636_s17 + $0x828] sm:$0xff] %v2447_v23  ;;  %v1430_v35 = vmax.f32 %v406_v26, 0.0  ;;  %v1431_v36 = vmax.f32 %v407_v31, 0.0  ;;  %v409_v37 = vld [vmem:[%s4615_s30 + $0x878] sm:$0xff]  ;;  %v410_v38 = vld [vmem:[%s4615_s30 + $0x880] sm:$0xff]  ;;  %3472 = vst [vmem:[%s4636_s17 + $0x830] sm:$0xff] %v2448_v27 }
  0xeb   : > { %v2450_v39 = vmin.f32 %v1426_v28, 1.0  ;;  %v2451_v40 = vmin.f32 %v1427_v29, 1.0  ;;  %v2452_v41 = vmin.f32 %v1428_v30, 1.0  ;;  %v1432_v42 = vmax.f32 %v408_v32, 0.0  ;;  %v411_v43 = vld [vmem:[%s4615_s30 + $0x888] sm:$0xff]  ;;  %v412_v44 = vld [vmem:[%s4615_s30 + $0x890] sm:$0xff] }
  0xec   : > { %3473 = vst [vmem:[%s4636_s17 + $0x838] sm:$0xff] %v2449_v33  ;;  %v2453_v45 = vmin.f32 %v1429_v34, 1.0  ;;  %v2454_v46 = vmin.f32 %v1430_v35, 1.0  ;;  %v2455_v47 = vmin.f32 %v1431_v36, 1.0  ;;  %v1433_v48 = vmax.f32 %v409_v37, 0.0  ;;  %v413_v49 = vld [vmem:[%s4615_s30 + $0x898] sm:$0xff] }
  0xed   : > { %v414_v50 = vld [vmem:[%s4615_s30 + $0x8a0] sm:$0xff]  ;;  %3474 = vst [vmem:[%s4636_s17 + $0x840] sm:$0xff] %v2450_v39  ;;  %3475 = vst [vmem:[%s4636_s17 + $0x848] sm:$0xff] %v2451_v40  ;;  %v2456_v51 = vmin.f32 %v1432_v42, 1.0  ;;  %v1434_v52 = vmax.f32 %v410_v38, 0.0  ;;  %v1435_v53 = vmax.f32 %v411_v43, 0.0 }
  0xee   : > { %3476 = vst [vmem:[%s4636_s17 + $0x850] sm:$0xff] %v2452_v41  ;;  %v1436_v54 = vmax.f32 %v412_v44, 0.0  ;;  %v415_v55 = vld [vmem:[%s4615_s30 + $0x8a8] sm:$0xff]  ;;  %v416_v56 = vld [vmem:[%s4615_s30 + $0x8b0] sm:$0xff]  ;;  %3477 = vst [vmem:[%s4636_s17 + $0x858] sm:$0xff] %v2453_v45  ;;  %v2457_v57 = vmin.f32 %v1433_v48, 1.0 }
  0xef   : > { %3478 = vst [vmem:[%s4636_s17 + $0x860] sm:$0xff] %v2454_v46  ;;  %3479 = vst [vmem:[%s4636_s17 + $0x868] sm:$0xff] %v2455_v47  ;;  %v1437_v58 = vmax.f32 %v413_v49, 0.0  ;;  %v1438_v59 = vmax.f32 %v414_v50, 0.0  ;;  %v1439_v60 = vmax.f32 %v415_v55, 0.0  ;;  %v417_v61 = vld [vmem:[%s4615_s30 + $0x8b8] sm:$0xff] }
  0xf0   : > { %v418_v62 = vld [vmem:[%s4615_s30 + $0x8c0] sm:$0xff]  ;;  %3480 = vst [vmem:[%s4636_s17 + $0x870] sm:$0xff] %v2456_v51  ;;  %v2458_v63 = vmin.f32 %v1434_v52, 1.0  ;;  %v2459_v0 = vmin.f32 %v1435_v53, 1.0  ;;  %v2460_v1 = vmin.f32 %v1436_v54, 1.0  ;;  %v1440_v2 = vmax.f32 %v416_v56, 0.0 }
  0xf1   : > { %v419_v3 = vld [vmem:[%s4615_s30 + $0x8c8] sm:$0xff]  ;;  %v420_v4 = vld [vmem:[%s4615_s30 + $0x8d0] sm:$0xff]  ;;  %3481 = vst [vmem:[%s4636_s17 + $0x878] sm:$0xff] %v2457_v57  ;;  %v2461_v5 = vmin.f32 %v1437_v58, 1.0  ;;  %v2462_v6 = vmin.f32 %v1438_v59, 1.0  ;;  %v2463_v7 = vmin.f32 %v1439_v60, 1.0 }
  0xf2   : > { %v1441_v8 = vmax.f32 %v417_v61, 0.0  ;;  %v421_v9 = vld [vmem:[%s4615_s30 + $0x8d8] sm:$0xff]  ;;  %v422_v10 = vld [vmem:[%s4615_s30 + $0x8e0] sm:$0xff]  ;;  %3482 = vst [vmem:[%s4636_s17 + $0x880] sm:$0xff] %v2458_v63  ;;  %3483 = vst [vmem:[%s4636_s17 + $0x888] sm:$0xff] %v2459_v0  ;;  %v2464_v11 = vmin.f32 %v1440_v2, 1.0 }
  0xf3   : > { %3484 = vst [vmem:[%s4636_s17 + $0x890] sm:$0xff] %v2460_v1  ;;  %v1442_v12 = vmax.f32 %v418_v62, 0.0  ;;  %v1443_v13 = vmax.f32 %v419_v3, 0.0  ;;  %v1444_v14 = vmax.f32 %v420_v4, 0.0  ;;  %v423_v15 = vld [vmem:[%s4615_s30 + $0x8e8] sm:$0xff]  ;;  %v424_v16 = vld [vmem:[%s4615_s30 + $0x8f0] sm:$0xff] }
  0xf4   : > { %3485 = vst [vmem:[%s4636_s17 + $0x898] sm:$0xff] %v2461_v5  ;;  %3486 = vst [vmem:[%s4636_s17 + $0x8a0] sm:$0xff] %v2462_v6  ;;  %v2465_v17 = vmin.f32 %v1441_v8, 1.0  ;;  %v1445_v18 = vmax.f32 %v421_v9, 0.0  ;;  %v1446_v19 = vmax.f32 %v422_v10, 0.0  ;;  %v1447_v20 = vmax.f32 %v423_v15, 0.0 }
  0xf5   : > { %3487 = vst [vmem:[%s4636_s17 + $0x8a8] sm:$0xff] %v2463_v7  ;;  %v425_v21 = vld [vmem:[%s4615_s30 + $0x8f8] sm:$0xff]  ;;  %v426_v22 = vld [vmem:[%s4615_s30 + $0x900] sm:$0xff]  ;;  %3488 = vst [vmem:[%s4636_s17 + $0x8b0] sm:$0xff] %v2464_v11  ;;  %v2466_v23 = vmin.f32 %v1442_v12, 1.0  ;;  %v2467_v24 = vmin.f32 %v1443_v13, 1.0 }
  0xf6   : > { %v2468_v25 = vmin.f32 %v1444_v14, 1.0  ;;  %v1448_v26 = vmax.f32 %v424_v16, 0.0  ;;  %v427_v27 = vld [vmem:[%s4615_s30 + $0x908] sm:$0xff]  ;;  %v428_v28 = vld [vmem:[%s4615_s30 + $0x910] sm:$0xff]  ;;  %3489 = vst [vmem:[%s4636_s17 + $0x8b8] sm:$0xff] %v2465_v17  ;;  %v2469_v29 = vmin.f32 %v1445_v18, 1.0 }
  0xf7   : > { %v2470_v30 = vmin.f32 %v1446_v19, 1.0  ;;  %v2471_v31 = vmin.f32 %v1447_v20, 1.0  ;;  %v1449_v32 = vmax.f32 %v425_v21, 0.0  ;;  %v429_v33 = vld [vmem:[%s4615_s30 + $0x918] sm:$0xff]  ;;  %v430_v34 = vld [vmem:[%s4615_s30 + $0x920] sm:$0xff]  ;;  %3490 = vst [vmem:[%s4636_s17 + $0x8c0] sm:$0xff] %v2466_v23 }
  0xf8   : > { %3491 = vst [vmem:[%s4636_s17 + $0x8c8] sm:$0xff] %v2467_v24  ;;  %3492 = vst [vmem:[%s4636_s17 + $0x8d0] sm:$0xff] %v2468_v25  ;;  %v2472_v35 = vmin.f32 %v1448_v26, 1.0  ;;  %v1450_v36 = vmax.f32 %v426_v22, 0.0  ;;  %v1451_v37 = vmax.f32 %v427_v27, 0.0  ;;  %v1452_v38 = vmax.f32 %v428_v28, 0.0 }
  0xf9   : > { %v431_v39 = vld [vmem:[%s4615_s30 + $0x928] sm:$0xff]  ;;  %v432_v40 = vld [vmem:[%s4615_s30 + $0x930] sm:$0xff]  ;;  %3493 = vst [vmem:[%s4636_s17 + $0x8d8] sm:$0xff] %v2469_v29  ;;  %3494 = vst [vmem:[%s4636_s17 + $0x8e0] sm:$0xff] %v2470_v30  ;;  %v2473_v41 = vmin.f32 %v1449_v32, 1.0  ;;  %v1453_v42 = vmax.f32 %v429_v33, 0.0 }
  0xfa   : > { %3495 = vst [vmem:[%s4636_s17 + $0x8e8] sm:$0xff] %v2471_v31  ;;  %v1454_v43 = vmax.f32 %v430_v34, 0.0  ;;  %v1455_v44 = vmax.f32 %v431_v39, 0.0  ;;  %v433_v45 = vld [vmem:[%s4615_s30 + $0x938] sm:$0xff]  ;;  %v434_v46 = vld [vmem:[%s4615_s30 + $0x940] sm:$0xff]  ;;  %3496 = vst [vmem:[%s4636_s17 + $0x8f0] sm:$0xff] %v2472_v35 }
  0xfb   : > { %v2474_v47 = vmin.f32 %v1450_v36, 1.0  ;;  %v2475_v48 = vmin.f32 %v1451_v37, 1.0  ;;  %v2476_v49 = vmin.f32 %v1452_v38, 1.0  ;;  %v1456_v50 = vmax.f32 %v432_v40, 0.0  ;;  %v435_v51 = vld [vmem:[%s4615_s30 + $0x948] sm:$0xff]  ;;  %v436_v52 = vld [vmem:[%s4615_s30 + $0x950] sm:$0xff] }
  0xfc   : > { %3497 = vst [vmem:[%s4636_s17 + $0x8f8] sm:$0xff] %v2473_v41  ;;  %v2477_v53 = vmin.f32 %v1453_v42, 1.0  ;;  %v2478_v54 = vmin.f32 %v1454_v43, 1.0  ;;  %v2479_v55 = vmin.f32 %v1455_v44, 1.0  ;;  %v1457_v56 = vmax.f32 %v433_v45, 0.0  ;;  %v437_v57 = vld [vmem:[%s4615_s30 + $0x958] sm:$0xff] }
  0xfd   : > { %v438_v58 = vld [vmem:[%s4615_s30 + $0x960] sm:$0xff]  ;;  %3498 = vst [vmem:[%s4636_s17 + $0x900] sm:$0xff] %v2474_v47  ;;  %3499 = vst [vmem:[%s4636_s17 + $0x908] sm:$0xff] %v2475_v48  ;;  %v2480_v59 = vmin.f32 %v1456_v50, 1.0  ;;  %v1458_v60 = vmax.f32 %v434_v46, 0.0  ;;  %v1459_v61 = vmax.f32 %v435_v51, 0.0 }
  0xfe   : > { %3500 = vst [vmem:[%s4636_s17 + $0x910] sm:$0xff] %v2476_v49  ;;  %v1460_v62 = vmax.f32 %v436_v52, 0.0  ;;  %v439_v63 = vld [vmem:[%s4615_s30 + $0x968] sm:$0xff]  ;;  %v440_v0 = vld [vmem:[%s4615_s30 + $0x970] sm:$0xff]  ;;  %3501 = vst [vmem:[%s4636_s17 + $0x918] sm:$0xff] %v2477_v53  ;;  %v2481_v1 = vmin.f32 %v1457_v56, 1.0 }
  0xff   : > { %3502 = vst [vmem:[%s4636_s17 + $0x920] sm:$0xff] %v2478_v54  ;;  %3503 = vst [vmem:[%s4636_s17 + $0x928] sm:$0xff] %v2479_v55  ;;  %v1461_v2 = vmax.f32 %v437_v57, 0.0  ;;  %v1462_v3 = vmax.f32 %v438_v58, 0.0  ;;  %v1463_v4 = vmax.f32 %v439_v63, 0.0  ;;  %v441_v5 = vld [vmem:[%s4615_s30 + $0x978] sm:$0xff] }
 0x100   : > { %v442_v6 = vld [vmem:[%s4615_s30 + $0x980] sm:$0xff]  ;;  %3504 = vst [vmem:[%s4636_s17 + $0x930] sm:$0xff] %v2480_v59  ;;  %v2482_v7 = vmin.f32 %v1458_v60, 1.0  ;;  %v2483_v8 = vmin.f32 %v1459_v61, 1.0  ;;  %v2484_v9 = vmin.f32 %v1460_v62, 1.0  ;;  %v1464_v10 = vmax.f32 %v440_v0, 0.0 }
 0x101   : > { %v443_v11 = vld [vmem:[%s4615_s30 + $0x988] sm:$0xff]  ;;  %v444_v12 = vld [vmem:[%s4615_s30 + $0x990] sm:$0xff]  ;;  %3505 = vst [vmem:[%s4636_s17 + $0x938] sm:$0xff] %v2481_v1  ;;  %v2485_v13 = vmin.f32 %v1461_v2, 1.0  ;;  %v2486_v14 = vmin.f32 %v1462_v3, 1.0  ;;  %v2487_v15 = vmin.f32 %v1463_v4, 1.0 }
 0x102   : > { %v1465_v16 = vmax.f32 %v441_v5, 0.0  ;;  %v445_v17 = vld [vmem:[%s4615_s30 + $0x998] sm:$0xff]  ;;  %v446_v18 = vld [vmem:[%s4615_s30 + $0x9a0] sm:$0xff]  ;;  %3506 = vst [vmem:[%s4636_s17 + $0x940] sm:$0xff] %v2482_v7  ;;  %3507 = vst [vmem:[%s4636_s17 + $0x948] sm:$0xff] %v2483_v8  ;;  %v2488_v19 = vmin.f32 %v1464_v10, 1.0 }
 0x103   : > { %3508 = vst [vmem:[%s4636_s17 + $0x950] sm:$0xff] %v2484_v9  ;;  %v1466_v20 = vmax.f32 %v442_v6, 0.0  ;;  %v1467_v21 = vmax.f32 %v443_v11, 0.0  ;;  %v1468_v22 = vmax.f32 %v444_v12, 0.0  ;;  %v447_v23 = vld [vmem:[%s4615_s30 + $0x9a8] sm:$0xff]  ;;  %v448_v24 = vld [vmem:[%s4615_s30 + $0x9b0] sm:$0xff] }
 0x104   : > { %3509 = vst [vmem:[%s4636_s17 + $0x958] sm:$0xff] %v2485_v13  ;;  %3510 = vst [vmem:[%s4636_s17 + $0x960] sm:$0xff] %v2486_v14  ;;  %v2489_v25 = vmin.f32 %v1465_v16, 1.0  ;;  %v1469_v26 = vmax.f32 %v445_v17, 0.0  ;;  %v1470_v27 = vmax.f32 %v446_v18, 0.0  ;;  %v1471_v28 = vmax.f32 %v447_v23, 0.0 }
 0x105   : > { %3511 = vst [vmem:[%s4636_s17 + $0x968] sm:$0xff] %v2487_v15  ;;  %v449_v29 = vld [vmem:[%s4615_s30 + $0x9b8] sm:$0xff]  ;;  %v450_v30 = vld [vmem:[%s4615_s30 + $0x9c0] sm:$0xff]  ;;  %3512 = vst [vmem:[%s4636_s17 + $0x970] sm:$0xff] %v2488_v19  ;;  %v2490_v31 = vmin.f32 %v1466_v20, 1.0  ;;  %v2491_v32 = vmin.f32 %v1467_v21, 1.0 }
 0x106   : > { %v2492_v33 = vmin.f32 %v1468_v22, 1.0  ;;  %v1472_v34 = vmax.f32 %v448_v24, 0.0  ;;  %v451_v35 = vld [vmem:[%s4615_s30 + $0x9c8] sm:$0xff]  ;;  %v452_v36 = vld [vmem:[%s4615_s30 + $0x9d0] sm:$0xff]  ;;  %3513 = vst [vmem:[%s4636_s17 + $0x978] sm:$0xff] %v2489_v25  ;;  %v2493_v37 = vmin.f32 %v1469_v26, 1.0 }
 0x107   : > { %v2494_v38 = vmin.f32 %v1470_v27, 1.0  ;;  %v2495_v39 = vmin.f32 %v1471_v28, 1.0  ;;  %v1473_v40 = vmax.f32 %v449_v29, 0.0  ;;  %v453_v41 = vld [vmem:[%s4615_s30 + $0x9d8] sm:$0xff]  ;;  %v454_v42 = vld [vmem:[%s4615_s30 + $0x9e0] sm:$0xff]  ;;  %3514 = vst [vmem:[%s4636_s17 + $0x980] sm:$0xff] %v2490_v31 }
 0x108   : > { %3515 = vst [vmem:[%s4636_s17 + $0x988] sm:$0xff] %v2491_v32  ;;  %3516 = vst [vmem:[%s4636_s17 + $0x990] sm:$0xff] %v2492_v33  ;;  %v2496_v43 = vmin.f32 %v1472_v34, 1.0  ;;  %v1474_v44 = vmax.f32 %v450_v30, 0.0  ;;  %v1475_v45 = vmax.f32 %v451_v35, 0.0  ;;  %v1476_v46 = vmax.f32 %v452_v36, 0.0 }
 0x109   : > { %v455_v47 = vld [vmem:[%s4615_s30 + $0x9e8] sm:$0xff]  ;;  %v456_v48 = vld [vmem:[%s4615_s30 + $0x9f0] sm:$0xff]  ;;  %3517 = vst [vmem:[%s4636_s17 + $0x998] sm:$0xff] %v2493_v37  ;;  %3518 = vst [vmem:[%s4636_s17 + $0x9a0] sm:$0xff] %v2494_v38  ;;  %v2497_v49 = vmin.f32 %v1473_v40, 1.0  ;;  %v1477_v50 = vmax.f32 %v453_v41, 0.0 }
 0x10a   : > { %3519 = vst [vmem:[%s4636_s17 + $0x9a8] sm:$0xff] %v2495_v39  ;;  %v1478_v51 = vmax.f32 %v454_v42, 0.0  ;;  %v1479_v52 = vmax.f32 %v455_v47, 0.0  ;;  %v457_v53 = vld [vmem:[%s4615_s30 + $0x9f8] sm:$0xff]  ;;  %v458_v54 = vld [vmem:[%s4615_s30 + $0xa00] sm:$0xff]  ;;  %3520 = vst [vmem:[%s4636_s17 + $0x9b0] sm:$0xff] %v2496_v43 }
 0x10b   : > { %v2498_v55 = vmin.f32 %v1474_v44, 1.0  ;;  %v2499_v56 = vmin.f32 %v1475_v45, 1.0  ;;  %v2500_v57 = vmin.f32 %v1476_v46, 1.0  ;;  %v1480_v58 = vmax.f32 %v456_v48, 0.0  ;;  %v459_v59 = vld [vmem:[%s4615_s30 + $0xa08] sm:$0xff]  ;;  %v460_v60 = vld [vmem:[%s4615_s30 + $0xa10] sm:$0xff] }
 0x10c   : > { %3521 = vst [vmem:[%s4636_s17 + $0x9b8] sm:$0xff] %v2497_v49  ;;  %v2501_v61 = vmin.f32 %v1477_v50, 1.0  ;;  %v2502_v62 = vmin.f32 %v1478_v51, 1.0  ;;  %v2503_v63 = vmin.f32 %v1479_v52, 1.0  ;;  %v1481_v0 = vmax.f32 %v457_v53, 0.0  ;;  %v461_v1 = vld [vmem:[%s4615_s30 + $0xa18] sm:$0xff] }
 0x10d   : > { %v462_v2 = vld [vmem:[%s4615_s30 + $0xa20] sm:$0xff]  ;;  %3522 = vst [vmem:[%s4636_s17 + $0x9c0] sm:$0xff] %v2498_v55  ;;  %3523 = vst [vmem:[%s4636_s17 + $0x9c8] sm:$0xff] %v2499_v56  ;;  %v2504_v3 = vmin.f32 %v1480_v58, 1.0  ;;  %v1482_v4 = vmax.f32 %v458_v54, 0.0  ;;  %v1483_v5 = vmax.f32 %v459_v59, 0.0 }
 0x10e   : > { %3524 = vst [vmem:[%s4636_s17 + $0x9d0] sm:$0xff] %v2500_v57  ;;  %v1484_v6 = vmax.f32 %v460_v60, 0.0  ;;  %v463_v7 = vld [vmem:[%s4615_s30 + $0xa28] sm:$0xff]  ;;  %v464_v8 = vld [vmem:[%s4615_s30 + $0xa30] sm:$0xff]  ;;  %3525 = vst [vmem:[%s4636_s17 + $0x9d8] sm:$0xff] %v2501_v61  ;;  %v2505_v9 = vmin.f32 %v1481_v0, 1.0 }
 0x10f   : > { %3526 = vst [vmem:[%s4636_s17 + $0x9e0] sm:$0xff] %v2502_v62  ;;  %3527 = vst [vmem:[%s4636_s17 + $0x9e8] sm:$0xff] %v2503_v63  ;;  %v1485_v10 = vmax.f32 %v461_v1, 0.0  ;;  %v1486_v11 = vmax.f32 %v462_v2, 0.0  ;;  %v1487_v12 = vmax.f32 %v463_v7, 0.0  ;;  %v465_v13 = vld [vmem:[%s4615_s30 + $0xa38] sm:$0xff] }
 0x110   : > { %v466_v14 = vld [vmem:[%s4615_s30 + $0xa40] sm:$0xff]  ;;  %3528 = vst [vmem:[%s4636_s17 + $0x9f0] sm:$0xff] %v2504_v3  ;;  %v2506_v15 = vmin.f32 %v1482_v4, 1.0  ;;  %v2507_v16 = vmin.f32 %v1483_v5, 1.0  ;;  %v2508_v17 = vmin.f32 %v1484_v6, 1.0  ;;  %v1488_v18 = vmax.f32 %v464_v8, 0.0 }
 0x111   : > { %v467_v19 = vld [vmem:[%s4615_s30 + $0xa48] sm:$0xff]  ;;  %v468_v20 = vld [vmem:[%s4615_s30 + $0xa50] sm:$0xff]  ;;  %3529 = vst [vmem:[%s4636_s17 + $0x9f8] sm:$0xff] %v2505_v9  ;;  %v2509_v21 = vmin.f32 %v1485_v10, 1.0  ;;  %v2510_v22 = vmin.f32 %v1486_v11, 1.0  ;;  %v2511_v23 = vmin.f32 %v1487_v12, 1.0 }
 0x112   : > { %v1489_v24 = vmax.f32 %v465_v13, 0.0  ;;  %v469_v25 = vld [vmem:[%s4615_s30 + $0xa58] sm:$0xff]  ;;  %v470_v26 = vld [vmem:[%s4615_s30 + $0xa60] sm:$0xff]  ;;  %3530 = vst [vmem:[%s4636_s17 + $0xa00] sm:$0xff] %v2506_v15  ;;  %3531 = vst [vmem:[%s4636_s17 + $0xa08] sm:$0xff] %v2507_v16  ;;  %v2512_v27 = vmin.f32 %v1488_v18, 1.0 }
 0x113   : > { %3532 = vst [vmem:[%s4636_s17 + $0xa10] sm:$0xff] %v2508_v17  ;;  %v1490_v28 = vmax.f32 %v466_v14, 0.0  ;;  %v1491_v29 = vmax.f32 %v467_v19, 0.0  ;;  %v1492_v30 = vmax.f32 %v468_v20, 0.0  ;;  %v471_v31 = vld [vmem:[%s4615_s30 + $0xa68] sm:$0xff]  ;;  %v472_v32 = vld [vmem:[%s4615_s30 + $0xa70] sm:$0xff] }
 0x114   : > { %3533 = vst [vmem:[%s4636_s17 + $0xa18] sm:$0xff] %v2509_v21  ;;  %3534 = vst [vmem:[%s4636_s17 + $0xa20] sm:$0xff] %v2510_v22  ;;  %v2513_v33 = vmin.f32 %v1489_v24, 1.0  ;;  %v1493_v34 = vmax.f32 %v469_v25, 0.0  ;;  %v1494_v35 = vmax.f32 %v470_v26, 0.0  ;;  %v1495_v36 = vmax.f32 %v471_v31, 0.0 }
 0x115   : > { %3535 = vst [vmem:[%s4636_s17 + $0xa28] sm:$0xff] %v2511_v23  ;;  %v473_v37 = vld [vmem:[%s4615_s30 + $0xa78] sm:$0xff]  ;;  %v474_v38 = vld [vmem:[%s4615_s30 + $0xa80] sm:$0xff]  ;;  %3536 = vst [vmem:[%s4636_s17 + $0xa30] sm:$0xff] %v2512_v27  ;;  %v2514_v39 = vmin.f32 %v1490_v28, 1.0  ;;  %v2515_v40 = vmin.f32 %v1491_v29, 1.0 }
 0x116   : > { %v2516_v41 = vmin.f32 %v1492_v30, 1.0  ;;  %v1496_v42 = vmax.f32 %v472_v32, 0.0  ;;  %v475_v43 = vld [vmem:[%s4615_s30 + $0xa88] sm:$0xff]  ;;  %v476_v44 = vld [vmem:[%s4615_s30 + $0xa90] sm:$0xff]  ;;  %3537 = vst [vmem:[%s4636_s17 + $0xa38] sm:$0xff] %v2513_v33  ;;  %v2517_v45 = vmin.f32 %v1493_v34, 1.0 }
 0x117   : > { %v2518_v46 = vmin.f32 %v1494_v35, 1.0  ;;  %v2519_v47 = vmin.f32 %v1495_v36, 1.0  ;;  %v1497_v48 = vmax.f32 %v473_v37, 0.0  ;;  %v477_v49 = vld [vmem:[%s4615_s30 + $0xa98] sm:$0xff]  ;;  %v478_v50 = vld [vmem:[%s4615_s30 + $0xaa0] sm:$0xff]  ;;  %3538 = vst [vmem:[%s4636_s17 + $0xa40] sm:$0xff] %v2514_v39 }
 0x118   : > { %3539 = vst [vmem:[%s4636_s17 + $0xa48] sm:$0xff] %v2515_v40  ;;  %3540 = vst [vmem:[%s4636_s17 + $0xa50] sm:$0xff] %v2516_v41  ;;  %v2520_v51 = vmin.f32 %v1496_v42, 1.0  ;;  %v1498_v52 = vmax.f32 %v474_v38, 0.0  ;;  %v1499_v53 = vmax.f32 %v475_v43, 0.0  ;;  %v1500_v54 = vmax.f32 %v476_v44, 0.0 }
 0x119   : > { %v479_v55 = vld [vmem:[%s4615_s30 + $0xaa8] sm:$0xff]  ;;  %v480_v56 = vld [vmem:[%s4615_s30 + $0xab0] sm:$0xff]  ;;  %3541 = vst [vmem:[%s4636_s17 + $0xa58] sm:$0xff] %v2517_v45  ;;  %3542 = vst [vmem:[%s4636_s17 + $0xa60] sm:$0xff] %v2518_v46  ;;  %v2521_v57 = vmin.f32 %v1497_v48, 1.0  ;;  %v1501_v58 = vmax.f32 %v477_v49, 0.0 }
 0x11a   : > { %3543 = vst [vmem:[%s4636_s17 + $0xa68] sm:$0xff] %v2519_v47  ;;  %v1502_v59 = vmax.f32 %v478_v50, 0.0  ;;  %v1503_v60 = vmax.f32 %v479_v55, 0.0  ;;  %v481_v61 = vld [vmem:[%s4615_s30 + $0xab8] sm:$0xff]  ;;  %v482_v62 = vld [vmem:[%s4615_s30 + $0xac0] sm:$0xff]  ;;  %3544 = vst [vmem:[%s4636_s17 + $0xa70] sm:$0xff] %v2520_v51 }
 0x11b   : > { %v2522_v63 = vmin.f32 %v1498_v52, 1.0  ;;  %v2523_v0 = vmin.f32 %v1499_v53, 1.0  ;;  %v2524_v1 = vmin.f32 %v1500_v54, 1.0  ;;  %v1504_v2 = vmax.f32 %v480_v56, 0.0  ;;  %v483_v3 = vld [vmem:[%s4615_s30 + $0xac8] sm:$0xff]  ;;  %v484_v4 = vld [vmem:[%s4615_s30 + $0xad0] sm:$0xff] }
 0x11c   : > { %3545 = vst [vmem:[%s4636_s17 + $0xa78] sm:$0xff] %v2521_v57  ;;  %v2525_v5 = vmin.f32 %v1501_v58, 1.0  ;;  %v2526_v6 = vmin.f32 %v1502_v59, 1.0  ;;  %v2527_v7 = vmin.f32 %v1503_v60, 1.0  ;;  %v1505_v8 = vmax.f32 %v481_v61, 0.0  ;;  %v485_v9 = vld [vmem:[%s4615_s30 + $0xad8] sm:$0xff] }
 0x11d   : > { %v486_v10 = vld [vmem:[%s4615_s30 + $0xae0] sm:$0xff]  ;;  %3546 = vst [vmem:[%s4636_s17 + $0xa80] sm:$0xff] %v2522_v63  ;;  %3547 = vst [vmem:[%s4636_s17 + $0xa88] sm:$0xff] %v2523_v0  ;;  %v2528_v11 = vmin.f32 %v1504_v2, 1.0  ;;  %v1506_v12 = vmax.f32 %v482_v62, 0.0  ;;  %v1507_v13 = vmax.f32 %v483_v3, 0.0 }
 0x11e   : > { %3548 = vst [vmem:[%s4636_s17 + $0xa90] sm:$0xff] %v2524_v1  ;;  %v1508_v14 = vmax.f32 %v484_v4, 0.0  ;;  %v487_v15 = vld [vmem:[%s4615_s30 + $0xae8] sm:$0xff]  ;;  %v488_v16 = vld [vmem:[%s4615_s30 + $0xaf0] sm:$0xff]  ;;  %3549 = vst [vmem:[%s4636_s17 + $0xa98] sm:$0xff] %v2525_v5  ;;  %v2529_v17 = vmin.f32 %v1505_v8, 1.0 }
 0x11f   : > { %3550 = vst [vmem:[%s4636_s17 + $0xaa0] sm:$0xff] %v2526_v6  ;;  %3551 = vst [vmem:[%s4636_s17 + $0xaa8] sm:$0xff] %v2527_v7  ;;  %v1509_v18 = vmax.f32 %v485_v9, 0.0  ;;  %v1510_v19 = vmax.f32 %v486_v10, 0.0  ;;  %v1511_v20 = vmax.f32 %v487_v15, 0.0  ;;  %v489_v21 = vld [vmem:[%s4615_s30 + $0xaf8] sm:$0xff] }
 0x120   : > { %v490_v22 = vld [vmem:[%s4615_s30 + $0xb00] sm:$0xff]  ;;  %3552 = vst [vmem:[%s4636_s17 + $0xab0] sm:$0xff] %v2528_v11  ;;  %v2530_v23 = vmin.f32 %v1506_v12, 1.0  ;;  %v2531_v24 = vmin.f32 %v1507_v13, 1.0  ;;  %v2532_v25 = vmin.f32 %v1508_v14, 1.0  ;;  %v1512_v26 = vmax.f32 %v488_v16, 0.0 }
 0x121   : > { %v491_v27 = vld [vmem:[%s4615_s30 + $0xb08] sm:$0xff]  ;;  %v492_v28 = vld [vmem:[%s4615_s30 + $0xb10] sm:$0xff]  ;;  %3553 = vst [vmem:[%s4636_s17 + $0xab8] sm:$0xff] %v2529_v17  ;;  %v2533_v29 = vmin.f32 %v1509_v18, 1.0  ;;  %v2534_v30 = vmin.f32 %v1510_v19, 1.0  ;;  %v2535_v31 = vmin.f32 %v1511_v20, 1.0 }
 0x122   : > { %v1513_v32 = vmax.f32 %v489_v21, 0.0  ;;  %v493_v33 = vld [vmem:[%s4615_s30 + $0xb18] sm:$0xff]  ;;  %v494_v34 = vld [vmem:[%s4615_s30 + $0xb20] sm:$0xff]  ;;  %3554 = vst [vmem:[%s4636_s17 + $0xac0] sm:$0xff] %v2530_v23  ;;  %3555 = vst [vmem:[%s4636_s17 + $0xac8] sm:$0xff] %v2531_v24  ;;  %v2536_v35 = vmin.f32 %v1512_v26, 1.0 }
 0x123   : > { %3556 = vst [vmem:[%s4636_s17 + $0xad0] sm:$0xff] %v2532_v25  ;;  %v1514_v36 = vmax.f32 %v490_v22, 0.0  ;;  %v1515_v37 = vmax.f32 %v491_v27, 0.0  ;;  %v1516_v38 = vmax.f32 %v492_v28, 0.0  ;;  %v495_v39 = vld [vmem:[%s4615_s30 + $0xb28] sm:$0xff]  ;;  %v496_v40 = vld [vmem:[%s4615_s30 + $0xb30] sm:$0xff] }
 0x124   : > { %3557 = vst [vmem:[%s4636_s17 + $0xad8] sm:$0xff] %v2533_v29  ;;  %3558 = vst [vmem:[%s4636_s17 + $0xae0] sm:$0xff] %v2534_v30  ;;  %v2537_v41 = vmin.f32 %v1513_v32, 1.0  ;;  %v1517_v42 = vmax.f32 %v493_v33, 0.0  ;;  %v1518_v43 = vmax.f32 %v494_v34, 0.0  ;;  %v1519_v44 = vmax.f32 %v495_v39, 0.0 }
 0x125   : > { %3559 = vst [vmem:[%s4636_s17 + $0xae8] sm:$0xff] %v2535_v31  ;;  %v497_v45 = vld [vmem:[%s4615_s30 + $0xb38] sm:$0xff]  ;;  %v498_v46 = vld [vmem:[%s4615_s30 + $0xb40] sm:$0xff]  ;;  %3560 = vst [vmem:[%s4636_s17 + $0xaf0] sm:$0xff] %v2536_v35  ;;  %v2538_v47 = vmin.f32 %v1514_v36, 1.0  ;;  %v2539_v48 = vmin.f32 %v1515_v37, 1.0 }
 0x126   : > { %v2540_v49 = vmin.f32 %v1516_v38, 1.0  ;;  %v1520_v50 = vmax.f32 %v496_v40, 0.0  ;;  %v499_v51 = vld [vmem:[%s4615_s30 + $0xb48] sm:$0xff]  ;;  %v500_v52 = vld [vmem:[%s4615_s30 + $0xb50] sm:$0xff]  ;;  %3561 = vst [vmem:[%s4636_s17 + $0xaf8] sm:$0xff] %v2537_v41  ;;  %v2541_v53 = vmin.f32 %v1517_v42, 1.0 }
 0x127   : > { %v2542_v54 = vmin.f32 %v1518_v43, 1.0  ;;  %v2543_v55 = vmin.f32 %v1519_v44, 1.0  ;;  %v1521_v56 = vmax.f32 %v497_v45, 0.0  ;;  %v501_v57 = vld [vmem:[%s4615_s30 + $0xb58] sm:$0xff]  ;;  %v502_v58 = vld [vmem:[%s4615_s30 + $0xb60] sm:$0xff]  ;;  %3562 = vst [vmem:[%s4636_s17 + $0xb00] sm:$0xff] %v2538_v47 }
 0x128   : > { %3563 = vst [vmem:[%s4636_s17 + $0xb08] sm:$0xff] %v2539_v48  ;;  %3564 = vst [vmem:[%s4636_s17 + $0xb10] sm:$0xff] %v2540_v49  ;;  %v2544_v59 = vmin.f32 %v1520_v50, 1.0  ;;  %v1522_v60 = vmax.f32 %v498_v46, 0.0  ;;  %v1523_v61 = vmax.f32 %v499_v51, 0.0  ;;  %v1524_v62 = vmax.f32 %v500_v52, 0.0 }
 0x129   : > { %v503_v63 = vld [vmem:[%s4615_s30 + $0xb68] sm:$0xff]  ;;  %v504_v0 = vld [vmem:[%s4615_s30 + $0xb70] sm:$0xff]  ;;  %3565 = vst [vmem:[%s4636_s17 + $0xb18] sm:$0xff] %v2541_v53  ;;  %3566 = vst [vmem:[%s4636_s17 + $0xb20] sm:$0xff] %v2542_v54  ;;  %v2545_v1 = vmin.f32 %v1521_v56, 1.0  ;;  %v1525_v2 = vmax.f32 %v501_v57, 0.0 }
 0x12a   : > { %3567 = vst [vmem:[%s4636_s17 + $0xb28] sm:$0xff] %v2543_v55  ;;  %v1526_v3 = vmax.f32 %v502_v58, 0.0  ;;  %v1527_v4 = vmax.f32 %v503_v63, 0.0  ;;  %v505_v5 = vld [vmem:[%s4615_s30 + $0xb78] sm:$0xff]  ;;  %v506_v6 = vld [vmem:[%s4615_s30 + $0xb80] sm:$0xff]  ;;  %3568 = vst [vmem:[%s4636_s17 + $0xb30] sm:$0xff] %v2544_v59 }
 0x12b   : > { %v2546_v7 = vmin.f32 %v1522_v60, 1.0  ;;  %v2547_v8 = vmin.f32 %v1523_v61, 1.0  ;;  %v2548_v9 = vmin.f32 %v1524_v62, 1.0  ;;  %v1528_v10 = vmax.f32 %v504_v0, 0.0  ;;  %v507_v11 = vld [vmem:[%s4615_s30 + $0xb88] sm:$0xff]  ;;  %v508_v12 = vld [vmem:[%s4615_s30 + $0xb90] sm:$0xff] }
 0x12c   : > { %3569 = vst [vmem:[%s4636_s17 + $0xb38] sm:$0xff] %v2545_v1  ;;  %v2549_v13 = vmin.f32 %v1525_v2, 1.0  ;;  %v2550_v14 = vmin.f32 %v1526_v3, 1.0  ;;  %v2551_v15 = vmin.f32 %v1527_v4, 1.0  ;;  %v1529_v16 = vmax.f32 %v505_v5, 0.0  ;;  %v509_v17 = vld [vmem:[%s4615_s30 + $0xb98] sm:$0xff] }
 0x12d   : > { %v510_v18 = vld [vmem:[%s4615_s30 + $0xba0] sm:$0xff]  ;;  %3570 = vst [vmem:[%s4636_s17 + $0xb40] sm:$0xff] %v2546_v7  ;;  %3571 = vst [vmem:[%s4636_s17 + $0xb48] sm:$0xff] %v2547_v8  ;;  %v2552_v19 = vmin.f32 %v1528_v10, 1.0  ;;  %v1530_v20 = vmax.f32 %v506_v6, 0.0  ;;  %v1531_v21 = vmax.f32 %v507_v11, 0.0 }
 0x12e   : > { %3572 = vst [vmem:[%s4636_s17 + $0xb50] sm:$0xff] %v2548_v9  ;;  %v1532_v22 = vmax.f32 %v508_v12, 0.0  ;;  %v511_v23 = vld [vmem:[%s4615_s30 + $0xba8] sm:$0xff]  ;;  %v512_v24 = vld [vmem:[%s4615_s30 + $0xbb0] sm:$0xff]  ;;  %3573 = vst [vmem:[%s4636_s17 + $0xb58] sm:$0xff] %v2549_v13  ;;  %v2553_v25 = vmin.f32 %v1529_v16, 1.0 }
 0x12f   : > { %3574 = vst [vmem:[%s4636_s17 + $0xb60] sm:$0xff] %v2550_v14  ;;  %3575 = vst [vmem:[%s4636_s17 + $0xb68] sm:$0xff] %v2551_v15  ;;  %v1533_v26 = vmax.f32 %v509_v17, 0.0  ;;  %v1534_v27 = vmax.f32 %v510_v18, 0.0  ;;  %v1535_v28 = vmax.f32 %v511_v23, 0.0  ;;  %v513_v29 = vld [vmem:[%s4615_s30 + $0xbb8] sm:$0xff] }
 0x130   : > { %v514_v30 = vld [vmem:[%s4615_s30 + $0xbc0] sm:$0xff]  ;;  %3576 = vst [vmem:[%s4636_s17 + $0xb70] sm:$0xff] %v2552_v19  ;;  %v2554_v31 = vmin.f32 %v1530_v20, 1.0  ;;  %v2555_v32 = vmin.f32 %v1531_v21, 1.0  ;;  %v2556_v33 = vmin.f32 %v1532_v22, 1.0  ;;  %v1536_v34 = vmax.f32 %v512_v24, 0.0 }
 0x131   : > { %v515_v35 = vld [vmem:[%s4615_s30 + $0xbc8] sm:$0xff]  ;;  %v516_v36 = vld [vmem:[%s4615_s30 + $0xbd0] sm:$0xff]  ;;  %3577 = vst [vmem:[%s4636_s17 + $0xb78] sm:$0xff] %v2553_v25  ;;  %v2557_v37 = vmin.f32 %v1533_v26, 1.0  ;;  %v2558_v38 = vmin.f32 %v1534_v27, 1.0  ;;  %v2559_v39 = vmin.f32 %v1535_v28, 1.0 }
 0x132   : > { %v1537_v40 = vmax.f32 %v513_v29, 0.0  ;;  %v517_v41 = vld [vmem:[%s4615_s30 + $0xbd8] sm:$0xff]  ;;  %v518_v42 = vld [vmem:[%s4615_s30 + $0xbe0] sm:$0xff]  ;;  %3578 = vst [vmem:[%s4636_s17 + $0xb80] sm:$0xff] %v2554_v31  ;;  %3579 = vst [vmem:[%s4636_s17 + $0xb88] sm:$0xff] %v2555_v32  ;;  %v2560_v43 = vmin.f32 %v1536_v34, 1.0 }
 0x133   : > { %3580 = vst [vmem:[%s4636_s17 + $0xb90] sm:$0xff] %v2556_v33  ;;  %v1538_v44 = vmax.f32 %v514_v30, 0.0  ;;  %v1539_v45 = vmax.f32 %v515_v35, 0.0  ;;  %v1540_v46 = vmax.f32 %v516_v36, 0.0  ;;  %v519_v47 = vld [vmem:[%s4615_s30 + $0xbe8] sm:$0xff]  ;;  %v520_v48 = vld [vmem:[%s4615_s30 + $0xbf0] sm:$0xff] }
 0x134   : > { %3581 = vst [vmem:[%s4636_s17 + $0xb98] sm:$0xff] %v2557_v37  ;;  %3582 = vst [vmem:[%s4636_s17 + $0xba0] sm:$0xff] %v2558_v38  ;;  %v2561_v49 = vmin.f32 %v1537_v40, 1.0  ;;  %v1541_v50 = vmax.f32 %v517_v41, 0.0  ;;  %v1542_v51 = vmax.f32 %v518_v42, 0.0  ;;  %v1543_v52 = vmax.f32 %v519_v47, 0.0 }
 0x135   : > { %3583 = vst [vmem:[%s4636_s17 + $0xba8] sm:$0xff] %v2559_v39  ;;  %v521_v53 = vld [vmem:[%s4615_s30 + $0xbf8] sm:$0xff]  ;;  %v522_v54 = vld [vmem:[%s4615_s30 + $0xc00] sm:$0xff]  ;;  %3584 = vst [vmem:[%s4636_s17 + $0xbb0] sm:$0xff] %v2560_v43  ;;  %v2562_v55 = vmin.f32 %v1538_v44, 1.0  ;;  %v2563_v56 = vmin.f32 %v1539_v45, 1.0 }
 0x136   : > { %v2564_v57 = vmin.f32 %v1540_v46, 1.0  ;;  %v1544_v58 = vmax.f32 %v520_v48, 0.0  ;;  %v523_v59 = vld [vmem:[%s4615_s30 + $0xc08] sm:$0xff]  ;;  %v524_v60 = vld [vmem:[%s4615_s30 + $0xc10] sm:$0xff]  ;;  %3585 = vst [vmem:[%s4636_s17 + $0xbb8] sm:$0xff] %v2561_v49  ;;  %v2565_v61 = vmin.f32 %v1541_v50, 1.0 }
 0x137   : > { %v2566_v62 = vmin.f32 %v1542_v51, 1.0  ;;  %v2567_v63 = vmin.f32 %v1543_v52, 1.0  ;;  %v1545_v0 = vmax.f32 %v521_v53, 0.0  ;;  %v525_v1 = vld [vmem:[%s4615_s30 + $0xc18] sm:$0xff]  ;;  %v526_v2 = vld [vmem:[%s4615_s30 + $0xc20] sm:$0xff]  ;;  %3586 = vst [vmem:[%s4636_s17 + $0xbc0] sm:$0xff] %v2562_v55 }
 0x138   : > { %3587 = vst [vmem:[%s4636_s17 + $0xbc8] sm:$0xff] %v2563_v56  ;;  %3588 = vst [vmem:[%s4636_s17 + $0xbd0] sm:$0xff] %v2564_v57  ;;  %v2568_v3 = vmin.f32 %v1544_v58, 1.0  ;;  %v1546_v4 = vmax.f32 %v522_v54, 0.0  ;;  %v1547_v5 = vmax.f32 %v523_v59, 0.0  ;;  %v1548_v6 = vmax.f32 %v524_v60, 0.0 }
 0x139   : > { %v527_v7 = vld [vmem:[%s4615_s30 + $0xc28] sm:$0xff]  ;;  %v528_v8 = vld [vmem:[%s4615_s30 + $0xc30] sm:$0xff]  ;;  %3589 = vst [vmem:[%s4636_s17 + $0xbd8] sm:$0xff] %v2565_v61  ;;  %3590 = vst [vmem:[%s4636_s17 + $0xbe0] sm:$0xff] %v2566_v62  ;;  %v2569_v9 = vmin.f32 %v1545_v0, 1.0  ;;  %v1549_v10 = vmax.f32 %v525_v1, 0.0 }
 0x13a   : > { %3591 = vst [vmem:[%s4636_s17 + $0xbe8] sm:$0xff] %v2567_v63  ;;  %v1550_v11 = vmax.f32 %v526_v2, 0.0  ;;  %v1551_v12 = vmax.f32 %v527_v7, 0.0  ;;  %v529_v13 = vld [vmem:[%s4615_s30 + $0xc38] sm:$0xff]  ;;  %v530_v14 = vld [vmem:[%s4615_s30 + $0xc40] sm:$0xff]  ;;  %3592 = vst [vmem:[%s4636_s17 + $0xbf0] sm:$0xff] %v2568_v3 }
 0x13b   : > { %v2570_v15 = vmin.f32 %v1546_v4, 1.0  ;;  %v2571_v16 = vmin.f32 %v1547_v5, 1.0  ;;  %v2572_v17 = vmin.f32 %v1548_v6, 1.0  ;;  %v1552_v18 = vmax.f32 %v528_v8, 0.0  ;;  %v531_v19 = vld [vmem:[%s4615_s30 + $0xc48] sm:$0xff]  ;;  %v532_v20 = vld [vmem:[%s4615_s30 + $0xc50] sm:$0xff] }
 0x13c   : > { %3593 = vst [vmem:[%s4636_s17 + $0xbf8] sm:$0xff] %v2569_v9  ;;  %v2573_v21 = vmin.f32 %v1549_v10, 1.0  ;;  %v2574_v22 = vmin.f32 %v1550_v11, 1.0  ;;  %v2575_v23 = vmin.f32 %v1551_v12, 1.0  ;;  %v1553_v24 = vmax.f32 %v529_v13, 0.0  ;;  %v533_v25 = vld [vmem:[%s4615_s30 + $0xc58] sm:$0xff] }
 0x13d   : > { %v534_v26 = vld [vmem:[%s4615_s30 + $0xc60] sm:$0xff]  ;;  %3594 = vst [vmem:[%s4636_s17 + $0xc00] sm:$0xff] %v2570_v15  ;;  %3595 = vst [vmem:[%s4636_s17 + $0xc08] sm:$0xff] %v2571_v16  ;;  %v2576_v27 = vmin.f32 %v1552_v18, 1.0  ;;  %v1554_v28 = vmax.f32 %v530_v14, 0.0  ;;  %v1555_v29 = vmax.f32 %v531_v19, 0.0 }
 0x13e   : > { %3596 = vst [vmem:[%s4636_s17 + $0xc10] sm:$0xff] %v2572_v17  ;;  %v1556_v30 = vmax.f32 %v532_v20, 0.0  ;;  %v535_v31 = vld [vmem:[%s4615_s30 + $0xc68] sm:$0xff]  ;;  %v536_v32 = vld [vmem:[%s4615_s30 + $0xc70] sm:$0xff]  ;;  %3597 = vst [vmem:[%s4636_s17 + $0xc18] sm:$0xff] %v2573_v21  ;;  %v2577_v33 = vmin.f32 %v1553_v24, 1.0 }
 0x13f   : > { %3598 = vst [vmem:[%s4636_s17 + $0xc20] sm:$0xff] %v2574_v22  ;;  %3599 = vst [vmem:[%s4636_s17 + $0xc28] sm:$0xff] %v2575_v23  ;;  %v1557_v34 = vmax.f32 %v533_v25, 0.0  ;;  %v1558_v35 = vmax.f32 %v534_v26, 0.0  ;;  %v1559_v36 = vmax.f32 %v535_v31, 0.0  ;;  %v537_v37 = vld [vmem:[%s4615_s30 + $0xc78] sm:$0xff] }
 0x140   : > { %v538_v38 = vld [vmem:[%s4615_s30 + $0xc80] sm:$0xff]  ;;  %3600 = vst [vmem:[%s4636_s17 + $0xc30] sm:$0xff] %v2576_v27  ;;  %v2578_v39 = vmin.f32 %v1554_v28, 1.0  ;;  %v2579_v40 = vmin.f32 %v1555_v29, 1.0  ;;  %v2580_v41 = vmin.f32 %v1556_v30, 1.0  ;;  %v1560_v42 = vmax.f32 %v536_v32, 0.0 }
 0x141   : > { %v539_v43 = vld [vmem:[%s4615_s30 + $0xc88] sm:$0xff]  ;;  %v540_v44 = vld [vmem:[%s4615_s30 + $0xc90] sm:$0xff]  ;;  %3601 = vst [vmem:[%s4636_s17 + $0xc38] sm:$0xff] %v2577_v33  ;;  %v2581_v45 = vmin.f32 %v1557_v34, 1.0  ;;  %v2582_v46 = vmin.f32 %v1558_v35, 1.0  ;;  %v2583_v47 = vmin.f32 %v1559_v36, 1.0 }
 0x142   : > { %v1561_v48 = vmax.f32 %v537_v37, 0.0  ;;  %v541_v49 = vld [vmem:[%s4615_s30 + $0xc98] sm:$0xff]  ;;  %v542_v50 = vld [vmem:[%s4615_s30 + $0xca0] sm:$0xff]  ;;  %3602 = vst [vmem:[%s4636_s17 + $0xc40] sm:$0xff] %v2578_v39  ;;  %3603 = vst [vmem:[%s4636_s17 + $0xc48] sm:$0xff] %v2579_v40  ;;  %v2584_v51 = vmin.f32 %v1560_v42, 1.0 }
 0x143   : > { %3604 = vst [vmem:[%s4636_s17 + $0xc50] sm:$0xff] %v2580_v41  ;;  %v1562_v52 = vmax.f32 %v538_v38, 0.0  ;;  %v1563_v53 = vmax.f32 %v539_v43, 0.0  ;;  %v1564_v54 = vmax.f32 %v540_v44, 0.0  ;;  %v543_v55 = vld [vmem:[%s4615_s30 + $0xca8] sm:$0xff]  ;;  %v544_v56 = vld [vmem:[%s4615_s30 + $0xcb0] sm:$0xff] }
 0x144   : > { %3605 = vst [vmem:[%s4636_s17 + $0xc58] sm:$0xff] %v2581_v45  ;;  %3606 = vst [vmem:[%s4636_s17 + $0xc60] sm:$0xff] %v2582_v46  ;;  %v2585_v57 = vmin.f32 %v1561_v48, 1.0  ;;  %v1565_v58 = vmax.f32 %v541_v49, 0.0  ;;  %v1566_v59 = vmax.f32 %v542_v50, 0.0  ;;  %v1567_v60 = vmax.f32 %v543_v55, 0.0 }
 0x145   : > { %3607 = vst [vmem:[%s4636_s17 + $0xc68] sm:$0xff] %v2583_v47  ;;  %v545_v61 = vld [vmem:[%s4615_s30 + $0xcb8] sm:$0xff]  ;;  %v546_v62 = vld [vmem:[%s4615_s30 + $0xcc0] sm:$0xff]  ;;  %3608 = vst [vmem:[%s4636_s17 + $0xc70] sm:$0xff] %v2584_v51  ;;  %v2586_v63 = vmin.f32 %v1562_v52, 1.0  ;;  %v2587_v0 = vmin.f32 %v1563_v53, 1.0 }
 0x146   : > { %v2588_v1 = vmin.f32 %v1564_v54, 1.0  ;;  %v1568_v2 = vmax.f32 %v544_v56, 0.0  ;;  %v547_v3 = vld [vmem:[%s4615_s30 + $0xcc8] sm:$0xff]  ;;  %v548_v4 = vld [vmem:[%s4615_s30 + $0xcd0] sm:$0xff]  ;;  %3609 = vst [vmem:[%s4636_s17 + $0xc78] sm:$0xff] %v2585_v57  ;;  %v2589_v5 = vmin.f32 %v1565_v58, 1.0 }
 0x147   : > { %v2590_v6 = vmin.f32 %v1566_v59, 1.0  ;;  %v2591_v7 = vmin.f32 %v1567_v60, 1.0  ;;  %v1569_v8 = vmax.f32 %v545_v61, 0.0  ;;  %v549_v9 = vld [vmem:[%s4615_s30 + $0xcd8] sm:$0xff]  ;;  %v550_v10 = vld [vmem:[%s4615_s30 + $0xce0] sm:$0xff]  ;;  %3610 = vst [vmem:[%s4636_s17 + $0xc80] sm:$0xff] %v2586_v63 }
 0x148   : > { %3611 = vst [vmem:[%s4636_s17 + $0xc88] sm:$0xff] %v2587_v0  ;;  %3612 = vst [vmem:[%s4636_s17 + $0xc90] sm:$0xff] %v2588_v1  ;;  %v2592_v11 = vmin.f32 %v1568_v2, 1.0  ;;  %v1570_v12 = vmax.f32 %v546_v62, 0.0  ;;  %v1571_v13 = vmax.f32 %v547_v3, 0.0  ;;  %v1572_v14 = vmax.f32 %v548_v4, 0.0 }
 0x149   : > { %v551_v15 = vld [vmem:[%s4615_s30 + $0xce8] sm:$0xff]  ;;  %v552_v16 = vld [vmem:[%s4615_s30 + $0xcf0] sm:$0xff]  ;;  %3613 = vst [vmem:[%s4636_s17 + $0xc98] sm:$0xff] %v2589_v5  ;;  %3614 = vst [vmem:[%s4636_s17 + $0xca0] sm:$0xff] %v2590_v6  ;;  %v2593_v17 = vmin.f32 %v1569_v8, 1.0  ;;  %v1573_v18 = vmax.f32 %v549_v9, 0.0 }
 0x14a   : > { %3615 = vst [vmem:[%s4636_s17 + $0xca8] sm:$0xff] %v2591_v7  ;;  %v1574_v19 = vmax.f32 %v550_v10, 0.0  ;;  %v1575_v20 = vmax.f32 %v551_v15, 0.0  ;;  %v553_v21 = vld [vmem:[%s4615_s30 + $0xcf8] sm:$0xff]  ;;  %v554_v22 = vld [vmem:[%s4615_s30 + $0xd00] sm:$0xff]  ;;  %3616 = vst [vmem:[%s4636_s17 + $0xcb0] sm:$0xff] %v2592_v11 }
 0x14b   : > { %v2594_v23 = vmin.f32 %v1570_v12, 1.0  ;;  %v2595_v24 = vmin.f32 %v1571_v13, 1.0  ;;  %v2596_v25 = vmin.f32 %v1572_v14, 1.0  ;;  %v1576_v26 = vmax.f32 %v552_v16, 0.0  ;;  %v555_v27 = vld [vmem:[%s4615_s30 + $0xd08] sm:$0xff]  ;;  %v556_v28 = vld [vmem:[%s4615_s30 + $0xd10] sm:$0xff] }
 0x14c   : > { %3617 = vst [vmem:[%s4636_s17 + $0xcb8] sm:$0xff] %v2593_v17  ;;  %v2597_v29 = vmin.f32 %v1573_v18, 1.0  ;;  %v2598_v30 = vmin.f32 %v1574_v19, 1.0  ;;  %v2599_v31 = vmin.f32 %v1575_v20, 1.0  ;;  %v1577_v32 = vmax.f32 %v553_v21, 0.0  ;;  %v557_v33 = vld [vmem:[%s4615_s30 + $0xd18] sm:$0xff] }
 0x14d   : > { %v558_v34 = vld [vmem:[%s4615_s30 + $0xd20] sm:$0xff]  ;;  %3618 = vst [vmem:[%s4636_s17 + $0xcc0] sm:$0xff] %v2594_v23  ;;  %3619 = vst [vmem:[%s4636_s17 + $0xcc8] sm:$0xff] %v2595_v24  ;;  %v2600_v35 = vmin.f32 %v1576_v26, 1.0  ;;  %v1578_v36 = vmax.f32 %v554_v22, 0.0  ;;  %v1579_v37 = vmax.f32 %v555_v27, 0.0 }
 0x14e   : > { %3620 = vst [vmem:[%s4636_s17 + $0xcd0] sm:$0xff] %v2596_v25  ;;  %v1580_v38 = vmax.f32 %v556_v28, 0.0  ;;  %v559_v39 = vld [vmem:[%s4615_s30 + $0xd28] sm:$0xff]  ;;  %v560_v40 = vld [vmem:[%s4615_s30 + $0xd30] sm:$0xff]  ;;  %3621 = vst [vmem:[%s4636_s17 + $0xcd8] sm:$0xff] %v2597_v29  ;;  %v2601_v41 = vmin.f32 %v1577_v32, 1.0 }
 0x14f   : > { %3622 = vst [vmem:[%s4636_s17 + $0xce0] sm:$0xff] %v2598_v30  ;;  %3623 = vst [vmem:[%s4636_s17 + $0xce8] sm:$0xff] %v2599_v31  ;;  %v1581_v42 = vmax.f32 %v557_v33, 0.0  ;;  %v1582_v43 = vmax.f32 %v558_v34, 0.0  ;;  %v1583_v44 = vmax.f32 %v559_v39, 0.0  ;;  %v561_v45 = vld [vmem:[%s4615_s30 + $0xd38] sm:$0xff] }
 0x150   : > { %v562_v46 = vld [vmem:[%s4615_s30 + $0xd40] sm:$0xff]  ;;  %3624 = vst [vmem:[%s4636_s17 + $0xcf0] sm:$0xff] %v2600_v35  ;;  %v2602_v47 = vmin.f32 %v1578_v36, 1.0  ;;  %v2603_v48 = vmin.f32 %v1579_v37, 1.0  ;;  %v2604_v49 = vmin.f32 %v1580_v38, 1.0  ;;  %v1584_v50 = vmax.f32 %v560_v40, 0.0 }
 0x151   : > { %v563_v51 = vld [vmem:[%s4615_s30 + $0xd48] sm:$0xff]  ;;  %v564_v52 = vld [vmem:[%s4615_s30 + $0xd50] sm:$0xff]  ;;  %3625 = vst [vmem:[%s4636_s17 + $0xcf8] sm:$0xff] %v2601_v41  ;;  %v2605_v53 = vmin.f32 %v1581_v42, 1.0  ;;  %v2606_v54 = vmin.f32 %v1582_v43, 1.0  ;;  %v2607_v55 = vmin.f32 %v1583_v44, 1.0 }
 0x152   : > { %v1585_v56 = vmax.f32 %v561_v45, 0.0  ;;  %v565_v57 = vld [vmem:[%s4615_s30 + $0xd58] sm:$0xff]  ;;  %v566_v58 = vld [vmem:[%s4615_s30 + $0xd60] sm:$0xff]  ;;  %3626 = vst [vmem:[%s4636_s17 + $0xd00] sm:$0xff] %v2602_v47  ;;  %3627 = vst [vmem:[%s4636_s17 + $0xd08] sm:$0xff] %v2603_v48  ;;  %v2608_v59 = vmin.f32 %v1584_v50, 1.0 }
 0x153   : > { %3628 = vst [vmem:[%s4636_s17 + $0xd10] sm:$0xff] %v2604_v49  ;;  %v1586_v60 = vmax.f32 %v562_v46, 0.0  ;;  %v1587_v61 = vmax.f32 %v563_v51, 0.0  ;;  %v1588_v62 = vmax.f32 %v564_v52, 0.0  ;;  %v567_v63 = vld [vmem:[%s4615_s30 + $0xd68] sm:$0xff]  ;;  %v568_v0 = vld [vmem:[%s4615_s30 + $0xd70] sm:$0xff] }
 0x154   : > { %3629 = vst [vmem:[%s4636_s17 + $0xd18] sm:$0xff] %v2605_v53  ;;  %3630 = vst [vmem:[%s4636_s17 + $0xd20] sm:$0xff] %v2606_v54  ;;  %v2609_v1 = vmin.f32 %v1585_v56, 1.0  ;;  %v1589_v2 = vmax.f32 %v565_v57, 0.0  ;;  %v1590_v3 = vmax.f32 %v566_v58, 0.0  ;;  %v1591_v4 = vmax.f32 %v567_v63, 0.0 }
 0x155   : > { %3631 = vst [vmem:[%s4636_s17 + $0xd28] sm:$0xff] %v2607_v55  ;;  %v569_v5 = vld [vmem:[%s4615_s30 + $0xd78] sm:$0xff]  ;;  %v570_v6 = vld [vmem:[%s4615_s30 + $0xd80] sm:$0xff]  ;;  %3632 = vst [vmem:[%s4636_s17 + $0xd30] sm:$0xff] %v2608_v59  ;;  %v2610_v7 = vmin.f32 %v1586_v60, 1.0  ;;  %v2611_v8 = vmin.f32 %v1587_v61, 1.0 }
 0x156   : > { %v2612_v9 = vmin.f32 %v1588_v62, 1.0  ;;  %v1592_v10 = vmax.f32 %v568_v0, 0.0  ;;  %v571_v11 = vld [vmem:[%s4615_s30 + $0xd88] sm:$0xff]  ;;  %v572_v12 = vld [vmem:[%s4615_s30 + $0xd90] sm:$0xff]  ;;  %3633 = vst [vmem:[%s4636_s17 + $0xd38] sm:$0xff] %v2609_v1  ;;  %v2613_v13 = vmin.f32 %v1589_v2, 1.0 }
 0x157   : > { %v2614_v14 = vmin.f32 %v1590_v3, 1.0  ;;  %v2615_v15 = vmin.f32 %v1591_v4, 1.0  ;;  %v1593_v16 = vmax.f32 %v569_v5, 0.0  ;;  %v573_v17 = vld [vmem:[%s4615_s30 + $0xd98] sm:$0xff]  ;;  %v574_v18 = vld [vmem:[%s4615_s30 + $0xda0] sm:$0xff]  ;;  %3634 = vst [vmem:[%s4636_s17 + $0xd40] sm:$0xff] %v2610_v7 }
 0x158   : > { %3635 = vst [vmem:[%s4636_s17 + $0xd48] sm:$0xff] %v2611_v8  ;;  %3636 = vst [vmem:[%s4636_s17 + $0xd50] sm:$0xff] %v2612_v9  ;;  %v2616_v19 = vmin.f32 %v1592_v10, 1.0  ;;  %v1594_v20 = vmax.f32 %v570_v6, 0.0  ;;  %v1595_v21 = vmax.f32 %v571_v11, 0.0  ;;  %v1596_v22 = vmax.f32 %v572_v12, 0.0 }
 0x159   : > { %v575_v23 = vld [vmem:[%s4615_s30 + $0xda8] sm:$0xff]  ;;  %v576_v24 = vld [vmem:[%s4615_s30 + $0xdb0] sm:$0xff]  ;;  %3637 = vst [vmem:[%s4636_s17 + $0xd58] sm:$0xff] %v2613_v13  ;;  %3638 = vst [vmem:[%s4636_s17 + $0xd60] sm:$0xff] %v2614_v14  ;;  %v2617_v25 = vmin.f32 %v1593_v16, 1.0  ;;  %v1597_v26 = vmax.f32 %v573_v17, 0.0 }
 0x15a   : > { %3639 = vst [vmem:[%s4636_s17 + $0xd68] sm:$0xff] %v2615_v15  ;;  %v1598_v27 = vmax.f32 %v574_v18, 0.0  ;;  %v1599_v28 = vmax.f32 %v575_v23, 0.0  ;;  %v577_v29 = vld [vmem:[%s4615_s30 + $0xdb8] sm:$0xff]  ;;  %v578_v30 = vld [vmem:[%s4615_s30 + $0xdc0] sm:$0xff]  ;;  %3640 = vst [vmem:[%s4636_s17 + $0xd70] sm:$0xff] %v2616_v19 }
 0x15b   : > { %v2618_v31 = vmin.f32 %v1594_v20, 1.0  ;;  %v2619_v32 = vmin.f32 %v1595_v21, 1.0  ;;  %v2620_v33 = vmin.f32 %v1596_v22, 1.0  ;;  %v1600_v34 = vmax.f32 %v576_v24, 0.0  ;;  %v579_v35 = vld [vmem:[%s4615_s30 + $0xdc8] sm:$0xff]  ;;  %v580_v36 = vld [vmem:[%s4615_s30 + $0xdd0] sm:$0xff] }
 0x15c   : > { %3641 = vst [vmem:[%s4636_s17 + $0xd78] sm:$0xff] %v2617_v25  ;;  %v2621_v37 = vmin.f32 %v1597_v26, 1.0  ;;  %v2622_v38 = vmin.f32 %v1598_v27, 1.0  ;;  %v2623_v39 = vmin.f32 %v1599_v28, 1.0  ;;  %v1601_v40 = vmax.f32 %v577_v29, 0.0  ;;  %v581_v41 = vld [vmem:[%s4615_s30 + $0xdd8] sm:$0xff] }
 0x15d   : > { %v582_v42 = vld [vmem:[%s4615_s30 + $0xde0] sm:$0xff]  ;;  %3642 = vst [vmem:[%s4636_s17 + $0xd80] sm:$0xff] %v2618_v31  ;;  %3643 = vst [vmem:[%s4636_s17 + $0xd88] sm:$0xff] %v2619_v32  ;;  %v2624_v43 = vmin.f32 %v1600_v34, 1.0  ;;  %v1602_v44 = vmax.f32 %v578_v30, 0.0  ;;  %v1603_v45 = vmax.f32 %v579_v35, 0.0 }
 0x15e   : > { %3644 = vst [vmem:[%s4636_s17 + $0xd90] sm:$0xff] %v2620_v33  ;;  %v1604_v46 = vmax.f32 %v580_v36, 0.0  ;;  %v583_v47 = vld [vmem:[%s4615_s30 + $0xde8] sm:$0xff]  ;;  %v584_v48 = vld [vmem:[%s4615_s30 + $0xdf0] sm:$0xff]  ;;  %3645 = vst [vmem:[%s4636_s17 + $0xd98] sm:$0xff] %v2621_v37  ;;  %v2625_v49 = vmin.f32 %v1601_v40, 1.0 }
 0x15f   : > { %3646 = vst [vmem:[%s4636_s17 + $0xda0] sm:$0xff] %v2622_v38  ;;  %3647 = vst [vmem:[%s4636_s17 + $0xda8] sm:$0xff] %v2623_v39  ;;  %v1605_v50 = vmax.f32 %v581_v41, 0.0  ;;  %v1606_v51 = vmax.f32 %v582_v42, 0.0  ;;  %v1607_v52 = vmax.f32 %v583_v47, 0.0  ;;  %v585_v53 = vld [vmem:[%s4615_s30 + $0xdf8] sm:$0xff] }
 0x160   : > { %v586_v54 = vld [vmem:[%s4615_s30 + $0xe00] sm:$0xff]  ;;  %3648 = vst [vmem:[%s4636_s17 + $0xdb0] sm:$0xff] %v2624_v43  ;;  %v2626_v55 = vmin.f32 %v1602_v44, 1.0  ;;  %v2627_v56 = vmin.f32 %v1603_v45, 1.0  ;;  %v2628_v57 = vmin.f32 %v1604_v46, 1.0  ;;  %v1608_v58 = vmax.f32 %v584_v48, 0.0 }
 0x161   : > { %v587_v59 = vld [vmem:[%s4615_s30 + $0xe08] sm:$0xff]  ;;  %v588_v60 = vld [vmem:[%s4615_s30 + $0xe10] sm:$0xff]  ;;  %3649 = vst [vmem:[%s4636_s17 + $0xdb8] sm:$0xff] %v2625_v49  ;;  %v2629_v61 = vmin.f32 %v1605_v50, 1.0  ;;  %v2630_v62 = vmin.f32 %v1606_v51, 1.0  ;;  %v2631_v63 = vmin.f32 %v1607_v52, 1.0 }
 0x162   : > { %v1609_v0 = vmax.f32 %v585_v53, 0.0  ;;  %v589_v1 = vld [vmem:[%s4615_s30 + $0xe18] sm:$0xff]  ;;  %v590_v2 = vld [vmem:[%s4615_s30 + $0xe20] sm:$0xff]  ;;  %3650 = vst [vmem:[%s4636_s17 + $0xdc0] sm:$0xff] %v2626_v55  ;;  %3651 = vst [vmem:[%s4636_s17 + $0xdc8] sm:$0xff] %v2627_v56  ;;  %v2632_v3 = vmin.f32 %v1608_v58, 1.0 }
 0x163   : > { %3652 = vst [vmem:[%s4636_s17 + $0xdd0] sm:$0xff] %v2628_v57  ;;  %v1610_v4 = vmax.f32 %v586_v54, 0.0  ;;  %v1611_v5 = vmax.f32 %v587_v59, 0.0  ;;  %v1612_v6 = vmax.f32 %v588_v60, 0.0  ;;  %v591_v7 = vld [vmem:[%s4615_s30 + $0xe28] sm:$0xff]  ;;  %v592_v8 = vld [vmem:[%s4615_s30 + $0xe30] sm:$0xff] }
 0x164   : > { %3653 = vst [vmem:[%s4636_s17 + $0xdd8] sm:$0xff] %v2629_v61  ;;  %3654 = vst [vmem:[%s4636_s17 + $0xde0] sm:$0xff] %v2630_v62  ;;  %v2633_v9 = vmin.f32 %v1609_v0, 1.0  ;;  %v1613_v10 = vmax.f32 %v589_v1, 0.0  ;;  %v1614_v11 = vmax.f32 %v590_v2, 0.0  ;;  %v1615_v12 = vmax.f32 %v591_v7, 0.0 }
 0x165   : > { %3655 = vst [vmem:[%s4636_s17 + $0xde8] sm:$0xff] %v2631_v63  ;;  %v593_v13 = vld [vmem:[%s4615_s30 + $0xe38] sm:$0xff]  ;;  %v594_v14 = vld [vmem:[%s4615_s30 + $0xe40] sm:$0xff]  ;;  %3656 = vst [vmem:[%s4636_s17 + $0xdf0] sm:$0xff] %v2632_v3  ;;  %v2634_v15 = vmin.f32 %v1610_v4, 1.0  ;;  %v2635_v16 = vmin.f32 %v1611_v5, 1.0 }
 0x166   : > { %v2636_v17 = vmin.f32 %v1612_v6, 1.0  ;;  %v1616_v18 = vmax.f32 %v592_v8, 0.0  ;;  %v595_v19 = vld [vmem:[%s4615_s30 + $0xe48] sm:$0xff]  ;;  %v596_v20 = vld [vmem:[%s4615_s30 + $0xe50] sm:$0xff]  ;;  %3657 = vst [vmem:[%s4636_s17 + $0xdf8] sm:$0xff] %v2633_v9  ;;  %v2637_v21 = vmin.f32 %v1613_v10, 1.0 }
 0x167   : > { %v2638_v22 = vmin.f32 %v1614_v11, 1.0  ;;  %v2639_v23 = vmin.f32 %v1615_v12, 1.0  ;;  %v1617_v24 = vmax.f32 %v593_v13, 0.0  ;;  %v597_v25 = vld [vmem:[%s4615_s30 + $0xe58] sm:$0xff]  ;;  %v598_v26 = vld [vmem:[%s4615_s30 + $0xe60] sm:$0xff]  ;;  %3658 = vst [vmem:[%s4636_s17 + $0xe00] sm:$0xff] %v2634_v15 }
 0x168   : > { %3659 = vst [vmem:[%s4636_s17 + $0xe08] sm:$0xff] %v2635_v16  ;;  %3660 = vst [vmem:[%s4636_s17 + $0xe10] sm:$0xff] %v2636_v17  ;;  %v2640_v27 = vmin.f32 %v1616_v18, 1.0  ;;  %v1618_v28 = vmax.f32 %v594_v14, 0.0  ;;  %v1619_v29 = vmax.f32 %v595_v19, 0.0  ;;  %v1620_v30 = vmax.f32 %v596_v20, 0.0 }
 0x169   : > { %v599_v31 = vld [vmem:[%s4615_s30 + $0xe68] sm:$0xff]  ;;  %v600_v32 = vld [vmem:[%s4615_s30 + $0xe70] sm:$0xff]  ;;  %3661 = vst [vmem:[%s4636_s17 + $0xe18] sm:$0xff] %v2637_v21  ;;  %3662 = vst [vmem:[%s4636_s17 + $0xe20] sm:$0xff] %v2638_v22  ;;  %v2641_v33 = vmin.f32 %v1617_v24, 1.0  ;;  %v1621_v34 = vmax.f32 %v597_v25, 0.0 }
 0x16a   : > { %3663 = vst [vmem:[%s4636_s17 + $0xe28] sm:$0xff] %v2639_v23  ;;  %v1622_v35 = vmax.f32 %v598_v26, 0.0  ;;  %v1623_v36 = vmax.f32 %v599_v31, 0.0  ;;  %v601_v37 = vld [vmem:[%s4615_s30 + $0xe78] sm:$0xff]  ;;  %v602_v38 = vld [vmem:[%s4615_s30 + $0xe80] sm:$0xff]  ;;  %3664 = vst [vmem:[%s4636_s17 + $0xe30] sm:$0xff] %v2640_v27 }
 0x16b   : > { %v2642_v39 = vmin.f32 %v1618_v28, 1.0  ;;  %v2643_v40 = vmin.f32 %v1619_v29, 1.0  ;;  %v2644_v41 = vmin.f32 %v1620_v30, 1.0  ;;  %v1624_v42 = vmax.f32 %v600_v32, 0.0  ;;  %v603_v43 = vld [vmem:[%s4615_s30 + $0xe88] sm:$0xff]  ;;  %v604_v44 = vld [vmem:[%s4615_s30 + $0xe90] sm:$0xff] }
 0x16c   : > { %3665 = vst [vmem:[%s4636_s17 + $0xe38] sm:$0xff] %v2641_v33  ;;  %v2645_v45 = vmin.f32 %v1621_v34, 1.0  ;;  %v2646_v46 = vmin.f32 %v1622_v35, 1.0  ;;  %v2647_v47 = vmin.f32 %v1623_v36, 1.0  ;;  %v1625_v48 = vmax.f32 %v601_v37, 0.0  ;;  %v605_v49 = vld [vmem:[%s4615_s30 + $0xe98] sm:$0xff] }
 0x16d   : > { %v606_v50 = vld [vmem:[%s4615_s30 + $0xea0] sm:$0xff]  ;;  %3666 = vst [vmem:[%s4636_s17 + $0xe40] sm:$0xff] %v2642_v39  ;;  %3667 = vst [vmem:[%s4636_s17 + $0xe48] sm:$0xff] %v2643_v40  ;;  %v2648_v51 = vmin.f32 %v1624_v42, 1.0  ;;  %v1626_v52 = vmax.f32 %v602_v38, 0.0  ;;  %v1627_v53 = vmax.f32 %v603_v43, 0.0 }
 0x16e   : > { %3668 = vst [vmem:[%s4636_s17 + $0xe50] sm:$0xff] %v2644_v41  ;;  %v1628_v54 = vmax.f32 %v604_v44, 0.0  ;;  %v607_v55 = vld [vmem:[%s4615_s30 + $0xea8] sm:$0xff]  ;;  %v608_v56 = vld [vmem:[%s4615_s30 + $0xeb0] sm:$0xff]  ;;  %3669 = vst [vmem:[%s4636_s17 + $0xe58] sm:$0xff] %v2645_v45  ;;  %v2649_v57 = vmin.f32 %v1625_v48, 1.0 }
 0x16f   : > { %3670 = vst [vmem:[%s4636_s17 + $0xe60] sm:$0xff] %v2646_v46  ;;  %3671 = vst [vmem:[%s4636_s17 + $0xe68] sm:$0xff] %v2647_v47  ;;  %v1629_v58 = vmax.f32 %v605_v49, 0.0  ;;  %v1630_v59 = vmax.f32 %v606_v50, 0.0  ;;  %v1631_v60 = vmax.f32 %v607_v55, 0.0  ;;  %v609_v61 = vld [vmem:[%s4615_s30 + $0xeb8] sm:$0xff] }
 0x170   : > { %v610_v62 = vld [vmem:[%s4615_s30 + $0xec0] sm:$0xff]  ;;  %3672 = vst [vmem:[%s4636_s17 + $0xe70] sm:$0xff] %v2648_v51  ;;  %v2650_v63 = vmin.f32 %v1626_v52, 1.0  ;;  %v2651_v0 = vmin.f32 %v1627_v53, 1.0  ;;  %v2652_v1 = vmin.f32 %v1628_v54, 1.0  ;;  %v1632_v2 = vmax.f32 %v608_v56, 0.0 }
 0x171   : > { %v611_v3 = vld [vmem:[%s4615_s30 + $0xec8] sm:$0xff]  ;;  %v612_v4 = vld [vmem:[%s4615_s30 + $0xed0] sm:$0xff]  ;;  %3673 = vst [vmem:[%s4636_s17 + $0xe78] sm:$0xff] %v2649_v57  ;;  %v2653_v5 = vmin.f32 %v1629_v58, 1.0  ;;  %v2654_v6 = vmin.f32 %v1630_v59, 1.0  ;;  %v2655_v7 = vmin.f32 %v1631_v60, 1.0 }
 0x172   : > { %v1633_v8 = vmax.f32 %v609_v61, 0.0  ;;  %v613_v9 = vld [vmem:[%s4615_s30 + $0xed8] sm:$0xff]  ;;  %v614_v10 = vld [vmem:[%s4615_s30 + $0xee0] sm:$0xff]  ;;  %3674 = vst [vmem:[%s4636_s17 + $0xe80] sm:$0xff] %v2650_v63  ;;  %3675 = vst [vmem:[%s4636_s17 + $0xe88] sm:$0xff] %v2651_v0  ;;  %v2656_v11 = vmin.f32 %v1632_v2, 1.0 }
 0x173   : > { %3676 = vst [vmem:[%s4636_s17 + $0xe90] sm:$0xff] %v2652_v1  ;;  %v1634_v12 = vmax.f32 %v610_v62, 0.0  ;;  %v1635_v13 = vmax.f32 %v611_v3, 0.0  ;;  %v1636_v14 = vmax.f32 %v612_v4, 0.0  ;;  %v615_v15 = vld [vmem:[%s4615_s30 + $0xee8] sm:$0xff]  ;;  %v616_v16 = vld [vmem:[%s4615_s30 + $0xef0] sm:$0xff] }
 0x174   : > { %3677 = vst [vmem:[%s4636_s17 + $0xe98] sm:$0xff] %v2653_v5  ;;  %3678 = vst [vmem:[%s4636_s17 + $0xea0] sm:$0xff] %v2654_v6  ;;  %v2657_v17 = vmin.f32 %v1633_v8, 1.0  ;;  %v1637_v18 = vmax.f32 %v613_v9, 0.0  ;;  %v1638_v19 = vmax.f32 %v614_v10, 0.0  ;;  %v1639_v20 = vmax.f32 %v615_v15, 0.0 }
 0x175   : > { %3679 = vst [vmem:[%s4636_s17 + $0xea8] sm:$0xff] %v2655_v7  ;;  %v617_v21 = vld [vmem:[%s4615_s30 + $0xef8] sm:$0xff]  ;;  %v618_v22 = vld [vmem:[%s4615_s30 + $0xf00] sm:$0xff]  ;;  %3680 = vst [vmem:[%s4636_s17 + $0xeb0] sm:$0xff] %v2656_v11  ;;  %v2658_v23 = vmin.f32 %v1634_v12, 1.0  ;;  %v2659_v24 = vmin.f32 %v1635_v13, 1.0 }
 0x176   : > { %v2660_v25 = vmin.f32 %v1636_v14, 1.0  ;;  %v1640_v26 = vmax.f32 %v616_v16, 0.0  ;;  %v619_v27 = vld [vmem:[%s4615_s30 + $0xf08] sm:$0xff]  ;;  %v620_v28 = vld [vmem:[%s4615_s30 + $0xf10] sm:$0xff]  ;;  %3681 = vst [vmem:[%s4636_s17 + $0xeb8] sm:$0xff] %v2657_v17  ;;  %v2661_v29 = vmin.f32 %v1637_v18, 1.0 }
 0x177   : > { %v2662_v30 = vmin.f32 %v1638_v19, 1.0  ;;  %v2663_v31 = vmin.f32 %v1639_v20, 1.0  ;;  %v1641_v32 = vmax.f32 %v617_v21, 0.0  ;;  %v621_v33 = vld [vmem:[%s4615_s30 + $0xf18] sm:$0xff]  ;;  %v622_v34 = vld [vmem:[%s4615_s30 + $0xf20] sm:$0xff]  ;;  %3682 = vst [vmem:[%s4636_s17 + $0xec0] sm:$0xff] %v2658_v23 }
 0x178   : > { %3683 = vst [vmem:[%s4636_s17 + $0xec8] sm:$0xff] %v2659_v24  ;;  %3684 = vst [vmem:[%s4636_s17 + $0xed0] sm:$0xff] %v2660_v25  ;;  %v2664_v35 = vmin.f32 %v1640_v26, 1.0  ;;  %v1642_v36 = vmax.f32 %v618_v22, 0.0  ;;  %v1643_v37 = vmax.f32 %v619_v27, 0.0  ;;  %v1644_v38 = vmax.f32 %v620_v28, 0.0 }
 0x179   : > { %v623_v39 = vld [vmem:[%s4615_s30 + $0xf28] sm:$0xff]  ;;  %v624_v40 = vld [vmem:[%s4615_s30 + $0xf30] sm:$0xff]  ;;  %3685 = vst [vmem:[%s4636_s17 + $0xed8] sm:$0xff] %v2661_v29  ;;  %3686 = vst [vmem:[%s4636_s17 + $0xee0] sm:$0xff] %v2662_v30  ;;  %v2665_v41 = vmin.f32 %v1641_v32, 1.0  ;;  %v1645_v42 = vmax.f32 %v621_v33, 0.0 }
 0x17a   : > { %3687 = vst [vmem:[%s4636_s17 + $0xee8] sm:$0xff] %v2663_v31  ;;  %v1646_v43 = vmax.f32 %v622_v34, 0.0  ;;  %v1647_v44 = vmax.f32 %v623_v39, 0.0  ;;  %v625_v45 = vld [vmem:[%s4615_s30 + $0xf38] sm:$0xff]  ;;  %v626_v46 = vld [vmem:[%s4615_s30 + $0xf40] sm:$0xff]  ;;  %3688 = vst [vmem:[%s4636_s17 + $0xef0] sm:$0xff] %v2664_v35 }
 0x17b   : > { %v2666_v47 = vmin.f32 %v1642_v36, 1.0  ;;  %v2667_v48 = vmin.f32 %v1643_v37, 1.0  ;;  %v2668_v49 = vmin.f32 %v1644_v38, 1.0  ;;  %v1648_v50 = vmax.f32 %v624_v40, 0.0  ;;  %v627_v51 = vld [vmem:[%s4615_s30 + $0xf48] sm:$0xff]  ;;  %v628_v52 = vld [vmem:[%s4615_s30 + $0xf50] sm:$0xff] }
 0x17c   : > { %3689 = vst [vmem:[%s4636_s17 + $0xef8] sm:$0xff] %v2665_v41  ;;  %v2669_v53 = vmin.f32 %v1645_v42, 1.0  ;;  %v2670_v54 = vmin.f32 %v1646_v43, 1.0  ;;  %v2671_v55 = vmin.f32 %v1647_v44, 1.0  ;;  %v1649_v56 = vmax.f32 %v625_v45, 0.0  ;;  %v629_v57 = vld [vmem:[%s4615_s30 + $0xf58] sm:$0xff] }
 0x17d   : > { %v630_v58 = vld [vmem:[%s4615_s30 + $0xf60] sm:$0xff]  ;;  %3690 = vst [vmem:[%s4636_s17 + $0xf00] sm:$0xff] %v2666_v47  ;;  %3691 = vst [vmem:[%s4636_s17 + $0xf08] sm:$0xff] %v2667_v48  ;;  %v2672_v59 = vmin.f32 %v1648_v50, 1.0  ;;  %v1650_v60 = vmax.f32 %v626_v46, 0.0  ;;  %v1651_v61 = vmax.f32 %v627_v51, 0.0 }
 0x17e   : > { %3692 = vst [vmem:[%s4636_s17 + $0xf10] sm:$0xff] %v2668_v49  ;;  %v1652_v62 = vmax.f32 %v628_v52, 0.0  ;;  %v631_v63 = vld [vmem:[%s4615_s30 + $0xf68] sm:$0xff]  ;;  %v632_v0 = vld [vmem:[%s4615_s30 + $0xf70] sm:$0xff]  ;;  %3693 = vst [vmem:[%s4636_s17 + $0xf18] sm:$0xff] %v2669_v53  ;;  %v2673_v1 = vmin.f32 %v1649_v56, 1.0 }
 0x17f   : > { %3694 = vst [vmem:[%s4636_s17 + $0xf20] sm:$0xff] %v2670_v54  ;;  %3695 = vst [vmem:[%s4636_s17 + $0xf28] sm:$0xff] %v2671_v55  ;;  %v1653_v2 = vmax.f32 %v629_v57, 0.0  ;;  %v1654_v3 = vmax.f32 %v630_v58, 0.0  ;;  %v1655_v4 = vmax.f32 %v631_v63, 0.0  ;;  %v633_v5 = vld [vmem:[%s4615_s30 + $0xf78] sm:$0xff] }
 0x180   : > { %v634_v6 = vld [vmem:[%s4615_s30 + $0xf80] sm:$0xff]  ;;  %3696 = vst [vmem:[%s4636_s17 + $0xf30] sm:$0xff] %v2672_v59  ;;  %v2674_v7 = vmin.f32 %v1650_v60, 1.0  ;;  %v2675_v8 = vmin.f32 %v1651_v61, 1.0  ;;  %v2676_v9 = vmin.f32 %v1652_v62, 1.0  ;;  %v1656_v10 = vmax.f32 %v632_v0, 0.0 }
 0x181   : > { %v635_v11 = vld [vmem:[%s4615_s30 + $0xf88] sm:$0xff]  ;;  %v636_v12 = vld [vmem:[%s4615_s30 + $0xf90] sm:$0xff]  ;;  %3697 = vst [vmem:[%s4636_s17 + $0xf38] sm:$0xff] %v2673_v1  ;;  %v2677_v13 = vmin.f32 %v1653_v2, 1.0  ;;  %v2678_v14 = vmin.f32 %v1654_v3, 1.0  ;;  %v2679_v15 = vmin.f32 %v1655_v4, 1.0 }
 0x182   : > { %v1657_v16 = vmax.f32 %v633_v5, 0.0  ;;  %v637_v17 = vld [vmem:[%s4615_s30 + $0xf98] sm:$0xff]  ;;  %v638_v18 = vld [vmem:[%s4615_s30 + $0xfa0] sm:$0xff]  ;;  %3698 = vst [vmem:[%s4636_s17 + $0xf40] sm:$0xff] %v2674_v7  ;;  %3699 = vst [vmem:[%s4636_s17 + $0xf48] sm:$0xff] %v2675_v8  ;;  %v2680_v19 = vmin.f32 %v1656_v10, 1.0 }
 0x183   : > { %3700 = vst [vmem:[%s4636_s17 + $0xf50] sm:$0xff] %v2676_v9  ;;  %v1658_v20 = vmax.f32 %v634_v6, 0.0  ;;  %v1659_v21 = vmax.f32 %v635_v11, 0.0  ;;  %v1660_v22 = vmax.f32 %v636_v12, 0.0  ;;  %v639_v23 = vld [vmem:[%s4615_s30 + $0xfa8] sm:$0xff]  ;;  %v640_v24 = vld [vmem:[%s4615_s30 + $0xfb0] sm:$0xff] }
 0x184   : > { %3701 = vst [vmem:[%s4636_s17 + $0xf58] sm:$0xff] %v2677_v13  ;;  %3702 = vst [vmem:[%s4636_s17 + $0xf60] sm:$0xff] %v2678_v14  ;;  %v2681_v25 = vmin.f32 %v1657_v16, 1.0  ;;  %v1661_v26 = vmax.f32 %v637_v17, 0.0  ;;  %v1662_v27 = vmax.f32 %v638_v18, 0.0  ;;  %v1663_v28 = vmax.f32 %v639_v23, 0.0 }
 0x185   : > { %3703 = vst [vmem:[%s4636_s17 + $0xf68] sm:$0xff] %v2679_v15  ;;  %v641_v29 = vld [vmem:[%s4615_s30 + $0xfb8] sm:$0xff]  ;;  %v642_v30 = vld [vmem:[%s4615_s30 + $0xfc0] sm:$0xff]  ;;  %3704 = vst [vmem:[%s4636_s17 + $0xf70] sm:$0xff] %v2680_v19  ;;  %v2682_v31 = vmin.f32 %v1658_v20, 1.0  ;;  %v2683_v32 = vmin.f32 %v1659_v21, 1.0 }
 0x186   : > { %v2684_v33 = vmin.f32 %v1660_v22, 1.0  ;;  %v1664_v34 = vmax.f32 %v640_v24, 0.0  ;;  %v643_v35 = vld [vmem:[%s4615_s30 + $0xfc8] sm:$0xff]  ;;  %v644_v36 = vld [vmem:[%s4615_s30 + $0xfd0] sm:$0xff]  ;;  %3705 = vst [vmem:[%s4636_s17 + $0xf78] sm:$0xff] %v2681_v25  ;;  %v2685_v37 = vmin.f32 %v1661_v26, 1.0 }
 0x187   : > { %v2686_v38 = vmin.f32 %v1662_v27, 1.0  ;;  %v2687_v39 = vmin.f32 %v1663_v28, 1.0  ;;  %v1665_v40 = vmax.f32 %v641_v29, 0.0  ;;  %v645_v41 = vld [vmem:[%s4615_s30 + $0xfd8] sm:$0xff]  ;;  %v646_v42 = vld [vmem:[%s4615_s30 + $0xfe0] sm:$0xff]  ;;  %3706 = vst [vmem:[%s4636_s17 + $0xf80] sm:$0xff] %v2682_v31 }
 0x188   : > { %3707 = vst [vmem:[%s4636_s17 + $0xf88] sm:$0xff] %v2683_v32  ;;  %3708 = vst [vmem:[%s4636_s17 + $0xf90] sm:$0xff] %v2684_v33  ;;  %v2688_v43 = vmin.f32 %v1664_v34, 1.0  ;;  %v1666_v44 = vmax.f32 %v642_v30, 0.0  ;;  %v1667_v45 = vmax.f32 %v643_v35, 0.0  ;;  %v1668_v46 = vmax.f32 %v644_v36, 0.0 }
 0x189   : > { %v647_v47 = vld [vmem:[%s4615_s30 + $0xfe8] sm:$0xff]  ;;  %v648_v48 = vld [vmem:[%s4615_s30 + $0xff0] sm:$0xff]  ;;  %3709 = vst [vmem:[%s4636_s17 + $0xf98] sm:$0xff] %v2685_v37  ;;  %3710 = vst [vmem:[%s4636_s17 + $0xfa0] sm:$0xff] %v2686_v38  ;;  %v2689_v49 = vmin.f32 %v1665_v40, 1.0  ;;  %v1669_v50 = vmax.f32 %v645_v41, 0.0 }
 0x18a   : > { %3711 = vst [vmem:[%s4636_s17 + $0xfa8] sm:$0xff] %v2687_v39  ;;  %v1670_v51 = vmax.f32 %v646_v42, 0.0  ;;  %v1671_v52 = vmax.f32 %v647_v47, 0.0  ;;  %v649_v53 = vld [vmem:[%s4615_s30 + $0xff8] sm:$0xff]  ;;  %v650_v54 = vld [vmem:[%s4615_s30 + $0x1000] sm:$0xff]  ;;  %3712 = vst [vmem:[%s4636_s17 + $0xfb0] sm:$0xff] %v2688_v43 }
 0x18b   : > { %v2690_v55 = vmin.f32 %v1666_v44, 1.0  ;;  %v2691_v56 = vmin.f32 %v1667_v45, 1.0  ;;  %v2692_v57 = vmin.f32 %v1668_v46, 1.0  ;;  %v1672_v58 = vmax.f32 %v648_v48, 0.0  ;;  %v651_v59 = vld [vmem:[%s4615_s30 + $0x1008] sm:$0xff]  ;;  %v652_v60 = vld [vmem:[%s4615_s30 + $0x1010] sm:$0xff] }
 0x18c   : > { %3713 = vst [vmem:[%s4636_s17 + $0xfb8] sm:$0xff] %v2689_v49  ;;  %v2693_v61 = vmin.f32 %v1669_v50, 1.0  ;;  %v2694_v62 = vmin.f32 %v1670_v51, 1.0  ;;  %v2695_v63 = vmin.f32 %v1671_v52, 1.0  ;;  %v1673_v0 = vmax.f32 %v649_v53, 0.0  ;;  %v653_v1 = vld [vmem:[%s4615_s30 + $0x1018] sm:$0xff] }
 0x18d   : > { %v654_v2 = vld [vmem:[%s4615_s30 + $0x1020] sm:$0xff]  ;;  %3714 = vst [vmem:[%s4636_s17 + $0xfc0] sm:$0xff] %v2690_v55  ;;  %3715 = vst [vmem:[%s4636_s17 + $0xfc8] sm:$0xff] %v2691_v56  ;;  %v2696_v3 = vmin.f32 %v1672_v58, 1.0  ;;  %v1674_v4 = vmax.f32 %v650_v54, 0.0  ;;  %v1675_v5 = vmax.f32 %v651_v59, 0.0 }
 0x18e   : > { %3716 = vst [vmem:[%s4636_s17 + $0xfd0] sm:$0xff] %v2692_v57  ;;  %v1676_v6 = vmax.f32 %v652_v60, 0.0  ;;  %v655_v7 = vld [vmem:[%s4615_s30 + $0x1028] sm:$0xff]  ;;  %v656_v8 = vld [vmem:[%s4615_s30 + $0x1030] sm:$0xff]  ;;  %3717 = vst [vmem:[%s4636_s17 + $0xfd8] sm:$0xff] %v2693_v61  ;;  %v2697_v9 = vmin.f32 %v1673_v0, 1.0 }
 0x18f   : > { %3718 = vst [vmem:[%s4636_s17 + $0xfe0] sm:$0xff] %v2694_v62  ;;  %3719 = vst [vmem:[%s4636_s17 + $0xfe8] sm:$0xff] %v2695_v63  ;;  %v1677_v10 = vmax.f32 %v653_v1, 0.0  ;;  %v1678_v11 = vmax.f32 %v654_v2, 0.0  ;;  %v1679_v12 = vmax.f32 %v655_v7, 0.0  ;;  %v657_v13 = vld [vmem:[%s4615_s30 + $0x1038] sm:$0xff] }
 0x190   : > { %v658_v14 = vld [vmem:[%s4615_s30 + $0x1040] sm:$0xff]  ;;  %3720 = vst [vmem:[%s4636_s17 + $0xff0] sm:$0xff] %v2696_v3  ;;  %v2698_v15 = vmin.f32 %v1674_v4, 1.0  ;;  %v2699_v16 = vmin.f32 %v1675_v5, 1.0  ;;  %v2700_v17 = vmin.f32 %v1676_v6, 1.0  ;;  %v1680_v18 = vmax.f32 %v656_v8, 0.0 }
 0x191   : > { %v659_v19 = vld [vmem:[%s4615_s30 + $0x1048] sm:$0xff]  ;;  %v660_v20 = vld [vmem:[%s4615_s30 + $0x1050] sm:$0xff]  ;;  %3721 = vst [vmem:[%s4636_s17 + $0xff8] sm:$0xff] %v2697_v9  ;;  %v2701_v21 = vmin.f32 %v1677_v10, 1.0  ;;  %v2702_v22 = vmin.f32 %v1678_v11, 1.0  ;;  %v2703_v23 = vmin.f32 %v1679_v12, 1.0 }
 0x192   : > { %v1681_v24 = vmax.f32 %v657_v13, 0.0  ;;  %v661_v25 = vld [vmem:[%s4615_s30 + $0x1058] sm:$0xff]  ;;  %v662_v26 = vld [vmem:[%s4615_s30 + $0x1060] sm:$0xff]  ;;  %3722 = vst [vmem:[%s4636_s17 + $0x1000] sm:$0xff] %v2698_v15  ;;  %3723 = vst [vmem:[%s4636_s17 + $0x1008] sm:$0xff] %v2699_v16  ;;  %v2704_v27 = vmin.f32 %v1680_v18, 1.0 }
 0x193   : > { %3724 = vst [vmem:[%s4636_s17 + $0x1010] sm:$0xff] %v2700_v17  ;;  %v1682_v28 = vmax.f32 %v658_v14, 0.0  ;;  %v1683_v29 = vmax.f32 %v659_v19, 0.0  ;;  %v1684_v30 = vmax.f32 %v660_v20, 0.0  ;;  %v663_v31 = vld [vmem:[%s4615_s30 + $0x1068] sm:$0xff]  ;;  %v664_v32 = vld [vmem:[%s4615_s30 + $0x1070] sm:$0xff] }
 0x194   : > { %3725 = vst [vmem:[%s4636_s17 + $0x1018] sm:$0xff] %v2701_v21  ;;  %3726 = vst [vmem:[%s4636_s17 + $0x1020] sm:$0xff] %v2702_v22  ;;  %v2705_v33 = vmin.f32 %v1681_v24, 1.0  ;;  %v1685_v34 = vmax.f32 %v661_v25, 0.0  ;;  %v1686_v35 = vmax.f32 %v662_v26, 0.0  ;;  %v1687_v36 = vmax.f32 %v663_v31, 0.0 }
 0x195   : > { %3727 = vst [vmem:[%s4636_s17 + $0x1028] sm:$0xff] %v2703_v23  ;;  %v665_v37 = vld [vmem:[%s4615_s30 + $0x1078] sm:$0xff]  ;;  %v666_v38 = vld [vmem:[%s4615_s30 + $0x1080] sm:$0xff]  ;;  %3728 = vst [vmem:[%s4636_s17 + $0x1030] sm:$0xff] %v2704_v27  ;;  %v2706_v39 = vmin.f32 %v1682_v28, 1.0  ;;  %v2707_v40 = vmin.f32 %v1683_v29, 1.0 }
 0x196   : > { %v2708_v41 = vmin.f32 %v1684_v30, 1.0  ;;  %v1688_v42 = vmax.f32 %v664_v32, 0.0  ;;  %v667_v43 = vld [vmem:[%s4615_s30 + $0x1088] sm:$0xff]  ;;  %v668_v44 = vld [vmem:[%s4615_s30 + $0x1090] sm:$0xff]  ;;  %3729 = vst [vmem:[%s4636_s17 + $0x1038] sm:$0xff] %v2705_v33  ;;  %v2709_v45 = vmin.f32 %v1685_v34, 1.0 }
 0x197   : > { %v2710_v46 = vmin.f32 %v1686_v35, 1.0  ;;  %v2711_v47 = vmin.f32 %v1687_v36, 1.0  ;;  %v1689_v48 = vmax.f32 %v665_v37, 0.0  ;;  %v669_v49 = vld [vmem:[%s4615_s30 + $0x1098] sm:$0xff]  ;;  %v670_v50 = vld [vmem:[%s4615_s30 + $0x10a0] sm:$0xff]  ;;  %3730 = vst [vmem:[%s4636_s17 + $0x1040] sm:$0xff] %v2706_v39 }
 0x198   : > { %3731 = vst [vmem:[%s4636_s17 + $0x1048] sm:$0xff] %v2707_v40  ;;  %3732 = vst [vmem:[%s4636_s17 + $0x1050] sm:$0xff] %v2708_v41  ;;  %v2712_v51 = vmin.f32 %v1688_v42, 1.0  ;;  %v1690_v52 = vmax.f32 %v666_v38, 0.0  ;;  %v1691_v53 = vmax.f32 %v667_v43, 0.0  ;;  %v1692_v54 = vmax.f32 %v668_v44, 0.0 }
 0x199   : > { %v671_v55 = vld [vmem:[%s4615_s30 + $0x10a8] sm:$0xff]  ;;  %v672_v56 = vld [vmem:[%s4615_s30 + $0x10b0] sm:$0xff]  ;;  %3733 = vst [vmem:[%s4636_s17 + $0x1058] sm:$0xff] %v2709_v45  ;;  %3734 = vst [vmem:[%s4636_s17 + $0x1060] sm:$0xff] %v2710_v46  ;;  %v2713_v57 = vmin.f32 %v1689_v48, 1.0  ;;  %v1693_v58 = vmax.f32 %v669_v49, 0.0 }
 0x19a   : > { %3735 = vst [vmem:[%s4636_s17 + $0x1068] sm:$0xff] %v2711_v47  ;;  %v1694_v59 = vmax.f32 %v670_v50, 0.0  ;;  %v1695_v60 = vmax.f32 %v671_v55, 0.0  ;;  %v673_v61 = vld [vmem:[%s4615_s30 + $0x10b8] sm:$0xff]  ;;  %v674_v62 = vld [vmem:[%s4615_s30 + $0x10c0] sm:$0xff]  ;;  %3736 = vst [vmem:[%s4636_s17 + $0x1070] sm:$0xff] %v2712_v51 }
 0x19b   : > { %v2714_v63 = vmin.f32 %v1690_v52, 1.0  ;;  %v2715_v0 = vmin.f32 %v1691_v53, 1.0  ;;  %v2716_v1 = vmin.f32 %v1692_v54, 1.0  ;;  %v1696_v2 = vmax.f32 %v672_v56, 0.0  ;;  %v675_v3 = vld [vmem:[%s4615_s30 + $0x10c8] sm:$0xff]  ;;  %v676_v4 = vld [vmem:[%s4615_s30 + $0x10d0] sm:$0xff] }
 0x19c   : > { %3737 = vst [vmem:[%s4636_s17 + $0x1078] sm:$0xff] %v2713_v57  ;;  %v2717_v5 = vmin.f32 %v1693_v58, 1.0  ;;  %v2718_v6 = vmin.f32 %v1694_v59, 1.0  ;;  %v2719_v7 = vmin.f32 %v1695_v60, 1.0  ;;  %v1697_v8 = vmax.f32 %v673_v61, 0.0  ;;  %v677_v9 = vld [vmem:[%s4615_s30 + $0x10d8] sm:$0xff] }
 0x19d   : > { %v678_v10 = vld [vmem:[%s4615_s30 + $0x10e0] sm:$0xff]  ;;  %3738 = vst [vmem:[%s4636_s17 + $0x1080] sm:$0xff] %v2714_v63  ;;  %3739 = vst [vmem:[%s4636_s17 + $0x1088] sm:$0xff] %v2715_v0  ;;  %v2720_v11 = vmin.f32 %v1696_v2, 1.0  ;;  %v1698_v12 = vmax.f32 %v674_v62, 0.0  ;;  %v1699_v13 = vmax.f32 %v675_v3, 0.0 }
 0x19e   : > { %3740 = vst [vmem:[%s4636_s17 + $0x1090] sm:$0xff] %v2716_v1  ;;  %v1700_v14 = vmax.f32 %v676_v4, 0.0  ;;  %v679_v15 = vld [vmem:[%s4615_s30 + $0x10e8] sm:$0xff]  ;;  %v680_v16 = vld [vmem:[%s4615_s30 + $0x10f0] sm:$0xff]  ;;  %3741 = vst [vmem:[%s4636_s17 + $0x1098] sm:$0xff] %v2717_v5  ;;  %v2721_v17 = vmin.f32 %v1697_v8, 1.0 }
 0x19f   : > { %3742 = vst [vmem:[%s4636_s17 + $0x10a0] sm:$0xff] %v2718_v6  ;;  %3743 = vst [vmem:[%s4636_s17 + $0x10a8] sm:$0xff] %v2719_v7  ;;  %v1701_v18 = vmax.f32 %v677_v9, 0.0  ;;  %v1702_v19 = vmax.f32 %v678_v10, 0.0  ;;  %v1703_v20 = vmax.f32 %v679_v15, 0.0  ;;  %v681_v21 = vld [vmem:[%s4615_s30 + $0x10f8] sm:$0xff] }
 0x1a0   : > { %v682_v22 = vld [vmem:[%s4615_s30 + $0x1100] sm:$0xff]  ;;  %3744 = vst [vmem:[%s4636_s17 + $0x10b0] sm:$0xff] %v2720_v11  ;;  %v2722_v23 = vmin.f32 %v1698_v12, 1.0  ;;  %v2723_v24 = vmin.f32 %v1699_v13, 1.0  ;;  %v2724_v25 = vmin.f32 %v1700_v14, 1.0  ;;  %v1704_v26 = vmax.f32 %v680_v16, 0.0 }
 0x1a1   : > { %v683_v27 = vld [vmem:[%s4615_s30 + $0x1108] sm:$0xff]  ;;  %v684_v28 = vld [vmem:[%s4615_s30 + $0x1110] sm:$0xff]  ;;  %3745 = vst [vmem:[%s4636_s17 + $0x10b8] sm:$0xff] %v2721_v17  ;;  %v2725_v29 = vmin.f32 %v1701_v18, 1.0  ;;  %v2726_v30 = vmin.f32 %v1702_v19, 1.0  ;;  %v2727_v31 = vmin.f32 %v1703_v20, 1.0 }
 0x1a2   : > { %v1705_v32 = vmax.f32 %v681_v21, 0.0  ;;  %v685_v33 = vld [vmem:[%s4615_s30 + $0x1118] sm:$0xff]  ;;  %v686_v34 = vld [vmem:[%s4615_s30 + $0x1120] sm:$0xff]  ;;  %3746 = vst [vmem:[%s4636_s17 + $0x10c0] sm:$0xff] %v2722_v23  ;;  %3747 = vst [vmem:[%s4636_s17 + $0x10c8] sm:$0xff] %v2723_v24  ;;  %v2728_v35 = vmin.f32 %v1704_v26, 1.0 }
 0x1a3   : > { %3748 = vst [vmem:[%s4636_s17 + $0x10d0] sm:$0xff] %v2724_v25  ;;  %v1706_v36 = vmax.f32 %v682_v22, 0.0  ;;  %v1707_v37 = vmax.f32 %v683_v27, 0.0  ;;  %v1708_v38 = vmax.f32 %v684_v28, 0.0  ;;  %v687_v39 = vld [vmem:[%s4615_s30 + $0x1128] sm:$0xff]  ;;  %v688_v40 = vld [vmem:[%s4615_s30 + $0x1130] sm:$0xff] }
 0x1a4   : > { %3749 = vst [vmem:[%s4636_s17 + $0x10d8] sm:$0xff] %v2725_v29  ;;  %3750 = vst [vmem:[%s4636_s17 + $0x10e0] sm:$0xff] %v2726_v30  ;;  %v2729_v41 = vmin.f32 %v1705_v32, 1.0  ;;  %v1709_v42 = vmax.f32 %v685_v33, 0.0  ;;  %v1710_v43 = vmax.f32 %v686_v34, 0.0  ;;  %v1711_v44 = vmax.f32 %v687_v39, 0.0 }
 0x1a5   : > { %3751 = vst [vmem:[%s4636_s17 + $0x10e8] sm:$0xff] %v2727_v31  ;;  %v689_v45 = vld [vmem:[%s4615_s30 + $0x1138] sm:$0xff]  ;;  %v690_v46 = vld [vmem:[%s4615_s30 + $0x1140] sm:$0xff]  ;;  %3752 = vst [vmem:[%s4636_s17 + $0x10f0] sm:$0xff] %v2728_v35  ;;  %v2730_v47 = vmin.f32 %v1706_v36, 1.0  ;;  %v2731_v48 = vmin.f32 %v1707_v37, 1.0 }
 0x1a6   : > { %v2732_v49 = vmin.f32 %v1708_v38, 1.0  ;;  %v1712_v50 = vmax.f32 %v688_v40, 0.0  ;;  %v691_v51 = vld [vmem:[%s4615_s30 + $0x1148] sm:$0xff]  ;;  %v692_v52 = vld [vmem:[%s4615_s30 + $0x1150] sm:$0xff]  ;;  %3753 = vst [vmem:[%s4636_s17 + $0x10f8] sm:$0xff] %v2729_v41  ;;  %v2733_v53 = vmin.f32 %v1709_v42, 1.0 }
 0x1a7   : > { %v2734_v54 = vmin.f32 %v1710_v43, 1.0  ;;  %v2735_v55 = vmin.f32 %v1711_v44, 1.0  ;;  %v1713_v56 = vmax.f32 %v689_v45, 0.0  ;;  %v693_v57 = vld [vmem:[%s4615_s30 + $0x1158] sm:$0xff]  ;;  %v694_v58 = vld [vmem:[%s4615_s30 + $0x1160] sm:$0xff]  ;;  %3754 = vst [vmem:[%s4636_s17 + $0x1100] sm:$0xff] %v2730_v47 }
 0x1a8   : > { %3755 = vst [vmem:[%s4636_s17 + $0x1108] sm:$0xff] %v2731_v48  ;;  %3756 = vst [vmem:[%s4636_s17 + $0x1110] sm:$0xff] %v2732_v49  ;;  %v2736_v59 = vmin.f32 %v1712_v50, 1.0  ;;  %v1714_v60 = vmax.f32 %v690_v46, 0.0  ;;  %v1715_v61 = vmax.f32 %v691_v51, 0.0  ;;  %v1716_v62 = vmax.f32 %v692_v52, 0.0 }
 0x1a9   : > { %v695_v63 = vld [vmem:[%s4615_s30 + $0x1168] sm:$0xff]  ;;  %v696_v0 = vld [vmem:[%s4615_s30 + $0x1170] sm:$0xff]  ;;  %3757 = vst [vmem:[%s4636_s17 + $0x1118] sm:$0xff] %v2733_v53  ;;  %3758 = vst [vmem:[%s4636_s17 + $0x1120] sm:$0xff] %v2734_v54  ;;  %v2737_v1 = vmin.f32 %v1713_v56, 1.0  ;;  %v1717_v2 = vmax.f32 %v693_v57, 0.0 }
 0x1aa   : > { %3759 = vst [vmem:[%s4636_s17 + $0x1128] sm:$0xff] %v2735_v55  ;;  %v1718_v3 = vmax.f32 %v694_v58, 0.0  ;;  %v1719_v4 = vmax.f32 %v695_v63, 0.0  ;;  %v697_v5 = vld [vmem:[%s4615_s30 + $0x1178] sm:$0xff]  ;;  %v698_v6 = vld [vmem:[%s4615_s30 + $0x1180] sm:$0xff]  ;;  %3760 = vst [vmem:[%s4636_s17 + $0x1130] sm:$0xff] %v2736_v59 }
 0x1ab   : > { %v2738_v7 = vmin.f32 %v1714_v60, 1.0  ;;  %v2739_v8 = vmin.f32 %v1715_v61, 1.0  ;;  %v2740_v9 = vmin.f32 %v1716_v62, 1.0  ;;  %v1720_v10 = vmax.f32 %v696_v0, 0.0  ;;  %v699_v11 = vld [vmem:[%s4615_s30 + $0x1188] sm:$0xff]  ;;  %v700_v12 = vld [vmem:[%s4615_s30 + $0x1190] sm:$0xff] }
 0x1ac   : > { %3761 = vst [vmem:[%s4636_s17 + $0x1138] sm:$0xff] %v2737_v1  ;;  %v2741_v13 = vmin.f32 %v1717_v2, 1.0  ;;  %v2742_v14 = vmin.f32 %v1718_v3, 1.0  ;;  %v2743_v15 = vmin.f32 %v1719_v4, 1.0  ;;  %v1721_v16 = vmax.f32 %v697_v5, 0.0  ;;  %v701_v17 = vld [vmem:[%s4615_s30 + $0x1198] sm:$0xff] }
 0x1ad   : > { %v702_v18 = vld [vmem:[%s4615_s30 + $0x11a0] sm:$0xff]  ;;  %3762 = vst [vmem:[%s4636_s17 + $0x1140] sm:$0xff] %v2738_v7  ;;  %3763 = vst [vmem:[%s4636_s17 + $0x1148] sm:$0xff] %v2739_v8  ;;  %v2744_v19 = vmin.f32 %v1720_v10, 1.0  ;;  %v1722_v20 = vmax.f32 %v698_v6, 0.0  ;;  %v1723_v21 = vmax.f32 %v699_v11, 0.0 }
 0x1ae   : > { %3764 = vst [vmem:[%s4636_s17 + $0x1150] sm:$0xff] %v2740_v9  ;;  %v1724_v22 = vmax.f32 %v700_v12, 0.0  ;;  %v703_v23 = vld [vmem:[%s4615_s30 + $0x11a8] sm:$0xff]  ;;  %v704_v24 = vld [vmem:[%s4615_s30 + $0x11b0] sm:$0xff]  ;;  %3765 = vst [vmem:[%s4636_s17 + $0x1158] sm:$0xff] %v2741_v13  ;;  %v2745_v25 = vmin.f32 %v1721_v16, 1.0 }
 0x1af   : > { %3766 = vst [vmem:[%s4636_s17 + $0x1160] sm:$0xff] %v2742_v14  ;;  %3767 = vst [vmem:[%s4636_s17 + $0x1168] sm:$0xff] %v2743_v15  ;;  %v1725_v26 = vmax.f32 %v701_v17, 0.0  ;;  %v1726_v27 = vmax.f32 %v702_v18, 0.0  ;;  %v1727_v28 = vmax.f32 %v703_v23, 0.0  ;;  %v705_v29 = vld [vmem:[%s4615_s30 + $0x11b8] sm:$0xff] }
 0x1b0   : > { %v706_v30 = vld [vmem:[%s4615_s30 + $0x11c0] sm:$0xff]  ;;  %3768 = vst [vmem:[%s4636_s17 + $0x1170] sm:$0xff] %v2744_v19  ;;  %v2746_v31 = vmin.f32 %v1722_v20, 1.0  ;;  %v2747_v32 = vmin.f32 %v1723_v21, 1.0  ;;  %v2748_v33 = vmin.f32 %v1724_v22, 1.0  ;;  %v1728_v34 = vmax.f32 %v704_v24, 0.0 }
 0x1b1   : > { %v707_v35 = vld [vmem:[%s4615_s30 + $0x11c8] sm:$0xff]  ;;  %v708_v36 = vld [vmem:[%s4615_s30 + $0x11d0] sm:$0xff]  ;;  %3769 = vst [vmem:[%s4636_s17 + $0x1178] sm:$0xff] %v2745_v25  ;;  %v2749_v37 = vmin.f32 %v1725_v26, 1.0  ;;  %v2750_v38 = vmin.f32 %v1726_v27, 1.0  ;;  %v2751_v39 = vmin.f32 %v1727_v28, 1.0 }
 0x1b2   : > { %v1729_v40 = vmax.f32 %v705_v29, 0.0  ;;  %v709_v41 = vld [vmem:[%s4615_s30 + $0x11d8] sm:$0xff]  ;;  %v710_v42 = vld [vmem:[%s4615_s30 + $0x11e0] sm:$0xff]  ;;  %3770 = vst [vmem:[%s4636_s17 + $0x1180] sm:$0xff] %v2746_v31  ;;  %3771 = vst [vmem:[%s4636_s17 + $0x1188] sm:$0xff] %v2747_v32  ;;  %v2752_v43 = vmin.f32 %v1728_v34, 1.0 }
 0x1b3   : > { %3772 = vst [vmem:[%s4636_s17 + $0x1190] sm:$0xff] %v2748_v33  ;;  %v1730_v44 = vmax.f32 %v706_v30, 0.0  ;;  %v1731_v45 = vmax.f32 %v707_v35, 0.0  ;;  %v1732_v46 = vmax.f32 %v708_v36, 0.0  ;;  %v711_v47 = vld [vmem:[%s4615_s30 + $0x11e8] sm:$0xff]  ;;  %v712_v48 = vld [vmem:[%s4615_s30 + $0x11f0] sm:$0xff] }
 0x1b4   : > { %3773 = vst [vmem:[%s4636_s17 + $0x1198] sm:$0xff] %v2749_v37  ;;  %3774 = vst [vmem:[%s4636_s17 + $0x11a0] sm:$0xff] %v2750_v38  ;;  %v2753_v49 = vmin.f32 %v1729_v40, 1.0  ;;  %v1733_v50 = vmax.f32 %v709_v41, 0.0  ;;  %v1734_v51 = vmax.f32 %v710_v42, 0.0  ;;  %v1735_v52 = vmax.f32 %v711_v47, 0.0 }
 0x1b5   : > { %3775 = vst [vmem:[%s4636_s17 + $0x11a8] sm:$0xff] %v2751_v39  ;;  %v713_v53 = vld [vmem:[%s4615_s30 + $0x11f8] sm:$0xff]  ;;  %v714_v54 = vld [vmem:[%s4615_s30 + $0x1200] sm:$0xff]  ;;  %3776 = vst [vmem:[%s4636_s17 + $0x11b0] sm:$0xff] %v2752_v43  ;;  %v2754_v55 = vmin.f32 %v1730_v44, 1.0  ;;  %v2755_v56 = vmin.f32 %v1731_v45, 1.0 }
 0x1b6   : > { %v2756_v57 = vmin.f32 %v1732_v46, 1.0  ;;  %v1736_v58 = vmax.f32 %v712_v48, 0.0  ;;  %v715_v59 = vld [vmem:[%s4615_s30 + $0x1208] sm:$0xff]  ;;  %v716_v60 = vld [vmem:[%s4615_s30 + $0x1210] sm:$0xff]  ;;  %3777 = vst [vmem:[%s4636_s17 + $0x11b8] sm:$0xff] %v2753_v49  ;;  %v2757_v61 = vmin.f32 %v1733_v50, 1.0 }
 0x1b7   : > { %v2758_v62 = vmin.f32 %v1734_v51, 1.0  ;;  %v2759_v63 = vmin.f32 %v1735_v52, 1.0  ;;  %v1737_v0 = vmax.f32 %v713_v53, 0.0  ;;  %v717_v1 = vld [vmem:[%s4615_s30 + $0x1218] sm:$0xff]  ;;  %v718_v2 = vld [vmem:[%s4615_s30 + $0x1220] sm:$0xff]  ;;  %3778 = vst [vmem:[%s4636_s17 + $0x11c0] sm:$0xff] %v2754_v55 }
 0x1b8   : > { %3779 = vst [vmem:[%s4636_s17 + $0x11c8] sm:$0xff] %v2755_v56  ;;  %3780 = vst [vmem:[%s4636_s17 + $0x11d0] sm:$0xff] %v2756_v57  ;;  %v2760_v3 = vmin.f32 %v1736_v58, 1.0  ;;  %v1738_v4 = vmax.f32 %v714_v54, 0.0  ;;  %v1739_v5 = vmax.f32 %v715_v59, 0.0  ;;  %v1740_v6 = vmax.f32 %v716_v60, 0.0 }
 0x1b9   : > { %v719_v7 = vld [vmem:[%s4615_s30 + $0x1228] sm:$0xff]  ;;  %v720_v8 = vld [vmem:[%s4615_s30 + $0x1230] sm:$0xff]  ;;  %3781 = vst [vmem:[%s4636_s17 + $0x11d8] sm:$0xff] %v2757_v61  ;;  %3782 = vst [vmem:[%s4636_s17 + $0x11e0] sm:$0xff] %v2758_v62  ;;  %v2761_v9 = vmin.f32 %v1737_v0, 1.0  ;;  %v1741_v10 = vmax.f32 %v717_v1, 0.0 }
 0x1ba   : > { %3783 = vst [vmem:[%s4636_s17 + $0x11e8] sm:$0xff] %v2759_v63  ;;  %v1742_v11 = vmax.f32 %v718_v2, 0.0  ;;  %v1743_v12 = vmax.f32 %v719_v7, 0.0  ;;  %v721_v13 = vld [vmem:[%s4615_s30 + $0x1238] sm:$0xff]  ;;  %v722_v14 = vld [vmem:[%s4615_s30 + $0x1240] sm:$0xff]  ;;  %3784 = vst [vmem:[%s4636_s17 + $0x11f0] sm:$0xff] %v2760_v3 }
 0x1bb   : > { %v2762_v15 = vmin.f32 %v1738_v4, 1.0  ;;  %v2763_v16 = vmin.f32 %v1739_v5, 1.0  ;;  %v2764_v17 = vmin.f32 %v1740_v6, 1.0  ;;  %v1744_v18 = vmax.f32 %v720_v8, 0.0  ;;  %v723_v19 = vld [vmem:[%s4615_s30 + $0x1248] sm:$0xff]  ;;  %v724_v20 = vld [vmem:[%s4615_s30 + $0x1250] sm:$0xff] }
 0x1bc   : > { %3785 = vst [vmem:[%s4636_s17 + $0x11f8] sm:$0xff] %v2761_v9  ;;  %v2765_v21 = vmin.f32 %v1741_v10, 1.0  ;;  %v2766_v22 = vmin.f32 %v1742_v11, 1.0  ;;  %v2767_v23 = vmin.f32 %v1743_v12, 1.0  ;;  %v1745_v24 = vmax.f32 %v721_v13, 0.0  ;;  %v725_v25 = vld [vmem:[%s4615_s30 + $0x1258] sm:$0xff] }
 0x1bd   : > { %v726_v26 = vld [vmem:[%s4615_s30 + $0x1260] sm:$0xff]  ;;  %3786 = vst [vmem:[%s4636_s17 + $0x1200] sm:$0xff] %v2762_v15  ;;  %3787 = vst [vmem:[%s4636_s17 + $0x1208] sm:$0xff] %v2763_v16  ;;  %v2768_v27 = vmin.f32 %v1744_v18, 1.0  ;;  %v1746_v28 = vmax.f32 %v722_v14, 0.0  ;;  %v1747_v29 = vmax.f32 %v723_v19, 0.0 }
 0x1be   : > { %3788 = vst [vmem:[%s4636_s17 + $0x1210] sm:$0xff] %v2764_v17  ;;  %v1748_v30 = vmax.f32 %v724_v20, 0.0  ;;  %v727_v31 = vld [vmem:[%s4615_s30 + $0x1268] sm:$0xff]  ;;  %v728_v32 = vld [vmem:[%s4615_s30 + $0x1270] sm:$0xff]  ;;  %3789 = vst [vmem:[%s4636_s17 + $0x1218] sm:$0xff] %v2765_v21  ;;  %v2769_v33 = vmin.f32 %v1745_v24, 1.0 }
 0x1bf   : > { %3790 = vst [vmem:[%s4636_s17 + $0x1220] sm:$0xff] %v2766_v22  ;;  %3791 = vst [vmem:[%s4636_s17 + $0x1228] sm:$0xff] %v2767_v23  ;;  %v1749_v34 = vmax.f32 %v725_v25, 0.0  ;;  %v1750_v35 = vmax.f32 %v726_v26, 0.0  ;;  %v1751_v36 = vmax.f32 %v727_v31, 0.0  ;;  %v729_v37 = vld [vmem:[%s4615_s30 + $0x1278] sm:$0xff] }
 0x1c0   : > { %v730_v38 = vld [vmem:[%s4615_s30 + $0x1280] sm:$0xff]  ;;  %3792 = vst [vmem:[%s4636_s17 + $0x1230] sm:$0xff] %v2768_v27  ;;  %v2770_v39 = vmin.f32 %v1746_v28, 1.0  ;;  %v2771_v40 = vmin.f32 %v1747_v29, 1.0  ;;  %v2772_v41 = vmin.f32 %v1748_v30, 1.0  ;;  %v1752_v42 = vmax.f32 %v728_v32, 0.0 }
 0x1c1   : > { %v731_v43 = vld [vmem:[%s4615_s30 + $0x1288] sm:$0xff]  ;;  %v732_v44 = vld [vmem:[%s4615_s30 + $0x1290] sm:$0xff]  ;;  %3793 = vst [vmem:[%s4636_s17 + $0x1238] sm:$0xff] %v2769_v33  ;;  %v2773_v45 = vmin.f32 %v1749_v34, 1.0  ;;  %v2774_v46 = vmin.f32 %v1750_v35, 1.0  ;;  %v2775_v47 = vmin.f32 %v1751_v36, 1.0 }
 0x1c2   : > { %v1753_v48 = vmax.f32 %v729_v37, 0.0  ;;  %v733_v49 = vld [vmem:[%s4615_s30 + $0x1298] sm:$0xff]  ;;  %v734_v50 = vld [vmem:[%s4615_s30 + $0x12a0] sm:$0xff]  ;;  %3794 = vst [vmem:[%s4636_s17 + $0x1240] sm:$0xff] %v2770_v39  ;;  %3795 = vst [vmem:[%s4636_s17 + $0x1248] sm:$0xff] %v2771_v40  ;;  %v2776_v51 = vmin.f32 %v1752_v42, 1.0 }
 0x1c3   : > { %3796 = vst [vmem:[%s4636_s17 + $0x1250] sm:$0xff] %v2772_v41  ;;  %v1754_v52 = vmax.f32 %v730_v38, 0.0  ;;  %v1755_v53 = vmax.f32 %v731_v43, 0.0  ;;  %v1756_v54 = vmax.f32 %v732_v44, 0.0  ;;  %v735_v55 = vld [vmem:[%s4615_s30 + $0x12a8] sm:$0xff]  ;;  %v736_v56 = vld [vmem:[%s4615_s30 + $0x12b0] sm:$0xff] }
 0x1c4   : > { %3797 = vst [vmem:[%s4636_s17 + $0x1258] sm:$0xff] %v2773_v45  ;;  %3798 = vst [vmem:[%s4636_s17 + $0x1260] sm:$0xff] %v2774_v46  ;;  %v2777_v57 = vmin.f32 %v1753_v48, 1.0  ;;  %v1757_v58 = vmax.f32 %v733_v49, 0.0  ;;  %v1758_v59 = vmax.f32 %v734_v50, 0.0  ;;  %v1759_v60 = vmax.f32 %v735_v55, 0.0 }
 0x1c5   : > { %3799 = vst [vmem:[%s4636_s17 + $0x1268] sm:$0xff] %v2775_v47  ;;  %v737_v61 = vld [vmem:[%s4615_s30 + $0x12b8] sm:$0xff]  ;;  %v738_v62 = vld [vmem:[%s4615_s30 + $0x12c0] sm:$0xff]  ;;  %3800 = vst [vmem:[%s4636_s17 + $0x1270] sm:$0xff] %v2776_v51  ;;  %v2778_v63 = vmin.f32 %v1754_v52, 1.0  ;;  %v2779_v0 = vmin.f32 %v1755_v53, 1.0 }
 0x1c6   : > { %v2780_v1 = vmin.f32 %v1756_v54, 1.0  ;;  %v1760_v2 = vmax.f32 %v736_v56, 0.0  ;;  %v739_v3 = vld [vmem:[%s4615_s30 + $0x12c8] sm:$0xff]  ;;  %v740_v4 = vld [vmem:[%s4615_s30 + $0x12d0] sm:$0xff]  ;;  %3801 = vst [vmem:[%s4636_s17 + $0x1278] sm:$0xff] %v2777_v57  ;;  %v2781_v5 = vmin.f32 %v1757_v58, 1.0 }
 0x1c7   : > { %v2782_v6 = vmin.f32 %v1758_v59, 1.0  ;;  %v2783_v7 = vmin.f32 %v1759_v60, 1.0  ;;  %v1761_v8 = vmax.f32 %v737_v61, 0.0  ;;  %v741_v9 = vld [vmem:[%s4615_s30 + $0x12d8] sm:$0xff]  ;;  %v742_v10 = vld [vmem:[%s4615_s30 + $0x12e0] sm:$0xff]  ;;  %3802 = vst [vmem:[%s4636_s17 + $0x1280] sm:$0xff] %v2778_v63 }
 0x1c8   : > { %3803 = vst [vmem:[%s4636_s17 + $0x1288] sm:$0xff] %v2779_v0  ;;  %3804 = vst [vmem:[%s4636_s17 + $0x1290] sm:$0xff] %v2780_v1  ;;  %v2784_v11 = vmin.f32 %v1760_v2, 1.0  ;;  %v1762_v12 = vmax.f32 %v738_v62, 0.0  ;;  %v1763_v13 = vmax.f32 %v739_v3, 0.0  ;;  %v1764_v14 = vmax.f32 %v740_v4, 0.0 }
 0x1c9   : > { %v743_v15 = vld [vmem:[%s4615_s30 + $0x12e8] sm:$0xff]  ;;  %v744_v16 = vld [vmem:[%s4615_s30 + $0x12f0] sm:$0xff]  ;;  %3805 = vst [vmem:[%s4636_s17 + $0x1298] sm:$0xff] %v2781_v5  ;;  %3806 = vst [vmem:[%s4636_s17 + $0x12a0] sm:$0xff] %v2782_v6  ;;  %v2785_v17 = vmin.f32 %v1761_v8, 1.0  ;;  %v1765_v18 = vmax.f32 %v741_v9, 0.0 }
 0x1ca   : > { %3807 = vst [vmem:[%s4636_s17 + $0x12a8] sm:$0xff] %v2783_v7  ;;  %v1766_v19 = vmax.f32 %v742_v10, 0.0  ;;  %v1767_v20 = vmax.f32 %v743_v15, 0.0  ;;  %v745_v21 = vld [vmem:[%s4615_s30 + $0x12f8] sm:$0xff]  ;;  %v746_v22 = vld [vmem:[%s4615_s30 + $0x1300] sm:$0xff]  ;;  %3808 = vst [vmem:[%s4636_s17 + $0x12b0] sm:$0xff] %v2784_v11 }
 0x1cb   : > { %v2786_v23 = vmin.f32 %v1762_v12, 1.0  ;;  %v2787_v24 = vmin.f32 %v1763_v13, 1.0  ;;  %v2788_v25 = vmin.f32 %v1764_v14, 1.0  ;;  %v1768_v26 = vmax.f32 %v744_v16, 0.0  ;;  %v747_v27 = vld [vmem:[%s4615_s30 + $0x1308] sm:$0xff]  ;;  %v748_v28 = vld [vmem:[%s4615_s30 + $0x1310] sm:$0xff] }
 0x1cc   : > { %3809 = vst [vmem:[%s4636_s17 + $0x12b8] sm:$0xff] %v2785_v17  ;;  %v2789_v29 = vmin.f32 %v1765_v18, 1.0  ;;  %v2790_v30 = vmin.f32 %v1766_v19, 1.0  ;;  %v2791_v31 = vmin.f32 %v1767_v20, 1.0  ;;  %v1769_v32 = vmax.f32 %v745_v21, 0.0  ;;  %v749_v33 = vld [vmem:[%s4615_s30 + $0x1318] sm:$0xff] }
 0x1cd   : > { %v750_v34 = vld [vmem:[%s4615_s30 + $0x1320] sm:$0xff]  ;;  %3810 = vst [vmem:[%s4636_s17 + $0x12c0] sm:$0xff] %v2786_v23  ;;  %3811 = vst [vmem:[%s4636_s17 + $0x12c8] sm:$0xff] %v2787_v24  ;;  %v2792_v35 = vmin.f32 %v1768_v26, 1.0  ;;  %v1770_v36 = vmax.f32 %v746_v22, 0.0  ;;  %v1771_v37 = vmax.f32 %v747_v27, 0.0 }
 0x1ce   : > { %3812 = vst [vmem:[%s4636_s17 + $0x12d0] sm:$0xff] %v2788_v25  ;;  %v1772_v38 = vmax.f32 %v748_v28, 0.0  ;;  %v751_v39 = vld [vmem:[%s4615_s30 + $0x1328] sm:$0xff]  ;;  %v752_v40 = vld [vmem:[%s4615_s30 + $0x1330] sm:$0xff]  ;;  %3813 = vst [vmem:[%s4636_s17 + $0x12d8] sm:$0xff] %v2789_v29  ;;  %v2793_v41 = vmin.f32 %v1769_v32, 1.0 }
 0x1cf   : > { %3814 = vst [vmem:[%s4636_s17 + $0x12e0] sm:$0xff] %v2790_v30  ;;  %3815 = vst [vmem:[%s4636_s17 + $0x12e8] sm:$0xff] %v2791_v31  ;;  %v1773_v42 = vmax.f32 %v749_v33, 0.0  ;;  %v1774_v43 = vmax.f32 %v750_v34, 0.0  ;;  %v1775_v44 = vmax.f32 %v751_v39, 0.0  ;;  %v753_v45 = vld [vmem:[%s4615_s30 + $0x1338] sm:$0xff] }
 0x1d0   : > { %v754_v46 = vld [vmem:[%s4615_s30 + $0x1340] sm:$0xff]  ;;  %3816 = vst [vmem:[%s4636_s17 + $0x12f0] sm:$0xff] %v2792_v35  ;;  %v2794_v47 = vmin.f32 %v1770_v36, 1.0  ;;  %v2795_v48 = vmin.f32 %v1771_v37, 1.0  ;;  %v2796_v49 = vmin.f32 %v1772_v38, 1.0  ;;  %v1776_v50 = vmax.f32 %v752_v40, 0.0 }
 0x1d1   : > { %v755_v51 = vld [vmem:[%s4615_s30 + $0x1348] sm:$0xff]  ;;  %v756_v52 = vld [vmem:[%s4615_s30 + $0x1350] sm:$0xff]  ;;  %3817 = vst [vmem:[%s4636_s17 + $0x12f8] sm:$0xff] %v2793_v41  ;;  %v2797_v53 = vmin.f32 %v1773_v42, 1.0  ;;  %v2798_v54 = vmin.f32 %v1774_v43, 1.0  ;;  %v2799_v55 = vmin.f32 %v1775_v44, 1.0 }
 0x1d2   : > { %v1777_v56 = vmax.f32 %v753_v45, 0.0  ;;  %v757_v57 = vld [vmem:[%s4615_s30 + $0x1358] sm:$0xff]  ;;  %v758_v58 = vld [vmem:[%s4615_s30 + $0x1360] sm:$0xff]  ;;  %3818 = vst [vmem:[%s4636_s17 + $0x1300] sm:$0xff] %v2794_v47  ;;  %3819 = vst [vmem:[%s4636_s17 + $0x1308] sm:$0xff] %v2795_v48  ;;  %v2800_v59 = vmin.f32 %v1776_v50, 1.0 }
 0x1d3   : > { %3820 = vst [vmem:[%s4636_s17 + $0x1310] sm:$0xff] %v2796_v49  ;;  %v1778_v60 = vmax.f32 %v754_v46, 0.0  ;;  %v1779_v61 = vmax.f32 %v755_v51, 0.0  ;;  %v1780_v62 = vmax.f32 %v756_v52, 0.0  ;;  %v759_v63 = vld [vmem:[%s4615_s30 + $0x1368] sm:$0xff]  ;;  %v760_v0 = vld [vmem:[%s4615_s30 + $0x1370] sm:$0xff] }
 0x1d4   : > { %3821 = vst [vmem:[%s4636_s17 + $0x1318] sm:$0xff] %v2797_v53  ;;  %3822 = vst [vmem:[%s4636_s17 + $0x1320] sm:$0xff] %v2798_v54  ;;  %v2801_v1 = vmin.f32 %v1777_v56, 1.0  ;;  %v1781_v2 = vmax.f32 %v757_v57, 0.0  ;;  %v1782_v3 = vmax.f32 %v758_v58, 0.0  ;;  %v1783_v4 = vmax.f32 %v759_v63, 0.0 }
 0x1d5   : > { %3823 = vst [vmem:[%s4636_s17 + $0x1328] sm:$0xff] %v2799_v55  ;;  %v761_v5 = vld [vmem:[%s4615_s30 + $0x1378] sm:$0xff]  ;;  %v762_v6 = vld [vmem:[%s4615_s30 + $0x1380] sm:$0xff]  ;;  %3824 = vst [vmem:[%s4636_s17 + $0x1330] sm:$0xff] %v2800_v59  ;;  %v2802_v7 = vmin.f32 %v1778_v60, 1.0  ;;  %v2803_v8 = vmin.f32 %v1779_v61, 1.0 }
 0x1d6   : > { %v2804_v9 = vmin.f32 %v1780_v62, 1.0  ;;  %v1784_v10 = vmax.f32 %v760_v0, 0.0  ;;  %v763_v11 = vld [vmem:[%s4615_s30 + $0x1388] sm:$0xff]  ;;  %v764_v12 = vld [vmem:[%s4615_s30 + $0x1390] sm:$0xff]  ;;  %3825 = vst [vmem:[%s4636_s17 + $0x1338] sm:$0xff] %v2801_v1  ;;  %v2805_v13 = vmin.f32 %v1781_v2, 1.0 }
 0x1d7   : > { %v2806_v14 = vmin.f32 %v1782_v3, 1.0  ;;  %v2807_v15 = vmin.f32 %v1783_v4, 1.0  ;;  %v1785_v16 = vmax.f32 %v761_v5, 0.0  ;;  %v765_v17 = vld [vmem:[%s4615_s30 + $0x1398] sm:$0xff]  ;;  %v766_v18 = vld [vmem:[%s4615_s30 + $0x13a0] sm:$0xff]  ;;  %3826 = vst [vmem:[%s4636_s17 + $0x1340] sm:$0xff] %v2802_v7 }
 0x1d8   : > { %3827 = vst [vmem:[%s4636_s17 + $0x1348] sm:$0xff] %v2803_v8  ;;  %3828 = vst [vmem:[%s4636_s17 + $0x1350] sm:$0xff] %v2804_v9  ;;  %v2808_v19 = vmin.f32 %v1784_v10, 1.0  ;;  %v1786_v20 = vmax.f32 %v762_v6, 0.0  ;;  %v1787_v21 = vmax.f32 %v763_v11, 0.0  ;;  %v1788_v22 = vmax.f32 %v764_v12, 0.0 }
 0x1d9   : > { %v767_v23 = vld [vmem:[%s4615_s30 + $0x13a8] sm:$0xff]  ;;  %v768_v24 = vld [vmem:[%s4615_s30 + $0x13b0] sm:$0xff]  ;;  %3829 = vst [vmem:[%s4636_s17 + $0x1358] sm:$0xff] %v2805_v13  ;;  %3830 = vst [vmem:[%s4636_s17 + $0x1360] sm:$0xff] %v2806_v14  ;;  %v2809_v25 = vmin.f32 %v1785_v16, 1.0  ;;  %v1789_v26 = vmax.f32 %v765_v17, 0.0 }
 0x1da   : > { %3831 = vst [vmem:[%s4636_s17 + $0x1368] sm:$0xff] %v2807_v15  ;;  %v1790_v27 = vmax.f32 %v766_v18, 0.0  ;;  %v1791_v28 = vmax.f32 %v767_v23, 0.0  ;;  %v769_v29 = vld [vmem:[%s4615_s30 + $0x13b8] sm:$0xff]  ;;  %v770_v30 = vld [vmem:[%s4615_s30 + $0x13c0] sm:$0xff]  ;;  %3832 = vst [vmem:[%s4636_s17 + $0x1370] sm:$0xff] %v2808_v19 }
 0x1db   : > { %v2810_v31 = vmin.f32 %v1786_v20, 1.0  ;;  %v2811_v32 = vmin.f32 %v1787_v21, 1.0  ;;  %v2812_v33 = vmin.f32 %v1788_v22, 1.0  ;;  %v1792_v34 = vmax.f32 %v768_v24, 0.0  ;;  %v771_v35 = vld [vmem:[%s4615_s30 + $0x13c8] sm:$0xff]  ;;  %v772_v36 = vld [vmem:[%s4615_s30 + $0x13d0] sm:$0xff] }
 0x1dc   : > { %3833 = vst [vmem:[%s4636_s17 + $0x1378] sm:$0xff] %v2809_v25  ;;  %v2813_v37 = vmin.f32 %v1789_v26, 1.0  ;;  %v2814_v38 = vmin.f32 %v1790_v27, 1.0  ;;  %v2815_v39 = vmin.f32 %v1791_v28, 1.0  ;;  %v1793_v40 = vmax.f32 %v769_v29, 0.0  ;;  %v773_v41 = vld [vmem:[%s4615_s30 + $0x13d8] sm:$0xff] }
 0x1dd   : > { %v774_v42 = vld [vmem:[%s4615_s30 + $0x13e0] sm:$0xff]  ;;  %3834 = vst [vmem:[%s4636_s17 + $0x1380] sm:$0xff] %v2810_v31  ;;  %3835 = vst [vmem:[%s4636_s17 + $0x1388] sm:$0xff] %v2811_v32  ;;  %v2816_v43 = vmin.f32 %v1792_v34, 1.0  ;;  %v1794_v44 = vmax.f32 %v770_v30, 0.0  ;;  %v1795_v45 = vmax.f32 %v771_v35, 0.0 }
 0x1de   : > { %3836 = vst [vmem:[%s4636_s17 + $0x1390] sm:$0xff] %v2812_v33  ;;  %v1796_v46 = vmax.f32 %v772_v36, 0.0  ;;  %v775_v47 = vld [vmem:[%s4615_s30 + $0x13e8] sm:$0xff]  ;;  %v776_v48 = vld [vmem:[%s4615_s30 + $0x13f0] sm:$0xff]  ;;  %3837 = vst [vmem:[%s4636_s17 + $0x1398] sm:$0xff] %v2813_v37  ;;  %v2817_v49 = vmin.f32 %v1793_v40, 1.0 }
 0x1df   : > { %3838 = vst [vmem:[%s4636_s17 + $0x13a0] sm:$0xff] %v2814_v38  ;;  %3839 = vst [vmem:[%s4636_s17 + $0x13a8] sm:$0xff] %v2815_v39  ;;  %v1797_v50 = vmax.f32 %v773_v41, 0.0  ;;  %v1798_v51 = vmax.f32 %v774_v42, 0.0  ;;  %v1799_v52 = vmax.f32 %v775_v47, 0.0  ;;  %v777_v53 = vld [vmem:[%s4615_s30 + $0x13f8] sm:$0xff] }
 0x1e0   : > { %v778_v54 = vld [vmem:[%s4615_s30 + $0x1400] sm:$0xff]  ;;  %3840 = vst [vmem:[%s4636_s17 + $0x13b0] sm:$0xff] %v2816_v43  ;;  %v2818_v55 = vmin.f32 %v1794_v44, 1.0  ;;  %v2819_v56 = vmin.f32 %v1795_v45, 1.0  ;;  %v2820_v57 = vmin.f32 %v1796_v46, 1.0  ;;  %v1800_v58 = vmax.f32 %v776_v48, 0.0 }
 0x1e1   : > { %v779_v59 = vld [vmem:[%s4615_s30 + $0x1408] sm:$0xff]  ;;  %v780_v60 = vld [vmem:[%s4615_s30 + $0x1410] sm:$0xff]  ;;  %3841 = vst [vmem:[%s4636_s17 + $0x13b8] sm:$0xff] %v2817_v49  ;;  %v2821_v61 = vmin.f32 %v1797_v50, 1.0  ;;  %v2822_v62 = vmin.f32 %v1798_v51, 1.0  ;;  %v2823_v63 = vmin.f32 %v1799_v52, 1.0 }
 0x1e2   : > { %v1801_v0 = vmax.f32 %v777_v53, 0.0  ;;  %v781_v1 = vld [vmem:[%s4615_s30 + $0x1418] sm:$0xff]  ;;  %v782_v2 = vld [vmem:[%s4615_s30 + $0x1420] sm:$0xff]  ;;  %3842 = vst [vmem:[%s4636_s17 + $0x13c0] sm:$0xff] %v2818_v55  ;;  %3843 = vst [vmem:[%s4636_s17 + $0x13c8] sm:$0xff] %v2819_v56  ;;  %v2824_v3 = vmin.f32 %v1800_v58, 1.0 }
 0x1e3   : > { %3844 = vst [vmem:[%s4636_s17 + $0x13d0] sm:$0xff] %v2820_v57  ;;  %v1802_v4 = vmax.f32 %v778_v54, 0.0  ;;  %v1803_v5 = vmax.f32 %v779_v59, 0.0  ;;  %v1804_v6 = vmax.f32 %v780_v60, 0.0  ;;  %v783_v7 = vld [vmem:[%s4615_s30 + $0x1428] sm:$0xff]  ;;  %v784_v8 = vld [vmem:[%s4615_s30 + $0x1430] sm:$0xff] }
 0x1e4   : > { %3845 = vst [vmem:[%s4636_s17 + $0x13d8] sm:$0xff] %v2821_v61  ;;  %3846 = vst [vmem:[%s4636_s17 + $0x13e0] sm:$0xff] %v2822_v62  ;;  %v2825_v9 = vmin.f32 %v1801_v0, 1.0  ;;  %v1805_v10 = vmax.f32 %v781_v1, 0.0  ;;  %v1806_v11 = vmax.f32 %v782_v2, 0.0  ;;  %v1807_v12 = vmax.f32 %v783_v7, 0.0 }
 0x1e5   : > { %3847 = vst [vmem:[%s4636_s17 + $0x13e8] sm:$0xff] %v2823_v63  ;;  %v785_v13 = vld [vmem:[%s4615_s30 + $0x1438] sm:$0xff]  ;;  %v786_v14 = vld [vmem:[%s4615_s30 + $0x1440] sm:$0xff]  ;;  %3848 = vst [vmem:[%s4636_s17 + $0x13f0] sm:$0xff] %v2824_v3  ;;  %v2826_v15 = vmin.f32 %v1802_v4, 1.0  ;;  %v2827_v16 = vmin.f32 %v1803_v5, 1.0 }
 0x1e6   : > { %v2828_v17 = vmin.f32 %v1804_v6, 1.0  ;;  %v1808_v18 = vmax.f32 %v784_v8, 0.0  ;;  %v787_v19 = vld [vmem:[%s4615_s30 + $0x1448] sm:$0xff]  ;;  %v788_v20 = vld [vmem:[%s4615_s30 + $0x1450] sm:$0xff]  ;;  %3849 = vst [vmem:[%s4636_s17 + $0x13f8] sm:$0xff] %v2825_v9  ;;  %v2829_v21 = vmin.f32 %v1805_v10, 1.0 }
 0x1e7   : > { %v2830_v22 = vmin.f32 %v1806_v11, 1.0  ;;  %v2831_v23 = vmin.f32 %v1807_v12, 1.0  ;;  %v1809_v24 = vmax.f32 %v785_v13, 0.0  ;;  %v789_v25 = vld [vmem:[%s4615_s30 + $0x1458] sm:$0xff]  ;;  %v790_v26 = vld [vmem:[%s4615_s30 + $0x1460] sm:$0xff]  ;;  %3850 = vst [vmem:[%s4636_s17 + $0x1400] sm:$0xff] %v2826_v15 }
 0x1e8   : > { %3851 = vst [vmem:[%s4636_s17 + $0x1408] sm:$0xff] %v2827_v16  ;;  %3852 = vst [vmem:[%s4636_s17 + $0x1410] sm:$0xff] %v2828_v17  ;;  %v2832_v27 = vmin.f32 %v1808_v18, 1.0  ;;  %v1810_v28 = vmax.f32 %v786_v14, 0.0  ;;  %v1811_v29 = vmax.f32 %v787_v19, 0.0  ;;  %v1812_v30 = vmax.f32 %v788_v20, 0.0 }
 0x1e9   : > { %v791_v31 = vld [vmem:[%s4615_s30 + $0x1468] sm:$0xff]  ;;  %v792_v32 = vld [vmem:[%s4615_s30 + $0x1470] sm:$0xff]  ;;  %3853 = vst [vmem:[%s4636_s17 + $0x1418] sm:$0xff] %v2829_v21  ;;  %3854 = vst [vmem:[%s4636_s17 + $0x1420] sm:$0xff] %v2830_v22  ;;  %v2833_v33 = vmin.f32 %v1809_v24, 1.0  ;;  %v1813_v34 = vmax.f32 %v789_v25, 0.0 }
 0x1ea   : > { %3855 = vst [vmem:[%s4636_s17 + $0x1428] sm:$0xff] %v2831_v23  ;;  %v1814_v35 = vmax.f32 %v790_v26, 0.0  ;;  %v1815_v36 = vmax.f32 %v791_v31, 0.0  ;;  %v793_v37 = vld [vmem:[%s4615_s30 + $0x1478] sm:$0xff]  ;;  %v794_v38 = vld [vmem:[%s4615_s30 + $0x1480] sm:$0xff]  ;;  %3856 = vst [vmem:[%s4636_s17 + $0x1430] sm:$0xff] %v2832_v27 }
 0x1eb   : > { %v2834_v39 = vmin.f32 %v1810_v28, 1.0  ;;  %v2835_v40 = vmin.f32 %v1811_v29, 1.0  ;;  %v2836_v41 = vmin.f32 %v1812_v30, 1.0  ;;  %v1816_v42 = vmax.f32 %v792_v32, 0.0  ;;  %v795_v43 = vld [vmem:[%s4615_s30 + $0x1488] sm:$0xff]  ;;  %v796_v44 = vld [vmem:[%s4615_s30 + $0x1490] sm:$0xff] }
 0x1ec   : > { %3857 = vst [vmem:[%s4636_s17 + $0x1438] sm:$0xff] %v2833_v33  ;;  %v2837_v45 = vmin.f32 %v1813_v34, 1.0  ;;  %v2838_v46 = vmin.f32 %v1814_v35, 1.0  ;;  %v2839_v47 = vmin.f32 %v1815_v36, 1.0  ;;  %v1817_v48 = vmax.f32 %v793_v37, 0.0  ;;  %v797_v49 = vld [vmem:[%s4615_s30 + $0x1498] sm:$0xff] }
 0x1ed   : > { %v798_v50 = vld [vmem:[%s4615_s30 + $0x14a0] sm:$0xff]  ;;  %3858 = vst [vmem:[%s4636_s17 + $0x1440] sm:$0xff] %v2834_v39  ;;  %3859 = vst [vmem:[%s4636_s17 + $0x1448] sm:$0xff] %v2835_v40  ;;  %v2840_v51 = vmin.f32 %v1816_v42, 1.0  ;;  %v1818_v52 = vmax.f32 %v794_v38, 0.0  ;;  %v1819_v53 = vmax.f32 %v795_v43, 0.0 }
 0x1ee   : > { %3860 = vst [vmem:[%s4636_s17 + $0x1450] sm:$0xff] %v2836_v41  ;;  %v1820_v54 = vmax.f32 %v796_v44, 0.0  ;;  %v799_v55 = vld [vmem:[%s4615_s30 + $0x14a8] sm:$0xff]  ;;  %v800_v56 = vld [vmem:[%s4615_s30 + $0x14b0] sm:$0xff]  ;;  %3861 = vst [vmem:[%s4636_s17 + $0x1458] sm:$0xff] %v2837_v45  ;;  %v2841_v57 = vmin.f32 %v1817_v48, 1.0 }
 0x1ef   : > { %3862 = vst [vmem:[%s4636_s17 + $0x1460] sm:$0xff] %v2838_v46  ;;  %3863 = vst [vmem:[%s4636_s17 + $0x1468] sm:$0xff] %v2839_v47  ;;  %v1821_v58 = vmax.f32 %v797_v49, 0.0  ;;  %v1822_v59 = vmax.f32 %v798_v50, 0.0  ;;  %v1823_v60 = vmax.f32 %v799_v55, 0.0  ;;  %v801_v61 = vld [vmem:[%s4615_s30 + $0x14b8] sm:$0xff] }
 0x1f0   : > { %v802_v62 = vld [vmem:[%s4615_s30 + $0x14c0] sm:$0xff]  ;;  %3864 = vst [vmem:[%s4636_s17 + $0x1470] sm:$0xff] %v2840_v51  ;;  %v2842_v63 = vmin.f32 %v1818_v52, 1.0  ;;  %v2843_v0 = vmin.f32 %v1819_v53, 1.0  ;;  %v2844_v1 = vmin.f32 %v1820_v54, 1.0  ;;  %v1824_v2 = vmax.f32 %v800_v56, 0.0 }
 0x1f1   : > { %v803_v3 = vld [vmem:[%s4615_s30 + $0x14c8] sm:$0xff]  ;;  %v804_v4 = vld [vmem:[%s4615_s30 + $0x14d0] sm:$0xff]  ;;  %3865 = vst [vmem:[%s4636_s17 + $0x1478] sm:$0xff] %v2841_v57  ;;  %v2845_v5 = vmin.f32 %v1821_v58, 1.0  ;;  %v2846_v6 = vmin.f32 %v1822_v59, 1.0  ;;  %v2847_v7 = vmin.f32 %v1823_v60, 1.0 }
 0x1f2   : > { %v1825_v8 = vmax.f32 %v801_v61, 0.0  ;;  %v805_v9 = vld [vmem:[%s4615_s30 + $0x14d8] sm:$0xff]  ;;  %v806_v10 = vld [vmem:[%s4615_s30 + $0x14e0] sm:$0xff]  ;;  %3866 = vst [vmem:[%s4636_s17 + $0x1480] sm:$0xff] %v2842_v63  ;;  %3867 = vst [vmem:[%s4636_s17 + $0x1488] sm:$0xff] %v2843_v0  ;;  %v2848_v11 = vmin.f32 %v1824_v2, 1.0 }
 0x1f3   : > { %3868 = vst [vmem:[%s4636_s17 + $0x1490] sm:$0xff] %v2844_v1  ;;  %v1826_v12 = vmax.f32 %v802_v62, 0.0  ;;  %v1827_v13 = vmax.f32 %v803_v3, 0.0  ;;  %v1828_v14 = vmax.f32 %v804_v4, 0.0  ;;  %v807_v15 = vld [vmem:[%s4615_s30 + $0x14e8] sm:$0xff]  ;;  %v808_v16 = vld [vmem:[%s4615_s30 + $0x14f0] sm:$0xff] }
 0x1f4   : > { %3869 = vst [vmem:[%s4636_s17 + $0x1498] sm:$0xff] %v2845_v5  ;;  %3870 = vst [vmem:[%s4636_s17 + $0x14a0] sm:$0xff] %v2846_v6  ;;  %v2849_v17 = vmin.f32 %v1825_v8, 1.0  ;;  %v1829_v18 = vmax.f32 %v805_v9, 0.0  ;;  %v1830_v19 = vmax.f32 %v806_v10, 0.0  ;;  %v1831_v20 = vmax.f32 %v807_v15, 0.0 }
 0x1f5   : > { %3871 = vst [vmem:[%s4636_s17 + $0x14a8] sm:$0xff] %v2847_v7  ;;  %v809_v21 = vld [vmem:[%s4615_s30 + $0x14f8] sm:$0xff]  ;;  %v810_v22 = vld [vmem:[%s4615_s30 + $0x1500] sm:$0xff]  ;;  %3872 = vst [vmem:[%s4636_s17 + $0x14b0] sm:$0xff] %v2848_v11  ;;  %v2850_v23 = vmin.f32 %v1826_v12, 1.0  ;;  %v2851_v24 = vmin.f32 %v1827_v13, 1.0 }
 0x1f6   : > { %v2852_v25 = vmin.f32 %v1828_v14, 1.0  ;;  %v1832_v26 = vmax.f32 %v808_v16, 0.0  ;;  %v811_v27 = vld [vmem:[%s4615_s30 + $0x1508] sm:$0xff]  ;;  %v812_v28 = vld [vmem:[%s4615_s30 + $0x1510] sm:$0xff]  ;;  %3873 = vst [vmem:[%s4636_s17 + $0x14b8] sm:$0xff] %v2849_v17  ;;  %v2853_v29 = vmin.f32 %v1829_v18, 1.0 }
 0x1f7   : > { %v2854_v30 = vmin.f32 %v1830_v19, 1.0  ;;  %v2855_v31 = vmin.f32 %v1831_v20, 1.0  ;;  %v1833_v32 = vmax.f32 %v809_v21, 0.0  ;;  %v813_v33 = vld [vmem:[%s4615_s30 + $0x1518] sm:$0xff]  ;;  %v814_v34 = vld [vmem:[%s4615_s30 + $0x1520] sm:$0xff]  ;;  %3874 = vst [vmem:[%s4636_s17 + $0x14c0] sm:$0xff] %v2850_v23 }
 0x1f8   : > { %3875 = vst [vmem:[%s4636_s17 + $0x14c8] sm:$0xff] %v2851_v24  ;;  %3876 = vst [vmem:[%s4636_s17 + $0x14d0] sm:$0xff] %v2852_v25  ;;  %v2856_v35 = vmin.f32 %v1832_v26, 1.0  ;;  %v1834_v36 = vmax.f32 %v810_v22, 0.0  ;;  %v1835_v37 = vmax.f32 %v811_v27, 0.0  ;;  %v1836_v38 = vmax.f32 %v812_v28, 0.0 }
 0x1f9   : > { %v815_v39 = vld [vmem:[%s4615_s30 + $0x1528] sm:$0xff]  ;;  %v816_v40 = vld [vmem:[%s4615_s30 + $0x1530] sm:$0xff]  ;;  %3877 = vst [vmem:[%s4636_s17 + $0x14d8] sm:$0xff] %v2853_v29  ;;  %3878 = vst [vmem:[%s4636_s17 + $0x14e0] sm:$0xff] %v2854_v30  ;;  %v2857_v41 = vmin.f32 %v1833_v32, 1.0  ;;  %v1837_v42 = vmax.f32 %v813_v33, 0.0 }
 0x1fa   : > { %3879 = vst [vmem:[%s4636_s17 + $0x14e8] sm:$0xff] %v2855_v31  ;;  %v1838_v43 = vmax.f32 %v814_v34, 0.0  ;;  %v1839_v44 = vmax.f32 %v815_v39, 0.0  ;;  %v817_v45 = vld [vmem:[%s4615_s30 + $0x1538] sm:$0xff]  ;;  %v818_v46 = vld [vmem:[%s4615_s30 + $0x1540] sm:$0xff]  ;;  %3880 = vst [vmem:[%s4636_s17 + $0x14f0] sm:$0xff] %v2856_v35 }
 0x1fb   : > { %v2858_v47 = vmin.f32 %v1834_v36, 1.0  ;;  %v2859_v48 = vmin.f32 %v1835_v37, 1.0  ;;  %v2860_v49 = vmin.f32 %v1836_v38, 1.0  ;;  %v1840_v50 = vmax.f32 %v816_v40, 0.0  ;;  %v819_v51 = vld [vmem:[%s4615_s30 + $0x1548] sm:$0xff]  ;;  %v820_v52 = vld [vmem:[%s4615_s30 + $0x1550] sm:$0xff] }
 0x1fc   : > { %3881 = vst [vmem:[%s4636_s17 + $0x14f8] sm:$0xff] %v2857_v41  ;;  %v2861_v53 = vmin.f32 %v1837_v42, 1.0  ;;  %v2862_v54 = vmin.f32 %v1838_v43, 1.0  ;;  %v2863_v55 = vmin.f32 %v1839_v44, 1.0  ;;  %v1841_v56 = vmax.f32 %v817_v45, 0.0  ;;  %v821_v57 = vld [vmem:[%s4615_s30 + $0x1558] sm:$0xff] }
 0x1fd   : > { %v822_v58 = vld [vmem:[%s4615_s30 + $0x1560] sm:$0xff]  ;;  %3882 = vst [vmem:[%s4636_s17 + $0x1500] sm:$0xff] %v2858_v47  ;;  %3883 = vst [vmem:[%s4636_s17 + $0x1508] sm:$0xff] %v2859_v48  ;;  %v2864_v59 = vmin.f32 %v1840_v50, 1.0  ;;  %v1842_v60 = vmax.f32 %v818_v46, 0.0  ;;  %v1843_v61 = vmax.f32 %v819_v51, 0.0 }
 0x1fe   : > { %3884 = vst [vmem:[%s4636_s17 + $0x1510] sm:$0xff] %v2860_v49  ;;  %v1844_v62 = vmax.f32 %v820_v52, 0.0  ;;  %v823_v63 = vld [vmem:[%s4615_s30 + $0x1568] sm:$0xff]  ;;  %v824_v0 = vld [vmem:[%s4615_s30 + $0x1570] sm:$0xff]  ;;  %3885 = vst [vmem:[%s4636_s17 + $0x1518] sm:$0xff] %v2861_v53  ;;  %v2865_v1 = vmin.f32 %v1841_v56, 1.0 }
 0x1ff   : > { %3886 = vst [vmem:[%s4636_s17 + $0x1520] sm:$0xff] %v2862_v54  ;;  %3887 = vst [vmem:[%s4636_s17 + $0x1528] sm:$0xff] %v2863_v55  ;;  %v1845_v2 = vmax.f32 %v821_v57, 0.0  ;;  %v1846_v3 = vmax.f32 %v822_v58, 0.0  ;;  %v1847_v4 = vmax.f32 %v823_v63, 0.0  ;;  %v825_v5 = vld [vmem:[%s4615_s30 + $0x1578] sm:$0xff] }
 0x200   : > { %v826_v6 = vld [vmem:[%s4615_s30 + $0x1580] sm:$0xff]  ;;  %3888 = vst [vmem:[%s4636_s17 + $0x1530] sm:$0xff] %v2864_v59  ;;  %v2866_v7 = vmin.f32 %v1842_v60, 1.0  ;;  %v2867_v8 = vmin.f32 %v1843_v61, 1.0  ;;  %v2868_v9 = vmin.f32 %v1844_v62, 1.0  ;;  %v1848_v10 = vmax.f32 %v824_v0, 0.0 }
 0x201   : > { %v827_v11 = vld [vmem:[%s4615_s30 + $0x1588] sm:$0xff]  ;;  %v828_v12 = vld [vmem:[%s4615_s30 + $0x1590] sm:$0xff]  ;;  %3889 = vst [vmem:[%s4636_s17 + $0x1538] sm:$0xff] %v2865_v1  ;;  %v2869_v13 = vmin.f32 %v1845_v2, 1.0  ;;  %v2870_v14 = vmin.f32 %v1846_v3, 1.0  ;;  %v2871_v15 = vmin.f32 %v1847_v4, 1.0 }
 0x202   : > { %v1849_v16 = vmax.f32 %v825_v5, 0.0  ;;  %v829_v17 = vld [vmem:[%s4615_s30 + $0x1598] sm:$0xff]  ;;  %v830_v18 = vld [vmem:[%s4615_s30 + $0x15a0] sm:$0xff]  ;;  %3890 = vst [vmem:[%s4636_s17 + $0x1540] sm:$0xff] %v2866_v7  ;;  %3891 = vst [vmem:[%s4636_s17 + $0x1548] sm:$0xff] %v2867_v8  ;;  %v2872_v19 = vmin.f32 %v1848_v10, 1.0 }
 0x203   : > { %3892 = vst [vmem:[%s4636_s17 + $0x1550] sm:$0xff] %v2868_v9  ;;  %v1850_v20 = vmax.f32 %v826_v6, 0.0  ;;  %v1851_v21 = vmax.f32 %v827_v11, 0.0  ;;  %v1852_v22 = vmax.f32 %v828_v12, 0.0  ;;  %v831_v23 = vld [vmem:[%s4615_s30 + $0x15a8] sm:$0xff]  ;;  %v832_v24 = vld [vmem:[%s4615_s30 + $0x15b0] sm:$0xff] }
 0x204   : > { %3893 = vst [vmem:[%s4636_s17 + $0x1558] sm:$0xff] %v2869_v13  ;;  %3894 = vst [vmem:[%s4636_s17 + $0x1560] sm:$0xff] %v2870_v14  ;;  %v2873_v25 = vmin.f32 %v1849_v16, 1.0  ;;  %v1853_v26 = vmax.f32 %v829_v17, 0.0  ;;  %v1854_v27 = vmax.f32 %v830_v18, 0.0  ;;  %v1855_v28 = vmax.f32 %v831_v23, 0.0 }
 0x205   : > { %3895 = vst [vmem:[%s4636_s17 + $0x1568] sm:$0xff] %v2871_v15  ;;  %v833_v29 = vld [vmem:[%s4615_s30 + $0x15b8] sm:$0xff]  ;;  %v834_v30 = vld [vmem:[%s4615_s30 + $0x15c0] sm:$0xff]  ;;  %3896 = vst [vmem:[%s4636_s17 + $0x1570] sm:$0xff] %v2872_v19  ;;  %v2874_v31 = vmin.f32 %v1850_v20, 1.0  ;;  %v2875_v32 = vmin.f32 %v1851_v21, 1.0 }
 0x206   : > { %v2876_v33 = vmin.f32 %v1852_v22, 1.0  ;;  %v1856_v34 = vmax.f32 %v832_v24, 0.0  ;;  %v835_v35 = vld [vmem:[%s4615_s30 + $0x15c8] sm:$0xff]  ;;  %v836_v36 = vld [vmem:[%s4615_s30 + $0x15d0] sm:$0xff]  ;;  %3897 = vst [vmem:[%s4636_s17 + $0x1578] sm:$0xff] %v2873_v25  ;;  %v2877_v37 = vmin.f32 %v1853_v26, 1.0 }
 0x207   : > { %v2878_v38 = vmin.f32 %v1854_v27, 1.0  ;;  %v2879_v39 = vmin.f32 %v1855_v28, 1.0  ;;  %v1857_v40 = vmax.f32 %v833_v29, 0.0  ;;  %v837_v41 = vld [vmem:[%s4615_s30 + $0x15d8] sm:$0xff]  ;;  %v838_v42 = vld [vmem:[%s4615_s30 + $0x15e0] sm:$0xff]  ;;  %3898 = vst [vmem:[%s4636_s17 + $0x1580] sm:$0xff] %v2874_v31 }
 0x208   : > { %3899 = vst [vmem:[%s4636_s17 + $0x1588] sm:$0xff] %v2875_v32  ;;  %3900 = vst [vmem:[%s4636_s17 + $0x1590] sm:$0xff] %v2876_v33  ;;  %v2880_v43 = vmin.f32 %v1856_v34, 1.0  ;;  %v1858_v44 = vmax.f32 %v834_v30, 0.0  ;;  %v1859_v45 = vmax.f32 %v835_v35, 0.0  ;;  %v1860_v46 = vmax.f32 %v836_v36, 0.0 }
 0x209   : > { %v839_v47 = vld [vmem:[%s4615_s30 + $0x15e8] sm:$0xff]  ;;  %v840_v48 = vld [vmem:[%s4615_s30 + $0x15f0] sm:$0xff]  ;;  %3901 = vst [vmem:[%s4636_s17 + $0x1598] sm:$0xff] %v2877_v37  ;;  %3902 = vst [vmem:[%s4636_s17 + $0x15a0] sm:$0xff] %v2878_v38  ;;  %v2881_v49 = vmin.f32 %v1857_v40, 1.0  ;;  %v1861_v50 = vmax.f32 %v837_v41, 0.0 }
 0x20a   : > { %3903 = vst [vmem:[%s4636_s17 + $0x15a8] sm:$0xff] %v2879_v39  ;;  %v1862_v51 = vmax.f32 %v838_v42, 0.0  ;;  %v1863_v52 = vmax.f32 %v839_v47, 0.0  ;;  %v841_v53 = vld [vmem:[%s4615_s30 + $0x15f8] sm:$0xff]  ;;  %v842_v54 = vld [vmem:[%s4615_s30 + $0x1600] sm:$0xff]  ;;  %3904 = vst [vmem:[%s4636_s17 + $0x15b0] sm:$0xff] %v2880_v43 }
 0x20b   : > { %v2882_v55 = vmin.f32 %v1858_v44, 1.0  ;;  %v2883_v56 = vmin.f32 %v1859_v45, 1.0  ;;  %v2884_v57 = vmin.f32 %v1860_v46, 1.0  ;;  %v1864_v58 = vmax.f32 %v840_v48, 0.0  ;;  %v843_v59 = vld [vmem:[%s4615_s30 + $0x1608] sm:$0xff]  ;;  %v844_v60 = vld [vmem:[%s4615_s30 + $0x1610] sm:$0xff] }
 0x20c   : > { %3905 = vst [vmem:[%s4636_s17 + $0x15b8] sm:$0xff] %v2881_v49  ;;  %v2885_v61 = vmin.f32 %v1861_v50, 1.0  ;;  %v2886_v62 = vmin.f32 %v1862_v51, 1.0  ;;  %v2887_v63 = vmin.f32 %v1863_v52, 1.0  ;;  %v1865_v0 = vmax.f32 %v841_v53, 0.0  ;;  %v845_v1 = vld [vmem:[%s4615_s30 + $0x1618] sm:$0xff] }
 0x20d   : > { %v846_v2 = vld [vmem:[%s4615_s30 + $0x1620] sm:$0xff]  ;;  %3906 = vst [vmem:[%s4636_s17 + $0x15c0] sm:$0xff] %v2882_v55  ;;  %3907 = vst [vmem:[%s4636_s17 + $0x15c8] sm:$0xff] %v2883_v56  ;;  %v2888_v3 = vmin.f32 %v1864_v58, 1.0  ;;  %v1866_v4 = vmax.f32 %v842_v54, 0.0  ;;  %v1867_v5 = vmax.f32 %v843_v59, 0.0 }
 0x20e   : > { %3908 = vst [vmem:[%s4636_s17 + $0x15d0] sm:$0xff] %v2884_v57  ;;  %v1868_v6 = vmax.f32 %v844_v60, 0.0  ;;  %v847_v7 = vld [vmem:[%s4615_s30 + $0x1628] sm:$0xff]  ;;  %v848_v8 = vld [vmem:[%s4615_s30 + $0x1630] sm:$0xff]  ;;  %3909 = vst [vmem:[%s4636_s17 + $0x15d8] sm:$0xff] %v2885_v61  ;;  %v2889_v9 = vmin.f32 %v1865_v0, 1.0 }
 0x20f   : > { %3910 = vst [vmem:[%s4636_s17 + $0x15e0] sm:$0xff] %v2886_v62  ;;  %3911 = vst [vmem:[%s4636_s17 + $0x15e8] sm:$0xff] %v2887_v63  ;;  %v1869_v10 = vmax.f32 %v845_v1, 0.0  ;;  %v1870_v11 = vmax.f32 %v846_v2, 0.0  ;;  %v1871_v12 = vmax.f32 %v847_v7, 0.0  ;;  %v849_v13 = vld [vmem:[%s4615_s30 + $0x1638] sm:$0xff] }
 0x210   : > { %v850_v14 = vld [vmem:[%s4615_s30 + $0x1640] sm:$0xff]  ;;  %3912 = vst [vmem:[%s4636_s17 + $0x15f0] sm:$0xff] %v2888_v3  ;;  %v2890_v15 = vmin.f32 %v1866_v4, 1.0  ;;  %v2891_v16 = vmin.f32 %v1867_v5, 1.0  ;;  %v2892_v17 = vmin.f32 %v1868_v6, 1.0  ;;  %v1872_v18 = vmax.f32 %v848_v8, 0.0 }
 0x211   : > { %v851_v19 = vld [vmem:[%s4615_s30 + $0x1648] sm:$0xff]  ;;  %v852_v20 = vld [vmem:[%s4615_s30 + $0x1650] sm:$0xff]  ;;  %3913 = vst [vmem:[%s4636_s17 + $0x15f8] sm:$0xff] %v2889_v9  ;;  %v2893_v21 = vmin.f32 %v1869_v10, 1.0  ;;  %v2894_v22 = vmin.f32 %v1870_v11, 1.0  ;;  %v2895_v23 = vmin.f32 %v1871_v12, 1.0 }
 0x212   : > { %v1873_v24 = vmax.f32 %v849_v13, 0.0  ;;  %v853_v25 = vld [vmem:[%s4615_s30 + $0x1658] sm:$0xff]  ;;  %v854_v26 = vld [vmem:[%s4615_s30 + $0x1660] sm:$0xff]  ;;  %3914 = vst [vmem:[%s4636_s17 + $0x1600] sm:$0xff] %v2890_v15  ;;  %3915 = vst [vmem:[%s4636_s17 + $0x1608] sm:$0xff] %v2891_v16  ;;  %v2896_v27 = vmin.f32 %v1872_v18, 1.0 }
 0x213   : > { %3916 = vst [vmem:[%s4636_s17 + $0x1610] sm:$0xff] %v2892_v17  ;;  %v1874_v28 = vmax.f32 %v850_v14, 0.0  ;;  %v1875_v29 = vmax.f32 %v851_v19, 0.0  ;;  %v1876_v30 = vmax.f32 %v852_v20, 0.0  ;;  %v855_v31 = vld [vmem:[%s4615_s30 + $0x1668] sm:$0xff]  ;;  %v856_v32 = vld [vmem:[%s4615_s30 + $0x1670] sm:$0xff] }
 0x214   : > { %3917 = vst [vmem:[%s4636_s17 + $0x1618] sm:$0xff] %v2893_v21  ;;  %3918 = vst [vmem:[%s4636_s17 + $0x1620] sm:$0xff] %v2894_v22  ;;  %v2897_v33 = vmin.f32 %v1873_v24, 1.0  ;;  %v1877_v34 = vmax.f32 %v853_v25, 0.0  ;;  %v1878_v35 = vmax.f32 %v854_v26, 0.0  ;;  %v1879_v36 = vmax.f32 %v855_v31, 0.0 }
 0x215   : > { %3919 = vst [vmem:[%s4636_s17 + $0x1628] sm:$0xff] %v2895_v23  ;;  %v857_v37 = vld [vmem:[%s4615_s30 + $0x1678] sm:$0xff]  ;;  %v858_v38 = vld [vmem:[%s4615_s30 + $0x1680] sm:$0xff]  ;;  %3920 = vst [vmem:[%s4636_s17 + $0x1630] sm:$0xff] %v2896_v27  ;;  %v2898_v39 = vmin.f32 %v1874_v28, 1.0  ;;  %v2899_v40 = vmin.f32 %v1875_v29, 1.0 }
 0x216   : > { %v2900_v41 = vmin.f32 %v1876_v30, 1.0  ;;  %v1880_v42 = vmax.f32 %v856_v32, 0.0  ;;  %v859_v43 = vld [vmem:[%s4615_s30 + $0x1688] sm:$0xff]  ;;  %v860_v44 = vld [vmem:[%s4615_s30 + $0x1690] sm:$0xff]  ;;  %3921 = vst [vmem:[%s4636_s17 + $0x1638] sm:$0xff] %v2897_v33  ;;  %v2901_v45 = vmin.f32 %v1877_v34, 1.0 }
 0x217   : > { %v2902_v46 = vmin.f32 %v1878_v35, 1.0  ;;  %v2903_v47 = vmin.f32 %v1879_v36, 1.0  ;;  %v1881_v48 = vmax.f32 %v857_v37, 0.0  ;;  %v861_v49 = vld [vmem:[%s4615_s30 + $0x1698] sm:$0xff]  ;;  %v862_v50 = vld [vmem:[%s4615_s30 + $0x16a0] sm:$0xff]  ;;  %3922 = vst [vmem:[%s4636_s17 + $0x1640] sm:$0xff] %v2898_v39 }
 0x218   : > { %3923 = vst [vmem:[%s4636_s17 + $0x1648] sm:$0xff] %v2899_v40  ;;  %3924 = vst [vmem:[%s4636_s17 + $0x1650] sm:$0xff] %v2900_v41  ;;  %v2904_v51 = vmin.f32 %v1880_v42, 1.0  ;;  %v1882_v52 = vmax.f32 %v858_v38, 0.0  ;;  %v1883_v53 = vmax.f32 %v859_v43, 0.0  ;;  %v1884_v54 = vmax.f32 %v860_v44, 0.0 }
 0x219   : > { %v863_v55 = vld [vmem:[%s4615_s30 + $0x16a8] sm:$0xff]  ;;  %v864_v56 = vld [vmem:[%s4615_s30 + $0x16b0] sm:$0xff]  ;;  %3925 = vst [vmem:[%s4636_s17 + $0x1658] sm:$0xff] %v2901_v45  ;;  %3926 = vst [vmem:[%s4636_s17 + $0x1660] sm:$0xff] %v2902_v46  ;;  %v2905_v57 = vmin.f32 %v1881_v48, 1.0  ;;  %v1885_v58 = vmax.f32 %v861_v49, 0.0 }
 0x21a   : > { %3927 = vst [vmem:[%s4636_s17 + $0x1668] sm:$0xff] %v2903_v47  ;;  %v1886_v59 = vmax.f32 %v862_v50, 0.0  ;;  %v1887_v60 = vmax.f32 %v863_v55, 0.0  ;;  %v865_v61 = vld [vmem:[%s4615_s30 + $0x16b8] sm:$0xff]  ;;  %v866_v62 = vld [vmem:[%s4615_s30 + $0x16c0] sm:$0xff]  ;;  %3928 = vst [vmem:[%s4636_s17 + $0x1670] sm:$0xff] %v2904_v51 }
 0x21b   : > { %v2906_v63 = vmin.f32 %v1882_v52, 1.0  ;;  %v2907_v0 = vmin.f32 %v1883_v53, 1.0  ;;  %v2908_v1 = vmin.f32 %v1884_v54, 1.0  ;;  %v1888_v2 = vmax.f32 %v864_v56, 0.0  ;;  %v867_v3 = vld [vmem:[%s4615_s30 + $0x16c8] sm:$0xff]  ;;  %v868_v4 = vld [vmem:[%s4615_s30 + $0x16d0] sm:$0xff] }
 0x21c   : > { %3929 = vst [vmem:[%s4636_s17 + $0x1678] sm:$0xff] %v2905_v57  ;;  %v2909_v5 = vmin.f32 %v1885_v58, 1.0  ;;  %v2910_v6 = vmin.f32 %v1886_v59, 1.0  ;;  %v2911_v7 = vmin.f32 %v1887_v60, 1.0  ;;  %v1889_v8 = vmax.f32 %v865_v61, 0.0  ;;  %v869_v9 = vld [vmem:[%s4615_s30 + $0x16d8] sm:$0xff] }
 0x21d   : > { %v870_v10 = vld [vmem:[%s4615_s30 + $0x16e0] sm:$0xff]  ;;  %3930 = vst [vmem:[%s4636_s17 + $0x1680] sm:$0xff] %v2906_v63  ;;  %3931 = vst [vmem:[%s4636_s17 + $0x1688] sm:$0xff] %v2907_v0  ;;  %v2912_v11 = vmin.f32 %v1888_v2, 1.0  ;;  %v1890_v12 = vmax.f32 %v866_v62, 0.0  ;;  %v1891_v13 = vmax.f32 %v867_v3, 0.0 }
 0x21e   : > { %3932 = vst [vmem:[%s4636_s17 + $0x1690] sm:$0xff] %v2908_v1  ;;  %v1892_v14 = vmax.f32 %v868_v4, 0.0  ;;  %v871_v15 = vld [vmem:[%s4615_s30 + $0x16e8] sm:$0xff]  ;;  %v872_v16 = vld [vmem:[%s4615_s30 + $0x16f0] sm:$0xff]  ;;  %3933 = vst [vmem:[%s4636_s17 + $0x1698] sm:$0xff] %v2909_v5  ;;  %v2913_v17 = vmin.f32 %v1889_v8, 1.0 }
 0x21f   : > { %3934 = vst [vmem:[%s4636_s17 + $0x16a0] sm:$0xff] %v2910_v6  ;;  %3935 = vst [vmem:[%s4636_s17 + $0x16a8] sm:$0xff] %v2911_v7  ;;  %v1893_v18 = vmax.f32 %v869_v9, 0.0  ;;  %v1894_v19 = vmax.f32 %v870_v10, 0.0  ;;  %v1895_v20 = vmax.f32 %v871_v15, 0.0  ;;  %v873_v21 = vld [vmem:[%s4615_s30 + $0x16f8] sm:$0xff] }
 0x220   : > { %v874_v22 = vld [vmem:[%s4615_s30 + $0x1700] sm:$0xff]  ;;  %3936 = vst [vmem:[%s4636_s17 + $0x16b0] sm:$0xff] %v2912_v11  ;;  %v2914_v23 = vmin.f32 %v1890_v12, 1.0  ;;  %v2915_v24 = vmin.f32 %v1891_v13, 1.0  ;;  %v2916_v25 = vmin.f32 %v1892_v14, 1.0  ;;  %v1896_v26 = vmax.f32 %v872_v16, 0.0 }
 0x221   : > { %v875_v27 = vld [vmem:[%s4615_s30 + $0x1708] sm:$0xff]  ;;  %v876_v28 = vld [vmem:[%s4615_s30 + $0x1710] sm:$0xff]  ;;  %3937 = vst [vmem:[%s4636_s17 + $0x16b8] sm:$0xff] %v2913_v17  ;;  %v2917_v29 = vmin.f32 %v1893_v18, 1.0  ;;  %v2918_v30 = vmin.f32 %v1894_v19, 1.0  ;;  %v2919_v31 = vmin.f32 %v1895_v20, 1.0 }
 0x222   : > { %v1897_v32 = vmax.f32 %v873_v21, 0.0  ;;  %v877_v33 = vld [vmem:[%s4615_s30 + $0x1718] sm:$0xff]  ;;  %v878_v34 = vld [vmem:[%s4615_s30 + $0x1720] sm:$0xff]  ;;  %3938 = vst [vmem:[%s4636_s17 + $0x16c0] sm:$0xff] %v2914_v23  ;;  %3939 = vst [vmem:[%s4636_s17 + $0x16c8] sm:$0xff] %v2915_v24  ;;  %v2920_v35 = vmin.f32 %v1896_v26, 1.0 }
 0x223   : > { %3940 = vst [vmem:[%s4636_s17 + $0x16d0] sm:$0xff] %v2916_v25  ;;  %v1898_v36 = vmax.f32 %v874_v22, 0.0  ;;  %v1899_v37 = vmax.f32 %v875_v27, 0.0  ;;  %v1900_v38 = vmax.f32 %v876_v28, 0.0  ;;  %v879_v39 = vld [vmem:[%s4615_s30 + $0x1728] sm:$0xff]  ;;  %v880_v40 = vld [vmem:[%s4615_s30 + $0x1730] sm:$0xff] }
 0x224   : > { %3941 = vst [vmem:[%s4636_s17 + $0x16d8] sm:$0xff] %v2917_v29  ;;  %3942 = vst [vmem:[%s4636_s17 + $0x16e0] sm:$0xff] %v2918_v30  ;;  %v2921_v41 = vmin.f32 %v1897_v32, 1.0  ;;  %v1901_v42 = vmax.f32 %v877_v33, 0.0  ;;  %v1902_v43 = vmax.f32 %v878_v34, 0.0  ;;  %v1903_v44 = vmax.f32 %v879_v39, 0.0 }
 0x225   : > { %3943 = vst [vmem:[%s4636_s17 + $0x16e8] sm:$0xff] %v2919_v31  ;;  %v881_v45 = vld [vmem:[%s4615_s30 + $0x1738] sm:$0xff]  ;;  %v882_v46 = vld [vmem:[%s4615_s30 + $0x1740] sm:$0xff]  ;;  %3944 = vst [vmem:[%s4636_s17 + $0x16f0] sm:$0xff] %v2920_v35  ;;  %v2922_v47 = vmin.f32 %v1898_v36, 1.0  ;;  %v2923_v48 = vmin.f32 %v1899_v37, 1.0 }
 0x226   : > { %v2924_v49 = vmin.f32 %v1900_v38, 1.0  ;;  %v1904_v50 = vmax.f32 %v880_v40, 0.0  ;;  %v883_v51 = vld [vmem:[%s4615_s30 + $0x1748] sm:$0xff]  ;;  %v884_v52 = vld [vmem:[%s4615_s30 + $0x1750] sm:$0xff]  ;;  %3945 = vst [vmem:[%s4636_s17 + $0x16f8] sm:$0xff] %v2921_v41  ;;  %v2925_v53 = vmin.f32 %v1901_v42, 1.0 }
 0x227   : > { %v2926_v54 = vmin.f32 %v1902_v43, 1.0  ;;  %v2927_v55 = vmin.f32 %v1903_v44, 1.0  ;;  %v1905_v56 = vmax.f32 %v881_v45, 0.0  ;;  %v885_v57 = vld [vmem:[%s4615_s30 + $0x1758] sm:$0xff]  ;;  %v886_v58 = vld [vmem:[%s4615_s30 + $0x1760] sm:$0xff]  ;;  %3946 = vst [vmem:[%s4636_s17 + $0x1700] sm:$0xff] %v2922_v47 }
 0x228   : > { %3947 = vst [vmem:[%s4636_s17 + $0x1708] sm:$0xff] %v2923_v48  ;;  %3948 = vst [vmem:[%s4636_s17 + $0x1710] sm:$0xff] %v2924_v49  ;;  %v2928_v59 = vmin.f32 %v1904_v50, 1.0  ;;  %v1906_v60 = vmax.f32 %v882_v46, 0.0  ;;  %v1907_v61 = vmax.f32 %v883_v51, 0.0  ;;  %v1908_v62 = vmax.f32 %v884_v52, 0.0 }
 0x229   : > { %v887_v63 = vld [vmem:[%s4615_s30 + $0x1768] sm:$0xff]  ;;  %v888_v0 = vld [vmem:[%s4615_s30 + $0x1770] sm:$0xff]  ;;  %3949 = vst [vmem:[%s4636_s17 + $0x1718] sm:$0xff] %v2925_v53  ;;  %3950 = vst [vmem:[%s4636_s17 + $0x1720] sm:$0xff] %v2926_v54  ;;  %v2929_v1 = vmin.f32 %v1905_v56, 1.0  ;;  %v1909_v2 = vmax.f32 %v885_v57, 0.0 }
 0x22a   : > { %3951 = vst [vmem:[%s4636_s17 + $0x1728] sm:$0xff] %v2927_v55  ;;  %v1910_v3 = vmax.f32 %v886_v58, 0.0  ;;  %v1911_v4 = vmax.f32 %v887_v63, 0.0  ;;  %v889_v5 = vld [vmem:[%s4615_s30 + $0x1778] sm:$0xff]  ;;  %v890_v6 = vld [vmem:[%s4615_s30 + $0x1780] sm:$0xff]  ;;  %3952 = vst [vmem:[%s4636_s17 + $0x1730] sm:$0xff] %v2928_v59 }
 0x22b   : > { %v2930_v7 = vmin.f32 %v1906_v60, 1.0  ;;  %v2931_v8 = vmin.f32 %v1907_v61, 1.0  ;;  %v2932_v9 = vmin.f32 %v1908_v62, 1.0  ;;  %v1912_v10 = vmax.f32 %v888_v0, 0.0  ;;  %v891_v11 = vld [vmem:[%s4615_s30 + $0x1788] sm:$0xff]  ;;  %v892_v12 = vld [vmem:[%s4615_s30 + $0x1790] sm:$0xff] }
 0x22c   : > { %3953 = vst [vmem:[%s4636_s17 + $0x1738] sm:$0xff] %v2929_v1  ;;  %v2933_v13 = vmin.f32 %v1909_v2, 1.0  ;;  %v2934_v14 = vmin.f32 %v1910_v3, 1.0  ;;  %v2935_v15 = vmin.f32 %v1911_v4, 1.0  ;;  %v1913_v16 = vmax.f32 %v889_v5, 0.0  ;;  %v893_v17 = vld [vmem:[%s4615_s30 + $0x1798] sm:$0xff] }
 0x22d   : > { %v894_v18 = vld [vmem:[%s4615_s30 + $0x17a0] sm:$0xff]  ;;  %3954 = vst [vmem:[%s4636_s17 + $0x1740] sm:$0xff] %v2930_v7  ;;  %3955 = vst [vmem:[%s4636_s17 + $0x1748] sm:$0xff] %v2931_v8  ;;  %v2936_v19 = vmin.f32 %v1912_v10, 1.0  ;;  %v1914_v20 = vmax.f32 %v890_v6, 0.0  ;;  %v1915_v21 = vmax.f32 %v891_v11, 0.0 }
 0x22e   : > { %3956 = vst [vmem:[%s4636_s17 + $0x1750] sm:$0xff] %v2932_v9  ;;  %v1916_v22 = vmax.f32 %v892_v12, 0.0  ;;  %v895_v23 = vld [vmem:[%s4615_s30 + $0x17a8] sm:$0xff]  ;;  %v896_v24 = vld [vmem:[%s4615_s30 + $0x17b0] sm:$0xff]  ;;  %3957 = vst [vmem:[%s4636_s17 + $0x1758] sm:$0xff] %v2933_v13  ;;  %v2937_v25 = vmin.f32 %v1913_v16, 1.0 }
 0x22f   : > { %3958 = vst [vmem:[%s4636_s17 + $0x1760] sm:$0xff] %v2934_v14  ;;  %3959 = vst [vmem:[%s4636_s17 + $0x1768] sm:$0xff] %v2935_v15  ;;  %v1917_v26 = vmax.f32 %v893_v17, 0.0  ;;  %v1918_v27 = vmax.f32 %v894_v18, 0.0  ;;  %v1919_v28 = vmax.f32 %v895_v23, 0.0  ;;  %v897_v29 = vld [vmem:[%s4615_s30 + $0x17b8] sm:$0xff] }
 0x230   : > { %v898_v30 = vld [vmem:[%s4615_s30 + $0x17c0] sm:$0xff]  ;;  %3960 = vst [vmem:[%s4636_s17 + $0x1770] sm:$0xff] %v2936_v19  ;;  %v2938_v31 = vmin.f32 %v1914_v20, 1.0  ;;  %v2939_v32 = vmin.f32 %v1915_v21, 1.0  ;;  %v2940_v33 = vmin.f32 %v1916_v22, 1.0  ;;  %v1920_v34 = vmax.f32 %v896_v24, 0.0 }
 0x231   : > { %v899_v35 = vld [vmem:[%s4615_s30 + $0x17c8] sm:$0xff]  ;;  %v900_v36 = vld [vmem:[%s4615_s30 + $0x17d0] sm:$0xff]  ;;  %3961 = vst [vmem:[%s4636_s17 + $0x1778] sm:$0xff] %v2937_v25  ;;  %v2941_v37 = vmin.f32 %v1917_v26, 1.0  ;;  %v2942_v38 = vmin.f32 %v1918_v27, 1.0  ;;  %v2943_v39 = vmin.f32 %v1919_v28, 1.0 }
 0x232   : > { %v1921_v40 = vmax.f32 %v897_v29, 0.0  ;;  %v901_v41 = vld [vmem:[%s4615_s30 + $0x17d8] sm:$0xff]  ;;  %v902_v42 = vld [vmem:[%s4615_s30 + $0x17e0] sm:$0xff]  ;;  %3962 = vst [vmem:[%s4636_s17 + $0x1780] sm:$0xff] %v2938_v31  ;;  %3963 = vst [vmem:[%s4636_s17 + $0x1788] sm:$0xff] %v2939_v32  ;;  %v2944_v43 = vmin.f32 %v1920_v34, 1.0 }
 0x233   : > { %3964 = vst [vmem:[%s4636_s17 + $0x1790] sm:$0xff] %v2940_v33  ;;  %v1922_v44 = vmax.f32 %v898_v30, 0.0  ;;  %v1923_v45 = vmax.f32 %v899_v35, 0.0  ;;  %v1924_v46 = vmax.f32 %v900_v36, 0.0  ;;  %v903_v47 = vld [vmem:[%s4615_s30 + $0x17e8] sm:$0xff]  ;;  %v904_v48 = vld [vmem:[%s4615_s30 + $0x17f0] sm:$0xff] }
 0x234   : > { %3965 = vst [vmem:[%s4636_s17 + $0x1798] sm:$0xff] %v2941_v37  ;;  %3966 = vst [vmem:[%s4636_s17 + $0x17a0] sm:$0xff] %v2942_v38  ;;  %v2945_v49 = vmin.f32 %v1921_v40, 1.0  ;;  %v1925_v50 = vmax.f32 %v901_v41, 0.0  ;;  %v1926_v51 = vmax.f32 %v902_v42, 0.0  ;;  %v1927_v52 = vmax.f32 %v903_v47, 0.0 }
 0x235   : > { %3967 = vst [vmem:[%s4636_s17 + $0x17a8] sm:$0xff] %v2943_v39  ;;  %v905_v53 = vld [vmem:[%s4615_s30 + $0x17f8] sm:$0xff]  ;;  %v906_v54 = vld [vmem:[%s4615_s30 + $0x1800] sm:$0xff]  ;;  %3968 = vst [vmem:[%s4636_s17 + $0x17b0] sm:$0xff] %v2944_v43  ;;  %v2946_v55 = vmin.f32 %v1922_v44, 1.0  ;;  %v2947_v56 = vmin.f32 %v1923_v45, 1.0 }
 0x236   : > { %v2948_v57 = vmin.f32 %v1924_v46, 1.0  ;;  %v1928_v58 = vmax.f32 %v904_v48, 0.0  ;;  %v907_v59 = vld [vmem:[%s4615_s30 + $0x1808] sm:$0xff]  ;;  %v908_v60 = vld [vmem:[%s4615_s30 + $0x1810] sm:$0xff]  ;;  %3969 = vst [vmem:[%s4636_s17 + $0x17b8] sm:$0xff] %v2945_v49  ;;  %v2949_v61 = vmin.f32 %v1925_v50, 1.0 }
 0x237   : > { %v2950_v62 = vmin.f32 %v1926_v51, 1.0  ;;  %v2951_v63 = vmin.f32 %v1927_v52, 1.0  ;;  %v1929_v0 = vmax.f32 %v905_v53, 0.0  ;;  %v909_v1 = vld [vmem:[%s4615_s30 + $0x1818] sm:$0xff]  ;;  %v910_v2 = vld [vmem:[%s4615_s30 + $0x1820] sm:$0xff]  ;;  %3970 = vst [vmem:[%s4636_s17 + $0x17c0] sm:$0xff] %v2946_v55 }
 0x238   : > { %3971 = vst [vmem:[%s4636_s17 + $0x17c8] sm:$0xff] %v2947_v56  ;;  %3972 = vst [vmem:[%s4636_s17 + $0x17d0] sm:$0xff] %v2948_v57  ;;  %v2952_v3 = vmin.f32 %v1928_v58, 1.0  ;;  %v1930_v4 = vmax.f32 %v906_v54, 0.0  ;;  %v1931_v5 = vmax.f32 %v907_v59, 0.0  ;;  %v1932_v6 = vmax.f32 %v908_v60, 0.0 }
 0x239   : > { %v911_v7 = vld [vmem:[%s4615_s30 + $0x1828] sm:$0xff]  ;;  %v912_v8 = vld [vmem:[%s4615_s30 + $0x1830] sm:$0xff]  ;;  %3973 = vst [vmem:[%s4636_s17 + $0x17d8] sm:$0xff] %v2949_v61  ;;  %3974 = vst [vmem:[%s4636_s17 + $0x17e0] sm:$0xff] %v2950_v62  ;;  %v2953_v9 = vmin.f32 %v1929_v0, 1.0  ;;  %v1933_v10 = vmax.f32 %v909_v1, 0.0 }
 0x23a   : > { %3975 = vst [vmem:[%s4636_s17 + $0x17e8] sm:$0xff] %v2951_v63  ;;  %v1934_v11 = vmax.f32 %v910_v2, 0.0  ;;  %v1935_v12 = vmax.f32 %v911_v7, 0.0  ;;  %v913_v13 = vld [vmem:[%s4615_s30 + $0x1838] sm:$0xff]  ;;  %v914_v14 = vld [vmem:[%s4615_s30 + $0x1840] sm:$0xff]  ;;  %3976 = vst [vmem:[%s4636_s17 + $0x17f0] sm:$0xff] %v2952_v3 }
 0x23b   : > { %v2954_v15 = vmin.f32 %v1930_v4, 1.0  ;;  %v2955_v16 = vmin.f32 %v1931_v5, 1.0  ;;  %v2956_v17 = vmin.f32 %v1932_v6, 1.0  ;;  %v1936_v18 = vmax.f32 %v912_v8, 0.0  ;;  %v915_v19 = vld [vmem:[%s4615_s30 + $0x1848] sm:$0xff]  ;;  %v916_v20 = vld [vmem:[%s4615_s30 + $0x1850] sm:$0xff] }
 0x23c   : > { %3977 = vst [vmem:[%s4636_s17 + $0x17f8] sm:$0xff] %v2953_v9  ;;  %v2957_v21 = vmin.f32 %v1933_v10, 1.0  ;;  %v2958_v22 = vmin.f32 %v1934_v11, 1.0  ;;  %v2959_v23 = vmin.f32 %v1935_v12, 1.0  ;;  %v1937_v24 = vmax.f32 %v913_v13, 0.0  ;;  %v917_v25 = vld [vmem:[%s4615_s30 + $0x1858] sm:$0xff] }
 0x23d   : > { %v918_v26 = vld [vmem:[%s4615_s30 + $0x1860] sm:$0xff]  ;;  %3978 = vst [vmem:[%s4636_s17 + $0x1800] sm:$0xff] %v2954_v15  ;;  %3979 = vst [vmem:[%s4636_s17 + $0x1808] sm:$0xff] %v2955_v16  ;;  %v2960_v27 = vmin.f32 %v1936_v18, 1.0  ;;  %v1938_v28 = vmax.f32 %v914_v14, 0.0  ;;  %v1939_v29 = vmax.f32 %v915_v19, 0.0 }
 0x23e   : > { %3980 = vst [vmem:[%s4636_s17 + $0x1810] sm:$0xff] %v2956_v17  ;;  %v1940_v30 = vmax.f32 %v916_v20, 0.0  ;;  %v919_v31 = vld [vmem:[%s4615_s30 + $0x1868] sm:$0xff]  ;;  %v920_v32 = vld [vmem:[%s4615_s30 + $0x1870] sm:$0xff]  ;;  %3981 = vst [vmem:[%s4636_s17 + $0x1818] sm:$0xff] %v2957_v21  ;;  %v2961_v33 = vmin.f32 %v1937_v24, 1.0 }
 0x23f   : > { %3982 = vst [vmem:[%s4636_s17 + $0x1820] sm:$0xff] %v2958_v22  ;;  %3983 = vst [vmem:[%s4636_s17 + $0x1828] sm:$0xff] %v2959_v23  ;;  %v1941_v34 = vmax.f32 %v917_v25, 0.0  ;;  %v1942_v35 = vmax.f32 %v918_v26, 0.0  ;;  %v1943_v36 = vmax.f32 %v919_v31, 0.0  ;;  %v921_v37 = vld [vmem:[%s4615_s30 + $0x1878] sm:$0xff] }
 0x240   : > { %v922_v38 = vld [vmem:[%s4615_s30 + $0x1880] sm:$0xff]  ;;  %3984 = vst [vmem:[%s4636_s17 + $0x1830] sm:$0xff] %v2960_v27  ;;  %v2962_v39 = vmin.f32 %v1938_v28, 1.0  ;;  %v2963_v40 = vmin.f32 %v1939_v29, 1.0  ;;  %v2964_v41 = vmin.f32 %v1940_v30, 1.0  ;;  %v1944_v42 = vmax.f32 %v920_v32, 0.0 }
 0x241   : > { %v923_v43 = vld [vmem:[%s4615_s30 + $0x1888] sm:$0xff]  ;;  %v924_v44 = vld [vmem:[%s4615_s30 + $0x1890] sm:$0xff]  ;;  %3985 = vst [vmem:[%s4636_s17 + $0x1838] sm:$0xff] %v2961_v33  ;;  %v2965_v45 = vmin.f32 %v1941_v34, 1.0  ;;  %v2966_v46 = vmin.f32 %v1942_v35, 1.0  ;;  %v2967_v47 = vmin.f32 %v1943_v36, 1.0 }
 0x242   : > { %v1945_v48 = vmax.f32 %v921_v37, 0.0  ;;  %v925_v49 = vld [vmem:[%s4615_s30 + $0x1898] sm:$0xff]  ;;  %v926_v50 = vld [vmem:[%s4615_s30 + $0x18a0] sm:$0xff]  ;;  %3986 = vst [vmem:[%s4636_s17 + $0x1840] sm:$0xff] %v2962_v39  ;;  %3987 = vst [vmem:[%s4636_s17 + $0x1848] sm:$0xff] %v2963_v40  ;;  %v2968_v51 = vmin.f32 %v1944_v42, 1.0 }
 0x243   : > { %3988 = vst [vmem:[%s4636_s17 + $0x1850] sm:$0xff] %v2964_v41  ;;  %v1946_v52 = vmax.f32 %v922_v38, 0.0  ;;  %v1947_v53 = vmax.f32 %v923_v43, 0.0  ;;  %v1948_v54 = vmax.f32 %v924_v44, 0.0  ;;  %v927_v55 = vld [vmem:[%s4615_s30 + $0x18a8] sm:$0xff]  ;;  %v928_v56 = vld [vmem:[%s4615_s30 + $0x18b0] sm:$0xff] }
 0x244   : > { %3989 = vst [vmem:[%s4636_s17 + $0x1858] sm:$0xff] %v2965_v45  ;;  %3990 = vst [vmem:[%s4636_s17 + $0x1860] sm:$0xff] %v2966_v46  ;;  %v2969_v57 = vmin.f32 %v1945_v48, 1.0  ;;  %v1949_v58 = vmax.f32 %v925_v49, 0.0  ;;  %v1950_v59 = vmax.f32 %v926_v50, 0.0  ;;  %v1951_v60 = vmax.f32 %v927_v55, 0.0 }
 0x245   : > { %3991 = vst [vmem:[%s4636_s17 + $0x1868] sm:$0xff] %v2967_v47  ;;  %v929_v61 = vld [vmem:[%s4615_s30 + $0x18b8] sm:$0xff]  ;;  %v930_v62 = vld [vmem:[%s4615_s30 + $0x18c0] sm:$0xff]  ;;  %3992 = vst [vmem:[%s4636_s17 + $0x1870] sm:$0xff] %v2968_v51  ;;  %v2970_v63 = vmin.f32 %v1946_v52, 1.0  ;;  %v2971_v0 = vmin.f32 %v1947_v53, 1.0 }
 0x246   : > { %v2972_v1 = vmin.f32 %v1948_v54, 1.0  ;;  %v1952_v2 = vmax.f32 %v928_v56, 0.0  ;;  %v931_v3 = vld [vmem:[%s4615_s30 + $0x18c8] sm:$0xff]  ;;  %v932_v4 = vld [vmem:[%s4615_s30 + $0x18d0] sm:$0xff]  ;;  %3993 = vst [vmem:[%s4636_s17 + $0x1878] sm:$0xff] %v2969_v57  ;;  %v2973_v5 = vmin.f32 %v1949_v58, 1.0 }
 0x247   : > { %v2974_v6 = vmin.f32 %v1950_v59, 1.0  ;;  %v2975_v7 = vmin.f32 %v1951_v60, 1.0  ;;  %v1953_v8 = vmax.f32 %v929_v61, 0.0  ;;  %v933_v9 = vld [vmem:[%s4615_s30 + $0x18d8] sm:$0xff]  ;;  %v934_v10 = vld [vmem:[%s4615_s30 + $0x18e0] sm:$0xff]  ;;  %3994 = vst [vmem:[%s4636_s17 + $0x1880] sm:$0xff] %v2970_v63 }
 0x248   : > { %3995 = vst [vmem:[%s4636_s17 + $0x1888] sm:$0xff] %v2971_v0  ;;  %3996 = vst [vmem:[%s4636_s17 + $0x1890] sm:$0xff] %v2972_v1  ;;  %v2976_v11 = vmin.f32 %v1952_v2, 1.0  ;;  %v1954_v12 = vmax.f32 %v930_v62, 0.0  ;;  %v1955_v13 = vmax.f32 %v931_v3, 0.0  ;;  %v1956_v14 = vmax.f32 %v932_v4, 0.0 }
 0x249   : > { %v935_v15 = vld [vmem:[%s4615_s30 + $0x18e8] sm:$0xff]  ;;  %v936_v16 = vld [vmem:[%s4615_s30 + $0x18f0] sm:$0xff]  ;;  %3997 = vst [vmem:[%s4636_s17 + $0x1898] sm:$0xff] %v2973_v5  ;;  %3998 = vst [vmem:[%s4636_s17 + $0x18a0] sm:$0xff] %v2974_v6  ;;  %v2977_v17 = vmin.f32 %v1953_v8, 1.0  ;;  %v1957_v18 = vmax.f32 %v933_v9, 0.0 }
 0x24a   : > { %3999 = vst [vmem:[%s4636_s17 + $0x18a8] sm:$0xff] %v2975_v7  ;;  %v1958_v19 = vmax.f32 %v934_v10, 0.0  ;;  %v1959_v20 = vmax.f32 %v935_v15, 0.0  ;;  %v937_v21 = vld [vmem:[%s4615_s30 + $0x18f8] sm:$0xff]  ;;  %v938_v22 = vld [vmem:[%s4615_s30 + $0x1900] sm:$0xff]  ;;  %4000 = vst [vmem:[%s4636_s17 + $0x18b0] sm:$0xff] %v2976_v11 }
 0x24b   : > { %v2978_v23 = vmin.f32 %v1954_v12, 1.0  ;;  %v2979_v24 = vmin.f32 %v1955_v13, 1.0  ;;  %v2980_v25 = vmin.f32 %v1956_v14, 1.0  ;;  %v1960_v26 = vmax.f32 %v936_v16, 0.0  ;;  %v939_v27 = vld [vmem:[%s4615_s30 + $0x1908] sm:$0xff]  ;;  %v940_v28 = vld [vmem:[%s4615_s30 + $0x1910] sm:$0xff] }
 0x24c   : > { %4001 = vst [vmem:[%s4636_s17 + $0x18b8] sm:$0xff] %v2977_v17  ;;  %v2981_v29 = vmin.f32 %v1957_v18, 1.0  ;;  %v2982_v30 = vmin.f32 %v1958_v19, 1.0  ;;  %v2983_v31 = vmin.f32 %v1959_v20, 1.0  ;;  %v1961_v32 = vmax.f32 %v937_v21, 0.0  ;;  %v941_v33 = vld [vmem:[%s4615_s30 + $0x1918] sm:$0xff] }
 0x24d   : > { %v942_v34 = vld [vmem:[%s4615_s30 + $0x1920] sm:$0xff]  ;;  %4002 = vst [vmem:[%s4636_s17 + $0x18c0] sm:$0xff] %v2978_v23  ;;  %4003 = vst [vmem:[%s4636_s17 + $0x18c8] sm:$0xff] %v2979_v24  ;;  %v2984_v35 = vmin.f32 %v1960_v26, 1.0  ;;  %v1962_v36 = vmax.f32 %v938_v22, 0.0  ;;  %v1963_v37 = vmax.f32 %v939_v27, 0.0 }
 0x24e   : > { %4004 = vst [vmem:[%s4636_s17 + $0x18d0] sm:$0xff] %v2980_v25  ;;  %v1964_v38 = vmax.f32 %v940_v28, 0.0  ;;  %v943_v39 = vld [vmem:[%s4615_s30 + $0x1928] sm:$0xff]  ;;  %v944_v40 = vld [vmem:[%s4615_s30 + $0x1930] sm:$0xff]  ;;  %4005 = vst [vmem:[%s4636_s17 + $0x18d8] sm:$0xff] %v2981_v29  ;;  %v2985_v41 = vmin.f32 %v1961_v32, 1.0 }
 0x24f   : > { %4006 = vst [vmem:[%s4636_s17 + $0x18e0] sm:$0xff] %v2982_v30  ;;  %4007 = vst [vmem:[%s4636_s17 + $0x18e8] sm:$0xff] %v2983_v31  ;;  %v1965_v42 = vmax.f32 %v941_v33, 0.0  ;;  %v1966_v43 = vmax.f32 %v942_v34, 0.0  ;;  %v1967_v44 = vmax.f32 %v943_v39, 0.0  ;;  %v945_v45 = vld [vmem:[%s4615_s30 + $0x1938] sm:$0xff] }
 0x250   : > { %v946_v46 = vld [vmem:[%s4615_s30 + $0x1940] sm:$0xff]  ;;  %4008 = vst [vmem:[%s4636_s17 + $0x18f0] sm:$0xff] %v2984_v35  ;;  %v2986_v47 = vmin.f32 %v1962_v36, 1.0  ;;  %v2987_v48 = vmin.f32 %v1963_v37, 1.0  ;;  %v2988_v49 = vmin.f32 %v1964_v38, 1.0  ;;  %v1968_v50 = vmax.f32 %v944_v40, 0.0 }
 0x251   : > { %v947_v51 = vld [vmem:[%s4615_s30 + $0x1948] sm:$0xff]  ;;  %v948_v52 = vld [vmem:[%s4615_s30 + $0x1950] sm:$0xff]  ;;  %4009 = vst [vmem:[%s4636_s17 + $0x18f8] sm:$0xff] %v2985_v41  ;;  %v2989_v53 = vmin.f32 %v1965_v42, 1.0  ;;  %v2990_v54 = vmin.f32 %v1966_v43, 1.0  ;;  %v2991_v55 = vmin.f32 %v1967_v44, 1.0 }
 0x252   : > { %v1969_v56 = vmax.f32 %v945_v45, 0.0  ;;  %v949_v57 = vld [vmem:[%s4615_s30 + $0x1958] sm:$0xff]  ;;  %v950_v58 = vld [vmem:[%s4615_s30 + $0x1960] sm:$0xff]  ;;  %4010 = vst [vmem:[%s4636_s17 + $0x1900] sm:$0xff] %v2986_v47  ;;  %4011 = vst [vmem:[%s4636_s17 + $0x1908] sm:$0xff] %v2987_v48  ;;  %v2992_v59 = vmin.f32 %v1968_v50, 1.0 }
 0x253   : > { %4012 = vst [vmem:[%s4636_s17 + $0x1910] sm:$0xff] %v2988_v49  ;;  %v1970_v60 = vmax.f32 %v946_v46, 0.0  ;;  %v1971_v61 = vmax.f32 %v947_v51, 0.0  ;;  %v1972_v62 = vmax.f32 %v948_v52, 0.0  ;;  %v951_v63 = vld [vmem:[%s4615_s30 + $0x1968] sm:$0xff]  ;;  %v952_v0 = vld [vmem:[%s4615_s30 + $0x1970] sm:$0xff] }
 0x254   : > { %4013 = vst [vmem:[%s4636_s17 + $0x1918] sm:$0xff] %v2989_v53  ;;  %4014 = vst [vmem:[%s4636_s17 + $0x1920] sm:$0xff] %v2990_v54  ;;  %v2993_v1 = vmin.f32 %v1969_v56, 1.0  ;;  %v1973_v2 = vmax.f32 %v949_v57, 0.0  ;;  %v1974_v3 = vmax.f32 %v950_v58, 0.0  ;;  %v1975_v4 = vmax.f32 %v951_v63, 0.0 }
 0x255   : > { %4015 = vst [vmem:[%s4636_s17 + $0x1928] sm:$0xff] %v2991_v55  ;;  %v953_v5 = vld [vmem:[%s4615_s30 + $0x1978] sm:$0xff]  ;;  %v954_v6 = vld [vmem:[%s4615_s30 + $0x1980] sm:$0xff]  ;;  %4016 = vst [vmem:[%s4636_s17 + $0x1930] sm:$0xff] %v2992_v59  ;;  %v2994_v7 = vmin.f32 %v1970_v60, 1.0  ;;  %v2995_v8 = vmin.f32 %v1971_v61, 1.0 }
 0x256   : > { %v2996_v9 = vmin.f32 %v1972_v62, 1.0  ;;  %v1976_v10 = vmax.f32 %v952_v0, 0.0  ;;  %v955_v11 = vld [vmem:[%s4615_s30 + $0x1988] sm:$0xff]  ;;  %v956_v12 = vld [vmem:[%s4615_s30 + $0x1990] sm:$0xff]  ;;  %4017 = vst [vmem:[%s4636_s17 + $0x1938] sm:$0xff] %v2993_v1  ;;  %v2997_v13 = vmin.f32 %v1973_v2, 1.0 }
 0x257   : > { %v2998_v14 = vmin.f32 %v1974_v3, 1.0  ;;  %v2999_v15 = vmin.f32 %v1975_v4, 1.0  ;;  %v1977_v16 = vmax.f32 %v953_v5, 0.0  ;;  %v957_v17 = vld [vmem:[%s4615_s30 + $0x1998] sm:$0xff]  ;;  %v958_v18 = vld [vmem:[%s4615_s30 + $0x19a0] sm:$0xff]  ;;  %4018 = vst [vmem:[%s4636_s17 + $0x1940] sm:$0xff] %v2994_v7 }
 0x258   : > { %4019 = vst [vmem:[%s4636_s17 + $0x1948] sm:$0xff] %v2995_v8  ;;  %4020 = vst [vmem:[%s4636_s17 + $0x1950] sm:$0xff] %v2996_v9  ;;  %v3000_v19 = vmin.f32 %v1976_v10, 1.0  ;;  %v1978_v20 = vmax.f32 %v954_v6, 0.0  ;;  %v1979_v21 = vmax.f32 %v955_v11, 0.0  ;;  %v1980_v22 = vmax.f32 %v956_v12, 0.0 }
 0x259   : > { %v959_v23 = vld [vmem:[%s4615_s30 + $0x19a8] sm:$0xff]  ;;  %v960_v24 = vld [vmem:[%s4615_s30 + $0x19b0] sm:$0xff]  ;;  %4021 = vst [vmem:[%s4636_s17 + $0x1958] sm:$0xff] %v2997_v13  ;;  %4022 = vst [vmem:[%s4636_s17 + $0x1960] sm:$0xff] %v2998_v14  ;;  %v3001_v25 = vmin.f32 %v1977_v16, 1.0  ;;  %v1981_v26 = vmax.f32 %v957_v17, 0.0 }
 0x25a   : > { %4023 = vst [vmem:[%s4636_s17 + $0x1968] sm:$0xff] %v2999_v15  ;;  %v1982_v27 = vmax.f32 %v958_v18, 0.0  ;;  %v1983_v28 = vmax.f32 %v959_v23, 0.0  ;;  %v961_v29 = vld [vmem:[%s4615_s30 + $0x19b8] sm:$0xff]  ;;  %v962_v30 = vld [vmem:[%s4615_s30 + $0x19c0] sm:$0xff]  ;;  %4024 = vst [vmem:[%s4636_s17 + $0x1970] sm:$0xff] %v3000_v19 }
 0x25b   : > { %v3002_v31 = vmin.f32 %v1978_v20, 1.0  ;;  %v3003_v32 = vmin.f32 %v1979_v21, 1.0  ;;  %v3004_v33 = vmin.f32 %v1980_v22, 1.0  ;;  %v1984_v34 = vmax.f32 %v960_v24, 0.0  ;;  %v963_v35 = vld [vmem:[%s4615_s30 + $0x19c8] sm:$0xff]  ;;  %v964_v36 = vld [vmem:[%s4615_s30 + $0x19d0] sm:$0xff] }
 0x25c   : > { %4025 = vst [vmem:[%s4636_s17 + $0x1978] sm:$0xff] %v3001_v25  ;;  %v3005_v37 = vmin.f32 %v1981_v26, 1.0  ;;  %v3006_v38 = vmin.f32 %v1982_v27, 1.0  ;;  %v3007_v39 = vmin.f32 %v1983_v28, 1.0  ;;  %v1985_v40 = vmax.f32 %v961_v29, 0.0  ;;  %v965_v41 = vld [vmem:[%s4615_s30 + $0x19d8] sm:$0xff] }
 0x25d   : > { %v966_v42 = vld [vmem:[%s4615_s30 + $0x19e0] sm:$0xff]  ;;  %4026 = vst [vmem:[%s4636_s17 + $0x1980] sm:$0xff] %v3002_v31  ;;  %4027 = vst [vmem:[%s4636_s17 + $0x1988] sm:$0xff] %v3003_v32  ;;  %v3008_v43 = vmin.f32 %v1984_v34, 1.0  ;;  %v1986_v44 = vmax.f32 %v962_v30, 0.0  ;;  %v1987_v45 = vmax.f32 %v963_v35, 0.0 }
 0x25e   : > { %4028 = vst [vmem:[%s4636_s17 + $0x1990] sm:$0xff] %v3004_v33  ;;  %v1988_v46 = vmax.f32 %v964_v36, 0.0  ;;  %v967_v47 = vld [vmem:[%s4615_s30 + $0x19e8] sm:$0xff]  ;;  %v968_v48 = vld [vmem:[%s4615_s30 + $0x19f0] sm:$0xff]  ;;  %4029 = vst [vmem:[%s4636_s17 + $0x1998] sm:$0xff] %v3005_v37  ;;  %v3009_v49 = vmin.f32 %v1985_v40, 1.0 }
 0x25f   : > { %4030 = vst [vmem:[%s4636_s17 + $0x19a0] sm:$0xff] %v3006_v38  ;;  %4031 = vst [vmem:[%s4636_s17 + $0x19a8] sm:$0xff] %v3007_v39  ;;  %v1989_v50 = vmax.f32 %v965_v41, 0.0  ;;  %v1990_v51 = vmax.f32 %v966_v42, 0.0  ;;  %v1991_v52 = vmax.f32 %v967_v47, 0.0  ;;  %v969_v53 = vld [vmem:[%s4615_s30 + $0x19f8] sm:$0xff] }
 0x260   : > { %v970_v54 = vld [vmem:[%s4615_s30 + $0x1a00] sm:$0xff]  ;;  %4032 = vst [vmem:[%s4636_s17 + $0x19b0] sm:$0xff] %v3008_v43  ;;  %v3010_v55 = vmin.f32 %v1986_v44, 1.0  ;;  %v3011_v56 = vmin.f32 %v1987_v45, 1.0  ;;  %v3012_v57 = vmin.f32 %v1988_v46, 1.0  ;;  %v1992_v58 = vmax.f32 %v968_v48, 0.0 }
 0x261   : > { %v971_v59 = vld [vmem:[%s4615_s30 + $0x1a08] sm:$0xff]  ;;  %v972_v60 = vld [vmem:[%s4615_s30 + $0x1a10] sm:$0xff]  ;;  %4033 = vst [vmem:[%s4636_s17 + $0x19b8] sm:$0xff] %v3009_v49  ;;  %v3013_v61 = vmin.f32 %v1989_v50, 1.0  ;;  %v3014_v62 = vmin.f32 %v1990_v51, 1.0  ;;  %v3015_v63 = vmin.f32 %v1991_v52, 1.0 }
 0x262   : > { %v1993_v0 = vmax.f32 %v969_v53, 0.0  ;;  %v973_v1 = vld [vmem:[%s4615_s30 + $0x1a18] sm:$0xff]  ;;  %v974_v2 = vld [vmem:[%s4615_s30 + $0x1a20] sm:$0xff]  ;;  %4034 = vst [vmem:[%s4636_s17 + $0x19c0] sm:$0xff] %v3010_v55  ;;  %4035 = vst [vmem:[%s4636_s17 + $0x19c8] sm:$0xff] %v3011_v56  ;;  %v3016_v3 = vmin.f32 %v1992_v58, 1.0 }
 0x263   : > { %4036 = vst [vmem:[%s4636_s17 + $0x19d0] sm:$0xff] %v3012_v57  ;;  %v1994_v4 = vmax.f32 %v970_v54, 0.0  ;;  %v1995_v5 = vmax.f32 %v971_v59, 0.0  ;;  %v1996_v6 = vmax.f32 %v972_v60, 0.0  ;;  %v975_v7 = vld [vmem:[%s4615_s30 + $0x1a28] sm:$0xff]  ;;  %v976_v8 = vld [vmem:[%s4615_s30 + $0x1a30] sm:$0xff] }
 0x264   : > { %4037 = vst [vmem:[%s4636_s17 + $0x19d8] sm:$0xff] %v3013_v61  ;;  %4038 = vst [vmem:[%s4636_s17 + $0x19e0] sm:$0xff] %v3014_v62  ;;  %v3017_v9 = vmin.f32 %v1993_v0, 1.0  ;;  %v1997_v10 = vmax.f32 %v973_v1, 0.0  ;;  %v1998_v11 = vmax.f32 %v974_v2, 0.0  ;;  %v1999_v12 = vmax.f32 %v975_v7, 0.0 }
 0x265   : > { %4039 = vst [vmem:[%s4636_s17 + $0x19e8] sm:$0xff] %v3015_v63  ;;  %v977_v13 = vld [vmem:[%s4615_s30 + $0x1a38] sm:$0xff]  ;;  %v978_v14 = vld [vmem:[%s4615_s30 + $0x1a40] sm:$0xff]  ;;  %4040 = vst [vmem:[%s4636_s17 + $0x19f0] sm:$0xff] %v3016_v3  ;;  %v3018_v15 = vmin.f32 %v1994_v4, 1.0  ;;  %v3019_v16 = vmin.f32 %v1995_v5, 1.0 }
 0x266   : > { %v3020_v17 = vmin.f32 %v1996_v6, 1.0  ;;  %v2000_v18 = vmax.f32 %v976_v8, 0.0  ;;  %v979_v19 = vld [vmem:[%s4615_s30 + $0x1a48] sm:$0xff]  ;;  %v980_v20 = vld [vmem:[%s4615_s30 + $0x1a50] sm:$0xff]  ;;  %4041 = vst [vmem:[%s4636_s17 + $0x19f8] sm:$0xff] %v3017_v9  ;;  %v3021_v21 = vmin.f32 %v1997_v10, 1.0 }
 0x267   : > { %v3022_v22 = vmin.f32 %v1998_v11, 1.0  ;;  %v3023_v23 = vmin.f32 %v1999_v12, 1.0  ;;  %v2001_v24 = vmax.f32 %v977_v13, 0.0  ;;  %v981_v25 = vld [vmem:[%s4615_s30 + $0x1a58] sm:$0xff]  ;;  %v982_v26 = vld [vmem:[%s4615_s30 + $0x1a60] sm:$0xff]  ;;  %4042 = vst [vmem:[%s4636_s17 + $0x1a00] sm:$0xff] %v3018_v15 }
 0x268   : > { %4043 = vst [vmem:[%s4636_s17 + $0x1a08] sm:$0xff] %v3019_v16  ;;  %4044 = vst [vmem:[%s4636_s17 + $0x1a10] sm:$0xff] %v3020_v17  ;;  %v3024_v27 = vmin.f32 %v2000_v18, 1.0  ;;  %v2002_v28 = vmax.f32 %v978_v14, 0.0  ;;  %v2003_v29 = vmax.f32 %v979_v19, 0.0  ;;  %v2004_v30 = vmax.f32 %v980_v20, 0.0 }
 0x269   : > { %v983_v31 = vld [vmem:[%s4615_s30 + $0x1a68] sm:$0xff]  ;;  %v984_v32 = vld [vmem:[%s4615_s30 + $0x1a70] sm:$0xff]  ;;  %4045 = vst [vmem:[%s4636_s17 + $0x1a18] sm:$0xff] %v3021_v21  ;;  %4046 = vst [vmem:[%s4636_s17 + $0x1a20] sm:$0xff] %v3022_v22  ;;  %v3025_v33 = vmin.f32 %v2001_v24, 1.0  ;;  %v2005_v34 = vmax.f32 %v981_v25, 0.0 }
 0x26a   : > { %4047 = vst [vmem:[%s4636_s17 + $0x1a28] sm:$0xff] %v3023_v23  ;;  %v2006_v35 = vmax.f32 %v982_v26, 0.0  ;;  %v2007_v36 = vmax.f32 %v983_v31, 0.0  ;;  %v985_v37 = vld [vmem:[%s4615_s30 + $0x1a78] sm:$0xff]  ;;  %v986_v38 = vld [vmem:[%s4615_s30 + $0x1a80] sm:$0xff]  ;;  %4048 = vst [vmem:[%s4636_s17 + $0x1a30] sm:$0xff] %v3024_v27 }
 0x26b   : > { %v3026_v39 = vmin.f32 %v2002_v28, 1.0  ;;  %v3027_v40 = vmin.f32 %v2003_v29, 1.0  ;;  %v3028_v41 = vmin.f32 %v2004_v30, 1.0  ;;  %v2008_v42 = vmax.f32 %v984_v32, 0.0  ;;  %v987_v43 = vld [vmem:[%s4615_s30 + $0x1a88] sm:$0xff]  ;;  %v988_v44 = vld [vmem:[%s4615_s30 + $0x1a90] sm:$0xff] }
 0x26c   : > { %4049 = vst [vmem:[%s4636_s17 + $0x1a38] sm:$0xff] %v3025_v33  ;;  %v3029_v45 = vmin.f32 %v2005_v34, 1.0  ;;  %v3030_v46 = vmin.f32 %v2006_v35, 1.0  ;;  %v3031_v47 = vmin.f32 %v2007_v36, 1.0  ;;  %v2009_v48 = vmax.f32 %v985_v37, 0.0  ;;  %v989_v49 = vld [vmem:[%s4615_s30 + $0x1a98] sm:$0xff] }
 0x26d   : > { %v990_v50 = vld [vmem:[%s4615_s30 + $0x1aa0] sm:$0xff]  ;;  %4050 = vst [vmem:[%s4636_s17 + $0x1a40] sm:$0xff] %v3026_v39  ;;  %4051 = vst [vmem:[%s4636_s17 + $0x1a48] sm:$0xff] %v3027_v40  ;;  %v3032_v51 = vmin.f32 %v2008_v42, 1.0  ;;  %v2010_v52 = vmax.f32 %v986_v38, 0.0  ;;  %v2011_v53 = vmax.f32 %v987_v43, 0.0 }
 0x26e   : > { %4052 = vst [vmem:[%s4636_s17 + $0x1a50] sm:$0xff] %v3028_v41  ;;  %v2012_v54 = vmax.f32 %v988_v44, 0.0  ;;  %v991_v55 = vld [vmem:[%s4615_s30 + $0x1aa8] sm:$0xff]  ;;  %v992_v56 = vld [vmem:[%s4615_s30 + $0x1ab0] sm:$0xff]  ;;  %4053 = vst [vmem:[%s4636_s17 + $0x1a58] sm:$0xff] %v3029_v45  ;;  %v3033_v57 = vmin.f32 %v2009_v48, 1.0 }
 0x26f   : > { %4054 = vst [vmem:[%s4636_s17 + $0x1a60] sm:$0xff] %v3030_v46  ;;  %4055 = vst [vmem:[%s4636_s17 + $0x1a68] sm:$0xff] %v3031_v47  ;;  %v2013_v58 = vmax.f32 %v989_v49, 0.0  ;;  %v2014_v59 = vmax.f32 %v990_v50, 0.0  ;;  %v2015_v60 = vmax.f32 %v991_v55, 0.0  ;;  %v993_v61 = vld [vmem:[%s4615_s30 + $0x1ab8] sm:$0xff] }
 0x270   : > { %v994_v62 = vld [vmem:[%s4615_s30 + $0x1ac0] sm:$0xff]  ;;  %4056 = vst [vmem:[%s4636_s17 + $0x1a70] sm:$0xff] %v3032_v51  ;;  %v3034_v63 = vmin.f32 %v2010_v52, 1.0  ;;  %v3035_v0 = vmin.f32 %v2011_v53, 1.0  ;;  %v3036_v1 = vmin.f32 %v2012_v54, 1.0  ;;  %v2016_v2 = vmax.f32 %v992_v56, 0.0 }
 0x271   : > { %v995_v3 = vld [vmem:[%s4615_s30 + $0x1ac8] sm:$0xff]  ;;  %v996_v4 = vld [vmem:[%s4615_s30 + $0x1ad0] sm:$0xff]  ;;  %4057 = vst [vmem:[%s4636_s17 + $0x1a78] sm:$0xff] %v3033_v57  ;;  %v3037_v5 = vmin.f32 %v2013_v58, 1.0  ;;  %v3038_v6 = vmin.f32 %v2014_v59, 1.0  ;;  %v3039_v7 = vmin.f32 %v2015_v60, 1.0 }
 0x272   : > { %v2017_v8 = vmax.f32 %v993_v61, 0.0  ;;  %v997_v9 = vld [vmem:[%s4615_s30 + $0x1ad8] sm:$0xff]  ;;  %v998_v10 = vld [vmem:[%s4615_s30 + $0x1ae0] sm:$0xff]  ;;  %4058 = vst [vmem:[%s4636_s17 + $0x1a80] sm:$0xff] %v3034_v63  ;;  %4059 = vst [vmem:[%s4636_s17 + $0x1a88] sm:$0xff] %v3035_v0  ;;  %v3040_v11 = vmin.f32 %v2016_v2, 1.0 }
 0x273   : > { %4060 = vst [vmem:[%s4636_s17 + $0x1a90] sm:$0xff] %v3036_v1  ;;  %v2018_v12 = vmax.f32 %v994_v62, 0.0  ;;  %v2019_v13 = vmax.f32 %v995_v3, 0.0  ;;  %v2020_v14 = vmax.f32 %v996_v4, 0.0  ;;  %v999_v15 = vld [vmem:[%s4615_s30 + $0x1ae8] sm:$0xff]  ;;  %v1000_v16 = vld [vmem:[%s4615_s30 + $0x1af0] sm:$0xff] }
 0x274   : > { %4061 = vst [vmem:[%s4636_s17 + $0x1a98] sm:$0xff] %v3037_v5  ;;  %4062 = vst [vmem:[%s4636_s17 + $0x1aa0] sm:$0xff] %v3038_v6  ;;  %v3041_v17 = vmin.f32 %v2017_v8, 1.0  ;;  %v2021_v18 = vmax.f32 %v997_v9, 0.0  ;;  %v2022_v19 = vmax.f32 %v998_v10, 0.0  ;;  %v2023_v20 = vmax.f32 %v999_v15, 0.0 }
 0x275   : > { %4063 = vst [vmem:[%s4636_s17 + $0x1aa8] sm:$0xff] %v3039_v7  ;;  %v1001_v21 = vld [vmem:[%s4615_s30 + $0x1af8] sm:$0xff]  ;;  %v1002_v22 = vld [vmem:[%s4615_s30 + $0x1b00] sm:$0xff]  ;;  %4064 = vst [vmem:[%s4636_s17 + $0x1ab0] sm:$0xff] %v3040_v11  ;;  %v3042_v23 = vmin.f32 %v2018_v12, 1.0  ;;  %v3043_v24 = vmin.f32 %v2019_v13, 1.0 }
 0x276   : > { %v3044_v25 = vmin.f32 %v2020_v14, 1.0  ;;  %v2024_v26 = vmax.f32 %v1000_v16, 0.0  ;;  %v1003_v27 = vld [vmem:[%s4615_s30 + $0x1b08] sm:$0xff]  ;;  %v1004_v28 = vld [vmem:[%s4615_s30 + $0x1b10] sm:$0xff]  ;;  %4065 = vst [vmem:[%s4636_s17 + $0x1ab8] sm:$0xff] %v3041_v17  ;;  %v3045_v29 = vmin.f32 %v2021_v18, 1.0 }
 0x277   : > { %v3046_v30 = vmin.f32 %v2022_v19, 1.0  ;;  %v3047_v31 = vmin.f32 %v2023_v20, 1.0  ;;  %v2025_v32 = vmax.f32 %v1001_v21, 0.0  ;;  %v1005_v33 = vld [vmem:[%s4615_s30 + $0x1b18] sm:$0xff]  ;;  %v1006_v34 = vld [vmem:[%s4615_s30 + $0x1b20] sm:$0xff]  ;;  %4066 = vst [vmem:[%s4636_s17 + $0x1ac0] sm:$0xff] %v3042_v23 }
 0x278   : > { %4067 = vst [vmem:[%s4636_s17 + $0x1ac8] sm:$0xff] %v3043_v24  ;;  %4068 = vst [vmem:[%s4636_s17 + $0x1ad0] sm:$0xff] %v3044_v25  ;;  %v3048_v35 = vmin.f32 %v2024_v26, 1.0  ;;  %v2026_v36 = vmax.f32 %v1002_v22, 0.0  ;;  %v2027_v37 = vmax.f32 %v1003_v27, 0.0  ;;  %v2028_v38 = vmax.f32 %v1004_v28, 0.0 }
 0x279   : > { %v1007_v39 = vld [vmem:[%s4615_s30 + $0x1b28] sm:$0xff]  ;;  %v1008_v40 = vld [vmem:[%s4615_s30 + $0x1b30] sm:$0xff]  ;;  %4069 = vst [vmem:[%s4636_s17 + $0x1ad8] sm:$0xff] %v3045_v29  ;;  %4070 = vst [vmem:[%s4636_s17 + $0x1ae0] sm:$0xff] %v3046_v30  ;;  %v3049_v41 = vmin.f32 %v2025_v32, 1.0  ;;  %v2029_v42 = vmax.f32 %v1005_v33, 0.0 }
 0x27a   : > { %4071 = vst [vmem:[%s4636_s17 + $0x1ae8] sm:$0xff] %v3047_v31  ;;  %v2030_v43 = vmax.f32 %v1006_v34, 0.0  ;;  %v2031_v44 = vmax.f32 %v1007_v39, 0.0  ;;  %v1009_v45 = vld [vmem:[%s4615_s30 + $0x1b38] sm:$0xff]  ;;  %v1010_v46 = vld [vmem:[%s4615_s30 + $0x1b40] sm:$0xff]  ;;  %4072 = vst [vmem:[%s4636_s17 + $0x1af0] sm:$0xff] %v3048_v35 }
 0x27b   : > { %v3050_v47 = vmin.f32 %v2026_v36, 1.0  ;;  %v3051_v48 = vmin.f32 %v2027_v37, 1.0  ;;  %v3052_v49 = vmin.f32 %v2028_v38, 1.0  ;;  %v2032_v50 = vmax.f32 %v1008_v40, 0.0  ;;  %v1011_v51 = vld [vmem:[%s4615_s30 + $0x1b48] sm:$0xff]  ;;  %v1012_v52 = vld [vmem:[%s4615_s30 + $0x1b50] sm:$0xff] }
 0x27c   : > { %4073 = vst [vmem:[%s4636_s17 + $0x1af8] sm:$0xff] %v3049_v41  ;;  %v3053_v53 = vmin.f32 %v2029_v42, 1.0  ;;  %v3054_v54 = vmin.f32 %v2030_v43, 1.0  ;;  %v3055_v55 = vmin.f32 %v2031_v44, 1.0  ;;  %v2033_v56 = vmax.f32 %v1009_v45, 0.0  ;;  %v1013_v57 = vld [vmem:[%s4615_s30 + $0x1b58] sm:$0xff] }
 0x27d   : > { %v1014_v58 = vld [vmem:[%s4615_s30 + $0x1b60] sm:$0xff]  ;;  %4074 = vst [vmem:[%s4636_s17 + $0x1b00] sm:$0xff] %v3050_v47  ;;  %4075 = vst [vmem:[%s4636_s17 + $0x1b08] sm:$0xff] %v3051_v48  ;;  %v3056_v59 = vmin.f32 %v2032_v50, 1.0  ;;  %v2034_v60 = vmax.f32 %v1010_v46, 0.0  ;;  %v2035_v61 = vmax.f32 %v1011_v51, 0.0 }
 0x27e   : > { %4076 = vst [vmem:[%s4636_s17 + $0x1b10] sm:$0xff] %v3052_v49  ;;  %v2036_v62 = vmax.f32 %v1012_v52, 0.0  ;;  %v1015_v63 = vld [vmem:[%s4615_s30 + $0x1b68] sm:$0xff]  ;;  %v1016_v0 = vld [vmem:[%s4615_s30 + $0x1b70] sm:$0xff]  ;;  %4077 = vst [vmem:[%s4636_s17 + $0x1b18] sm:$0xff] %v3053_v53  ;;  %v3057_v1 = vmin.f32 %v2033_v56, 1.0 }
 0x27f   : > { %4078 = vst [vmem:[%s4636_s17 + $0x1b20] sm:$0xff] %v3054_v54  ;;  %4079 = vst [vmem:[%s4636_s17 + $0x1b28] sm:$0xff] %v3055_v55  ;;  %v2037_v2 = vmax.f32 %v1013_v57, 0.0  ;;  %v2038_v3 = vmax.f32 %v1014_v58, 0.0  ;;  %v2039_v4 = vmax.f32 %v1015_v63, 0.0  ;;  %v1017_v5 = vld [vmem:[%s4615_s30 + $0x1b78] sm:$0xff] }
 0x280   : > { %v1018_v6 = vld [vmem:[%s4615_s30 + $0x1b80] sm:$0xff]  ;;  %4080 = vst [vmem:[%s4636_s17 + $0x1b30] sm:$0xff] %v3056_v59  ;;  %v3058_v7 = vmin.f32 %v2034_v60, 1.0  ;;  %v3059_v8 = vmin.f32 %v2035_v61, 1.0  ;;  %v3060_v9 = vmin.f32 %v2036_v62, 1.0  ;;  %v2040_v10 = vmax.f32 %v1016_v0, 0.0 }
 0x281   : > { %v1019_v11 = vld [vmem:[%s4615_s30 + $0x1b88] sm:$0xff]  ;;  %v1020_v12 = vld [vmem:[%s4615_s30 + $0x1b90] sm:$0xff]  ;;  %4081 = vst [vmem:[%s4636_s17 + $0x1b38] sm:$0xff] %v3057_v1  ;;  %v3061_v13 = vmin.f32 %v2037_v2, 1.0  ;;  %v3062_v14 = vmin.f32 %v2038_v3, 1.0  ;;  %v3063_v15 = vmin.f32 %v2039_v4, 1.0 }
 0x282   : > { %v2041_v16 = vmax.f32 %v1017_v5, 0.0  ;;  %v1021_v17 = vld [vmem:[%s4615_s30 + $0x1b98] sm:$0xff]  ;;  %v1022_v18 = vld [vmem:[%s4615_s30 + $0x1ba0] sm:$0xff]  ;;  %4082 = vst [vmem:[%s4636_s17 + $0x1b40] sm:$0xff] %v3058_v7  ;;  %4083 = vst [vmem:[%s4636_s17 + $0x1b48] sm:$0xff] %v3059_v8  ;;  %v3064_v19 = vmin.f32 %v2040_v10, 1.0 }
 0x283   : > { %4084 = vst [vmem:[%s4636_s17 + $0x1b50] sm:$0xff] %v3060_v9  ;;  %v2042_v20 = vmax.f32 %v1018_v6, 0.0  ;;  %v2043_v21 = vmax.f32 %v1019_v11, 0.0  ;;  %v2044_v22 = vmax.f32 %v1020_v12, 0.0  ;;  %v1023_v23 = vld [vmem:[%s4615_s30 + $0x1ba8] sm:$0xff]  ;;  %v1024_v24 = vld [vmem:[%s4615_s30 + $0x1bb0] sm:$0xff] }
 0x284   : > { %4085 = vst [vmem:[%s4636_s17 + $0x1b58] sm:$0xff] %v3061_v13  ;;  %4086 = vst [vmem:[%s4636_s17 + $0x1b60] sm:$0xff] %v3062_v14  ;;  %v3065_v25 = vmin.f32 %v2041_v16, 1.0  ;;  %v2045_v26 = vmax.f32 %v1021_v17, 0.0  ;;  %v2046_v27 = vmax.f32 %v1022_v18, 0.0  ;;  %v2047_v28 = vmax.f32 %v1023_v23, 0.0 }
 0x285   : > { %4087 = vst [vmem:[%s4636_s17 + $0x1b68] sm:$0xff] %v3063_v15  ;;  %v1025_v29 = vld [vmem:[%s4615_s30 + $0x1bb8] sm:$0xff]  ;;  %v1026_v30 = vld [vmem:[%s4615_s30 + $0x1bc0] sm:$0xff]  ;;  %4088 = vst [vmem:[%s4636_s17 + $0x1b70] sm:$0xff] %v3064_v19  ;;  %v3066_v31 = vmin.f32 %v2042_v20, 1.0  ;;  %v3067_v32 = vmin.f32 %v2043_v21, 1.0 }
 0x286   : > { %v3068_v33 = vmin.f32 %v2044_v22, 1.0  ;;  %v2048_v34 = vmax.f32 %v1024_v24, 0.0  ;;  %v1027_v35 = vld [vmem:[%s4615_s30 + $0x1bc8] sm:$0xff]  ;;  %v1028_v36 = vld [vmem:[%s4615_s30 + $0x1bd0] sm:$0xff]  ;;  %4089 = vst [vmem:[%s4636_s17 + $0x1b78] sm:$0xff] %v3065_v25  ;;  %v3069_v37 = vmin.f32 %v2045_v26, 1.0 }
 0x287   : > { %v3070_v38 = vmin.f32 %v2046_v27, 1.0  ;;  %v3071_v39 = vmin.f32 %v2047_v28, 1.0  ;;  %v2049_v40 = vmax.f32 %v1025_v29, 0.0  ;;  %v1029_v41 = vld [vmem:[%s4615_s30 + $0x1bd8] sm:$0xff]  ;;  %v1030_v42 = vld [vmem:[%s4615_s30 + $0x1be0] sm:$0xff]  ;;  %4090 = vst [vmem:[%s4636_s17 + $0x1b80] sm:$0xff] %v3066_v31 }
 0x288   : > { %4091 = vst [vmem:[%s4636_s17 + $0x1b88] sm:$0xff] %v3067_v32  ;;  %4092 = vst [vmem:[%s4636_s17 + $0x1b90] sm:$0xff] %v3068_v33  ;;  %v3072_v43 = vmin.f32 %v2048_v34, 1.0  ;;  %v2050_v44 = vmax.f32 %v1026_v30, 0.0  ;;  %v2051_v45 = vmax.f32 %v1027_v35, 0.0  ;;  %v2052_v46 = vmax.f32 %v1028_v36, 0.0 }
 0x289   : > { %v1031_v47 = vld [vmem:[%s4615_s30 + $0x1be8] sm:$0xff]  ;;  %v1032_v48 = vld [vmem:[%s4615_s30 + $0x1bf0] sm:$0xff]  ;;  %4093 = vst [vmem:[%s4636_s17 + $0x1b98] sm:$0xff] %v3069_v37  ;;  %4094 = vst [vmem:[%s4636_s17 + $0x1ba0] sm:$0xff] %v3070_v38  ;;  %v3073_v49 = vmin.f32 %v2049_v40, 1.0  ;;  %v2053_v50 = vmax.f32 %v1029_v41, 0.0 }
 0x28a   : > { %4095 = vst [vmem:[%s4636_s17 + $0x1ba8] sm:$0xff] %v3071_v39  ;;  %v2054_v51 = vmax.f32 %v1030_v42, 0.0  ;;  %v2055_v52 = vmax.f32 %v1031_v47, 0.0  ;;  %v1033_v53 = vld [vmem:[%s4615_s30 + $0x1bf8] sm:$0xff]  ;;  %v1034_v54 = vld [vmem:[%s4615_s30 + $0x1c00] sm:$0xff]  ;;  %4096 = vst [vmem:[%s4636_s17 + $0x1bb0] sm:$0xff] %v3072_v43 }
 0x28b   : > { %v3074_v55 = vmin.f32 %v2050_v44, 1.0  ;;  %v3075_v56 = vmin.f32 %v2051_v45, 1.0  ;;  %v3076_v57 = vmin.f32 %v2052_v46, 1.0  ;;  %v2056_v58 = vmax.f32 %v1032_v48, 0.0  ;;  %v1035_v59 = vld [vmem:[%s4615_s30 + $0x1c08] sm:$0xff]  ;;  %v1036_v60 = vld [vmem:[%s4615_s30 + $0x1c10] sm:$0xff] }
 0x28c   : > { %4097 = vst [vmem:[%s4636_s17 + $0x1bb8] sm:$0xff] %v3073_v49  ;;  %v3077_v61 = vmin.f32 %v2053_v50, 1.0  ;;  %v3078_v62 = vmin.f32 %v2054_v51, 1.0  ;;  %v3079_v63 = vmin.f32 %v2055_v52, 1.0  ;;  %v2057_v0 = vmax.f32 %v1033_v53, 0.0  ;;  %v1037_v1 = vld [vmem:[%s4615_s30 + $0x1c18] sm:$0xff] }
 0x28d   : > { %v1038_v2 = vld [vmem:[%s4615_s30 + $0x1c20] sm:$0xff]  ;;  %4098 = vst [vmem:[%s4636_s17 + $0x1bc0] sm:$0xff] %v3074_v55  ;;  %4099 = vst [vmem:[%s4636_s17 + $0x1bc8] sm:$0xff] %v3075_v56  ;;  %v3080_v3 = vmin.f32 %v2056_v58, 1.0  ;;  %v2058_v4 = vmax.f32 %v1034_v54, 0.0  ;;  %v2059_v5 = vmax.f32 %v1035_v59, 0.0 }
 0x28e   : > { %4100 = vst [vmem:[%s4636_s17 + $0x1bd0] sm:$0xff] %v3076_v57  ;;  %v2060_v6 = vmax.f32 %v1036_v60, 0.0  ;;  %v1039_v7 = vld [vmem:[%s4615_s30 + $0x1c28] sm:$0xff]  ;;  %v1040_v8 = vld [vmem:[%s4615_s30 + $0x1c30] sm:$0xff]  ;;  %4101 = vst [vmem:[%s4636_s17 + $0x1bd8] sm:$0xff] %v3077_v61  ;;  %v3081_v9 = vmin.f32 %v2057_v0, 1.0 }
 0x28f   : > { %4102 = vst [vmem:[%s4636_s17 + $0x1be0] sm:$0xff] %v3078_v62  ;;  %4103 = vst [vmem:[%s4636_s17 + $0x1be8] sm:$0xff] %v3079_v63  ;;  %v2061_v10 = vmax.f32 %v1037_v1, 0.0  ;;  %v2062_v11 = vmax.f32 %v1038_v2, 0.0  ;;  %v2063_v12 = vmax.f32 %v1039_v7, 0.0  ;;  %v1041_v13 = vld [vmem:[%s4615_s30 + $0x1c38] sm:$0xff] }
 0x290   : > { %v1042_v14 = vld [vmem:[%s4615_s30 + $0x1c40] sm:$0xff]  ;;  %4104 = vst [vmem:[%s4636_s17 + $0x1bf0] sm:$0xff] %v3080_v3  ;;  %v3082_v15 = vmin.f32 %v2058_v4, 1.0  ;;  %v3083_v16 = vmin.f32 %v2059_v5, 1.0  ;;  %v3084_v17 = vmin.f32 %v2060_v6, 1.0  ;;  %v2064_v18 = vmax.f32 %v1040_v8, 0.0 }
 0x291   : > { %v1043_v19 = vld [vmem:[%s4615_s30 + $0x1c48] sm:$0xff]  ;;  %v1044_v20 = vld [vmem:[%s4615_s30 + $0x1c50] sm:$0xff]  ;;  %4105 = vst [vmem:[%s4636_s17 + $0x1bf8] sm:$0xff] %v3081_v9  ;;  %v3085_v21 = vmin.f32 %v2061_v10, 1.0  ;;  %v3086_v22 = vmin.f32 %v2062_v11, 1.0  ;;  %v3087_v23 = vmin.f32 %v2063_v12, 1.0 }
 0x292   : > { %v2065_v24 = vmax.f32 %v1041_v13, 0.0  ;;  %v1045_v25 = vld [vmem:[%s4615_s30 + $0x1c58] sm:$0xff]  ;;  %v1046_v26 = vld [vmem:[%s4615_s30 + $0x1c60] sm:$0xff]  ;;  %4106 = vst [vmem:[%s4636_s17 + $0x1c00] sm:$0xff] %v3082_v15  ;;  %4107 = vst [vmem:[%s4636_s17 + $0x1c08] sm:$0xff] %v3083_v16  ;;  %v3088_v27 = vmin.f32 %v2064_v18, 1.0 }
 0x293   : > { %4108 = vst [vmem:[%s4636_s17 + $0x1c10] sm:$0xff] %v3084_v17  ;;  %v2066_v28 = vmax.f32 %v1042_v14, 0.0  ;;  %v2067_v29 = vmax.f32 %v1043_v19, 0.0  ;;  %v2068_v30 = vmax.f32 %v1044_v20, 0.0  ;;  %v1047_v31 = vld [vmem:[%s4615_s30 + $0x1c68] sm:$0xff]  ;;  %v1048_v32 = vld [vmem:[%s4615_s30 + $0x1c70] sm:$0xff] }
 0x294   : > { %4109 = vst [vmem:[%s4636_s17 + $0x1c18] sm:$0xff] %v3085_v21  ;;  %4110 = vst [vmem:[%s4636_s17 + $0x1c20] sm:$0xff] %v3086_v22  ;;  %v3089_v33 = vmin.f32 %v2065_v24, 1.0  ;;  %v2069_v34 = vmax.f32 %v1045_v25, 0.0  ;;  %v2070_v35 = vmax.f32 %v1046_v26, 0.0  ;;  %v2071_v36 = vmax.f32 %v1047_v31, 0.0 }
 0x295   : > { %4111 = vst [vmem:[%s4636_s17 + $0x1c28] sm:$0xff] %v3087_v23  ;;  %v1049_v37 = vld [vmem:[%s4615_s30 + $0x1c78] sm:$0xff]  ;;  %v1050_v38 = vld [vmem:[%s4615_s30 + $0x1c80] sm:$0xff]  ;;  %4112 = vst [vmem:[%s4636_s17 + $0x1c30] sm:$0xff] %v3088_v27  ;;  %v3090_v39 = vmin.f32 %v2066_v28, 1.0  ;;  %v3091_v40 = vmin.f32 %v2067_v29, 1.0 }
 0x296   : > { %v3092_v41 = vmin.f32 %v2068_v30, 1.0  ;;  %v2072_v42 = vmax.f32 %v1048_v32, 0.0  ;;  %v1051_v43 = vld [vmem:[%s4615_s30 + $0x1c88] sm:$0xff]  ;;  %v1052_v44 = vld [vmem:[%s4615_s30 + $0x1c90] sm:$0xff]  ;;  %4113 = vst [vmem:[%s4636_s17 + $0x1c38] sm:$0xff] %v3089_v33  ;;  %v3093_v45 = vmin.f32 %v2069_v34, 1.0 }
 0x297   : > { %v3094_v46 = vmin.f32 %v2070_v35, 1.0  ;;  %v3095_v47 = vmin.f32 %v2071_v36, 1.0  ;;  %v2073_v48 = vmax.f32 %v1049_v37, 0.0  ;;  %v1053_v49 = vld [vmem:[%s4615_s30 + $0x1c98] sm:$0xff]  ;;  %v1054_v50 = vld [vmem:[%s4615_s30 + $0x1ca0] sm:$0xff]  ;;  %4114 = vst [vmem:[%s4636_s17 + $0x1c40] sm:$0xff] %v3090_v39 }
 0x298   : > { %4115 = vst [vmem:[%s4636_s17 + $0x1c48] sm:$0xff] %v3091_v40  ;;  %4116 = vst [vmem:[%s4636_s17 + $0x1c50] sm:$0xff] %v3092_v41  ;;  %v3096_v51 = vmin.f32 %v2072_v42, 1.0  ;;  %v2074_v52 = vmax.f32 %v1050_v38, 0.0  ;;  %v2075_v53 = vmax.f32 %v1051_v43, 0.0  ;;  %v2076_v54 = vmax.f32 %v1052_v44, 0.0 }
 0x299   : > { %v1055_v55 = vld [vmem:[%s4615_s30 + $0x1ca8] sm:$0xff]  ;;  %v1056_v56 = vld [vmem:[%s4615_s30 + $0x1cb0] sm:$0xff]  ;;  %4117 = vst [vmem:[%s4636_s17 + $0x1c58] sm:$0xff] %v3093_v45  ;;  %4118 = vst [vmem:[%s4636_s17 + $0x1c60] sm:$0xff] %v3094_v46  ;;  %v3097_v57 = vmin.f32 %v2073_v48, 1.0  ;;  %v2077_v58 = vmax.f32 %v1053_v49, 0.0 }
 0x29a   : > { %4119 = vst [vmem:[%s4636_s17 + $0x1c68] sm:$0xff] %v3095_v47  ;;  %v2078_v59 = vmax.f32 %v1054_v50, 0.0  ;;  %v2079_v60 = vmax.f32 %v1055_v55, 0.0  ;;  %v1057_v61 = vld [vmem:[%s4615_s30 + $0x1cb8] sm:$0xff]  ;;  %v1058_v62 = vld [vmem:[%s4615_s30 + $0x1cc0] sm:$0xff]  ;;  %4120 = vst [vmem:[%s4636_s17 + $0x1c70] sm:$0xff] %v3096_v51 }
 0x29b   : > { %v3098_v63 = vmin.f32 %v2074_v52, 1.0  ;;  %v3099_v0 = vmin.f32 %v2075_v53, 1.0  ;;  %v3100_v1 = vmin.f32 %v2076_v54, 1.0  ;;  %v2080_v2 = vmax.f32 %v1056_v56, 0.0  ;;  %v1059_v3 = vld [vmem:[%s4615_s30 + $0x1cc8] sm:$0xff]  ;;  %v1060_v4 = vld [vmem:[%s4615_s30 + $0x1cd0] sm:$0xff] }
 0x29c   : > { %4121 = vst [vmem:[%s4636_s17 + $0x1c78] sm:$0xff] %v3097_v57  ;;  %v3101_v5 = vmin.f32 %v2077_v58, 1.0  ;;  %v3102_v6 = vmin.f32 %v2078_v59, 1.0  ;;  %v3103_v7 = vmin.f32 %v2079_v60, 1.0  ;;  %v2081_v8 = vmax.f32 %v1057_v61, 0.0  ;;  %v1061_v9 = vld [vmem:[%s4615_s30 + $0x1cd8] sm:$0xff] }
 0x29d   : > { %v1062_v10 = vld [vmem:[%s4615_s30 + $0x1ce0] sm:$0xff]  ;;  %4122 = vst [vmem:[%s4636_s17 + $0x1c80] sm:$0xff] %v3098_v63  ;;  %4123 = vst [vmem:[%s4636_s17 + $0x1c88] sm:$0xff] %v3099_v0  ;;  %v3104_v11 = vmin.f32 %v2080_v2, 1.0  ;;  %v2082_v12 = vmax.f32 %v1058_v62, 0.0  ;;  %v2083_v13 = vmax.f32 %v1059_v3, 0.0 }
 0x29e   : > { %4124 = vst [vmem:[%s4636_s17 + $0x1c90] sm:$0xff] %v3100_v1  ;;  %v2084_v14 = vmax.f32 %v1060_v4, 0.0  ;;  %v1063_v15 = vld [vmem:[%s4615_s30 + $0x1ce8] sm:$0xff]  ;;  %v1064_v16 = vld [vmem:[%s4615_s30 + $0x1cf0] sm:$0xff]  ;;  %4125 = vst [vmem:[%s4636_s17 + $0x1c98] sm:$0xff] %v3101_v5  ;;  %v3105_v17 = vmin.f32 %v2081_v8, 1.0 }
 0x29f   : > { %4126 = vst [vmem:[%s4636_s17 + $0x1ca0] sm:$0xff] %v3102_v6  ;;  %4127 = vst [vmem:[%s4636_s17 + $0x1ca8] sm:$0xff] %v3103_v7  ;;  %v2085_v18 = vmax.f32 %v1061_v9, 0.0  ;;  %v2086_v19 = vmax.f32 %v1062_v10, 0.0  ;;  %v2087_v20 = vmax.f32 %v1063_v15, 0.0  ;;  %v1065_v21 = vld [vmem:[%s4615_s30 + $0x1cf8] sm:$0xff] }
 0x2a0   : > { %v1066_v22 = vld [vmem:[%s4615_s30 + $0x1d00] sm:$0xff]  ;;  %4128 = vst [vmem:[%s4636_s17 + $0x1cb0] sm:$0xff] %v3104_v11  ;;  %v3106_v23 = vmin.f32 %v2082_v12, 1.0  ;;  %v3107_v24 = vmin.f32 %v2083_v13, 1.0  ;;  %v3108_v25 = vmin.f32 %v2084_v14, 1.0  ;;  %v2088_v26 = vmax.f32 %v1064_v16, 0.0 }
 0x2a1   : > { %v1067_v27 = vld [vmem:[%s4615_s30 + $0x1d08] sm:$0xff]  ;;  %v1068_v28 = vld [vmem:[%s4615_s30 + $0x1d10] sm:$0xff]  ;;  %4129 = vst [vmem:[%s4636_s17 + $0x1cb8] sm:$0xff] %v3105_v17  ;;  %v3109_v29 = vmin.f32 %v2085_v18, 1.0  ;;  %v3110_v30 = vmin.f32 %v2086_v19, 1.0  ;;  %v3111_v31 = vmin.f32 %v2087_v20, 1.0 }
 0x2a2   : > { %v2089_v32 = vmax.f32 %v1065_v21, 0.0  ;;  %v1069_v33 = vld [vmem:[%s4615_s30 + $0x1d18] sm:$0xff]  ;;  %v1070_v34 = vld [vmem:[%s4615_s30 + $0x1d20] sm:$0xff]  ;;  %4130 = vst [vmem:[%s4636_s17 + $0x1cc0] sm:$0xff] %v3106_v23  ;;  %4131 = vst [vmem:[%s4636_s17 + $0x1cc8] sm:$0xff] %v3107_v24  ;;  %v3112_v35 = vmin.f32 %v2088_v26, 1.0 }
 0x2a3   : > { %4132 = vst [vmem:[%s4636_s17 + $0x1cd0] sm:$0xff] %v3108_v25  ;;  %v2090_v36 = vmax.f32 %v1066_v22, 0.0  ;;  %v2091_v37 = vmax.f32 %v1067_v27, 0.0  ;;  %v2092_v38 = vmax.f32 %v1068_v28, 0.0  ;;  %v1071_v39 = vld [vmem:[%s4615_s30 + $0x1d28] sm:$0xff]  ;;  %v1072_v40 = vld [vmem:[%s4615_s30 + $0x1d30] sm:$0xff] }
 0x2a4   : > { %4133 = vst [vmem:[%s4636_s17 + $0x1cd8] sm:$0xff] %v3109_v29  ;;  %4134 = vst [vmem:[%s4636_s17 + $0x1ce0] sm:$0xff] %v3110_v30  ;;  %v3113_v41 = vmin.f32 %v2089_v32, 1.0  ;;  %v2093_v42 = vmax.f32 %v1069_v33, 0.0  ;;  %v2094_v43 = vmax.f32 %v1070_v34, 0.0  ;;  %v2095_v44 = vmax.f32 %v1071_v39, 0.0 }
 0x2a5   : > { %4135 = vst [vmem:[%s4636_s17 + $0x1ce8] sm:$0xff] %v3111_v31  ;;  %v1073_v45 = vld [vmem:[%s4615_s30 + $0x1d38] sm:$0xff]  ;;  %v1074_v46 = vld [vmem:[%s4615_s30 + $0x1d40] sm:$0xff]  ;;  %4136 = vst [vmem:[%s4636_s17 + $0x1cf0] sm:$0xff] %v3112_v35  ;;  %v3114_v47 = vmin.f32 %v2090_v36, 1.0  ;;  %v3115_v48 = vmin.f32 %v2091_v37, 1.0 }
 0x2a6   : > { %v3116_v49 = vmin.f32 %v2092_v38, 1.0  ;;  %v2096_v50 = vmax.f32 %v1072_v40, 0.0  ;;  %v1075_v51 = vld [vmem:[%s4615_s30 + $0x1d48] sm:$0xff]  ;;  %v1076_v52 = vld [vmem:[%s4615_s30 + $0x1d50] sm:$0xff]  ;;  %4137 = vst [vmem:[%s4636_s17 + $0x1cf8] sm:$0xff] %v3113_v41  ;;  %v3117_v53 = vmin.f32 %v2093_v42, 1.0 }
 0x2a7   : > { %v3118_v54 = vmin.f32 %v2094_v43, 1.0  ;;  %v3119_v55 = vmin.f32 %v2095_v44, 1.0  ;;  %v2097_v56 = vmax.f32 %v1073_v45, 0.0  ;;  %v1077_v57 = vld [vmem:[%s4615_s30 + $0x1d58] sm:$0xff]  ;;  %v1078_v58 = vld [vmem:[%s4615_s30 + $0x1d60] sm:$0xff]  ;;  %4138 = vst [vmem:[%s4636_s17 + $0x1d00] sm:$0xff] %v3114_v47 }
 0x2a8   : > { %4139 = vst [vmem:[%s4636_s17 + $0x1d08] sm:$0xff] %v3115_v48  ;;  %4140 = vst [vmem:[%s4636_s17 + $0x1d10] sm:$0xff] %v3116_v49  ;;  %v3120_v59 = vmin.f32 %v2096_v50, 1.0  ;;  %v2098_v60 = vmax.f32 %v1074_v46, 0.0  ;;  %v2099_v61 = vmax.f32 %v1075_v51, 0.0  ;;  %v2100_v62 = vmax.f32 %v1076_v52, 0.0 }
 0x2a9   : > { %v1079_v63 = vld [vmem:[%s4615_s30 + $0x1d68] sm:$0xff]  ;;  %v1080_v0 = vld [vmem:[%s4615_s30 + $0x1d70] sm:$0xff]  ;;  %4141 = vst [vmem:[%s4636_s17 + $0x1d18] sm:$0xff] %v3117_v53  ;;  %4142 = vst [vmem:[%s4636_s17 + $0x1d20] sm:$0xff] %v3118_v54  ;;  %v3121_v1 = vmin.f32 %v2097_v56, 1.0  ;;  %v2101_v2 = vmax.f32 %v1077_v57, 0.0 }
 0x2aa   : > { %4143 = vst [vmem:[%s4636_s17 + $0x1d28] sm:$0xff] %v3119_v55  ;;  %v2102_v3 = vmax.f32 %v1078_v58, 0.0  ;;  %v2103_v4 = vmax.f32 %v1079_v63, 0.0  ;;  %v1081_v5 = vld [vmem:[%s4615_s30 + $0x1d78] sm:$0xff]  ;;  %v1082_v6 = vld [vmem:[%s4615_s30 + $0x1d80] sm:$0xff]  ;;  %4144 = vst [vmem:[%s4636_s17 + $0x1d30] sm:$0xff] %v3120_v59 }
 0x2ab   : > { %v3122_v7 = vmin.f32 %v2098_v60, 1.0  ;;  %v3123_v8 = vmin.f32 %v2099_v61, 1.0  ;;  %v3124_v9 = vmin.f32 %v2100_v62, 1.0  ;;  %v2104_v10 = vmax.f32 %v1080_v0, 0.0  ;;  %v1083_v11 = vld [vmem:[%s4615_s30 + $0x1d88] sm:$0xff]  ;;  %v1084_v12 = vld [vmem:[%s4615_s30 + $0x1d90] sm:$0xff] }
 0x2ac   : > { %4145 = vst [vmem:[%s4636_s17 + $0x1d38] sm:$0xff] %v3121_v1  ;;  %v3125_v13 = vmin.f32 %v2101_v2, 1.0  ;;  %v3126_v14 = vmin.f32 %v2102_v3, 1.0  ;;  %v3127_v15 = vmin.f32 %v2103_v4, 1.0  ;;  %v2105_v16 = vmax.f32 %v1081_v5, 0.0  ;;  %v1085_v17 = vld [vmem:[%s4615_s30 + $0x1d98] sm:$0xff] }
 0x2ad   : > { %v1086_v18 = vld [vmem:[%s4615_s30 + $0x1da0] sm:$0xff]  ;;  %4146 = vst [vmem:[%s4636_s17 + $0x1d40] sm:$0xff] %v3122_v7  ;;  %4147 = vst [vmem:[%s4636_s17 + $0x1d48] sm:$0xff] %v3123_v8  ;;  %v3128_v19 = vmin.f32 %v2104_v10, 1.0  ;;  %v2106_v20 = vmax.f32 %v1082_v6, 0.0  ;;  %v2107_v21 = vmax.f32 %v1083_v11, 0.0 }
 0x2ae   : > { %4148 = vst [vmem:[%s4636_s17 + $0x1d50] sm:$0xff] %v3124_v9  ;;  %v2108_v22 = vmax.f32 %v1084_v12, 0.0  ;;  %v1087_v23 = vld [vmem:[%s4615_s30 + $0x1da8] sm:$0xff]  ;;  %v1088_v24 = vld [vmem:[%s4615_s30 + $0x1db0] sm:$0xff]  ;;  %4149 = vst [vmem:[%s4636_s17 + $0x1d58] sm:$0xff] %v3125_v13  ;;  %v3129_v25 = vmin.f32 %v2105_v16, 1.0 }
 0x2af   : > { %4150 = vst [vmem:[%s4636_s17 + $0x1d60] sm:$0xff] %v3126_v14  ;;  %4151 = vst [vmem:[%s4636_s17 + $0x1d68] sm:$0xff] %v3127_v15  ;;  %v2109_v26 = vmax.f32 %v1085_v17, 0.0  ;;  %v2110_v27 = vmax.f32 %v1086_v18, 0.0  ;;  %v2111_v28 = vmax.f32 %v1087_v23, 0.0  ;;  %v1089_v29 = vld [vmem:[%s4615_s30 + $0x1db8] sm:$0xff] }
 0x2b0   : > { %v1090_v30 = vld [vmem:[%s4615_s30 + $0x1dc0] sm:$0xff]  ;;  %4152 = vst [vmem:[%s4636_s17 + $0x1d70] sm:$0xff] %v3128_v19  ;;  %v3130_v31 = vmin.f32 %v2106_v20, 1.0  ;;  %v3131_v32 = vmin.f32 %v2107_v21, 1.0  ;;  %v3132_v33 = vmin.f32 %v2108_v22, 1.0  ;;  %v2112_v34 = vmax.f32 %v1088_v24, 0.0 }
 0x2b1   : > { %v1091_v35 = vld [vmem:[%s4615_s30 + $0x1dc8] sm:$0xff]  ;;  %v1092_v36 = vld [vmem:[%s4615_s30 + $0x1dd0] sm:$0xff]  ;;  %4153 = vst [vmem:[%s4636_s17 + $0x1d78] sm:$0xff] %v3129_v25  ;;  %v3133_v37 = vmin.f32 %v2109_v26, 1.0  ;;  %v3134_v38 = vmin.f32 %v2110_v27, 1.0  ;;  %v3135_v39 = vmin.f32 %v2111_v28, 1.0 }
 0x2b2   : > { %v2113_v40 = vmax.f32 %v1089_v29, 0.0  ;;  %v1093_v41 = vld [vmem:[%s4615_s30 + $0x1dd8] sm:$0xff]  ;;  %v1094_v42 = vld [vmem:[%s4615_s30 + $0x1de0] sm:$0xff]  ;;  %4154 = vst [vmem:[%s4636_s17 + $0x1d80] sm:$0xff] %v3130_v31  ;;  %4155 = vst [vmem:[%s4636_s17 + $0x1d88] sm:$0xff] %v3131_v32  ;;  %v3136_v43 = vmin.f32 %v2112_v34, 1.0 }
 0x2b3   : > { %4156 = vst [vmem:[%s4636_s17 + $0x1d90] sm:$0xff] %v3132_v33  ;;  %v2114_v44 = vmax.f32 %v1090_v30, 0.0  ;;  %v2115_v45 = vmax.f32 %v1091_v35, 0.0  ;;  %v2116_v46 = vmax.f32 %v1092_v36, 0.0  ;;  %v1095_v47 = vld [vmem:[%s4615_s30 + $0x1de8] sm:$0xff]  ;;  %v1096_v48 = vld [vmem:[%s4615_s30 + $0x1df0] sm:$0xff] }
 0x2b4   : > { %4157 = vst [vmem:[%s4636_s17 + $0x1d98] sm:$0xff] %v3133_v37  ;;  %4158 = vst [vmem:[%s4636_s17 + $0x1da0] sm:$0xff] %v3134_v38  ;;  %v3137_v49 = vmin.f32 %v2113_v40, 1.0  ;;  %v2117_v50 = vmax.f32 %v1093_v41, 0.0  ;;  %v2118_v51 = vmax.f32 %v1094_v42, 0.0  ;;  %v2119_v52 = vmax.f32 %v1095_v47, 0.0 }
 0x2b5   : > { %4159 = vst [vmem:[%s4636_s17 + $0x1da8] sm:$0xff] %v3135_v39  ;;  %v1097_v53 = vld [vmem:[%s4615_s30 + $0x1df8] sm:$0xff]  ;;  %v1098_v54 = vld [vmem:[%s4615_s30 + $0x1e00] sm:$0xff]  ;;  %4160 = vst [vmem:[%s4636_s17 + $0x1db0] sm:$0xff] %v3136_v43  ;;  %v3138_v55 = vmin.f32 %v2114_v44, 1.0  ;;  %v3139_v56 = vmin.f32 %v2115_v45, 1.0 }
 0x2b6   : > { %v3140_v57 = vmin.f32 %v2116_v46, 1.0  ;;  %v2120_v58 = vmax.f32 %v1096_v48, 0.0  ;;  %v1099_v59 = vld [vmem:[%s4615_s30 + $0x1e08] sm:$0xff]  ;;  %v1100_v60 = vld [vmem:[%s4615_s30 + $0x1e10] sm:$0xff]  ;;  %4161 = vst [vmem:[%s4636_s17 + $0x1db8] sm:$0xff] %v3137_v49  ;;  %v3141_v61 = vmin.f32 %v2117_v50, 1.0 }
 0x2b7   : > { %v3142_v62 = vmin.f32 %v2118_v51, 1.0  ;;  %v3143_v63 = vmin.f32 %v2119_v52, 1.0  ;;  %v2121_v0 = vmax.f32 %v1097_v53, 0.0  ;;  %v1101_v1 = vld [vmem:[%s4615_s30 + $0x1e18] sm:$0xff]  ;;  %v1102_v2 = vld [vmem:[%s4615_s30 + $0x1e20] sm:$0xff]  ;;  %4162 = vst [vmem:[%s4636_s17 + $0x1dc0] sm:$0xff] %v3138_v55 }
 0x2b8   : > { %4163 = vst [vmem:[%s4636_s17 + $0x1dc8] sm:$0xff] %v3139_v56  ;;  %4164 = vst [vmem:[%s4636_s17 + $0x1dd0] sm:$0xff] %v3140_v57  ;;  %v3144_v3 = vmin.f32 %v2120_v58, 1.0  ;;  %v2122_v4 = vmax.f32 %v1098_v54, 0.0  ;;  %v2123_v5 = vmax.f32 %v1099_v59, 0.0  ;;  %v2124_v6 = vmax.f32 %v1100_v60, 0.0 }
 0x2b9   : > { %v1103_v7 = vld [vmem:[%s4615_s30 + $0x1e28] sm:$0xff]  ;;  %v1104_v8 = vld [vmem:[%s4615_s30 + $0x1e30] sm:$0xff]  ;;  %4165 = vst [vmem:[%s4636_s17 + $0x1dd8] sm:$0xff] %v3141_v61  ;;  %4166 = vst [vmem:[%s4636_s17 + $0x1de0] sm:$0xff] %v3142_v62  ;;  %v3145_v9 = vmin.f32 %v2121_v0, 1.0  ;;  %v2125_v10 = vmax.f32 %v1101_v1, 0.0 }
 0x2ba   : > { %4167 = vst [vmem:[%s4636_s17 + $0x1de8] sm:$0xff] %v3143_v63  ;;  %v2126_v11 = vmax.f32 %v1102_v2, 0.0  ;;  %v2127_v12 = vmax.f32 %v1103_v7, 0.0  ;;  %v1105_v13 = vld [vmem:[%s4615_s30 + $0x1e38] sm:$0xff]  ;;  %v1106_v14 = vld [vmem:[%s4615_s30 + $0x1e40] sm:$0xff]  ;;  %4168 = vst [vmem:[%s4636_s17 + $0x1df0] sm:$0xff] %v3144_v3 }
 0x2bb   : > { %v3146_v15 = vmin.f32 %v2122_v4, 1.0  ;;  %v3147_v16 = vmin.f32 %v2123_v5, 1.0  ;;  %v3148_v17 = vmin.f32 %v2124_v6, 1.0  ;;  %v2128_v18 = vmax.f32 %v1104_v8, 0.0  ;;  %v1107_v19 = vld [vmem:[%s4615_s30 + $0x1e48] sm:$0xff]  ;;  %v1108_v20 = vld [vmem:[%s4615_s30 + $0x1e50] sm:$0xff] }
 0x2bc   : > { %4169 = vst [vmem:[%s4636_s17 + $0x1df8] sm:$0xff] %v3145_v9  ;;  %v3149_v21 = vmin.f32 %v2125_v10, 1.0  ;;  %v3150_v22 = vmin.f32 %v2126_v11, 1.0  ;;  %v3151_v23 = vmin.f32 %v2127_v12, 1.0  ;;  %v2129_v24 = vmax.f32 %v1105_v13, 0.0  ;;  %v1109_v25 = vld [vmem:[%s4615_s30 + $0x1e58] sm:$0xff] }
 0x2bd   : > { %v1110_v26 = vld [vmem:[%s4615_s30 + $0x1e60] sm:$0xff]  ;;  %4170 = vst [vmem:[%s4636_s17 + $0x1e00] sm:$0xff] %v3146_v15  ;;  %4171 = vst [vmem:[%s4636_s17 + $0x1e08] sm:$0xff] %v3147_v16  ;;  %v3152_v27 = vmin.f32 %v2128_v18, 1.0  ;;  %v2130_v28 = vmax.f32 %v1106_v14, 0.0  ;;  %v2131_v29 = vmax.f32 %v1107_v19, 0.0 }
 0x2be   : > { %4172 = vst [vmem:[%s4636_s17 + $0x1e10] sm:$0xff] %v3148_v17  ;;  %v2132_v30 = vmax.f32 %v1108_v20, 0.0  ;;  %v1111_v31 = vld [vmem:[%s4615_s30 + $0x1e68] sm:$0xff]  ;;  %v1112_v32 = vld [vmem:[%s4615_s30 + $0x1e70] sm:$0xff]  ;;  %4173 = vst [vmem:[%s4636_s17 + $0x1e18] sm:$0xff] %v3149_v21  ;;  %v3153_v33 = vmin.f32 %v2129_v24, 1.0 }
 0x2bf   : > { %4174 = vst [vmem:[%s4636_s17 + $0x1e20] sm:$0xff] %v3150_v22  ;;  %4175 = vst [vmem:[%s4636_s17 + $0x1e28] sm:$0xff] %v3151_v23  ;;  %v2133_v34 = vmax.f32 %v1109_v25, 0.0  ;;  %v2134_v35 = vmax.f32 %v1110_v26, 0.0  ;;  %v2135_v36 = vmax.f32 %v1111_v31, 0.0  ;;  %v1113_v37 = vld [vmem:[%s4615_s30 + $0x1e78] sm:$0xff] }
 0x2c0   : > { %v1114_v38 = vld [vmem:[%s4615_s30 + $0x1e80] sm:$0xff]  ;;  %4176 = vst [vmem:[%s4636_s17 + $0x1e30] sm:$0xff] %v3152_v27  ;;  %v3154_v39 = vmin.f32 %v2130_v28, 1.0  ;;  %v3155_v40 = vmin.f32 %v2131_v29, 1.0  ;;  %v3156_v41 = vmin.f32 %v2132_v30, 1.0  ;;  %v2136_v42 = vmax.f32 %v1112_v32, 0.0 }
 0x2c1   : > { %v1115_v43 = vld [vmem:[%s4615_s30 + $0x1e88] sm:$0xff]  ;;  %v1116_v44 = vld [vmem:[%s4615_s30 + $0x1e90] sm:$0xff]  ;;  %4177 = vst [vmem:[%s4636_s17 + $0x1e38] sm:$0xff] %v3153_v33  ;;  %v3157_v45 = vmin.f32 %v2133_v34, 1.0  ;;  %v3158_v46 = vmin.f32 %v2134_v35, 1.0  ;;  %v3159_v47 = vmin.f32 %v2135_v36, 1.0 }
 0x2c2   : > { %v2137_v48 = vmax.f32 %v1113_v37, 0.0  ;;  %v1117_v49 = vld [vmem:[%s4615_s30 + $0x1e98] sm:$0xff]  ;;  %v1118_v50 = vld [vmem:[%s4615_s30 + $0x1ea0] sm:$0xff]  ;;  %4178 = vst [vmem:[%s4636_s17 + $0x1e40] sm:$0xff] %v3154_v39  ;;  %4179 = vst [vmem:[%s4636_s17 + $0x1e48] sm:$0xff] %v3155_v40  ;;  %v3160_v51 = vmin.f32 %v2136_v42, 1.0 }
 0x2c3   : > { %4180 = vst [vmem:[%s4636_s17 + $0x1e50] sm:$0xff] %v3156_v41  ;;  %v2138_v52 = vmax.f32 %v1114_v38, 0.0  ;;  %v2139_v53 = vmax.f32 %v1115_v43, 0.0  ;;  %v2140_v54 = vmax.f32 %v1116_v44, 0.0  ;;  %v1119_v55 = vld [vmem:[%s4615_s30 + $0x1ea8] sm:$0xff]  ;;  %v1120_v56 = vld [vmem:[%s4615_s30 + $0x1eb0] sm:$0xff] }
 0x2c4   : > { %4181 = vst [vmem:[%s4636_s17 + $0x1e58] sm:$0xff] %v3157_v45  ;;  %4182 = vst [vmem:[%s4636_s17 + $0x1e60] sm:$0xff] %v3158_v46  ;;  %v3161_v57 = vmin.f32 %v2137_v48, 1.0  ;;  %v2141_v58 = vmax.f32 %v1117_v49, 0.0  ;;  %v2142_v59 = vmax.f32 %v1118_v50, 0.0  ;;  %v2143_v60 = vmax.f32 %v1119_v55, 0.0 }
 0x2c5   : > { %4183 = vst [vmem:[%s4636_s17 + $0x1e68] sm:$0xff] %v3159_v47  ;;  %v1121_v61 = vld [vmem:[%s4615_s30 + $0x1eb8] sm:$0xff]  ;;  %v1122_v62 = vld [vmem:[%s4615_s30 + $0x1ec0] sm:$0xff]  ;;  %4184 = vst [vmem:[%s4636_s17 + $0x1e70] sm:$0xff] %v3160_v51  ;;  %v3162_v63 = vmin.f32 %v2138_v52, 1.0  ;;  %v3163_v0 = vmin.f32 %v2139_v53, 1.0 }
 0x2c6   : > { %v3164_v1 = vmin.f32 %v2140_v54, 1.0  ;;  %v2144_v2 = vmax.f32 %v1120_v56, 0.0  ;;  %v1123_v3 = vld [vmem:[%s4615_s30 + $0x1ec8] sm:$0xff]  ;;  %v1124_v4 = vld [vmem:[%s4615_s30 + $0x1ed0] sm:$0xff]  ;;  %4185 = vst [vmem:[%s4636_s17 + $0x1e78] sm:$0xff] %v3161_v57  ;;  %v3165_v5 = vmin.f32 %v2141_v58, 1.0 }
 0x2c7   : > { %v3166_v6 = vmin.f32 %v2142_v59, 1.0  ;;  %v3167_v7 = vmin.f32 %v2143_v60, 1.0  ;;  %v2145_v8 = vmax.f32 %v1121_v61, 0.0  ;;  %v1125_v9 = vld [vmem:[%s4615_s30 + $0x1ed8] sm:$0xff]  ;;  %v1126_v10 = vld [vmem:[%s4615_s30 + $0x1ee0] sm:$0xff]  ;;  %4186 = vst [vmem:[%s4636_s17 + $0x1e80] sm:$0xff] %v3162_v63 }
 0x2c8   : > { %4187 = vst [vmem:[%s4636_s17 + $0x1e88] sm:$0xff] %v3163_v0  ;;  %4188 = vst [vmem:[%s4636_s17 + $0x1e90] sm:$0xff] %v3164_v1  ;;  %v3168_v11 = vmin.f32 %v2144_v2, 1.0  ;;  %v2146_v12 = vmax.f32 %v1122_v62, 0.0  ;;  %v2147_v13 = vmax.f32 %v1123_v3, 0.0  ;;  %v2148_v14 = vmax.f32 %v1124_v4, 0.0 }
 0x2c9   : > { %v1127_v15 = vld [vmem:[%s4615_s30 + $0x1ee8] sm:$0xff]  ;;  %v1128_v16 = vld [vmem:[%s4615_s30 + $0x1ef0] sm:$0xff]  ;;  %4189 = vst [vmem:[%s4636_s17 + $0x1e98] sm:$0xff] %v3165_v5  ;;  %4190 = vst [vmem:[%s4636_s17 + $0x1ea0] sm:$0xff] %v3166_v6  ;;  %v3169_v17 = vmin.f32 %v2145_v8, 1.0  ;;  %v2149_v18 = vmax.f32 %v1125_v9, 0.0 }
 0x2ca   : > { %4191 = vst [vmem:[%s4636_s17 + $0x1ea8] sm:$0xff] %v3167_v7  ;;  %v2150_v19 = vmax.f32 %v1126_v10, 0.0  ;;  %v2151_v20 = vmax.f32 %v1127_v15, 0.0  ;;  %v1129_v21 = vld [vmem:[%s4615_s30 + $0x1ef8] sm:$0xff]  ;;  %v1130_v22 = vld [vmem:[%s4615_s30 + $0x1f00] sm:$0xff]  ;;  %4192 = vst [vmem:[%s4636_s17 + $0x1eb0] sm:$0xff] %v3168_v11 }
 0x2cb   : > { %v3170_v23 = vmin.f32 %v2146_v12, 1.0  ;;  %v3171_v24 = vmin.f32 %v2147_v13, 1.0  ;;  %v3172_v25 = vmin.f32 %v2148_v14, 1.0  ;;  %v2152_v26 = vmax.f32 %v1128_v16, 0.0  ;;  %v1131_v27 = vld [vmem:[%s4615_s30 + $0x1f08] sm:$0xff]  ;;  %v1132_v28 = vld [vmem:[%s4615_s30 + $0x1f10] sm:$0xff] }
 0x2cc   : > { %4193 = vst [vmem:[%s4636_s17 + $0x1eb8] sm:$0xff] %v3169_v17  ;;  %v3173_v29 = vmin.f32 %v2149_v18, 1.0  ;;  %v3174_v30 = vmin.f32 %v2150_v19, 1.0  ;;  %v3175_v31 = vmin.f32 %v2151_v20, 1.0  ;;  %v2153_v32 = vmax.f32 %v1129_v21, 0.0  ;;  %v1133_v33 = vld [vmem:[%s4615_s30 + $0x1f18] sm:$0xff] }
 0x2cd   : > { %v1134_v34 = vld [vmem:[%s4615_s30 + $0x1f20] sm:$0xff]  ;;  %4194 = vst [vmem:[%s4636_s17 + $0x1ec0] sm:$0xff] %v3170_v23  ;;  %4195 = vst [vmem:[%s4636_s17 + $0x1ec8] sm:$0xff] %v3171_v24  ;;  %v3176_v35 = vmin.f32 %v2152_v26, 1.0  ;;  %v2154_v36 = vmax.f32 %v1130_v22, 0.0  ;;  %v2155_v37 = vmax.f32 %v1131_v27, 0.0 }
 0x2ce   : > { %4196 = vst [vmem:[%s4636_s17 + $0x1ed0] sm:$0xff] %v3172_v25  ;;  %v2156_v38 = vmax.f32 %v1132_v28, 0.0  ;;  %v1135_v39 = vld [vmem:[%s4615_s30 + $0x1f28] sm:$0xff]  ;;  %v1136_v40 = vld [vmem:[%s4615_s30 + $0x1f30] sm:$0xff]  ;;  %4197 = vst [vmem:[%s4636_s17 + $0x1ed8] sm:$0xff] %v3173_v29  ;;  %v3177_v41 = vmin.f32 %v2153_v32, 1.0 }
 0x2cf   : > { %4198 = vst [vmem:[%s4636_s17 + $0x1ee0] sm:$0xff] %v3174_v30  ;;  %4199 = vst [vmem:[%s4636_s17 + $0x1ee8] sm:$0xff] %v3175_v31  ;;  %v2157_v42 = vmax.f32 %v1133_v33, 0.0  ;;  %v2158_v43 = vmax.f32 %v1134_v34, 0.0  ;;  %v2159_v44 = vmax.f32 %v1135_v39, 0.0  ;;  %v1137_v45 = vld [vmem:[%s4615_s30 + $0x1f38] sm:$0xff] }
 0x2d0   : > { %v1138_v46 = vld [vmem:[%s4615_s30 + $0x1f40] sm:$0xff]  ;;  %4200 = vst [vmem:[%s4636_s17 + $0x1ef0] sm:$0xff] %v3176_v35  ;;  %v3178_v47 = vmin.f32 %v2154_v36, 1.0  ;;  %v3179_v48 = vmin.f32 %v2155_v37, 1.0  ;;  %v3180_v49 = vmin.f32 %v2156_v38, 1.0  ;;  %v2160_v50 = vmax.f32 %v1136_v40, 0.0 }
 0x2d1   : > { %v1139_v51 = vld [vmem:[%s4615_s30 + $0x1f48] sm:$0xff]  ;;  %v1140_v52 = vld [vmem:[%s4615_s30 + $0x1f50] sm:$0xff]  ;;  %4201 = vst [vmem:[%s4636_s17 + $0x1ef8] sm:$0xff] %v3177_v41  ;;  %v3181_v53 = vmin.f32 %v2157_v42, 1.0  ;;  %v3182_v54 = vmin.f32 %v2158_v43, 1.0  ;;  %v3183_v55 = vmin.f32 %v2159_v44, 1.0 }
 0x2d2   : > { %v2161_v56 = vmax.f32 %v1137_v45, 0.0  ;;  %v1141_v57 = vld [vmem:[%s4615_s30 + $0x1f58] sm:$0xff]  ;;  %v1142_v58 = vld [vmem:[%s4615_s30 + $0x1f60] sm:$0xff]  ;;  %4202 = vst [vmem:[%s4636_s17 + $0x1f00] sm:$0xff] %v3178_v47  ;;  %4203 = vst [vmem:[%s4636_s17 + $0x1f08] sm:$0xff] %v3179_v48  ;;  %v3184_v59 = vmin.f32 %v2160_v50, 1.0 }
 0x2d3   : > { %4204 = vst [vmem:[%s4636_s17 + $0x1f10] sm:$0xff] %v3180_v49  ;;  %v2162_v60 = vmax.f32 %v1138_v46, 0.0  ;;  %v2163_v61 = vmax.f32 %v1139_v51, 0.0  ;;  %v2164_v62 = vmax.f32 %v1140_v52, 0.0  ;;  %v1143_v63 = vld [vmem:[%s4615_s30 + $0x1f68] sm:$0xff]  ;;  %v1144_v0 = vld [vmem:[%s4615_s30 + $0x1f70] sm:$0xff] }
 0x2d4   : > { %4205 = vst [vmem:[%s4636_s17 + $0x1f18] sm:$0xff] %v3181_v53  ;;  %4206 = vst [vmem:[%s4636_s17 + $0x1f20] sm:$0xff] %v3182_v54  ;;  %v3185_v1 = vmin.f32 %v2161_v56, 1.0  ;;  %v2165_v2 = vmax.f32 %v1141_v57, 0.0  ;;  %v2166_v3 = vmax.f32 %v1142_v58, 0.0  ;;  %v2167_v4 = vmax.f32 %v1143_v63, 0.0 }
 0x2d5   : > { %4207 = vst [vmem:[%s4636_s17 + $0x1f28] sm:$0xff] %v3183_v55  ;;  %v1145_v5 = vld [vmem:[%s4615_s30 + $0x1f78] sm:$0xff]  ;;  %v1146_v6 = vld [vmem:[%s4615_s30 + $0x1f80] sm:$0xff]  ;;  %4208 = vst [vmem:[%s4636_s17 + $0x1f30] sm:$0xff] %v3184_v59  ;;  %v3186_v7 = vmin.f32 %v2162_v60, 1.0  ;;  %v3187_v8 = vmin.f32 %v2163_v61, 1.0 }
 0x2d6   : > { %v3188_v9 = vmin.f32 %v2164_v62, 1.0  ;;  %v2168_v10 = vmax.f32 %v1144_v0, 0.0  ;;  %v1147_v11 = vld [vmem:[%s4615_s30 + $0x1f88] sm:$0xff]  ;;  %v1148_v12 = vld [vmem:[%s4615_s30 + $0x1f90] sm:$0xff]  ;;  %4209 = vst [vmem:[%s4636_s17 + $0x1f38] sm:$0xff] %v3185_v1  ;;  %v3189_v13 = vmin.f32 %v2165_v2, 1.0 }
 0x2d7   : > { %v3190_v14 = vmin.f32 %v2166_v3, 1.0  ;;  %v3191_v15 = vmin.f32 %v2167_v4, 1.0  ;;  %v2169_v16 = vmax.f32 %v1145_v5, 0.0  ;;  %v1149_v17 = vld [vmem:[%s4615_s30 + $0x1f98] sm:$0xff]  ;;  %v1150_v18 = vld [vmem:[%s4615_s30 + $0x1fa0] sm:$0xff]  ;;  %4210 = vst [vmem:[%s4636_s17 + $0x1f40] sm:$0xff] %v3186_v7 }
 0x2d8   : > { %4211 = vst [vmem:[%s4636_s17 + $0x1f48] sm:$0xff] %v3187_v8  ;;  %4212 = vst [vmem:[%s4636_s17 + $0x1f50] sm:$0xff] %v3188_v9  ;;  %v3192_v19 = vmin.f32 %v2168_v10, 1.0  ;;  %v2170_v20 = vmax.f32 %v1146_v6, 0.0  ;;  %v2171_v21 = vmax.f32 %v1147_v11, 0.0  ;;  %v2172_v22 = vmax.f32 %v1148_v12, 0.0 }
 0x2d9   : > { %v1151_v23 = vld [vmem:[%s4615_s30 + $0x1fa8] sm:$0xff]  ;;  %v1152_v24 = vld [vmem:[%s4615_s30 + $0x1fb0] sm:$0xff]  ;;  %4213 = vst [vmem:[%s4636_s17 + $0x1f58] sm:$0xff] %v3189_v13  ;;  %4214 = vst [vmem:[%s4636_s17 + $0x1f60] sm:$0xff] %v3190_v14  ;;  %v3193_v25 = vmin.f32 %v2169_v16, 1.0  ;;  %v2173_v26 = vmax.f32 %v1149_v17, 0.0 }
 0x2da   : > { %4215 = vst [vmem:[%s4636_s17 + $0x1f68] sm:$0xff] %v3191_v15  ;;  %v2174_v27 = vmax.f32 %v1150_v18, 0.0  ;;  %v2175_v28 = vmax.f32 %v1151_v23, 0.0  ;;  %v1153_v29 = vld [vmem:[%s4615_s30 + $0x1fb8] sm:$0xff]  ;;  %v1154_v30 = vld [vmem:[%s4615_s30 + $0x1fc0] sm:$0xff]  ;;  %4216 = vst [vmem:[%s4636_s17 + $0x1f70] sm:$0xff] %v3192_v19 }
 0x2db   : > { %v3194_v31 = vmin.f32 %v2170_v20, 1.0  ;;  %v3195_v32 = vmin.f32 %v2171_v21, 1.0  ;;  %v3196_v33 = vmin.f32 %v2172_v22, 1.0  ;;  %v2176_v34 = vmax.f32 %v1152_v24, 0.0  ;;  %v1155_v35 = vld [vmem:[%s4615_s30 + $0x1fc8] sm:$0xff]  ;;  %v1156_v36 = vld [vmem:[%s4615_s30 + $0x1fd0] sm:$0xff] }
 0x2dc   : > { %4217 = vst [vmem:[%s4636_s17 + $0x1f78] sm:$0xff] %v3193_v25  ;;  %v3197_v37 = vmin.f32 %v2173_v26, 1.0  ;;  %v3198_v38 = vmin.f32 %v2174_v27, 1.0  ;;  %v3199_v39 = vmin.f32 %v2175_v28, 1.0  ;;  %v2177_v40 = vmax.f32 %v1153_v29, 0.0  ;;  %v1157_v41 = vld [vmem:[%s4615_s30 + $0x1fd8] sm:$0xff] }
 0x2dd   : > { %v1158_v42 = vld [vmem:[%s4615_s30 + $0x1fe0] sm:$0xff]  ;;  %4218 = vst [vmem:[%s4636_s17 + $0x1f80] sm:$0xff] %v3194_v31  ;;  %4219 = vst [vmem:[%s4636_s17 + $0x1f88] sm:$0xff] %v3195_v32  ;;  %v3200_v43 = vmin.f32 %v2176_v34, 1.0  ;;  %v2178_v44 = vmax.f32 %v1154_v30, 0.0  ;;  %v2179_v45 = vmax.f32 %v1155_v35, 0.0 }
 0x2de   : > { %4220 = vst [vmem:[%s4636_s17 + $0x1f90] sm:$0xff] %v3196_v33  ;;  %v2180_v46 = vmax.f32 %v1156_v36, 0.0  ;;  %v1159_v47 = vld [vmem:[%s4615_s30 + $0x1fe8] sm:$0xff]  ;;  %v1160_v48 = vld [vmem:[%s4615_s30 + $0x1ff0] sm:$0xff]  ;;  %4221 = vst [vmem:[%s4636_s17 + $0x1f98] sm:$0xff] %v3197_v37  ;;  %v3201_v49 = vmin.f32 %v2177_v40, 1.0 }
 0x2df   : > { %4222 = vst [vmem:[%s4636_s17 + $0x1fa0] sm:$0xff] %v3198_v38  ;;  %4223 = vst [vmem:[%s4636_s17 + $0x1fa8] sm:$0xff] %v3199_v39  ;;  %v2181_v50 = vmax.f32 %v1157_v41, 0.0  ;;  %v2182_v51 = vmax.f32 %v1158_v42, 0.0  ;;  %v2183_v52 = vmax.f32 %v1159_v47, 0.0  ;;  %v1161_v53 = vld [vmem:[%s4615_s30 + $0x1ff8] sm:$0xff] }
 0x2e0   : > { %4224 = vst [vmem:[%s4636_s17 + $0x1fb0] sm:$0xff] %v3200_v43  ;;  %v3202_v54 = vmin.f32 %v2178_v44, 1.0  ;;  %v3203_v55 = vmin.f32 %v2179_v45, 1.0  ;;  %v3204_v56 = vmin.f32 %v2180_v46, 1.0  ;;  %v2184_v57 = vmax.f32 %v1160_v48, 0.0  ;;  %4225 = vst [vmem:[%s4636_s17 + $0x1fb8] sm:$0xff] %v3201_v49 }
 0x2e1   : > { %v3205_v58 = vmin.f32 %v2181_v50, 1.0  ;;  %v3206_v59 = vmin.f32 %v2182_v51, 1.0  ;;  %v3207_v60 = vmin.f32 %v2183_v52, 1.0  ;;  %v2185_v61 = vmax.f32 %v1161_v53, 0.0  ;;  %s4235_s10 = scalar_lea.sflag [#allocation4], %s4609_s23  ;;  %s4422_s3 = scalar_lea.vmem %s6675_s27, 131072 }
 0x2e2   : > { %4226 = vst [vmem:[%s4636_s17 + $0x1fc0] sm:$0xff] %v3202_v54  ;;  %4227 = vst [vmem:[%s4636_s17 + $0x1fc8] sm:$0xff] %v3203_v55  ;;  %v3208_v62 = vmin.f32 %v2184_v57, 1.0  ;;  %p4423_p6 = scmp.ne.s32.totalorder %s6675_s27, %s4422_s3  ;;  %p6731_p10 = scmp.ne.s32.totalorder %s6728_s18, 0 }
 0x2e3   : > { %4228 = vst [vmem:[%s4636_s17 + $0x1fd0] sm:$0xff] %v3204_v56  ;;  %4229 = vst [vmem:[%s4636_s17 + $0x1fd8] sm:$0xff] %v3205_v58  ;;  %v3209_v63 = vmin.f32 %v2185_v61, 1.0  ;;  %s4493_s4 = smov [#allocation5]  }
 0x2e4   : > { %4230 = vst [vmem:[%s4636_s17 + $0x1fe0] sm:$0xff] %v3206_v59  ;;  %4231 = vst [vmem:[%s4636_s17 + $0x1fe8] sm:$0xff] %v3207_v60  ;;  %p4424_p11 = pnand %p4423_p6, %p6731_p10  ;;  %s4426_s5 = sshll.u32 %s4493_s4, 4  ;;  %s4427_s5 = int_to_ptr.vmem [resolvable:$false] %s4426_s5 }
 0x2e5   : > { %4232 = vst [vmem:[%s4636_s17 + $0x1ff0] sm:$0xff] %v3208_v62  ;;  %4233 = vst [vmem:[%s4636_s17 + $0x1ff8] sm:$0xff] %v3209_v63  ;;  %s4428_s11 = scalar_lea.vmem %s4427_s5, 262144  ;;  %p4429_p8 = scmp.lt.s32.totalorder %s6675_s27, %s4427_s5 }
 0x2e6   : > { %p4425_p12 = pneg %p4424_p11  ;;  %p4430_p9 = scmp.lt.s32.totalorder %s4428_s11, %s4422_s3 }
 0x2e8   : > { %p4431_p13 = por %p4430_p9, %p4429_p8 }
 0x2ea   : > { %p4432_p1 = pnand %p4431_p13, %p4425_p12 }
 0x2ec   : > { %4435 = shalt.err (!%p4432_p1)
}
 0x2ed   : > { %s4436_s13 = scalar_lea.hbm %s6673_s2, 131072  ;;  %s4440_s20 = scalar_lea.hbm %s6724_s1, 524288 }
 0x2ee   : > { %p4437_p3 = scmp.ne.s32.totalorder %s6673_s2, %s4436_s13  ;;  %p4441_p0 = scmp.lt.u32.totalorder %s6673_s2, %s6724_s1 }
 0x2ef   : > { %p4442_p2 = scmp.lt.u32.totalorder %s4440_s20, %s4436_s13  ;;  %p4444_p6 = scmp.lt.u32.totalorder %s4436_s13, %s6673_s2 }
 0x2f0   : > { %p4438_p4 = pnand %p4437_p3, %p6731_p10 }
 0x2f1   : > { %p4443_p7 = por %p4442_p2, %p4441_p0 }
 0x2f2   : > { %p4439_p5 = pneg %p4438_p4 }
 0x2f3   : > { %p4445_p11 = por %p4444_p6, %p4443_p7 }
 0x2f5   : > { %p4446_p12 = pnand %p4445_p11, %p4439_p5 }
 0x2f7   : > { %4449 = shalt.err (!%p4446_p12)
}
 0x2f8   : > { %s4494_s24 = smov 512   ;;  %s4495_s26 = smov 32  }
 0x2f9   : > { %4344 = dma.vmem_to_hbm [thread:$0]  (%p6731_p10), %s6675_s27, 131072, %s6673_s2, %s4235_s10, %s4494_s24, %s4494_s24, %s4495_s26  }
 0x2fa PF: > { %p4355_p8 = scmp.ge.s32.totalorder %s4488_s9, 2  ;;  %s4264_s30 = sand.u32 1, %s4476_s6  }
 0x2fb   : > { %p6732_p9 = scmp.ne.s32.totalorder %s6729_s19, 0  ;;  %s4265_s17 = scalar_lea.sflag [#allocation4], %s4264_s30 }
 0x2fd   : > { %p4351_p13 = pnand %p4355_p8, %p6732_p9 }
 0x2ff   : > { %4471 = dma.done.wait (!%p4351_p13), %s4265_s17, 131072  }
 0x300   : > { %4473 = vsyncadd (!%p4351_p13), %s4265_s17, 4294836224  ;;  %p14_p1 = scmp.ge.s32.totalorder %s4531_s12, 6   ;;  %s6733_s6 = smov %s4480_s7 }
 0x301   : > { %s6734_s7 = smov %s4484_s8  ;;  %s6735_s8 = smov %s4543_s15 }
 0x302   : > { %s6736_s9 = smov %s4531_s12  ;;  %16 = sbr.rel (!%p14_p1) target bundleno = 5 (0x5), region = 69 }
 0x309   :  { %4270 = vsyncpa [#allocation3], 1 }
 0x30a   :  { %4272 = vsyncpa [#allocation3 + $0x1], 1 }
 0x30b   :  { %4273 = vsyncpa [#allocation4], 1 }
 0x30c   :  { %4275 = vsyncpa [#allocation4 + $0x1], 1 }

</bundles_post_ra>
